<compile_context>
chip_gen: v5e
topology: v5e:2x2
jax: 0.10.0
libtpu: 0.0.40
codegen_flags: <defaults>
</compile_context>

<pallas_src>
import functools

import jax
import jax.numpy as jnp
from jax.experimental import pallas as pl
from jax.experimental.pallas import tpu as pltpu


# ----------------------------- Pallas kernel ---------------------------------

def _basic_layer_kernel(*refs, stride, apply_shortcut):
    """Fused ResNetBasicLayer for one spatially pre-padded batch image.

    Refs (in order; ws_ref only present when apply_shortcut):
      x_ref   (1, H+2, W+2, Cinp)   bf16 padded input (f32 for identity shortcut)
      w1_ref  (9*Cinp, Coutp)       bf16, BN1 scale folded, taps stacked (dy,dx,ci)
      w2_ref  (9*Coutp, Coutp)      bf16, BN2 scale folded
      ws_ref  (Cinp, Coutp)         bf16, shortcut-BN scale folded
      b1_ref  (1, Coutp)            f32 BN1 bias
      b2_ref  (1, Coutp)            f32 BN2 bias (+ shortcut-BN bias when fused)
      o_ref   (1, Ho*Wo, Coutp)     lane-dense output slab
      h1p_scr (Ho+2, Wo+2, Coutp)   bf16 spatially padded conv1 output (scratch)
    """
    if apply_shortcut:
        x_ref, w1_ref, w2_ref, ws_ref, b1_ref, b2_ref, o_ref, h1p_scr = refs
    else:
        x_ref, w1_ref, w2_ref, b1_ref, b2_ref, o_ref, h1p_scr = refs
        ws_ref = None

    _, hp, wp, cinp = x_ref.shape
    h, w = hp - 2, wp - 2
    coutp = o_ref.shape[-1]
    ho = (h - 1) // stride + 1
    wo = (w - 1) // stride + 1

    def conv3x3(tap_fn, w_ref, c):
        # 3x3 conv as 9 accumulated MXU matmuls: acc += tap_k @ w_k  (K split
        # per tap; no materialized im2col slab).
        acc = None
        for dy in range(3):
            for dx in range(3):
                k = dy * 3 + dx
                lhs = tap_fn(dy, dx).reshape(ho * wo, c)
                part = jnp.dot(lhs, w_ref[k * c:(k + 1) * c, :],
                               preferred_element_type=jnp.float32)
                acc = part if acc is None else acc + part
        return acc

    def x_tap(dy, dx):
        if stride == 1:
            t = x_ref[0, dy:dy + ho, dx:dx + wo, :]
        else:
            t = x_ref[0, pl.ds(dy, ho, stride=stride),
                      pl.ds(dx, wo, stride=stride), :]
        return t.astype(jnp.bfloat16)

    # ---- conv1: 3x3 (stride) + folded-BN bias + ReLU -------------------------
    a1 = conv3x3(x_tap, w1_ref, cinp)
    h1 = jnp.maximum(a1 + b1_ref[...], 0.0)

    # Stage h1 (bf16) spatially zero-padded for conv2; h1 never leaves VMEM.
    # Only the halo rows/cols are zeroed (the interior is fully overwritten);
    # this is done every step (4 tiny stores) instead of once because each
    # TensorCore has its own scratch under the "parallel" batch axis.
    zrow = jnp.zeros((1, wo + 2, coutp), h1p_scr.dtype)
    zcol = jnp.zeros((ho + 2, 1, coutp), h1p_scr.dtype)
    h1p_scr[0:1, :, :] = zrow
    h1p_scr[ho + 1:ho + 2, :, :] = zrow
    h1p_scr[:, 0:1, :] = zcol
    h1p_scr[:, wo + 1:wo + 2, :] = zcol
    h1p_scr[1:ho + 1, 1:wo + 1, :] = (
        h1.reshape(ho, wo, coutp).astype(h1p_scr.dtype))

    # ---- shortcut -------------------------------------------------------------
    if apply_shortcut:
        if stride == 1:
            xs = x_ref[0, 1:h + 1, 1:w + 1, :]
        else:
            xs = x_ref[0, pl.ds(1, ho, stride=stride),
                       pl.ds(1, wo, stride=stride), :]
        res = jnp.dot(xs.reshape(ho * wo, cinp).astype(jnp.bfloat16),
                      ws_ref[...], preferred_element_type=jnp.float32)
    else:
        # identity shortcut (cin == cout, stride == 1): read the f32 input so
        # the residual stays exact; padded channel lanes are zero.
        res = x_ref[0, 1:h + 1, 1:w + 1, :].reshape(
            ho * wo, cinp).astype(jnp.float32)

    # ---- conv2: 3x3 stride 1 + folded-BN bias, residual add, final ReLU ------
    def h1_tap(dy, dx):
        return h1p_scr[dy:dy + ho, dx:dx + wo, :]

    a2 = conv3x3(h1_tap, w2_ref, coutp)
    out = jnp.maximum(a2 + b2_ref[...] + res, 0.0)
    o_ref[0] = out.astype(o_ref.dtype)


# ------------------------------- JAX wrapper ----------------------------------

def _round_up(v, m):
    return (v + m - 1) // m * m


def _fold_bn(gamma, beta, mean, var, eps=1e-5):
    scale = gamma / jnp.sqrt(var + eps)
    bias = beta - mean * scale
    return scale.astype(jnp.float32), bias.astype(jnp.float32)


def _pack_conv_weight(w_oihw, scale_o, cin_pad, cout_pad):
    # (O, I, kh, kw) * scale[O] -> (kh, kw, I, O), zero-pad channels, flatten
    # K = kh*kw*cin_pad so tap k occupies rows [k*cin_pad, (k+1)*cin_pad).
    o, i, kh, kw = w_oihw.shape
    wt = jnp.transpose(w_oihw * scale_o[:, None, None, None], (2, 3, 1, 0))
    wt = jnp.pad(wt, ((0, 0), (0, 0), (0, cin_pad - i), (0, cout_pad - o)))
    return wt.reshape(kh * kw * cin_pad, cout_pad).astype(jnp.bfloat16)


def _pad_bias(b, cpad):
    return jnp.pad(b, (0, cpad - b.shape[0])).reshape(1, cpad).astype(jnp.float32)


def _resident_spec(shape):
    """BlockSpec for a grid-invariant operand; single-buffered when supported."""
    index_map = lambda i: (0,) * len(shape)
    try:
        return pl.BlockSpec(shape, index_map, pipeline_mode=pl.Buffered(1))
    except (TypeError, AttributeError):
        return pl.BlockSpec(shape, index_map)  # fall back to default buffering


def _vmem_limit_bytes(bytes_needed):
    try:
        cap = int(pltpu.get_tpu_info().vmem_capacity_bytes)
    except Exception:  # noqa: BLE001 - conservative fallback (v7x capacity)
        cap = 64 * 1024 * 1024
    return int(min(max(bytes_needed, 32 * 1024 * 1024), cap * 7 // 8))


@functools.partial(jax.jit, static_argnames=("stride",))
def resnet_basic_layer(x_nchw, params, stride=1):
    """Forward pass of ResNetBasicLayer.  Input/output are NCHW."""
    n, cin, h, w = x_nchw.shape
    cout = params['w1'].shape[0]
    ho = (h - 1) // stride + 1
    wo = (w - 1) // stride + 1
    cinp = _round_up(cin, 128)
    coutp = _round_up(cout, 128)
    apply_shortcut = (cin != cout) or (stride != 1)

    # bf16 halves the input DMA; keep f32 only when the identity shortcut needs
    # the exact residual straight from x.
    act_dtype = jnp.bfloat16 if apply_shortcut else jnp.float32

    # NCHW -> NHWC, channel pad to a lane multiple, 1-px spatial halo, cast.
    # One fused XLA pass; the kernel then needs no in-kernel input staging.
    x = jnp.transpose(x_nchw, (0, 2, 3, 1)).astype(act_dtype)
    x = jnp.pad(x, ((0, 0), (1, 1), (1, 1), (0, cinp - cin)))

    s1, b1 = _fold_bn(params['bn1_g'], params['bn1_b'],
                      params['bn1_m'], params['bn1_v'])
    s2, b2 = _fold_bn(params['bn2_g'], params['bn2_b'],
                      params['bn2_m'], params['bn2_v'])
    w1 = _pack_conv_weight(params['w1'], s1, cinp, coutp)
    w2 = _pack_conv_weight(params['w2'], s2, coutp, coutp)

    inputs = [x, w1, w2]
    in_specs = [
        pl.BlockSpec((1, h + 2, w + 2, cinp), lambda i: (i, 0, 0, 0)),
        _resident_spec((9 * cinp, coutp)),
        _resident_spec((9 * coutp, coutp)),
    ]
    if apply_shortcut:
        ss, bs = _fold_bn(params['bns_g'], params['bns_b'],
                          params['bns_m'], params['bns_v'])
        ws = _pack_conv_weight(params['ws'], ss, cinp, coutp)
        b2 = b2 + bs  # shortcut-BN bias folded into the epilogue bias
        inputs.append(ws)
        in_specs.append(_resident_spec((cinp, coutp)))
    inputs += [_pad_bias(b1, coutp), _pad_bias(b2, coutp)]
    in_specs += [_resident_spec((1, coutp)), _resident_spec((1, coutp))]

    kernel = functools.partial(_basic_layer_kernel, stride=stride,
                               apply_shortcut=apply_shortcut)

    # Per-step VMEM: double-buffered x/out, (single-buffered) weights, padded-h1
    # scratch, plus headroom for accumulators / tap windows.
    est = (2 * (h + 2) * (w + 2) * cinp * jnp.dtype(act_dtype).itemsize
           + 2 * ho * wo * coutp * 4
           + sum(int(a.size) * a.dtype.itemsize for a in inputs[1:])
           + (ho + 2) * (wo + 2) * coutp * 2
           + 3 * ho * wo * coutp * 4)
    vmem_limit = _vmem_limit_bytes(est * 3 // 2 + (2 << 20))

    out = pl.pallas_call(
        kernel,
        out_shape=jax.ShapeDtypeStruct((n, ho * wo, coutp), x_nchw.dtype),
        grid_spec=pltpu.PrefetchScalarGridSpec(
            num_scalar_prefetch=0,
            grid=(n,),
            in_specs=in_specs,
            out_specs=pl.BlockSpec((1, ho * wo, coutp), lambda i: (i, 0, 0)),
            scratch_shapes=[pltpu.VMEM((ho + 2, wo + 2, coutp), jnp.bfloat16)],
        ),
        compiler_params=pltpu.CompilerParams(
            dimension_semantics=("parallel",),
            vmem_limit_bytes=vmem_limit),
    )(*inputs)

    out = out.reshape(n, ho, wo, coutp)[:, :, :, :cout]
    return jnp.transpose(out, (0, 3, 1, 2))  # back to NCHW


# ------------------------------ pure-JAX references ---------------------------

def ref_forward(x, params, stride=1, eps=1e-5, compute_dtype=jnp.float32):
    """Faithful reference of the PyTorch module (inference-mode BN)."""
    def conv(a, w, s, p):
        return jax.lax.conv_general_dilated(
            a.astype(compute_dtype), w.astype(compute_dtype),
            (s, s), ((p, p), (p, p)),
            dimension_numbers=('NCHW', 'OIHW', 'NCHW'),
            preferred_element_type=jnp.float32,
            precision=jax.lax.Precision.HIGHEST)

    def bn(a, g, b, m, v):
        sc = g / jnp.sqrt(v + eps)
        return a * sc[None, :, None, None] + (b - m * sc)[None, :, None, None]

    cout, cin = params['w1'].shape[0], params['w1'].shape[1]
    h1 = jax.nn.relu(bn(conv(x, params['w1'], stride, 1),
                        params['bn1_g'], params['bn1_b'],
                        params['bn1_m'], params['bn1_v']))
    h2 = bn(conv(h1, params['w2'], 1, 1),
            params['bn2_g'], params['bn2_b'], params['bn2_m'], params['bn2_v'])
    if cin != cout or stride != 1:
        res = bn(conv(x, params['ws'], stride, 0),
                 params['bns_g'], params['bns_b'],
                 params['bns_m'], params['bns_v'])
    else:
        res = x
    return jax.nn.relu(h2 + res)


def _bn_scale_folded_params(params, eps=1e-5):
    """Re-express each conv+BN with the BN scale pre-multiplied into the conv
    weight (so the BN scale becomes exactly 1).  Numerically identical in f32,
    but makes a bf16 reference round (w * scale) exactly like the kernel's
    packed weights -> enables a tight low-precision comparison."""
    out = dict(params)

    def fold(wk, gk, bk, mk, vk):
        s = params[gk] / jnp.sqrt(params[vk] + eps)
        out[wk] = params[wk] * s[:, None, None, None]
        out[gk] = jnp.sqrt(params[vk] + eps)        # -> scale == 1 exactly
        out[bk] = params[bk] - params[mk] * s
        out[mk] = jnp.zeros_like(params[mk])

    fold('w1', 'bn1_g', 'bn1_b', 'bn1_m', 'bn1_v')
    fold('w2', 'bn2_g', 'bn2_b', 'bn2_m', 'bn2_v')
    if 'ws' in params:
        fold('ws', 'bns_g', 'bns_b', 'bns_m', 'bns_v')
    return out


# ----------------------------------- main --------------------------------------

if __name__ == "__main__":
    N, CIN, COUT, H, W, STRIDE = 2, 4, 8, 16, 16, 1
    keys = jax.random.split(jax.random.PRNGKey(0), 17)

    params = {
        'w1': jax.random.normal(keys[0], (COUT, CIN, 3, 3), jnp.float32) * 0.1,
        'w2': jax.random.normal(keys[1], (COUT, COUT, 3, 3), jnp.float32) * 0.1,
        'ws': jax.random.normal(keys[2], (COUT, CIN, 1, 1), jnp.float32) * 0.1,
        'bn1_g': jax.random.uniform(keys[3], (COUT,), jnp.float32, 0.5, 1.5),
        'bn1_b': jax.random.normal(keys[4], (COUT,), jnp.float32) * 0.1,
        'bn1_m': jax.random.normal(keys[5], (COUT,), jnp.float32) * 0.1,
        'bn1_v': jax.random.uniform(keys[6], (COUT,), jnp.float32, 0.5, 1.5),
        'bn2_g': jax.random.uniform(keys[7], (COUT,), jnp.float32, 0.5, 1.5),
        'bn2_b': jax.random.normal(keys[8], (COUT,), jnp.float32) * 0.1,
        'bn2_m': jax.random.normal(keys[9], (COUT,), jnp.float32) * 0.1,
        'bn2_v': jax.random.uniform(keys[10], (COUT,), jnp.float32, 0.5, 1.5),
        'bns_g': jax.random.uniform(keys[11], (COUT,), jnp.float32, 0.5, 1.5),
        'bns_b': jax.random.normal(keys[12], (COUT,), jnp.float32) * 0.1,
        'bns_m': jax.random.normal(keys[13], (COUT,), jnp.float32) * 0.1,
        'bns_v': jax.random.uniform(keys[14], (COUT,), jnp.float32, 0.5, 1.5),
    }
    x = jax.random.normal(keys[16], (N, CIN, H, W), jnp.float32)

    out = jax.block_until_ready(resnet_basic_layer(x, params, stride=STRIDE))

    # Tight check vs a bf16 reference that rounds the scale-folded weights the
    # same way the kernel does, plus a loose sanity check vs the exact f32 ref.
    ref_fp = ref_forward(x, params, stride=STRIDE, compute_dtype=jnp.float32)
    ref_lp = ref_forward(x, _bn_scale_folded_params(params), stride=STRIDE,
                         compute_dtype=jnp.bfloat16)
    jax.block_until_ready((ref_lp, ref_fp))

    assert out.shape == ref_fp.shape, (out.shape, ref_fp.shape)
    err_lp = float(jnp.max(jnp.abs(out - ref_lp)))
    err_fp = float(jnp.max(jnp.abs(out - ref_fp)))
    if err_lp < 1e-2 and err_fp < 1e-1:
        print("KERNEL_OK")
    else:
        raise AssertionError(
            f"mismatch: err_vs_bf16_matched_ref={err_lp}, err_vs_f32_ref={err_fp}")
</pallas_src>

<mosaic_0001>
module attributes {stable_mosaic.version = 11 : i64} {
  func.func @_basic_layer_kernel(%arg0: i32, %arg1: memref<1x18x18x128xbf16, #tpu.memory_space<vmem>>, %arg2: memref<1152x128xbf16, #tpu.memory_space<vmem>>, %arg3: memref<1152x128xbf16, #tpu.memory_space<vmem>>, %arg4: memref<128x128xbf16, #tpu.memory_space<vmem>>, %arg5: memref<1x128xf32, #tpu.memory_space<vmem>>, %arg6: memref<1x128xf32, #tpu.memory_space<vmem>>, %arg7: memref<1x256x128xf32, #tpu.memory_space<vmem>>, %arg8: memref<18x18x128xbf16, #tpu.memory_space<vmem>>) attributes {dimension_semantics = [#tpu.dimension_semantics<parallel>], iteration_bounds = array<i64: 2>, scalar_prefetch = 0 : i64, scratch_operands = 1 : i64, tpu.core_type = #tpu.core_type<tc>, window_params = [{transform_indices = @transform_0, window_bounds = array<i64: 1, 18, 18, 128>}, {pipeline_mode = #tpu.pipeline_mode<synchronous>, transform_indices = @transform_1, window_bounds = array<i64: 1152, 128>}, {pipeline_mode = #tpu.pipeline_mode<synchronous>, transform_indices = @transform_2, window_bounds = array<i64: 1152, 128>}, {pipeline_mode = #tpu.pipeline_mode<synchronous>, transform_indices = @transform_3, window_bounds = array<i64: 128, 128>}, {pipeline_mode = #tpu.pipeline_mode<synchronous>, transform_indices = @transform_4, window_bounds = array<i64: 1, 128>}, {pipeline_mode = #tpu.pipeline_mode<synchronous>, transform_indices = @transform_5, window_bounds = array<i64: 1, 128>}, {transform_indices = @transform_6, window_bounds = array<i64: 1, 256, 128>}]} {
    %c0 = arith.constant 0 : index
    %c0_0 = arith.constant 0 : index
    %c0_1 = arith.constant 0 : index
    %c0_2 = arith.constant 0 : index
    %0 = vector.load %arg1[%c0, %c0_0, %c0_1, %c0_2] : memref<1x18x18x128xbf16, #tpu.memory_space<vmem>>, vector<1x16x16x128xbf16>
    %1 = vector.shape_cast %0 : vector<1x16x16x128xbf16> to vector<16x16x128xbf16>
    %2 = vector.shape_cast %1 : vector<16x16x128xbf16> to vector<256x128xbf16>
    %c0_3 = arith.constant 0 : index
    %c0_4 = arith.constant 0 : index
    %3 = vector.load %arg2[%c0_3, %c0_4] : memref<1152x128xbf16, #tpu.memory_space<vmem>>, vector<128x128xbf16>
    %cst = arith.constant dense<0.000000e+00> : vector<256x128xf32>
    %4 = tpu.matmul %2, %3, %cst {dimension_numbers = #tpu.dot_dimension_numbers<[1], [0], [0], [1], [0, 0, 1, 1], [], []>} : vector<256x128xbf16>, vector<128x128xbf16>, vector<256x128xf32> -> vector<256x128xf32>
    %c0_5 = arith.constant 0 : index
    %c0_6 = arith.constant 0 : index
    %c1 = arith.constant 1 : index
    %c0_7 = arith.constant 0 : index
    %5 = vector.load %arg1[%c0_5, %c0_6, %c1, %c0_7] : memref<1x18x18x128xbf16, #tpu.memory_space<vmem>>, vector<1x16x16x128xbf16>
    %6 = vector.shape_cast %5 : vector<1x16x16x128xbf16> to vector<16x16x128xbf16>
    %7 = vector.shape_cast %6 : vector<16x16x128xbf16> to vector<256x128xbf16>
    %c128 = arith.constant 128 : index
    %c0_8 = arith.constant 0 : index
    %8 = vector.load %arg2[%c128, %c0_8] : memref<1152x128xbf16, #tpu.memory_space<vmem>>, vector<128x128xbf16>
    %cst_9 = arith.constant dense<0.000000e+00> : vector<256x128xf32>
    %9 = tpu.matmul %7, %8, %cst_9 {dimension_numbers = #tpu.dot_dimension_numbers<[1], [0], [0], [1], [0, 0, 1, 1], [], []>} : vector<256x128xbf16>, vector<128x128xbf16>, vector<256x128xf32> -> vector<256x128xf32>
    %10 = arith.addf %4, %9 : vector<256x128xf32>
    %c0_10 = arith.constant 0 : index
    %c0_11 = arith.constant 0 : index
    %c2 = arith.constant 2 : index
    %c0_12 = arith.constant 0 : index
    %11 = vector.load %arg1[%c0_10, %c0_11, %c2, %c0_12] : memref<1x18x18x128xbf16, #tpu.memory_space<vmem>>, vector<1x16x16x128xbf16>
    %12 = vector.shape_cast %11 : vector<1x16x16x128xbf16> to vector<16x16x128xbf16>
    %13 = vector.shape_cast %12 : vector<16x16x128xbf16> to vector<256x128xbf16>
    %c256 = arith.constant 256 : index
    %c0_13 = arith.constant 0 : index
    %14 = vector.load %arg2[%c256, %c0_13] : memref<1152x128xbf16, #tpu.memory_space<vmem>>, vector<128x128xbf16>
    %cst_14 = arith.constant dense<0.000000e+00> : vector<256x128xf32>
    %15 = tpu.matmul %13, %14, %cst_14 {dimension_numbers = #tpu.dot_dimension_numbers<[1], [0], [0], [1], [0, 0, 1, 1], [], []>} : vector<256x128xbf16>, vector<128x128xbf16>, vector<256x128xf32> -> vector<256x128xf32>
    %16 = arith.addf %10, %15 : vector<256x128xf32>
    %c0_15 = arith.constant 0 : index
    %c1_16 = arith.constant 1 : index
    %c0_17 = arith.constant 0 : index
    %c0_18 = arith.constant 0 : index
    %17 = vector.load %arg1[%c0_15, %c1_16, %c0_17, %c0_18] : memref<1x18x18x128xbf16, #tpu.memory_space<vmem>>, vector<1x16x16x128xbf16>
    %18 = vector.shape_cast %17 : vector<1x16x16x128xbf16> to vector<16x16x128xbf16>
    %19 = vector.shape_cast %18 : vector<16x16x128xbf16> to vector<256x128xbf16>
    %c384 = arith.constant 384 : index
    %c0_19 = arith.constant 0 : index
    %20 = vector.load %arg2[%c384, %c0_19] : memref<1152x128xbf16, #tpu.memory_space<vmem>>, vector<128x128xbf16>
    %cst_20 = arith.constant dense<0.000000e+00> : vector<256x128xf32>
    %21 = tpu.matmul %19, %20, %cst_20 {dimension_numbers = #tpu.dot_dimension_numbers<[1], [0], [0], [1], [0, 0, 1, 1], [], []>} : vector<256x128xbf16>, vector<128x128xbf16>, vector<256x128xf32> -> vector<256x128xf32>
    %22 = arith.addf %16, %21 : vector<256x128xf32>
    %c0_21 = arith.constant 0 : index
    %c1_22 = arith.constant 1 : index
    %c1_23 = arith.constant 1 : index
    %c0_24 = arith.constant 0 : index
    %23 = vector.load %arg1[%c0_21, %c1_22, %c1_23, %c0_24] : memref<1x18x18x128xbf16, #tpu.memory_space<vmem>>, vector<1x16x16x128xbf16>
    %24 = vector.shape_cast %23 : vector<1x16x16x128xbf16> to vector<16x16x128xbf16>
    %25 = vector.shape_cast %24 : vector<16x16x128xbf16> to vector<256x128xbf16>
    %c512 = arith.constant 512 : index
    %c0_25 = arith.constant 0 : index
    %26 = vector.load %arg2[%c512, %c0_25] : memref<1152x128xbf16, #tpu.memory_space<vmem>>, vector<128x128xbf16>
    %cst_26 = arith.constant dense<0.000000e+00> : vector<256x128xf32>
    %27 = tpu.matmul %25, %26, %cst_26 {dimension_numbers = #tpu.dot_dimension_numbers<[1], [0], [0], [1], [0, 0, 1, 1], [], []>} : vector<256x128xbf16>, vector<128x128xbf16>, vector<256x128xf32> -> vector<256x128xf32>
    %28 = arith.addf %22, %27 : vector<256x128xf32>
    %c0_27 = arith.constant 0 : index
    %c1_28 = arith.constant 1 : index
    %c2_29 = arith.constant 2 : index
    %c0_30 = arith.constant 0 : index
    %29 = vector.load %arg1[%c0_27, %c1_28, %c2_29, %c0_30] : memref<1x18x18x128xbf16, #tpu.memory_space<vmem>>, vector<1x16x16x128xbf16>
    %30 = vector.shape_cast %29 : vector<1x16x16x128xbf16> to vector<16x16x128xbf16>
    %31 = vector.shape_cast %30 : vector<16x16x128xbf16> to vector<256x128xbf16>
    %c640 = arith.constant 640 : index
    %c0_31 = arith.constant 0 : index
    %32 = vector.load %arg2[%c640, %c0_31] : memref<1152x128xbf16, #tpu.memory_space<vmem>>, vector<128x128xbf16>
    %cst_32 = arith.constant dense<0.000000e+00> : vector<256x128xf32>
    %33 = tpu.matmul %31, %32, %cst_32 {dimension_numbers = #tpu.dot_dimension_numbers<[1], [0], [0], [1], [0, 0, 1, 1], [], []>} : vector<256x128xbf16>, vector<128x128xbf16>, vector<256x128xf32> -> vector<256x128xf32>
    %34 = arith.addf %28, %33 : vector<256x128xf32>
    %c0_33 = arith.constant 0 : index
    %c2_34 = arith.constant 2 : index
    %c0_35 = arith.constant 0 : index
    %c0_36 = arith.constant 0 : index
    %35 = vector.load %arg1[%c0_33, %c2_34, %c0_35, %c0_36] : memref<1x18x18x128xbf16, #tpu.memory_space<vmem>>, vector<1x16x16x128xbf16>
    %36 = vector.shape_cast %35 : vector<1x16x16x128xbf16> to vector<16x16x128xbf16>
    %37 = vector.shape_cast %36 : vector<16x16x128xbf16> to vector<256x128xbf16>
    %c768 = arith.constant 768 : index
    %c0_37 = arith.constant 0 : index
    %38 = vector.load %arg2[%c768, %c0_37] : memref<1152x128xbf16, #tpu.memory_space<vmem>>, vector<128x128xbf16>
    %cst_38 = arith.constant dense<0.000000e+00> : vector<256x128xf32>
    %39 = tpu.matmul %37, %38, %cst_38 {dimension_numbers = #tpu.dot_dimension_numbers<[1], [0], [0], [1], [0, 0, 1, 1], [], []>} : vector<256x128xbf16>, vector<128x128xbf16>, vector<256x128xf32> -> vector<256x128xf32>
    %40 = arith.addf %34, %39 : vector<256x128xf32>
    %c0_39 = arith.constant 0 : index
    %c2_40 = arith.constant 2 : index
    %c1_41 = arith.constant 1 : index
    %c0_42 = arith.constant 0 : index
    %41 = vector.load %arg1[%c0_39, %c2_40, %c1_41, %c0_42] : memref<1x18x18x128xbf16, #tpu.memory_space<vmem>>, vector<1x16x16x128xbf16>
    %42 = vector.shape_cast %41 : vector<1x16x16x128xbf16> to vector<16x16x128xbf16>
    %43 = vector.shape_cast %42 : vector<16x16x128xbf16> to vector<256x128xbf16>
    %c896 = arith.constant 896 : index
    %c0_43 = arith.constant 0 : index
    %44 = vector.load %arg2[%c896, %c0_43] : memref<1152x128xbf16, #tpu.memory_space<vmem>>, vector<128x128xbf16>
    %cst_44 = arith.constant dense<0.000000e+00> : vector<256x128xf32>
    %45 = tpu.matmul %43, %44, %cst_44 {dimension_numbers = #tpu.dot_dimension_numbers<[1], [0], [0], [1], [0, 0, 1, 1], [], []>} : vector<256x128xbf16>, vector<128x128xbf16>, vector<256x128xf32> -> vector<256x128xf32>
    %46 = arith.addf %40, %45 : vector<256x128xf32>
    %c0_45 = arith.constant 0 : index
    %c2_46 = arith.constant 2 : index
    %c2_47 = arith.constant 2 : index
    %c0_48 = arith.constant 0 : index
    %47 = vector.load %arg1[%c0_45, %c2_46, %c2_47, %c0_48] : memref<1x18x18x128xbf16, #tpu.memory_space<vmem>>, vector<1x16x16x128xbf16>
    %48 = vector.shape_cast %47 : vector<1x16x16x128xbf16> to vector<16x16x128xbf16>
    %49 = vector.shape_cast %48 : vector<16x16x128xbf16> to vector<256x128xbf16>
    %c1024 = arith.constant 1024 : index
    %c0_49 = arith.constant 0 : index
    %50 = vector.load %arg2[%c1024, %c0_49] : memref<1152x128xbf16, #tpu.memory_space<vmem>>, vector<128x128xbf16>
    %cst_50 = arith.constant dense<0.000000e+00> : vector<256x128xf32>
    %51 = tpu.matmul %49, %50, %cst_50 {dimension_numbers = #tpu.dot_dimension_numbers<[1], [0], [0], [1], [0, 0, 1, 1], [], []>} : vector<256x128xbf16>, vector<128x128xbf16>, vector<256x128xf32> -> vector<256x128xf32>
    %52 = arith.addf %46, %51 : vector<256x128xf32>
    %c0_51 = arith.constant 0 : index
    %c0_52 = arith.constant 0 : index
    %53 = vector.load %arg5[%c0_51, %c0_52] : memref<1x128xf32, #tpu.memory_space<vmem>>, vector<1x128xf32>
    %54 = vector.broadcast %53 : vector<1x128xf32> to vector<256x128xf32>
    %55 = arith.addf %52, %54 : vector<256x128xf32>
    %cst_53 = arith.constant 0.000000e+00 : f32
    %56 = vector.broadcast %cst_53 : f32 to vector<256x128xf32>
    %57 = arith.maximumf %55, %56 : vector<256x128xf32>
    %cst_54 = arith.constant 0.000000e+00 : bf16
    %58 = vector.broadcast %cst_54 : bf16 to vector<1x18x128xbf16>
    %cst_55 = arith.constant 0.000000e+00 : bf16
    %59 = vector.broadcast %cst_55 : bf16 to vector<18x1x128xbf16>
    %c0_56 = arith.constant 0 : index
    %c0_57 = arith.constant 0 : index
    %c0_58 = arith.constant 0 : index
    %60 = vector.load %arg8[%c0_56, %c0_57, %c0_58] : memref<18x18x128xbf16, #tpu.memory_space<vmem>>, vector<1x18x128xbf16>
    tpu.vector_store %arg8[%c0_56, %c0_57, %c0_58], %58 {strides = array<i32>} : memref<18x18x128xbf16, #tpu.memory_space<vmem>>, vector<1x18x128xbf16>,
    %c17 = arith.constant 17 : index
    %c0_59 = arith.constant 0 : index
    %c0_60 = arith.constant 0 : index
    %61 = vector.load %arg8[%c17, %c0_59, %c0_60] : memref<18x18x128xbf16, #tpu.memory_space<vmem>>, vector<1x18x128xbf16>
    tpu.vector_store %arg8[%c17, %c0_59, %c0_60], %58 {strides = array<i32>} : memref<18x18x128xbf16, #tpu.memory_space<vmem>>, vector<1x18x128xbf16>,
    %c0_61 = arith.constant 0 : index
    %c0_62 = arith.constant 0 : index
    %c0_63 = arith.constant 0 : index
    %62 = vector.load %arg8[%c0_61, %c0_62, %c0_63] : memref<18x18x128xbf16, #tpu.memory_space<vmem>>, vector<18x1x128xbf16>
    tpu.vector_store %arg8[%c0_61, %c0_62, %c0_63], %59 {strides = array<i32>} : memref<18x18x128xbf16, #tpu.memory_space<vmem>>, vector<18x1x128xbf16>,
    %c0_64 = arith.constant 0 : index
    %c17_65 = arith.constant 17 : index
    %c0_66 = arith.constant 0 : index
    %63 = vector.load %arg8[%c0_64, %c17_65, %c0_66] : memref<18x18x128xbf16, #tpu.memory_space<vmem>>, vector<18x1x128xbf16>
    tpu.vector_store %arg8[%c0_64, %c17_65, %c0_66], %59 {strides = array<i32>} : memref<18x18x128xbf16, #tpu.memory_space<vmem>>, vector<18x1x128xbf16>,
    %64 = vector.shape_cast %57 : vector<256x128xf32> to vector<16x16x128xf32>
    %65 = arith.truncf %64 : vector<16x16x128xf32> to vector<16x16x128xbf16>
    %c1_67 = arith.constant 1 : index
    %c1_68 = arith.constant 1 : index
    %c0_69 = arith.constant 0 : index
    %66 = vector.load %arg8[%c1_67, %c1_68, %c0_69] : memref<18x18x128xbf16, #tpu.memory_space<vmem>>, vector<16x16x128xbf16>
    tpu.vector_store %arg8[%c1_67, %c1_68, %c0_69], %65 {strides = array<i32>} : memref<18x18x128xbf16, #tpu.memory_space<vmem>>, vector<16x16x128xbf16>,
    %c0_70 = arith.constant 0 : index
    %c1_71 = arith.constant 1 : index
    %c1_72 = arith.constant 1 : index
    %c0_73 = arith.constant 0 : index
    %67 = vector.load %arg1[%c0_70, %c1_71, %c1_72, %c0_73] : memref<1x18x18x128xbf16, #tpu.memory_space<vmem>>, vector<1x16x16x128xbf16>
    %68 = vector.shape_cast %67 : vector<1x16x16x128xbf16> to vector<16x16x128xbf16>
    %69 = vector.shape_cast %68 : vector<16x16x128xbf16> to vector<256x128xbf16>
    %c0_74 = arith.constant 0 : index
    %c0_75 = arith.constant 0 : index
    %70 = vector.load %arg4[%c0_74, %c0_75] : memref<128x128xbf16, #tpu.memory_space<vmem>>, vector<128x128xbf16>
    %cst_76 = arith.constant dense<0.000000e+00> : vector<256x128xf32>
    %71 = tpu.matmul %69, %70, %cst_76 {dimension_numbers = #tpu.dot_dimension_numbers<[1], [0], [0], [1], [0, 0, 1, 1], [], []>} : vector<256x128xbf16>, vector<128x128xbf16>, vector<256x128xf32> -> vector<256x128xf32>
    %c0_77 = arith.constant 0 : index
    %c0_78 = arith.constant 0 : index
    %c0_79 = arith.constant 0 : index
    %72 = vector.load %arg8[%c0_77, %c0_78, %c0_79] : memref<18x18x128xbf16, #tpu.memory_space<vmem>>, vector<16x16x128xbf16>
    %73 = vector.shape_cast %72 : vector<16x16x128xbf16> to vector<256x128xbf16>
    %c0_80 = arith.constant 0 : index
    %c0_81 = arith.constant 0 : index
    %74 = vector.load %arg3[%c0_80, %c0_81] : memref<1152x128xbf16, #tpu.memory_space<vmem>>, vector<128x128xbf16>
    %cst_82 = arith.constant dense<0.000000e+00> : vector<256x128xf32>
    %75 = tpu.matmul %73, %74, %cst_82 {dimension_numbers = #tpu.dot_dimension_numbers<[1], [0], [0], [1], [0, 0, 1, 1], [], []>} : vector<256x128xbf16>, vector<128x128xbf16>, vector<256x128xf32> -> vector<256x128xf32>
    %c0_83 = arith.constant 0 : index
    %c1_84 = arith.constant 1 : index
    %c0_85 = arith.constant 0 : index
    %76 = vector.load %arg8[%c0_83, %c1_84, %c0_85] : memref<18x18x128xbf16, #tpu.memory_space<vmem>>, vector<16x16x128xbf16>
    %77 = vector.shape_cast %76 : vector<16x16x128xbf16> to vector<256x128xbf16>
    %c128_86 = arith.constant 128 : index
    %c0_87 = arith.constant 0 : index
    %78 = vector.load %arg3[%c128_86, %c0_87] : memref<1152x128xbf16, #tpu.memory_space<vmem>>, vector<128x128xbf16>
    %cst_88 = arith.constant dense<0.000000e+00> : vector<256x128xf32>
    %79 = tpu.matmul %77, %78, %cst_88 {dimension_numbers = #tpu.dot_dimension_numbers<[1], [0], [0], [1], [0, 0, 1, 1], [], []>} : vector<256x128xbf16>, vector<128x128xbf16>, vector<256x128xf32> -> vector<256x128xf32>
    %80 = arith.addf %75, %79 : vector<256x128xf32>
    %c0_89 = arith.constant 0 : index
    %c2_90 = arith.constant 2 : index
    %c0_91 = arith.constant 0 : index
    %81 = vector.load %arg8[%c0_89, %c2_90, %c0_91] : memref<18x18x128xbf16, #tpu.memory_space<vmem>>, vector<16x16x128xbf16>
    %82 = vector.shape_cast %81 : vector<16x16x128xbf16> to vector<256x128xbf16>
    %c256_92 = arith.constant 256 : index
    %c0_93 = arith.constant 0 : index
    %83 = vector.load %arg3[%c256_92, %c0_93] : memref<1152x128xbf16, #tpu.memory_space<vmem>>, vector<128x128xbf16>
    %cst_94 = arith.constant dense<0.000000e+00> : vector<256x128xf32>
    %84 = tpu.matmul %82, %83, %cst_94 {dimension_numbers = #tpu.dot_dimension_numbers<[1], [0], [0], [1], [0, 0, 1, 1], [], []>} : vector<256x128xbf16>, vector<128x128xbf16>, vector<256x128xf32> -> vector<256x128xf32>
    %85 = arith.addf %80, %84 : vector<256x128xf32>
    %c1_95 = arith.constant 1 : index
    %c0_96 = arith.constant 0 : index
    %c0_97 = arith.constant 0 : index
    %86 = vector.load %arg8[%c1_95, %c0_96, %c0_97] : memref<18x18x128xbf16, #tpu.memory_space<vmem>>, vector<16x16x128xbf16>
    %87 = vector.shape_cast %86 : vector<16x16x128xbf16> to vector<256x128xbf16>
    %c384_98 = arith.constant 384 : index
    %c0_99 = arith.constant 0 : index
    %88 = vector.load %arg3[%c384_98, %c0_99] : memref<1152x128xbf16, #tpu.memory_space<vmem>>, vector<128x128xbf16>
    %cst_100 = arith.constant dense<0.000000e+00> : vector<256x128xf32>
    %89 = tpu.matmul %87, %88, %cst_100 {dimension_numbers = #tpu.dot_dimension_numbers<[1], [0], [0], [1], [0, 0, 1, 1], [], []>} : vector<256x128xbf16>, vector<128x128xbf16>, vector<256x128xf32> -> vector<256x128xf32>
    %90 = arith.addf %85, %89 : vector<256x128xf32>
    %c1_101 = arith.constant 1 : index
    %c1_102 = arith.constant 1 : index
    %c0_103 = arith.constant 0 : index
    %91 = vector.load %arg8[%c1_101, %c1_102, %c0_103] : memref<18x18x128xbf16, #tpu.memory_space<vmem>>, vector<16x16x128xbf16>
    %92 = vector.shape_cast %91 : vector<16x16x128xbf16> to vector<256x128xbf16>
    %c512_104 = arith.constant 512 : index
    %c0_105 = arith.constant 0 : index
    %93 = vector.load %arg3[%c512_104, %c0_105] : memref<1152x128xbf16, #tpu.memory_space<vmem>>, vector<128x128xbf16>
    %cst_106 = arith.constant dense<0.000000e+00> : vector<256x128xf32>
    %94 = tpu.matmul %92, %93, %cst_106 {dimension_numbers = #tpu.dot_dimension_numbers<[1], [0], [0], [1], [0, 0, 1, 1], [], []>} : vector<256x128xbf16>, vector<128x128xbf16>, vector<256x128xf32> -> vector<256x128xf32>
    %95 = arith.addf %90, %94 : vector<256x128xf32>
    %c1_107 = arith.constant 1 : index
    %c2_108 = arith.constant 2 : index
    %c0_109 = arith.constant 0 : index
    %96 = vector.load %arg8[%c1_107, %c2_108, %c0_109] : memref<18x18x128xbf16, #tpu.memory_space<vmem>>, vector<16x16x128xbf16>
    %97 = vector.shape_cast %96 : vector<16x16x128xbf16> to vector<256x128xbf16>
    %c640_110 = arith.constant 640 : index
    %c0_111 = arith.constant 0 : index
    %98 = vector.load %arg3[%c640_110, %c0_111] : memref<1152x128xbf16, #tpu.memory_space<vmem>>, vector<128x128xbf16>
    %cst_112 = arith.constant dense<0.000000e+00> : vector<256x128xf32>
    %99 = tpu.matmul %97, %98, %cst_112 {dimension_numbers = #tpu.dot_dimension_numbers<[1], [0], [0], [1], [0, 0, 1, 1], [], []>} : vector<256x128xbf16>, vector<128x128xbf16>, vector<256x128xf32> -> vector<256x128xf32>
    %100 = arith.addf %95, %99 : vector<256x128xf32>
    %c2_113 = arith.constant 2 : index
    %c0_114 = arith.constant 0 : index
    %c0_115 = arith.constant 0 : index
    %101 = vector.load %arg8[%c2_113, %c0_114, %c0_115] : memref<18x18x128xbf16, #tpu.memory_space<vmem>>, vector<16x16x128xbf16>
    %102 = vector.shape_cast %101 : vector<16x16x128xbf16> to vector<256x128xbf16>
    %c768_116 = arith.constant 768 : index
    %c0_117 = arith.constant 0 : index
    %103 = vector.load %arg3[%c768_116, %c0_117] : memref<1152x128xbf16, #tpu.memory_space<vmem>>, vector<128x128xbf16>
    %cst_118 = arith.constant dense<0.000000e+00> : vector<256x128xf32>
    %104 = tpu.matmul %102, %103, %cst_118 {dimension_numbers = #tpu.dot_dimension_numbers<[1], [0], [0], [1], [0, 0, 1, 1], [], []>} : vector<256x128xbf16>, vector<128x128xbf16>, vector<256x128xf32> -> vector<256x128xf32>
    %105 = arith.addf %100, %104 : vector<256x128xf32>
    %c2_119 = arith.constant 2 : index
    %c1_120 = arith.constant 1 : index
    %c0_121 = arith.constant 0 : index
    %106 = vector.load %arg8[%c2_119, %c1_120, %c0_121] : memref<18x18x128xbf16, #tpu.memory_space<vmem>>, vector<16x16x128xbf16>
    %107 = vector.shape_cast %106 : vector<16x16x128xbf16> to vector<256x128xbf16>
    %c896_122 = arith.constant 896 : index
    %c0_123 = arith.constant 0 : index
    %108 = vector.load %arg3[%c896_122, %c0_123] : memref<1152x128xbf16, #tpu.memory_space<vmem>>, vector<128x128xbf16>
    %cst_124 = arith.constant dense<0.000000e+00> : vector<256x128xf32>
    %109 = tpu.matmul %107, %108, %cst_124 {dimension_numbers = #tpu.dot_dimension_numbers<[1], [0], [0], [1], [0, 0, 1, 1], [], []>} : vector<256x128xbf16>, vector<128x128xbf16>, vector<256x128xf32> -> vector<256x128xf32>
    %110 = arith.addf %105, %109 : vector<256x128xf32>
    %c2_125 = arith.constant 2 : index
    %c2_126 = arith.constant 2 : index
    %c0_127 = arith.constant 0 : index
    %111 = vector.load %arg8[%c2_125, %c2_126, %c0_127] : memref<18x18x128xbf16, #tpu.memory_space<vmem>>, vector<16x16x128xbf16>
    %112 = vector.shape_cast %111 : vector<16x16x128xbf16> to vector<256x128xbf16>
    %c1024_128 = arith.constant 1024 : index
    %c0_129 = arith.constant 0 : index
    %113 = vector.load %arg3[%c1024_128, %c0_129] : memref<1152x128xbf16, #tpu.memory_space<vmem>>, vector<128x128xbf16>
    %cst_130 = arith.constant dense<0.000000e+00> : vector<256x128xf32>
    %114 = tpu.matmul %112, %113, %cst_130 {dimension_numbers = #tpu.dot_dimension_numbers<[1], [0], [0], [1], [0, 0, 1, 1], [], []>} : vector<256x128xbf16>, vector<128x128xbf16>, vector<256x128xf32> -> vector<256x128xf32>
    %115 = arith.addf %110, %114 : vector<256x128xf32>
    %c0_131 = arith.constant 0 : index
    %c0_132 = arith.constant 0 : index
    %116 = vector.load %arg6[%c0_131, %c0_132] : memref<1x128xf32, #tpu.memory_space<vmem>>, vector<1x128xf32>
    %117 = vector.broadcast %116 : vector<1x128xf32> to vector<256x128xf32>
    %118 = arith.addf %115, %117 : vector<256x128xf32>
    %119 = arith.addf %118, %71 : vector<256x128xf32>
    %cst_133 = arith.constant 0.000000e+00 : f32
    %120 = vector.broadcast %cst_133 : f32 to vector<256x128xf32>
    %121 = arith.maximumf %119, %120 : vector<256x128xf32>
    %c0_134 = arith.constant 0 : index
    %c0_135 = arith.constant 0 : index
    %c0_136 = arith.constant 0 : index
    %122 = vector.load %arg7[%c0_134, %c0_135, %c0_136] : memref<1x256x128xf32, #tpu.memory_space<vmem>>, vector<1x256x128xf32>
    %123 = vector.shape_cast %122 : vector<1x256x128xf32> to vector<256x128xf32>
    %124 = vector.shape_cast %121 : vector<256x128xf32> to vector<1x256x128xf32>
    tpu.vector_store %arg7[%c0_134, %c0_135, %c0_136], %124 {strides = array<i32>} : memref<1x256x128xf32, #tpu.memory_space<vmem>>, vector<1x256x128xf32>,
    return
  }
  func.func @transform_0(%arg0: i32) -> (i32, i32, i32, i32) {
    %c0_i32 = arith.constant 0 : i32
    %c0_i32_0 = arith.constant 0 : i32
    %c0_i32_1 = arith.constant 0 : i32
    %c0_i32_2 = arith.constant 0 : i32
    return %arg0, %c0_i32, %c0_i32_0, %c0_i32_1 : i32, i32, i32, i32
  }
  func.func @transform_1(%arg0: i32) -> (i32, i32) {
    %c0_i32 = arith.constant 0 : i32
    %c0_i32_0 = arith.constant 0 : i32
    %c0_i32_1 = arith.constant 0 : i32
    return %c0_i32, %c0_i32_0 : i32, i32
  }
  func.func @transform_2(%arg0: i32) -> (i32, i32) {
    %c0_i32 = arith.constant 0 : i32
    %c0_i32_0 = arith.constant 0 : i32
    %c0_i32_1 = arith.constant 0 : i32
    return %c0_i32, %c0_i32_0 : i32, i32
  }
  func.func @transform_3(%arg0: i32) -> (i32, i32) {
    %c0_i32 = arith.constant 0 : i32
    %c0_i32_0 = arith.constant 0 : i32
    %c0_i32_1 = arith.constant 0 : i32
    return %c0_i32, %c0_i32_0 : i32, i32
  }
  func.func @transform_4(%arg0: i32) -> (i32, i32) {
    %c0_i32 = arith.constant 0 : i32
    %c0_i32_0 = arith.constant 0 : i32
    %c0_i32_1 = arith.constant 0 : i32
    return %c0_i32, %c0_i32_0 : i32, i32
  }
  func.func @transform_5(%arg0: i32) -> (i32, i32) {
    %c0_i32 = arith.constant 0 : i32
    %c0_i32_0 = arith.constant 0 : i32
    %c0_i32_1 = arith.constant 0 : i32
    return %c0_i32, %c0_i32_0 : i32, i32
  }
  func.func @transform_6(%arg0: i32) -> (i32, i32, i32) {
    %c0_i32 = arith.constant 0 : i32
    %c0_i32_0 = arith.constant 0 : i32
    %c0_i32_1 = arith.constant 0 : i32
    return %arg0, %c0_i32, %c0_i32_0 : i32, i32, i32
  }
}

</mosaic_0001>

<bundles_post_ra>
// kernel: resnet_basic_layer.1
= control target key start
LH: loop header
LB: loop body
LE: loop exit
PB: predicated region body
PF: predicated region fallthrough
CT: control target
= control target key end

     0   :  { %s11724_s21 = smov 0   ;;  %s15895_s0 = inlined_call_operand.vmem [shape: bf16[2,18,18,128], index: 0, kind: input, shape index: {}]   ;;  %s15896_s1 = inlined_call_operand.vmem [shape: bf16[1152,128], index: 1, kind: input, shape index: {}]   ;;  %s15897_s2 = inlined_call_operand.vmem [shape: bf16[1152,128], index: 2, kind: input, shape index: {}]   ;;  %s15898_s3 = inlined_call_operand.vmem [shape: bf16[128,128], index: 3, kind: input, shape index: {}]   ;;  %s15899_s4 = inlined_call_operand.vmem [shape: f32[1,128], index: 4, kind: input, shape index: {}]   ;;  %s15900_s5 = inlined_call_operand.vmem [shape: f32[1,128], index: 5, kind: input, shape index: {}]   ;;  %s15901_s6 = inlined_call_operand.vmem [shape: f32[2,256,128], index: 6, kind: output, shape index: {}]  }
   0x1 LB: > { %s10045_s22 = sadd.s32 4294967295, %s11686_s21   ;;  %p10049_p0 = scmp.ge.s32.totalorder %s11686_s21, 1  ;;  %s11686_s21 = sphi %s11724_s21, %s16_s21  }
   0x2   : > { %p212_p1 = scmp.lt.s32.totalorder %s11686_s21, 3 }
   0x4   : > { %p213_p2 = pnand %p10049_p0, %p212_p1 }
   0x6   : > { %216 = sbr.rel (%p213_p2) target bundleno = 1582 (0x62e), region = 44 }
   0xb   : > { %v11415_v0 = vld [vmem:[%s15896_s1 + $0x78] sm:$0xff]  ;;  %p242_p3 = scmp.lt.s32.totalorder %s10045_s22, 1  ;;  %v11414_v3 = vld [vmem:[%s15896_s1 + $0x70] sm:$0xff]  ;;  %v11413_v6 = vld [vmem:[%s15896_s1 + $0x68] sm:$0xff]  ;;  %vm317_vm0 = vsmask.f32 3328 }
   0xc   : > { %v11738_v1 = vld [vmem:[%s15896_s1 + $0x38] sm:$0xff]  ;;  %832 = vmatpush.bf16.msra.mxu0 %v11415_v0  ;;  %11632 = vmatpush.bf16.msra.mxu3 %v11415_v0  ;;  %v11755_v4 = vld [vmem:[%s15896_s1 + $0x30] sm:$0xff]  ;;  %v11776_v7 = vld [vmem:[%s15896_s1 + $0x28] sm:$0xff]  ;;  %vm318_vm1 = vsmask.f32 7440  ;;  %vm1202_vm2 = vcmask 1042432  }
   0xd   : > { %v11743_v2 = vld [vmem:[%s15896_s1 + $0xb8] sm:$0xff]  ;;  %s16190_s22 = smov (!%p242_p3, %s10045_s22), 1  ;;  %1065 = vmatpush.bf16.msra.mxu1 %v11738_v1  ;;  %v11760_v5 = vld [vmem:[%s15896_s1 + $0xb0] sm:$0xff]  ;;  %v11781_v8 = vld [vmem:[%s15896_s1 + $0xa8] sm:$0xff]  ;;  %vm1203_vm3 = vcmask 1046532   ;;  %v15910_v56 = vmov 0 }
   0xe   : > { %1445 = vmatpush.bf16.msra.mxu2 %v11743_v2  ;;  %s11656_s11 = smul.u32 216, %s16190_s22  ;;  %v11412_v9 = vld [vmem:[%s15896_s1 + $0x60] sm:$0xff]  ;;  %v11411_v35 = vld [vmem:[%s15896_s1 + $0x58] sm:$0xff]  ;;  %vm11841_vm4 = vmor %vm317_vm0, %vm318_vm1  ;;  %vm4482_vm6 = vsmask.f32 256  ;;  %vm4481_vm7 = vcmask 1040384  }
   0xf   : > { %v11799_v18 = vld [vmem:[%s15896_s1 + $0x20] sm:$0xff]  ;;  %v11831_v40 = vld [vmem:[%s15896_s1 + $0x18] sm:$0xff]  ;;  %v11410_v53 = vld [vmem:[%s15896_s1 + $0x50] sm:$0xff]  ;;  %vm4538_vm9 = vsmask.f32 7938  ;;  %vm4949_vm11 = vcmask 1043456  }
  0x10   : > { %833 = vmatpush.bf16.msra.mxu0 %v11414_v3  ;;  %11633 = vmatpush.bf16.msra.mxu3 %v11414_v3  ;;  %s11769_s16 = scalar_lea.vmem %s15895_s0, %s11656_s11  ;;  %v11804_v19 = vld [vmem:[%s15896_s1 + $0xa0] sm:$0xff]  ;;  %v11836_v41 = vld [vmem:[%s15896_s1 + $0x98] sm:$0xff]  ;;  %vm11853_vm5 = vmor %vm1202_vm2, %vm1203_vm3  ;;  %vm4626_vm12 = vsmask.f32 4368  ;;  %s11383_s17 = sshll.u32 %s16190_s22, 8 }
  0x11   : > { %1066 = vmatpush.bf16.msra.mxu1 %v11755_v4  ;;  %v253_v10 = vld [vmem:[%s11769_s16] sm:$0xf]  ;;  %v11788_v11 = vld [vmem:[%s11769_s16 + $0x4] sm:$0xf]  ;;  %v11791_v12 = vld [vmem:[%s11769_s16 + $0x8] sm:$0x1]  ;;  %s15725_s20 = scalar_lea.vmem %s15901_s6, %s11383_s17 }
  0x12   : > { %1446 = vmatpush.bf16.msra.mxu2 %v11760_v5  ;;  %v321_v13 = vshrl.u32 %v253_v10, 16  ;;  %v324_v14 = vshll.u32 %v253_v10, 16  ;;  %v330_v15 = vshll.u32 %v11788_v11, 16  ;;  %v334_v16 = vshrl.u32 %v11788_v11, 16  ;;  %v277_v17 = vld [vmem:[%s11769_s16 + $0x90] sm:$0xf]  ;;  %vm13308_vm8 = vmand %vm4481_vm7, %vm4482_vm6 }
  0x13   : > { %v11807_v20 = vld [vmem:[%s11769_s16 + $0x94] sm:$0xf]  ;;  %v609_v21 = vshrl.u32 %v277_v17, 16  ;;  %v11814_v26 = vld [vmem:[%s11769_s16 + $0x98] sm:$0x1]  ;;  %v340_v27 = vshll.u32 %v11791_v12, 16  ;;  %vm13333_vm10 = vmand %vm4481_vm7, %vm4538_vm9 }
  0x14   : > { %834 = vmatpush.bf16.msra.mxu0 %v11413_v6  ;;  %11634 = vmatpush.bf16.msra.mxu3 %v11413_v6  ;;  %v323_v22 = vrot.slane %v321_v13, 4  ;;  %v326_v23 = vrot.slane %v324_v14, 5  ;;  %v11811_v24 = vrot.slane %v330_v15, 5  ;;  %v336_v25 = vrot.slane %v334_v16, 4  ;;  %v1154_v34 = vld [vmem:[%s11769_s16] sm:$0xe]  ;;  %vm13512_vm13 = vmand %vm4949_vm11, %vm4538_vm9 }
  0x15   : > { %1067 = vmatpush.bf16.msra.mxu1 %v11776_v7  ;;  %v611_v28 = vrot.slane %v609_v21, 4  ;;  %v612_v29 = vshll.u32 %v277_v17, 16  ;;  %v618_v30 = vshll.u32 %v11807_v20, 16  ;;  %v622_v33 = vshrl.u32 %v11807_v20, 16  ;;  %v255_v39 = vld [vmem:[%s11769_s16 + $0xc] sm:$0xf]  ;;  %vm13562_vm14 = vmor %vm4482_vm6, %vm4626_vm12 }
  0x16   : > { %1447 = vmatpush.bf16.msra.mxu2 %v11781_v8  ;;  %v327_v31 = vor.u32 %v326_v23, %v323_v22  ;;  %v337_v32 = vor.u32 %v336_v25, %v11811_v24  ;;  %v628_v38 = vshll.u32 %v11814_v26, 16  ;;  %v342_v44 = vrot.slane %v340_v27, 5  ;;  %v11846_v51 = vld [vmem:[%s11769_s16 + $0x10] sm:$0xf]  ;;  %v279_v3 = vld [vmem:[%s11769_s16 + $0x9c] sm:$0xf] }
  0x17   : > { %v614_v36 = vrot.slane %v612_v29, 5  ;;  %v620_v37 = vrot.slane %v618_v30, 5  ;;  %v624_v42 = vrot.slane %v622_v33, 4  ;;  %v1207_v46 = vrot.slane %v11788_v11, 5  ;;  %v11863_v58 = vld [vmem:[%s15896_s1 + $0x10] sm:$0xff]  ;;  %v11409_v13 = vld [vmem:[%s15896_s1 + $0x48] sm:$0xff] }
  0x18   : > { %835 = vmatpush.bf16.msra.mxu0 %v11412_v9  ;;  %11635 = vmatpush.bf16.msra.mxu3 %v11412_v9  ;;  %v328_v43 = vrot.slane %v327_v31, 4  ;;  %v338_v48 = vrot.slane %v337_v32, 4  ;;  %v10181_v50 = vrot.slane %v1154_v34, 9  ;;  %v345_v52 = vshrl.u32 %v255_v39, 16  ;;  %v11868_v59 = vld [vmem:[%s15896_s1 + $0x90] sm:$0xff]  ;;  %v11897_v21 = vld [vmem:[%s15896_s1 + $0x8] sm:$0xff] }
  0x19   : > { %1068 = vmatpush.bf16.msra.mxu1 %v11799_v18  ;;  %v615_v45 = vor.u32 %v614_v36, %v611_v28  ;;  %v625_v49 = vor.u32 %v624_v42, %v620_v37  ;;  %v630_v55 = vrot.slane %v628_v38, 5  ;;  %v15911_v56 = vsel %vm11853_vm5, 4294967295, %v15910_v56  ;;  %v11876_v6 = vld [vmem:[%s11769_s16 + $0xa0] sm:$0xf]  ;;  %v11902_v22 = vld [vmem:[%s15896_s1 + $0x88] sm:$0xff] }
  0x1a   : > { %1448 = vmatpush.bf16.msra.mxu2 %v11804_v19  ;;  %15912 = vst [vmem:[#allocation3_spill] sm:$0xff] %v15911_v56  ;;  %v1210_v57 = vrot.slane %v11791_v12, 5  ;;  %v1209_v61 = vrot.slane %v1207_v46, 4  ;;  %v333_v62 = vsel %vm11841_vm4, %v328_v43, %v11811_v24  ;;  %v348_v63 = vshll.u32 %v255_v39, 16  ;;  %v11907_v31 = vld [vmem:[%s11769_s16 + $0x14] sm:$0x1] }
  0x1b   : > { %v616_v54 = vrot.slane %v615_v45, 4  ;;  %v626_v60 = vrot.slane %v625_v49, 4  ;;  %v354_v0 = vshll.u32 %v11846_v51, 16  ;;  %v343_v9 = vsel %vm11841_vm4, %v338_v48, %v342_v44  ;;  %v11921_v44 = vld [vmem:[%s15896_s1] sm:$0xff] }
  0x1c   : > { %836 = vmatpush.bf16.msra.mxu0 %v11411_v35  ;;  %11636 = vmatpush.bf16.msra.mxu3 %v11411_v35  ;;  %v1208_v10 = vsel %vm11853_vm5, %v10181_v50, %v1207_v46  ;;  %v347_v11 = vrot.slane %v345_v52, 4  ;;  %v358_v12 = vshrl.u32 %v11846_v51, 16  ;;  %v1211_v16 = vsel %vm11853_vm5, %v1209_v61, %v1210_v57  ;;  %v11926_v45 = vld [vmem:[%s15896_s1 + $0x80] sm:$0xff]  ;;  %v11455_v50 = vld [vmem:[%s15896_s1 + $0x138] sm:$0xff] }
  0x1d   : > { %1069 = vmatpush.bf16.msra.mxu1 %v11831_v40  ;;  %v621_v14 = vsel %vm11841_vm4, %v616_v54, %v620_v37  ;;  %v631_v15 = vsel %vm11841_vm4, %v626_v60, %v630_v55  ;;  %v350_v17 = vrot.slane %v348_v63, 5  ;;  %v11904_v23 = vrot.slane %v354_v0, 5  ;;  %v11408_v37 = vld [vmem:[%s15896_s1 + $0x40] sm:$0xff]  ;;  %v1155_v0 = vld [vmem:[%s11769_s16 + $0xc] sm:$0xe] }
  0x1e   : > { %1449 = vmatpush.bf16.msra.mxu2 %v11836_v41  ;;  %v360_v24 = vrot.slane %v358_v12, 4  ;;  %v633_v25 = vshrl.u32 %v279_v3, 16  ;;  %v636_v27 = vshll.u32 %v279_v3, 16  ;;  %v720_v28 = vunpack.c.l.b16 %v333_v62  ;;  %v11931_v49 = vld [vmem:[%s11769_s16 + $0xa4] sm:$0x1] }
  0x1f   : > { %v721_v29 = vunpack.c.l.b16 %v343_v9  ;;  %v1333_v30 = vunpack.c.l.b16 %v1208_v10  ;;  %v642_v32 = vshll.u32 %v11876_v6, 16  ;;  %v744_v33 = vunpack.c.l.b16 %v621_v14  ;;  %v11384_v57 = vld [vmem:[%s11769_s16] sm:$0xff]  ;;  %v11946_v12 = vld [vmem:[%s11769_s16 + $0x1c] sm:$0xf] }
  0x20   : > { %837 = vmatpush.bf16.msra.mxu0 %v11410_v53  ;;  %11637 = vmatpush.bf16.msra.mxu3 %v11410_v53  ;;  %v745_v34 = vunpack.c.l.b16 %v631_v15  ;;  %v1334_v35 = vunpack.c.l.b16 %v1211_v16  ;;  %v351_v36 = vor.u32 %v350_v17, %v347_v11  ;;  %v635_v38 = vrot.slane %v633_v25, 4  ;;  %v257_v11 = vld [vmem:[%s11769_s16 + $0x18] sm:$0xf]  ;;  %v281_v15 = vld [vmem:[%s11769_s16 + $0xa8] sm:$0xf]  ;;  %v11454_v25 = vld [vmem:[%s15896_s1 + $0x130] sm:$0xff] }
  0x21   : > { %1070 = vmatpush.bf16.msra.mxu1 %v11863_v58  ;;  %v638_v39 = vrot.slane %v636_v27, 5  ;;  %v11913_v42 = vrot.slane %v642_v32, 5  ;;  %v646_v43 = vshrl.u32 %v11876_v6, 16  ;;  %v361_v46 = vor.u32 %v360_v24, %v11904_v23  ;;  %v11953_v16 = vld [vmem:[%s11769_s16 + $0xac] sm:$0xf] }
  0x22   : > { %1450 = vmatpush.bf16.msra.mxu2 %v11868_v59  ;;  %v364_v48 = vshll.u32 %v11907_v31, 16  ;;  %v752_v53 = vpack.c.b16 %v721_v29, %v720_v28  ;;  %v764_v54 = vpack.c.b16 %v745_v34, %v744_v33  ;;  %v352_v55 = vrot.slane %v351_v36, 4 }
  0x23   : > { %v648_v52 = vrot.slane %v646_v43, 4  ;;  %v1365_v60 = vpack.c.b16 %v1334_v35, %v1333_v30  ;;  %v639_v61 = vor.u32 %v638_v39, %v635_v38  ;;  %v652_v63 = vshll.u32 %v11931_v49, 16 }
  0x24   : > { %838 = vmatpush.bf16.msra.mxu0 %v11409_v13  ;;  %11638 = vmatpush.bf16.msra.mxu3 %v11409_v13  ;;  %v362_v3 = vrot.slane %v361_v46, 4  ;;  %v366_v9 = vrot.slane %v364_v48, 5  ;;  %v1214_v10 = vrot.slane %v11846_v51, 5  ;;  %v357_v13 = vsel %vm11841_vm4, %v352_v55, %v11904_v23 }
  0x25   : > { %1071 = vmatpush.bf16.msra.mxu1 %v11897_v21  ;;  %v649_v62 = vor.u32 %v648_v52, %v11913_v42  ;;  %v10182_v14 = vrot.slane %v1155_v0, 9  ;;  %v640_v17 = vrot.slane %v639_v61, 4  ;;  %v654_v24 = vrot.slane %v652_v63, 5  ;;  %v11978_v0 = vld [vmem:[%s11769_s16 + $0xb0] sm:$0x1] }
  0x26   : > { %1451 = vmatpush.bf16.msra.mxu2 %v11902_v22  ;;  %v367_v27 = vsel %vm11841_vm4, %v362_v3, %v366_v9  ;;  %v1216_v28 = vrot.slane %v1214_v10, 4  ;;  %v369_v23 = vshrl.u32 %v257_v11, 16  ;;  %v372_v29 = vshll.u32 %v257_v11, 16 }
  0x27   : > { %v650_v51 = vrot.slane %v649_v62, 4  ;;  %v378_v30 = vshll.u32 %v11946_v12, 16  ;;  %v382_v32 = vshrl.u32 %v11946_v12, 16  ;;  %v657_v33 = vshrl.u32 %v281_v15, 16 }
  0x28   : > { %839 = vmatpush.bf16.msra.mxu0 %v11408_v37  ;;  %11639 = vmatpush.bf16.msra.mxu3 %v11408_v37  ;;  %v660_v34 = vshll.u32 %v281_v15, 16  ;;  %v670_v35 = vshrl.u32 %v11953_v16, 16  ;;  %v722_v36 = vunpack.c.l.b16 %v357_v13  ;;  %v645_v37 = vsel %vm11841_vm4, %v640_v17, %v11913_v42  ;;  %v1156_v13 = vld [vmem:[%s11769_s16 + $0x18] sm:$0xe] }
  0x29   : > { %1072 = vmatpush.bf16.msra.mxu1 %v11921_v44  ;;  %v1215_v38 = vsel %vm11853_vm5, %v10182_v14, %v1214_v10  ;;  %v723_v39 = vunpack.c.l.b16 %v367_v27  ;;  %v371_v46 = vrot.slane %v369_v23, 4  ;;  %v374_v48 = vrot.slane %v372_v29, 5 }
  0x2a   : > { %1452 = vmatpush.bf16.msra.mxu2 %v11926_v45  ;;  %v384_v52 = vrot.slane %v382_v32, 4  ;;  %v662_v42 = vrot.slane %v660_v34, 5  ;;  %v672_v61 = vrot.slane %v670_v35, 4  ;;  %v1335_v62 = vunpack.c.l.b16 %v1215_v38  ;;  %v259_v34 = vld [vmem:[%s11769_s16 + $0x24] sm:$0xf] }
  0x2b   : > { %840 = vmatmul.bf16.vlgmr.msra.gmra.mxu0 %v752_v53  ;;  %900 = vmatmul.bf16.vlgmr.msra.gmra.mxu3 %v764_v54  ;;  %v659_v53 = vrot.slane %v657_v33, 4  ;;  %v746_v54 = vunpack.c.l.b16 %v645_v37  ;;  %v375_v3 = vor.u32 %v374_v48, %v371_v46  ;;  %v753_v9 = vpack.c.b16 %v723_v39, %v722_v36  ;;  %v283_v36 = vld [vmem:[%s11769_s16 + $0xb4] sm:$0xf]  ;;  %v11999_v37 = vld [vmem:[%s11769_s16 + $0xb8] sm:$0xf] }
  0x2c   : > { %11640 = vmatpush.bf16.msrb.mxu3 %v11738_v1  ;;  %2440 = vmatpush.bf16.msrb.mxu0 %v11455_v50  ;;  %v1217_v1 = vrot.slane %v11907_v31, 5  ;;  %v666_v31 = vshll.u32 %v11953_v16, 16  ;;  %v380_v50 = vrot.slane %v378_v30, 5  ;;  %v676_v17 = vshll.u32 %v11978_v0, 16 }
  0x2d   : > { %1073 = vmatmul.bf16.vlgmr.msra.gmra.mxu1 %v11384_v57  ;;  %1453 = vmatmul.bf16.vlgmr.msra.gmra.mxu2 %v1365_v60  ;;  %v303_v57 = vld [vmem:[%s11769_s16 + $0x20] sm:$0x1]  ;;  %v663_v11 = vor.u32 %v662_v42, %v659_v53  ;;  %v10183_v27 = vrot.slane %v1156_v13, 9  ;;  %v393_v39 = vshrl.u32 %v259_v34, 16  ;;  %v681_v53 = vshrl.u32 %v283_v36, 16 }
  0x2e   : > { %v1218_v43 = vsel %vm11853_vm5, %v1216_v28, %v1217_v1  ;;  %v668_v60 = vrot.slane %v666_v31, 5  ;;  %v388_v10 = vshll.u32 %v303_v57, 16  ;;  %v678_v30 = vrot.slane %v676_v17, 5  ;;  %v11453_v31 = vld [vmem:[%s15896_s1 + $0x128] sm:$0xff] }
  0x2f   : > { %v1336_v63 = vunpack.c.l.b16 %v1218_v43  ;;  %v1224_v33 = vrot.slane %v303_v57, 5  ;;  %v396_v43 = vshll.u32 %v259_v34, 16  ;;  %v684_v42 = vshll.u32 %v283_v36, 16 }
  0x30   : > { %11641 = vmatpush.bf16.msrb.mxu3 %v11755_v4  ;;  %2441 = vmatpush.bf16.msrb.mxu0 %v11454_v25  ;;  %v655_v4 = vsel %vm11841_vm4, %v650_v51, %v654_v24  ;;  %v673_v15 = vor.u32 %v672_v61, %v668_v60  ;;  %v1221_v51 = vrot.slane %v11946_v12, 5  ;;  %v11385_v24 = vld [vmem:[%s11769_s16 + $0xc] sm:$0xff]  ;;  %v376_v25 = vrot.slane %v375_v3, 4  ;;  %v11988_v12 = vld [vmem:[%s11769_s16 + $0x28] sm:$0xf] }
  0x31   : > { %v747_v55 = vunpack.c.l.b16 %v655_v4  ;;  %v1366_v1 = vpack.c.b16 %v1336_v63, %v1335_v62  ;;  %v390_v23 = vrot.slane %v388_v10, 5  ;;  %v395_v62 = vrot.slane %v393_v39, 4 }
  0x32   : > { %v674_v29 = vrot.slane %v673_v15, 4  ;;  %v1223_v32 = vrot.slane %v1221_v51, 4  ;;  %v381_v35 = vsel %vm11841_vm4, %v376_v25, %v380_v50  ;;  %v398_v63 = vrot.slane %v396_v43, 5  ;;  %v262_v43 = vld [vmem:[%s11769_s16 + $0x34] sm:$0xf] }
  0x33   : > { %v765_v14 = vpack.c.b16 %v747_v55, %v746_v54  ;;  %v690_v54 = vshll.u32 %v11999_v37, 16  ;;  %v724_v55 = vunpack.c.l.b16 %v381_v35  ;;  %v683_v13 = vrot.slane %v681_v53, 4 }
  0x34   : > { %11642 = vmatpush.bf16.msrb.mxu3 %v11776_v7  ;;  %v385_v7 = vor.u32 %v384_v52, %v380_v50  ;;  %2442 = vmatpush.bf16.msrb.mxu0 %v11453_v31  ;;  %v679_v46 = vsel %vm11841_vm4, %v674_v29, %v678_v30  ;;  %v1225_v48 = vsel %vm11853_vm5, %v1223_v32, %v1224_v33  ;;  %v402_v50 = vshll.u32 %v11988_v12, 16  ;;  %v1157_v32 = vld [vmem:[%s11769_s16 + $0x24] sm:$0xe] }
  0x35   : > { %v406_v52 = vshrl.u32 %v11988_v12, 16  ;;  %v749_v3 = vunpack.c.l.b16 %v679_v46  ;;  %v692_v15 = vrot.slane %v690_v54, 5  ;;  %v1228_v33 = vrot.slane %v11988_v12, 5 }
  0x36   : > { %v386_v28 = vrot.slane %v385_v7, 4  ;;  %v404_v7 = vrot.slane %v402_v50, 5  ;;  %v10184_v35 = vrot.slane %v1157_v32, 9  ;;  %v426_v54 = vshll.u32 %v262_v43, 16 }
  0x37   : > { %v408_v10 = vrot.slane %v406_v52, 4 }
  0x38   : > { %11643 = vmatpush.bf16.msrb.mxu3 %v11799_v18  ;;  %v664_v18 = vrot.slane %v663_v11, 4  ;;  %v391_v4 = vsel %vm11841_vm4, %v386_v28, %v390_v23  ;;  %v304_v11 = vld [vmem:[%s11769_s16 + $0x2c] sm:$0x1]  ;;  %v11386_v28 = vld [vmem:[%s11769_s16 + $0x18] sm:$0xff] }
  0x39   : > { %v1231_v39 = vrot.slane %v304_v11, 5 }
  0x3a   : > { %v669_v38 = vsel %vm11841_vm4, %v664_v18, %v668_v60  ;;  %v725_v60 = vunpack.c.l.b16 %v391_v4  ;;  %v261_v4 = vld [vmem:[%s11769_s16 + $0x30] sm:$0xf] }
  0x3b   : > { %845 = vmatmul.bf16.gmra.mxu0 %v753_v9  ;;  %905 = vmatmul.bf16.gmra.mxu3 %v765_v14  ;;  %v748_v61 = vunpack.c.l.b16 %v669_v38  ;;  %v1338_v9 = vunpack.c.l.b16 %v1225_v48  ;;  %v686_v14 = vrot.slane %v684_v42, 5  ;;  %v1230_v38 = vrot.slane %v1228_v33, 4 }
  0x3c   : > { %11644 = vmatpush.bf16.msrb.mxu3 %v11831_v40  ;;  %v1222_v40 = vsel %vm11853_vm5, %v10183_v27, %v1221_v51  ;;  %v12017_v51 = vld [vmem:[%s11769_s16 + $0xbc] sm:$0x1]  ;;  %v409_v27 = vor.u32 %v408_v10, %v404_v7  ;;  %v1229_v48 = vsel %vm11853_vm5, %v10184_v35, %v1228_v33  ;;  %v417_v50 = vshrl.u32 %v261_v4, 16 }
  0x3d   : > { %1078 = vmatmul.bf16.gmra.mxu1 %v11385_v24  ;;  %1458 = vmatmul.bf16.gmra.mxu2 %v1366_v1  ;;  %v1337_v57 = vunpack.c.l.b16 %v1222_v40  ;;  %v399_v24 = vor.u32 %v398_v63, %v395_v62  ;;  %v754_v1 = vpack.c.b16 %v725_v60, %v724_v55  ;;  %v766_v25 = vpack.c.b16 %v749_v3, %v748_v61 }
  0x3e   : > { %v687_v18 = vor.u32 %v686_v14, %v683_v13  ;;  %v700_v30 = vshll.u32 %v12017_v51, 16  ;;  %v420_v52 = vshll.u32 %v261_v4, 16  ;;  %v1339_v62 = vunpack.c.l.b16 %v1229_v48 }
  0x3f   : > { %v1367_v23 = vpack.c.b16 %v1338_v9, %v1337_v57  ;;  %v400_v34 = vrot.slane %v399_v24, 4  ;;  %v419_v63 = vrot.slane %v417_v50, 4 }
  0x40   : > { %11645 = vmatpush.bf16.msrb.mxu3 %v11863_v58  ;;  %v694_v58 = vshrl.u32 %v11999_v37, 16  ;;  %v702_v36 = vrot.slane %v700_v30, 5  ;;  %v422_v9 = vrot.slane %v420_v52, 5 }
  0x41   : > { %v405_v12 = vsel %vm11841_vm4, %v400_v34, %v404_v7  ;;  %v428_v7 = vrot.slane %v426_v54, 5  ;;  %v11396_v54 = vld [vmem:[%s11769_s16 + $0x90] sm:$0xff] }
  0x42   : > { %v696_v17 = vrot.slane %v694_v58, 4  ;;  %v1232_v58 = vsel %vm11853_vm5, %v1230_v38, %v1231_v39  ;;  %v726_v55 = vunpack.c.l.b16 %v405_v12 }
  0x43   : > { %v1340_v3 = vunpack.c.l.b16 %v1232_v58  ;;  %v11388_v58 = vld [vmem:[%s11769_s16 + $0x30] sm:$0xff] }
  0x44   : > { %11646 = vmatpush.bf16.msrb.mxu3 %v11897_v21  ;;  %v412_v21 = vshll.u32 %v304_v11, 16  ;;  %v697_v29 = vor.u32 %v696_v17, %v692_v15  ;;  %v305_v11 = vld [vmem:[%s11769_s16 + $0x38] sm:$0x1]  ;;  %v423_v17 = vor.u32 %v422_v9, %v419_v63 }
  0x45   : > { %v1238_v33 = vrot.slane %v305_v11, 5 }
  0x46   : > { %v414_v31 = vrot.slane %v412_v21, 5  ;;  %v698_v40 = vrot.slane %v697_v29, 4  ;;  %v263_v21 = vld [vmem:[%s11769_s16 + $0x3c] sm:$0xf]  ;;  %v11452_v29 = vld [vmem:[%s15896_s1 + $0x120] sm:$0xff] }
  0x47   : > { %v444_v34 = vshll.u32 %v263_v21, 16  ;;  %2443 = vmatpush.bf16.msrb.mxu0 %v11452_v29 }
  0x48   : > { %11647 = vmatpush.bf16.msrb.mxu3 %v11921_v44  ;;  %v410_v44 = vrot.slane %v409_v27, 4  ;;  %v703_v42 = vsel %vm11841_vm4, %v698_v40, %v702_v36  ;;  %v1158_v27 = vld [vmem:[%s11769_s16 + $0x30] sm:$0xe] }
  0x49   : > { %v751_v61 = vunpack.c.l.b16 %v703_v42  ;;  %v10185_v30 = vrot.slane %v1158_v27, 9  ;;  %v446_v4 = vrot.slane %v444_v34, 5 }
  0x4a   : > { %v415_v46 = vsel %vm11841_vm4, %v410_v44, %v414_v31 }
  0x4b   : > { %850 = vmatmul.bf16.gmra.mxu0 %v754_v1  ;;  %910 = vmatmul.bf16.gmra.mxu3 %v766_v25  ;;  %v727_v57 = vunpack.c.l.b16 %v415_v46  ;;  %v436_v1 = vshll.u32 %v305_v11, 16  ;;  %v1235_v25 = vrot.slane %v262_v43, 5 }
  0x4c   : > { %11648 = vmatpush.bf16.msra.mxu3 %v11743_v2  ;;  %v688_v2 = vrot.slane %v687_v18, 4  ;;  %v264_v18 = vld [vmem:[%s11769_s16 + $0x40] sm:$0xf] }
  0x4d   : > { %1083 = vmatmul.bf16.gmra.mxu1 %v11386_v28  ;;  %1463 = vmatmul.bf16.gmra.mxu2 %v1367_v23  ;;  %v755_v13 = vpack.c.b16 %v727_v57, %v726_v55  ;;  %v424_v28 = vrot.slane %v423_v17, 4  ;;  %v1237_v32 = vrot.slane %v1235_v25, 4  ;;  %v450_v44 = vshll.u32 %v264_v18, 16  ;;  %v1159_v57 = vld [vmem:[%s11769_s16 + $0x3c] sm:$0xe] }
  0x4e   : > { %v693_v53 = vsel %vm11841_vm4, %v688_v2, %v692_v15  ;;  %v11387_v15 = vld [vmem:[%s11769_s16 + $0x24] sm:$0xff]  ;;  %v454_v31 = vshrl.u32 %v264_v18, 16  ;;  %v1236_v40 = vsel %vm11853_vm5, %v10185_v30, %v1235_v25  ;;  %v10186_v63 = vrot.slane %v1159_v57, 9  ;;  %v307_v30 = vld [vmem:[%s11769_s16 + $0x50] sm:$0x1] }
  0x4f   : > { %v750_v60 = vunpack.c.l.b16 %v693_v53  ;;  %v429_v35 = vsel %vm11841_vm4, %v424_v28, %v428_v7  ;;  %v1239_v36 = vsel %vm11853_vm5, %v1237_v32, %v1238_v33  ;;  %v452_v12 = vrot.slane %v450_v44, 5  ;;  %v11397_v33 = vld [vmem:[%s11769_s16 + $0x9c] sm:$0xff] }
  0x50   : > { %11649 = vmatpush.bf16.msra.mxu3 %v11760_v5  ;;  %v430_v5 = vshrl.u32 %v262_v43, 16  ;;  %v728_v38 = vunpack.c.l.b16 %v429_v35  ;;  %v306_v43 = vld [vmem:[%s11769_s16 + $0x44] sm:$0x1]  ;;  %v456_v46 = vrot.slane %v454_v31, 4  ;;  %v1341_v48 = vunpack.c.l.b16 %v1236_v40  ;;  %v1160_v40 = vld [vmem:[%s11769_s16 + $0x48] sm:$0xe] }
  0x51   : > { %v767_v14 = vpack.c.b16 %v751_v61, %v750_v60  ;;  %v1342_v50 = vunpack.c.l.b16 %v1239_v36  ;;  %v460_v53 = vshll.u32 %v306_v43, 16  ;;  %v1245_v9 = vrot.slane %v306_v43, 5  ;;  %v267_v36 = vld [vmem:[%s11769_s16 + $0x54] sm:$0xf] }
  0x52   : > { %v432_v10 = vrot.slane %v430_v5, 4  ;;  %v457_v5 = vor.u32 %v456_v46, %v452_v12  ;;  %v484_v35 = vshll.u32 %v307_v30, 16  ;;  %v10187_v43 = vrot.slane %v1160_v40, 9 }
  0x53   : > { %v1369_v55 = vpack.c.b16 %v1342_v50, %v1341_v48  ;;  %v462_v61 = vrot.slane %v460_v53, 5  ;;  %v1252_v46 = vrot.slane %v307_v30, 5  ;;  %v489_v48 = vshrl.u32 %v267_v36, 16 }
  0x54   : > { %11650 = vmatpush.bf16.msra.mxu3 %v11781_v8  ;;  %v1368_v8 = vpack.c.b16 %v1340_v3, %v1339_v62  ;;  %v433_v24 = vor.u32 %v432_v10, %v428_v7  ;;  %v458_v62 = vrot.slane %v457_v5, 4  ;;  %v265_v7 = vld [vmem:[%s11769_s16 + $0x48] sm:$0xf]  ;;  %v266_v10 = vld [vmem:[%s11769_s16 + $0x4c] sm:$0xf]  ;;  %v492_v50 = vshll.u32 %v267_v36, 16 }
  0x55   : > { %v468_v17 = vshll.u32 %v265_v7, 16 }
  0x56   : > { %v434_v23 = vrot.slane %v433_v24, 4  ;;  %v474_v24 = vshll.u32 %v266_v10, 16  ;;  %v494_v57 = vrot.slane %v492_v50, 5 }
  0x58   : > { %11651 = vmatpush.bf16.msra.mxu3 %v11804_v19  ;;  %v438_v19 = vrot.slane %v436_v1, 5  ;;  %v478_v1 = vshrl.u32 %v266_v10, 16 }
  0x5a   : > { %v439_v2 = vsel %vm11841_vm4, %v434_v23, %v438_v19  ;;  %v470_v19 = vrot.slane %v468_v17, 5  ;;  %v480_v29 = vrot.slane %v478_v1, 4  ;;  %v11390_v1 = vld [vmem:[%s11769_s16 + $0x48] sm:$0xff] }
  0x5b   : > { %855 = vmatmul.bf16.gmra.mxu0 %v755_v13  ;;  %915 = vmatmul.bf16.gmra.mxu3 %v767_v14  ;;  %v729_v39 = vunpack.c.l.b16 %v439_v2  ;;  %v463_v13 = vsel %vm11841_vm4, %v458_v62, %v462_v61  ;;  %v1249_v2 = vrot.slane %v266_v10, 5  ;;  %v308_v62 = vld [vmem:[%s11769_s16 + $0x5c] sm:$0x1]  ;;  %v1294_v10 = vrot.slane %v11814_v26, 5 }
  0x5c   : > { %11652 = vmatpush.bf16.msra.mxu3 %v11836_v41  ;;  %v441_v41 = vshrl.u32 %v263_v21, 16  ;;  %v731_v27 = vunpack.c.l.b16 %v463_v13  ;;  %v508_v13 = vshll.u32 %v308_v62, 16 }
  0x5d   : > { %1088 = vmatmul.bf16.gmra.mxu1 %v11387_v15  ;;  %1468 = vmatmul.bf16.gmra.mxu2 %v1368_v8  ;;  %v756_v42 = vpack.c.b16 %v729_v39, %v728_v38  ;;  %v465_v8 = vshrl.u32 %v265_v7, 16  ;;  %v486_v38 = vrot.slane %v484_v35, 5  ;;  %v268_v39 = vld [vmem:[%s11769_s16 + $0x58] sm:$0xf]  ;;  %v1250_v5 = vsel %vm11853_vm5, %v10187_v43, %v1249_v2  ;;  %v1166_v7 = vld [vmem:[%s11769_s16 + $0x90] sm:$0xe] }
  0x5e   : > { %v502_v53 = vshrl.u32 %v268_v39, 16  ;;  %v510_v26 = vrot.slane %v508_v13, 5  ;;  %v270_v35 = vld [vmem:[%s11769_s16 + $0x64] sm:$0xf]  ;;  %v12131_v13 = vld [vmem:[%s11769_s16 + $0x70] sm:$0xf] }
  0x5f   : > { %v467_v23 = vrot.slane %v465_v8, 4  ;;  %v11398_v8 = vld [vmem:[%s11769_s16 + $0xa8] sm:$0xff]  ;;  %v526_v43 = vshrl.u32 %v270_v35, 16 }
  0x60   : > { %11653 = vmatpush.bf16.msra.mxu3 %v11868_v59  ;;  %v443_v59 = vrot.slane %v441_v41, 4  ;;  %v11389_v41 = vld [vmem:[%s11769_s16 + $0x3c] sm:$0xff] }
  0x61   : > { %v471_v44 = vor.u32 %v470_v19, %v467_v23 }
  0x62   : > { %v447_v52 = vor.u32 %v446_v4, %v443_v59 }
  0x63   : > { %v472_v59 = vrot.slane %v471_v44, 4  ;;  %v11450_v44 = vld [vmem:[%s15896_s1 + $0x110] sm:$0xff] }
  0x64   : > { %11654 = vmatpush.bf16.msra.mxu3 %v11902_v22  ;;  %v1242_v22 = vrot.slane %v264_v18, 5  ;;  %v448_v60 = vrot.slane %v447_v52, 4  ;;  %v476_v18 = vrot.slane %v474_v24, 5  ;;  %v498_v52 = vshll.u32 %v268_v39, 16 }
  0x65   : > { %v1256_v24 = vrot.slane %v268_v39, 5  ;;  %v522_v39 = vshll.u32 %v270_v35, 16 }
  0x66   : > { %v1244_v3 = vrot.slane %v1242_v22, 4  ;;  %v453_v11 = vsel %vm11841_vm4, %v448_v60, %v452_v12  ;;  %v1243_v14 = vsel %vm11853_vm5, %v10186_v63, %v1242_v22  ;;  %v481_v31 = vor.u32 %v480_v29, %v476_v18 }
  0x67   : > { %v730_v25 = vunpack.c.l.b16 %v453_v11  ;;  %v1343_v21 = vunpack.c.l.b16 %v1243_v14  ;;  %v1251_v12 = vrot.slane %v1249_v2, 4  ;;  %v500_v63 = vrot.slane %v498_v52, 5 }
  0x68   : > { %11655 = vmatpush.bf16.msra.mxu3 %v11926_v45  ;;  %v11451_v45 = vld [vmem:[%s15896_s1 + $0x118] sm:$0xff]  ;;  %v1246_v15 = vsel %vm11853_vm5, %v1244_v3, %v1245_v9  ;;  %v482_v4 = vrot.slane %v481_v31, 4  ;;  %v504_v3 = vrot.slane %v502_v53, 4  ;;  %v1345_v9 = vunpack.c.l.b16 %v1250_v5  ;;  %v269_v31 = vld [vmem:[%s11769_s16 + $0x60] sm:$0xf] }
  0x69   : > { %2444 = vmatpush.bf16.msrb.mxu0 %v11451_v45  ;;  %v1344_v28 = vunpack.c.l.b16 %v1246_v15  ;;  %v757_v32 = vpack.c.b16 %v731_v27, %v730_v25  ;;  %v1253_v22 = vsel %vm11853_vm5, %v1251_v12, %v1252_v46  ;;  %v10193_v14 = vrot.slane %v1166_v7, 9  ;;  %v1161_v27 = vld [vmem:[%s11769_s16 + $0x54] sm:$0xe] }
  0x6a   : > { %v1346_v45 = vunpack.c.l.b16 %v1253_v22  ;;  %v505_v17 = vor.u32 %v504_v3, %v500_v63  ;;  %v10188_v30 = vrot.slane %v1161_v27, 9  ;;  %v11446_v12 = vld [vmem:[%s15896_s1 + $0xf0] sm:$0xff]  ;;  %v528_v5 = vrot.slane %v526_v43, 4  ;;  %v309_v22 = vld [vmem:[%s11769_s16 + $0x68] sm:$0x1] }
  0x6b   : > { %860 = vmatmul.bf16.gmra.mxu0 %v756_v42  ;;  %1133 = vmatmul.bf16.vlgmr.msrb.gmra.mxu3 %v11396_v54  ;;  %v1370_v34 = vpack.c.b16 %v1344_v28, %v1343_v21  ;;  %v477_v42 = vsel %vm11841_vm4, %v472_v59, %v476_v18  ;;  %v487_v54 = vsel %vm11841_vm4, %v482_v4, %v486_v38  ;;  %v513_v4 = vshrl.u32 %v269_v31, 16  ;;  %v1167_v43 = vld [vmem:[%s11769_s16 + $0x9c] sm:$0xe] }
  0x6c   : > { %v732_v60 = vunpack.c.l.b16 %v477_v42  ;;  %v733_v61 = vunpack.c.l.b16 %v487_v54  ;;  %v1371_v25 = vpack.c.b16 %v1346_v45, %v1345_v9  ;;  %v506_v29 = vrot.slane %v505_v17, 4  ;;  %v1162_v9 = vld [vmem:[%s11769_s16 + $0x60] sm:$0xe]  ;;  %v271_v45 = vld [vmem:[%s11769_s16 + $0x6c] sm:$0xf] }
  0x6d   : > { %1093 = vmatmul.bf16.gmra.mxu1 %v11388_v58  ;;  %1473 = vmatmul.bf16.gmra.mxu2 %v1369_v55  ;;  %v1291_v58 = vrot.slane %v11807_v20, 5  ;;  %v491_v55 = vrot.slane %v489_v48, 4  ;;  %v1257_v36 = vsel %vm11853_vm5, %v10188_v30, %v1256_v24  ;;  %v516_v38 = vshll.u32 %v269_v31, 16 }
  0x6e   : > { %v758_v20 = vpack.c.b16 %v733_v61, %v732_v60  ;;  %2445 = vmatpush.bf16.msrb.mxu0 %v11450_v44  ;;  %v511_v40 = vsel %vm11841_vm4, %v506_v29, %v510_v26  ;;  %v1347_v50 = vunpack.c.l.b16 %v1257_v36  ;;  %v515_v53 = vrot.slane %v513_v4, 4  ;;  %v11449_v29 = vld [vmem:[%s15896_s1 + $0x108] sm:$0xff] }
  0x6f   : > { %v495_v11 = vor.u32 %v494_v57, %v491_v55  ;;  %v1293_v15 = vrot.slane %v1291_v58, 4  ;;  %v1292_v21 = vsel %vm11853_vm5, %v10193_v14, %v1291_v58  ;;  %v735_v48 = vunpack.c.l.b16 %v511_v40  ;;  %v11399_v55 = vld [vmem:[%s11769_s16 + $0xb4] sm:$0xff]  ;;  %v11445_v14 = vld [vmem:[%s15896_s1 + $0xe8] sm:$0xff] }
  0x70   : > { %v1357_v19 = vunpack.c.l.b16 %v1292_v21  ;;  %v518_v42 = vrot.slane %v516_v38, 5  ;;  %v524_v54 = vrot.slane %v522_v39, 5  ;;  %v11391_v57 = vld [vmem:[%s11769_s16 + $0x54] sm:$0xff]  ;;  %v1263_v3 = vrot.slane %v270_v35, 5  ;;  %v11392_v38 = vld [vmem:[%s11769_s16 + $0x60] sm:$0xff] }
  0x71   : > { %v1295_v28 = vsel %vm11853_vm5, %v1293_v15, %v1294_v10  ;;  %v496_v23 = vrot.slane %v495_v11, 4  ;;  %v10189_v15 = vrot.slane %v1162_v9, 9  ;;  %v537_v17 = vshrl.u32 %v271_v45, 16  ;;  %v310_v35 = vld [vmem:[%s11769_s16 + $0x74] sm:$0x1] }
  0x72   : > { %v1358_v18 = vunpack.c.l.b16 %v1295_v28  ;;  %v519_v61 = vor.u32 %v518_v42, %v515_v53  ;;  %2446 = vmatpush.bf16.msrb.mxu0 %v11449_v29  ;;  %v1163_v53 = vld [vmem:[%s11769_s16 + $0x6c] sm:$0xe] }
  0x73   : > { %v501_v2 = vsel %vm11841_vm4, %v496_v23, %v500_v63  ;;  %v532_v63 = vshll.u32 %v309_v22, 16  ;;  %v1264_v28 = vsel %vm11853_vm5, %v10189_v15, %v1263_v3  ;;  %v539_v26 = vrot.slane %v537_v17, 4 }
  0x74   : > { %v734_v46 = vunpack.c.l.b16 %v501_v2  ;;  %v520_v7 = vrot.slane %v519_v61, 4  ;;  %v1349_v44 = vunpack.c.l.b16 %v1264_v28  ;;  %v10190_v61 = vrot.slane %v1163_v53, 9 }
  0x75   : > { %v534_v11 = vrot.slane %v532_v63, 5  ;;  %v1273_v63 = vrot.slane %v310_v35, 5  ;;  %v1305_v53 = vrot.slane %v11953_v16, 5  ;;  %v11459_v16 = vld [vmem:[%s15896_s1 + $0x158] sm:$0xff] }
  0x76   : > { %v759_v58 = vpack.c.b16 %v735_v48, %v734_v46  ;;  %v525_v27 = vsel %vm11841_vm4, %v520_v7, %v524_v54  ;;  %v1270_v48 = vrot.slane %v12131_v13, 5 }
  0x77   : > { %v736_v30 = vunpack.c.l.b16 %v525_v27 }
  0x7b   : > { %865 = vmatmul.bf16.gmra.mxu0 %v757_v32  ;;  %1138 = vmatmul.bf16.gmra.mxu3 %v11397_v33  ;;  %v1258_v32 = vrot.slane %v1256_v24, 4  ;;  %v1259_v33 = vrot.slane %v308_v62, 5  ;;  %v529_v62 = vor.u32 %v528_v5, %v524_v54  ;;  %v540_v24 = vshll.u32 %v271_v45, 16 }
  0x7c   : > { %v10194_v5 = vrot.slane %v1167_v43, 9  ;;  %v11460_v43 = vld [vmem:[%s15896_s1 + $0x160] sm:$0xff] }
  0x7d   : > { %1098 = vmatmul.bf16.gmra.mxu1 %v11389_v41  ;;  %1478 = vmatmul.bf16.gmra.mxu2 %v1370_v34  ;;  %v12104_v41 = vpack.c.b16 %v1358_v18, %v1357_v19  ;;  %v11447_v34 = vld [vmem:[%s15896_s1 + $0xf8] sm:$0xff]  ;;  %v1260_v59 = vsel %vm11853_vm5, %v1258_v32, %v1259_v33  ;;  %v530_v10 = vrot.slane %v529_v62, 4  ;;  %v542_v19 = vrot.slane %v540_v24, 5  ;;  %v11444_v18 = vld [vmem:[%s15896_s1 + $0xe0] sm:$0xff] }
  0x7e   : > { %1759 = vmatpush.bf16.msrb.mxu3 %v11447_v34  ;;  %v1348_v52 = vunpack.c.l.b16 %v1260_v59  ;;  %v556_v59 = vshll.u32 %v310_v35, 16  ;;  %v1272_v62 = vrot.slane %v1270_v48, 4  ;;  %v11486_v35 = vld [vmem:[%s15896_s1 + $0x1b0] sm:$0xff] }
  0x7f   : > { %v535_v21 = vsel %vm11841_vm4, %v530_v10, %v534_v11  ;;  %v543_v2 = vor.u32 %v542_v19, %v539_v26  ;;  %v11442_v19 = vld [vmem:[%s15896_s1 + $0xd0] sm:$0xff] }
  0x80   : > { %v1372_v60 = vpack.c.b16 %v1348_v52, %v1347_v50  ;;  %v737_v32 = vunpack.c.l.b16 %v535_v21  ;;  %v558_v54 = vrot.slane %v556_v59, 5  ;;  %v1274_v27 = vsel %vm11853_vm5, %v1272_v62, %v1273_v63  ;;  %v12231_v63 = vld [vmem:[%s11769_s16 + $0x88] sm:$0xf] }
  0x81   : > { %v544_v52 = vrot.slane %v543_v2, 4  ;;  %v1308_v62 = vrot.slane %v11978_v0, 5  ;;  %v11484_v0 = vld [vmem:[%s15896_s1 + $0x1a0] sm:$0xff] }
  0x82   : > { %1760 = vmatpush.bf16.msrb.mxu3 %v11446_v12  ;;  %v760_v40 = vpack.c.b16 %v737_v32, %v736_v30  ;;  %v1298_v12 = vrot.slane %v11876_v6, 5 }
  0x84   : > { %v1300_v6 = vrot.slane %v1298_v12, 4 }
  0x86   : > { %1761 = vmatpush.bf16.msrb.mxu3 %v11445_v14  ;;  %v11462_v14 = vld [vmem:[%s15896_s1 + $0x170] sm:$0xff] }
  0x8a   : > { %1762 = vmatpush.bf16.msrb.mxu3 %v11444_v18  ;;  %v11461_v18 = vld [vmem:[%s15896_s1 + $0x168] sm:$0xff] }
  0x8b   : > { %870 = vmatmul.bf16.gmra.mxu0 %v758_v20  ;;  %1143 = vmatmul.bf16.gmra.mxu3 %v11398_v8  ;;  %v1265_v20 = vrot.slane %v1263_v3, 4  ;;  %v1266_v8 = vrot.slane %v309_v22, 5  ;;  %v273_v22 = vld [vmem:[%s11769_s16 + $0x78] sm:$0xf] }
  0x8c   : > { %v564_v45 = vshll.u32 %v273_v22, 16 }
  0x8d   : > { %1103 = vmatmul.bf16.gmra.mxu1 %v11390_v1  ;;  %1483 = vmatmul.bf16.gmra.mxu2 %v1371_v25  ;;  %v546_v1 = vshll.u32 %v12131_v13, 16  ;;  %v550_v25 = vshrl.u32 %v12131_v13, 16  ;;  %v1267_v23 = vsel %vm11853_vm5, %v1265_v20, %v1266_v8  ;;  %v1299_v8 = vsel %vm11853_vm5, %v10194_v5, %v1298_v12  ;;  %v11485_v5 = vld [vmem:[%s15896_s1 + $0x1a8] sm:$0xff] }
  0x8e   : > { %v1350_v31 = vunpack.c.l.b16 %v1267_v23  ;;  %v566_v26 = vrot.slane %v564_v45, 5  ;;  %v1359_v29 = vunpack.c.l.b16 %v1299_v8 }
  0x8f   : > { %v548_v33 = vrot.slane %v546_v1, 5  ;;  %v552_v34 = vrot.slane %v550_v25, 4  ;;  %v1271_v25 = vsel %vm11853_vm5, %v10190_v61, %v1270_v48  ;;  %v11393_v48 = vld [vmem:[%s11769_s16 + $0x6c] sm:$0xff]  ;;  %v275_v61 = vld [vmem:[%s11769_s16 + $0x84] sm:$0xf] }
  0x90   : > { %v1373_v39 = vpack.c.b16 %v1350_v31, %v1349_v44  ;;  %v1352_v44 = vunpack.c.l.b16 %v1274_v27  ;;  %v12203_v31 = vld [vmem:[%s11769_s16 + $0x80] sm:$0x1] }
  0x91   : > { %v553_v36 = vor.u32 %v552_v34, %v548_v33  ;;  %v549_v9 = vsel %vm11841_vm4, %v544_v52, %v548_v33  ;;  %v1351_v34 = vunpack.c.l.b16 %v1271_v25  ;;  %v1168_v52 = vld [vmem:[%s11769_s16 + $0xa8] sm:$0xe]  ;;  %v11458_v25 = vld [vmem:[%s15896_s1 + $0x150] sm:$0xff] }
  0x92   : > { %v738_v1 = vunpack.c.l.b16 %v549_v9  ;;  %v11441_v9 = vld [vmem:[%s15896_s1 + $0xc8] sm:$0xff] }
  0x93   : > { %v554_v42 = vrot.slane %v553_v36, 4 }
  0x95   : > { %v559_v10 = vsel %vm11841_vm4, %v554_v42, %v558_v54 }
  0x96   : > { %v739_v28 = vunpack.c.l.b16 %v559_v10  ;;  %v1280_v10 = vrot.slane %v12203_v31, 5 }
  0x98   : > { %v761_v59 = vpack.c.b16 %v739_v28, %v738_v1  ;;  %v598_v1 = vshrl.u32 %v12231_v63, 16 }
  0x9b   : > { %875 = vmatmul.bf16.gmra.mxu0 %v759_v58  ;;  %1148 = vmatmul.bf16.gmra.mxu3 %v11399_v55  ;;  %v11463_v58 = vld [vmem:[%s15896_s1 + $0x178] sm:$0xff]  ;;  %v1301_v55 = vrot.slane %v11931_v49, 5  ;;  %v561_v49 = vshrl.u32 %v273_v22, 16 }
  0x9c   : > { %2865 = vmatpush.bf16.msrb.mxu1 %v11463_v58 }
  0x9d   : > { %1108 = vmatmul.bf16.gmra.mxu1 %v11391_v57  ;;  %1488 = vmatmul.bf16.gmra.mxu2 %v1372_v60  ;;  %v12165_v57 = vld [vmem:[%s11769_s16 + $0x7c] sm:$0xf]  ;;  %v1302_v17 = vsel %vm11853_vm5, %v1300_v6, %v1301_v55  ;;  %v563_v23 = vrot.slane %v561_v49, 4  ;;  %v1164_v6 = vld [vmem:[%s11769_s16 + $0x78] sm:$0xe]  ;;  %v11448_v49 = vld [vmem:[%s15896_s1 + $0x100] sm:$0xff] }
  0x9e   : > { %v11443_v60 = vld [vmem:[%s15896_s1 + $0xd8] sm:$0xff]  ;;  %v570_v11 = vshll.u32 %v12165_v57, 16  ;;  %v574_v13 = vshrl.u32 %v12165_v57, 16  ;;  %v1360_v30 = vunpack.c.l.b16 %v1302_v17  ;;  %v1277_v54 = vrot.slane %v12165_v57, 5  ;;  %2447 = vmatpush.bf16.msrb.mxu0 %v11448_v49 }
  0x9f   : > { %1763 = vmatpush.bf16.msrb.mxu3 %v11443_v60  ;;  %v1307_v57 = vrot.slane %v1305_v53, 4  ;;  %v10191_v45 = vrot.slane %v1164_v6, 9 }
  0xa0   : > { %2866 = vmatpush.bf16.msrb.mxu1 %v11462_v14  ;;  %v12200_v32 = vrot.slane %v570_v11, 5  ;;  %v576_v33 = vrot.slane %v574_v13, 4  ;;  %v585_v14 = vshrl.u32 %v275_v61, 16 }
  0xa3   : > { %1764 = vmatpush.bf16.msrb.mxu3 %v11442_v19 }
  0xa4   : > { %2867 = vmatpush.bf16.msrb.mxu1 %v11461_v18  ;;  %v1278_v18 = vsel %vm11853_vm5, %v10191_v45, %v1277_v54  ;;  %v1165_v45 = vld [vmem:[%s11769_s16 + $0x84] sm:$0xe] }
  0xa7   : > { %1765 = vmatpush.bf16.msrb.mxu3 %v11441_v9 }
  0xa8   : > { %v841_v4 = vpop.f32.mrf.mxu0  ;;  %2868 = vmatpush.bf16.msrb.mxu1 %v11460_v43  ;;  %v312_v43 = vld [vmem:[%s11769_s16 + $0x8c] sm:$0x1] }
  0xaa   : > { %v1074_v46 = vpop.f32.mrf.mxu1 }
  0xab   : > { %v1075_v50 = vadd.f32 %v1074_v46, %v841_v4  ;;  %880 = vmatmul.bf16.gmra.mxu0 %v760_v40  ;;  %1513 = vmatmul.bf16.vlgmr.msra.gmra.mxu3 %v12104_v41  ;;  %v11487_v41 = vld [vmem:[%s15896_s1 + $0x1b8] sm:$0xff]  ;;  %v567_v40 = vor.u32 %v566_v26, %v563_v23  ;;  %v1378_v4 = vpack.c.b16 %v1360_v30, %v1359_v29 }
  0xac   : > { %3179 = vmatpush.bf16.msrb.mxu2 %v11487_v41  ;;  %v10195_v41 = vrot.slane %v1168_v52, 9  ;;  %2869 = vmatpush.bf16.msrb.mxu1 %v11459_v16  ;;  %v1309_v23 = vsel %vm11853_vm5, %v1307_v57, %v1308_v62  ;;  %v11483_v30 = vld [vmem:[%s15896_s1 + $0x198] sm:$0xff]  ;;  %v1284_v57 = vrot.slane %v12231_v63, 5  ;;  %v11481_v62 = vld [vmem:[%s15896_s1 + $0x188] sm:$0xff] }
  0xad   : > { %1113 = vmatmul.bf16.gmra.mxu1 %v11392_v38  ;;  %1493 = vmatmul.bf16.gmra.mxu2 %v1373_v39  ;;  %v577_v38 = vor.u32 %v576_v33, %v12200_v32  ;;  %v580_v39 = vshll.u32 %v12203_v31, 16  ;;  %v568_v58 = vrot.slane %v567_v40, 4  ;;  %v11440_v31 = vld [vmem:[%s15896_s1 + $0xc0] sm:$0xff] }
  0xae   : > { %v12173_v3 = vpop.f32.mrf.mxu3  ;;  %v1306_v28 = vsel %vm11853_vm5, %v10195_v41, %v1305_v53  ;;  %1766 = vmatpush.bf16.msrb.mxu3 %v11440_v31  ;;  %v1169_v41 = vld [vmem:[%s11769_s16 + $0xb4] sm:$0xe] }
  0xaf   : > { %v578_v55 = vrot.slane %v577_v38, 4  ;;  %v582_v60 = vrot.slane %v580_v39, 5  ;;  %v573_v13 = vsel %vm11841_vm4, %v568_v58, %v12200_v32  ;;  %v1361_v40 = vunpack.c.l.b16 %v1306_v28 }
  0xb0   : > { %v1454_v7 = vpop.f32.mrf.mxu2  ;;  %v843_v20 = vpop.f32.mrf.mxu0  ;;  %3180 = vmatpush.bf16.msrb.mxu2 %v11486_v35  ;;  %v740_v19 = vunpack.c.l.b16 %v573_v13  ;;  %2870 = vmatpush.bf16.msrb.mxu1 %v11458_v25  ;;  %v11457_v35 = vld [vmem:[%s15896_s1 + $0x148] sm:$0xff]  ;;  %v1353_v38 = vunpack.c.l.b16 %v1278_v18 }
  0xb1   : > { %v12184_v15 = vadd.f32 %v1454_v7, %v1075_v50  ;;  %v1374_v50 = vpack.c.b16 %v1352_v44, %v1351_v34  ;;  %v1279_v7 = vrot.slane %v1277_v54, 4  ;;  %v583_v17 = vsel %vm11841_vm4, %v578_v55, %v582_v60  ;;  %v11394_v55 = vld [vmem:[%s11769_s16 + $0x78] sm:$0xff]  ;;  %v10357_v13 = vld [vmem:[%s11769_s16 + $0xc] sm:$0xf] }
  0xb2   : > { %v1076_v24 = vpop.f32.mrf.mxu1  ;;  %v741_v33 = vunpack.c.l.b16 %v583_v17  ;;  %v587_v34 = vrot.slane %v585_v14, 4  ;;  %v11495_v14 = vld [vmem:[%s15896_s1 + $0x1f8] sm:$0xff]  ;;  %v1287_v17 = vrot.slane %v312_v43, 5 }
  0xb3   : > { %v1077_v21 = vadd.f32 %v1076_v24, %v843_v20  ;;  %v588_v20 = vshll.u32 %v275_v61, 16  ;;  %v594_v24 = vshll.u32 %v12231_v63, 16  ;;  %v1281_v29 = vsel %vm11853_vm5, %v1279_v7, %v1280_v10  ;;  %3860 = vmatpush.bf16.msra.mxu3 %v11495_v14 }
  0xb4   : > { %3181 = vmatpush.bf16.msrb.mxu2 %v11485_v5  ;;  %v1354_v39 = vunpack.c.l.b16 %v1281_v29  ;;  %2871 = vmatpush.bf16.msrb.mxu1 %v11457_v35  ;;  %v762_v53 = vpack.c.b16 %v741_v33, %v740_v19  ;;  %v604_v5 = vshll.u32 %v312_v43, 16  ;;  %v1312_v61 = vrot.slane %v11999_v37, 5 }
  0xb5   : > { %v590_v44 = vrot.slane %v588_v20, 5  ;;  %v1315_v63 = vrot.slane %v12017_v51, 5  ;;  %v10192_v20 = vrot.slane %v1165_v45, 9  ;;  %v1932_v19 = vshll.u32 %v10357_v13, 16 }
  0xb6   : > { %v12208_v2 = vpop.f32.mrf.mxu3  ;;  %v1375_v60 = vpack.c.b16 %v1354_v39, %v1353_v38  ;;  %v606_v10 = vrot.slane %v604_v5, 5  ;;  %v1314_v37 = vrot.slane %v1312_v61, 4 }
  0xb7   : > { %v1934_v43 = vrot.slane %v1932_v19, 5 }
  0xb8   : > { %v1456_v36 = vpop.f32.mrf.mxu2  ;;  %v846_v46 = vpop.f32.mrf.mxu0  ;;  %3182 = vmatpush.bf16.msrb.mxu2 %v11484_v0  ;;  %v10196_v0 = vrot.slane %v1169_v41, 9 }
  0xb9   : > { %v12215_v12 = vadd.f32 %v1456_v36, %v1077_v21  ;;  %v1362_v36 = vunpack.c.l.b16 %v1309_v23 }
  0xba   : > { %v1079_v42 = vpop.f32.mrf.mxu1  ;;  %v1313_v23 = vsel %vm11853_vm5, %v10196_v0, %v1312_v61  ;;  %v11395_v61 = vld [vmem:[%s11769_s16 + $0x84] sm:$0xff] }
  0xbb   : > { %v1080_v22 = vadd.f32 %v1079_v42, %v846_v46  ;;  %885 = vmatmul.bf16.gmra.mxu0 %v761_v59  ;;  %1518 = vmatmul.bf16.gmra.mxu3 %v1378_v4  ;;  %v12274_v59 = vrot.slane %v594_v24, 5  ;;  %v600_v4 = vrot.slane %v598_v1, 4  ;;  %v11482_v46 = vld [vmem:[%s15896_s1 + $0x190] sm:$0xff]  ;;  %v1379_v42 = vpack.c.b16 %v1362_v36, %v1361_v40  ;;  %v11480_v1 = vld [vmem:[%s15896_s1 + $0x180] sm:$0xff] }
  0xbc   : > { %3183 = vmatpush.bf16.msrb.mxu2 %v11483_v30  ;;  %v12302_v24 = vld [vmem:[%s11769_s16 + $0x10] sm:$0xf]  ;;  %v1316_v30 = vsel %vm11853_vm5, %v1314_v37, %v1315_v63  ;;  %v10360_v63 = vld [vmem:[%s11769_s16 + $0x18] sm:$0xf] }
  0xbd   : > { %1118 = vmatmul.bf16.gmra.mxu1 %v11393_v48  ;;  %1498 = vmatmul.bf16.gmra.mxu2 %v1374_v50  ;;  %v591_v50 = vor.u32 %v590_v44, %v587_v34  ;;  %v601_v54 = vor.u32 %v600_v4, %v12274_v59  ;;  %v1942_v33 = vshrl.u32 %v12302_v24, 16  ;;  %v1285_v44 = vsel %vm11853_vm5, %v10192_v20, %v1284_v57 }
  0xbe   : > { %v12243_v11 = vpop.f32.mrf.mxu3  ;;  %v1363_v4 = vunpack.c.l.b16 %v1313_v23  ;;  %v1364_v38 = vunpack.c.l.b16 %v1316_v30 }
  0xbf   : > { %v592_v49 = vrot.slane %v591_v50, 4  ;;  %v602_v7 = vrot.slane %v601_v54, 4 }
  0xc0   : > { %v1459_v8 = vpop.f32.mrf.mxu2  ;;  %v848_v21 = vpop.f32.mrf.mxu0  ;;  %3184 = vmatpush.bf16.msrb.mxu2 %v11482_v46  ;;  %v1355_v46 = vunpack.c.l.b16 %v1285_v44 }
  0xc1   : > { %v12255_v27 = vadd.f32 %v1459_v8, %v1080_v22  ;;  %v11456_v22 = vld [vmem:[%s15896_s1 + $0x140] sm:$0xff]  ;;  %v1286_v8 = vrot.slane %v1284_v57, 4  ;;  %v597_v51 = vsel %vm11841_vm4, %v592_v49, %v12274_v59  ;;  %v607_v28 = vsel %vm11841_vm4, %v602_v7, %v606_v10  ;;  %v11503_v59 = vld [vmem:[%s15896_s1 + $0x238] sm:$0xff]  ;;  %v10437_v7 = vld [vmem:[%s11769_s16 + $0xc] sm:$0xe] }
  0xc2   : > { %v1081_v26 = vpop.f32.mrf.mxu1  ;;  %2872 = vmatpush.bf16.msrb.mxu1 %v11456_v22  ;;  %v742_v40 = vunpack.c.l.b16 %v597_v51  ;;  %v743_v36 = vunpack.c.l.b16 %v607_v28  ;;  %4285 = vmatpush.bf16.msra.mxu0 %v11503_v59  ;;  %v2627_v49 = vrot.slane %v12302_v24, 5  ;;  %v1953_v51 = vshrl.u32 %v10360_v63, 16 }
  0xc3   : > { %v1082_v32 = vadd.f32 %v1081_v26, %v848_v21  ;;  %v1929_v26 = vshrl.u32 %v10357_v13, 16  ;;  %v1288_v31 = vsel %vm11853_vm5, %v1286_v8, %v1287_v17  ;;  %v10453_v13 = vrot.slane %v10437_v7, 9  ;;  %v12339_v8 = vld [vmem:[%s11769_s16 + $0x1c] sm:$0xf]  ;;  %v10363_v7 = vld [vmem:[%s11769_s16 + $0x24] sm:$0xf] }
  0xc4   : > { %3185 = vmatpush.bf16.msrb.mxu2 %v11481_v62  ;;  %v1356_v50 = vunpack.c.l.b16 %v1288_v31  ;;  %v763_v22 = vpack.c.b16 %v743_v36, %v742_v40  ;;  %v2629_v14 = vrot.slane %v2627_v49, 4  ;;  %v1962_v19 = vshll.u32 %v12339_v8, 16 }
  0xc5   : > { %v1931_v39 = vrot.slane %v1929_v26, 4 }
  0xc6   : > { %v12280_v48 = vpop.f32.mrf.mxu3 }
  0xc8   : > { %v1461_v52 = vpop.f32.mrf.mxu2  ;;  %v851_v6 = vpop.f32.mrf.mxu0  ;;  %3186 = vmatpush.bf16.msrb.mxu2 %v11480_v1 }
  0xc9   : > { %v12286_v58 = vadd.f32 %v1461_v52, %v1082_v32  ;;  %v1938_v32 = vshll.u32 %v12302_v24, 16 }
  0xca   : > { %v1084_v16 = vpop.f32.mrf.mxu1 }
  0xcb   : > { %v1085_v9 = vadd.f32 %v1084_v16, %v851_v6  ;;  %890 = vmatmul.bf16.gmra.mxu0 %v762_v53  ;;  %1523 = vmatmul.bf16.gmra.mxu3 %v1379_v42  ;;  %v1940_v52 = vrot.slane %v1938_v32, 5  ;;  %v1944_v53 = vrot.slane %v1942_v33, 4  ;;  %v10359_v42 = vld [vmem:[%s11769_s16 + $0x14] sm:$0x1]  ;;  %v1380_v6 = vpack.c.b16 %v1364_v38, %v1363_v4 }
  0xcc   : > { %v1376_v16 = vpack.c.b16 %v1356_v50, %v1355_v46  ;;  %v1948_v62 = vshll.u32 %v10359_v42, 16  ;;  %v2630_v20 = vrot.slane %v10359_v42, 5  ;;  %v2628_v32 = vsel %vm11853_vm5, %v10453_v13, %v2627_v49  ;;  %v11424_v50 = vld [vmem:[%s11769_s16 + $0xc] sm:$0xff]  ;;  %v12369_v13 = vld [vmem:[%s11769_s16 + $0x28] sm:$0xf] }
  0xcd   : > { %1123 = vmatmul.bf16.gmra.mxu1 %v11394_v55  ;;  %1503 = vmatmul.bf16.gmra.mxu2 %v1375_v60  ;;  %v1935_v55 = vor.u32 %v1934_v43, %v1931_v39  ;;  %v1945_v57 = vor.u32 %v1944_v53, %v1940_v52  ;;  %v2753_v36 = vunpack.c.l.b16 %v2628_v32  ;;  %v1964_v4 = vrot.slane %v1962_v19, 5  ;;  %v10362_v39 = vld [vmem:[%s11769_s16 + $0x20] sm:$0x1] }
  0xce   : > { %v12307_v25 = vpop.f32.mrf.mxu3  ;;  %v1950_v37 = vrot.slane %v1948_v62, 5  ;;  %v2631_v33 = vsel %vm11853_vm5, %v2629_v14, %v2630_v20  ;;  %v10438_v62 = vld [vmem:[%s11769_s16 + $0x18] sm:$0xe]  ;;  %v1986_v19 = vshll.u32 %v12369_v13, 16 }
  0xcf   : > { %v1936_v10 = vrot.slane %v1935_v55, 4  ;;  %v1946_v0 = vrot.slane %v1945_v57, 4  ;;  %v2754_v59 = vunpack.c.l.b16 %v2631_v33 }
  0xd0   : > { %v1464_v21 = vpop.f32.mrf.mxu2  ;;  %v853_v29 = vpop.f32.mrf.mxu0 }
  0xd1   : > { %v12316_v18 = vadd.f32 %v1464_v21, %v1085_v9  ;;  %v1941_v24 = vsel %vm11841_vm4, %v1936_v10, %v1940_v52  ;;  %v1956_v21 = vshll.u32 %v10360_v63, 16  ;;  %v1951_v26 = vsel %vm11841_vm4, %v1946_v0, %v1950_v37  ;;  %v11494_v10 = vld [vmem:[%s15896_s1 + $0x1f0] sm:$0xff] }
  0xd2   : > { %v1086_v34 = vpop.f32.mrf.mxu1  ;;  %v2328_v44 = vunpack.c.l.b16 %v1941_v24  ;;  %v2329_v31 = vunpack.c.l.b16 %v1951_v26  ;;  %v10454_v0 = vrot.slane %v10438_v62, 9  ;;  %v2637_v63 = vrot.slane %v10362_v39, 5  ;;  %3861 = vmatpush.bf16.msra.mxu3 %v11494_v10 }
  0xd3   : > { %v1087_v35 = vadd.f32 %v1086_v34, %v853_v29  ;;  %v1966_v29 = vshrl.u32 %v12339_v8, 16  ;;  %v1958_v40 = vrot.slane %v1956_v21, 5  ;;  %v1977_v24 = vshrl.u32 %v10363_v7, 16 }
  0xd4   : > { %v2360_v52 = vpack.c.b16 %v2329_v31, %v2328_v44 }
  0xd5   : > { %v1968_v38 = vrot.slane %v1966_v29, 4  ;;  %v1990_v29 = vshrl.u32 %v12369_v13, 16 }
  0xd6   : > { %v12330_v54 = vpop.f32.mrf.mxu3 }
  0xd7   : > { %v1969_v55 = vor.u32 %v1968_v38, %v1964_v4  ;;  %v1992_v38 = vrot.slane %v1990_v29, 4 }
  0xd8   : > { %v1466_v5 = vpop.f32.mrf.mxu2  ;;  %v856_v41 = vpop.f32.mrf.mxu0 }
  0xd9   : > { %v12332_v60 = vadd.f32 %v1466_v5, %v1087_v35  ;;  %v1955_v35 = vrot.slane %v1953_v51, 4  ;;  %v1970_v49 = vrot.slane %v1969_v55, 4  ;;  %v1980_v51 = vshll.u32 %v10363_v7, 16 }
  0xda   : > { %v1089_v9 = vpop.f32.mrf.mxu1 }
  0xdb   : > { %v1090_v45 = vadd.f32 %v1089_v9, %v856_v41  ;;  %895 = vmatmul.bf16.gmra.mxu0 %v763_v22  ;;  %1528 = vmatmul.bf16.gmra.mxu3 %v1380_v6  ;;  %v1959_v53 = vor.u32 %v1958_v40, %v1955_v35  ;;  %v2785_v22 = vpack.c.b16 %v2754_v59, %v2753_v36  ;;  %v11464_v6 = vld [vmem:[%s11769_s16 + $0x18] sm:$0xff]  ;;  %v1972_v41 = vshll.u32 %v10362_v39, 16  ;;  %v10365_v39 = vld [vmem:[%s11769_s16 + $0x2c] sm:$0x1] }
  0xdc   : > { %v1979_v35 = vrot.slane %v1977_v24, 4  ;;  %v1982_v40 = vrot.slane %v1980_v51, 5 }
  0xdd   : > { %1128 = vmatmul.bf16.gmra.mxu1 %v11395_v61  ;;  %1508 = vmatmul.bf16.gmra.mxu2 %v1376_v16  ;;  %v2634_v16 = vrot.slane %v12339_v8, 5  ;;  %v1960_v9 = vrot.slane %v1959_v53, 4  ;;  %v11425_v53 = vld [vmem:[%s11769_s16 + $0x18] sm:$0xff] }
  0xde   : > { %v12341_v17 = vpop.f32.mrf.mxu3 }
  0xdf   : > { %v2636_v37 = vrot.slane %v2634_v16, 4 }
  0xe0   : > { %v1469_v1 = vpop.f32.mrf.mxu2  ;;  %v858_v23 = vpop.f32.mrf.mxu0 }
  0xe1   : > { %v12345_v28 = vadd.f32 %v1469_v1, %v1090_v45  ;;  %v1974_v45 = vrot.slane %v1972_v41, 5  ;;  %v1965_v1 = vsel %vm11841_vm4, %v1960_v9, %v1964_v4  ;;  %v2638_v32 = vsel %vm11853_vm5, %v2636_v37, %v2637_v63 }
  0xe2   : > { %v1091_v30 = vpop.f32.mrf.mxu1  ;;  %v2330_v44 = vunpack.c.l.b16 %v1965_v1  ;;  %v2756_v59 = vunpack.c.l.b16 %v2638_v32  ;;  %v1988_v4 = vrot.slane %v1986_v19, 5  ;;  %v2641_v9 = vrot.slane %v12369_v13, 5 }
  0xe3   : > { %v1092_v34 = vadd.f32 %v1091_v30, %v858_v23  ;;  %v1975_v26 = vsel %vm11841_vm4, %v1970_v49, %v1974_v45  ;;  %v10439_v45 = vld [vmem:[%s11769_s16 + $0x24] sm:$0xe] }
  0xe4   : > { %v2331_v31 = vunpack.c.l.b16 %v1975_v26  ;;  %v10455_v37 = vrot.slane %v10439_v45, 9  ;;  %v2643_v63 = vrot.slane %v2641_v9, 4 }
  0xe6   : > { %v12356_v43 = vpop.f32.mrf.mxu3 }
  0xe8   : > { %v1471_v46 = vpop.f32.mrf.mxu2  ;;  %v861_v5 = vpop.f32.mrf.mxu0 }
  0xe9   : > { %v12359_v42 = vadd.f32 %v1471_v46, %v1092_v34  ;;  %v11502_v34 = vld [vmem:[%s15896_s1 + $0x230] sm:$0xff] }
  0xea   : > { %v1094_v61 = vpop.f32.mrf.mxu1  ;;  %4286 = vmatpush.bf16.msra.mxu0 %v11502_v34 }
  0xeb   : > { %v1095_v57 = vadd.f32 %v1094_v61, %v861_v5  ;;  %1767 = vmatmul.bf16.vlgmr.msrb.gmra.mxu3 %v11424_v50  ;;  %2448 = vmatmul.bf16.vlgmr.msrb.gmra.mxu0 %v2360_v52  ;;  %v2361_v5 = vpack.c.b16 %v2331_v31, %v2330_v44  ;;  %v11465_v61 = vld [vmem:[%s11769_s16 + $0x24] sm:$0xff] }
  0xed   : > { %2873 = vmatmul.bf16.vlgmr.msrb.gmra.mxu1 %v2785_v22  ;;  %3187 = vmatmul.bf16.vlgmr.msrb.gmra.mxu2 %v11464_v6  ;;  %v1983_v22 = vor.u32 %v1982_v40, %v1979_v35 }
  0xee   : > { %v1134_v14 = vpop.f32.mrf.mxu3 }
  0xef   : > { %v12372_v20 = vadd.f32 %v1134_v14, %v12173_v3  ;;  %v2635_v3 = vsel %vm11853_vm5, %v10454_v0, %v2634_v16  ;;  %v1993_v16 = vor.u32 %v1992_v38, %v1988_v4  ;;  %v10366_v0 = vld [vmem:[%s11769_s16 + $0x30] sm:$0xf]  ;;  %v2644_v14 = vrot.slane %v10365_v39, 5 }
  0xf0   : > { %v1474_v8 = vpop.f32.mrf.mxu2  ;;  %v863_v23 = vpop.f32.mrf.mxu0  ;;  %v2755_v36 = vunpack.c.l.b16 %v2635_v3  ;;  %v2004_v26 = vshll.u32 %v10366_v0, 16 }
  0xf1   : > { %v12376_v21 = vadd.f32 %v1474_v8, %v1095_v57  ;;  %v1996_v57 = vshll.u32 %v10365_v39, 16  ;;  %v1994_v7 = vrot.slane %v1993_v16, 4  ;;  %v12401_v8 = vld [vmem:[%s11769_s16 + $0x34] sm:$0xf]  ;;  %v2645_v34 = vsel %vm11853_vm5, %v2643_v63, %v2644_v14  ;;  %v10369_v63 = vld [vmem:[%s11769_s16 + $0x3c] sm:$0xf] }
  0xf2   : > { %v1096_v30 = vpop.f32.mrf.mxu1  ;;  %v2786_v41 = vpack.c.b16 %v2756_v59, %v2755_v36  ;;  %v2010_v3 = vshll.u32 %v12401_v8, 16  ;;  %v2014_v32 = vshrl.u32 %v12401_v8, 16  ;;  %v2006_v36 = vrot.slane %v2004_v26, 5  ;;  %v11493_v14 = vld [vmem:[%s15896_s1 + $0x1e8] sm:$0xff] }
  0xf3   : > { %v1097_v33 = vadd.f32 %v1096_v30, %v863_v23  ;;  %v1998_v10 = vrot.slane %v1996_v57, 5  ;;  %v2001_v23 = vshrl.u32 %v10366_v0, 16  ;;  %3862 = vmatpush.bf16.msra.mxu3 %v11493_v14 }
  0xf4   : > { %v2012_v38 = vrot.slane %v2010_v3, 5  ;;  %v2016_v39 = vrot.slane %v2014_v32, 4  ;;  %v2025_v3 = vshrl.u32 %v10369_v63, 16  ;;  %v2028_v32 = vshll.u32 %v10369_v63, 16 }
  0xf5   : > { %v1999_v30 = vsel %vm11841_vm4, %v1994_v7, %v1998_v10  ;;  %v2003_v40 = vrot.slane %v2001_v23, 4  ;;  %v10440_v10 = vld [vmem:[%s11769_s16 + $0x30] sm:$0xe]  ;;  %v12433_v23 = vld [vmem:[%s11769_s16 + $0x40] sm:$0xf] }
  0xf6   : > { %v1136_v46 = vpop.f32.mrf.mxu3  ;;  %v2333_v35 = vunpack.c.l.b16 %v1999_v30  ;;  %v2655_v14 = vrot.slane %v12433_v23, 5 }
  0xf7   : > { %v12391_v50 = vadd.f32 %v1136_v46, %v12208_v2  ;;  %v1984_v2 = vrot.slane %v1983_v22, 4  ;;  %v10368_v46 = vld [vmem:[%s11769_s16 + $0x38] sm:$0x1]  ;;  %v11426_v22 = vld [vmem:[%s11769_s16 + $0x24] sm:$0xff] }
  0xf8   : > { %v1476_v52 = vpop.f32.mrf.mxu2  ;;  %v866_v55 = vpop.f32.mrf.mxu0 }
  0xf9   : > { %v12394_v6 = vadd.f32 %v1476_v52, %v1097_v33  ;;  %v1989_v51 = vsel %vm11841_vm4, %v1984_v2, %v1988_v4  ;;  %v2758_v4 = vunpack.c.l.b16 %v2645_v34  ;;  %v2648_v2 = vrot.slane %v12401_v8, 5 }
  0xfa   : > { %v1099_v62 = vpop.f32.mrf.mxu1  ;;  %v2332_v31 = vunpack.c.l.b16 %v1989_v51  ;;  %v2651_v51 = vrot.slane %v10368_v46, 5 }
  0xfb   : > { %v1100_v49 = vadd.f32 %v1099_v62, %v866_v55  ;;  %1772 = vmatmul.bf16.gmra.mxu3 %v11425_v53  ;;  %2453 = vmatmul.bf16.gmra.mxu0 %v2361_v5  ;;  %v11466_v62 = vld [vmem:[%s11769_s16 + $0x30] sm:$0xff] }
  0xfc   : > { %v2362_v55 = vpack.c.b16 %v2333_v35, %v2332_v31  ;;  %v2038_v31 = vshrl.u32 %v12433_v23, 16 }
  0xfd   : > { %2878 = vmatmul.bf16.gmra.mxu1 %v2786_v41  ;;  %3192 = vmatmul.bf16.gmra.mxu2 %v11465_v61  ;;  %v2007_v41 = vor.u32 %v2006_v36, %v2003_v40 }
  0xfe   : > { %v1139_v1 = vpop.f32.mrf.mxu3 }
  0xff   : > { %v12404_v24 = vadd.f32 %v1139_v1, %v12243_v11  ;;  %v2642_v11 = vsel %vm11853_vm5, %v10455_v37, %v2641_v9  ;;  %v2017_v9 = vor.u32 %v2016_v39, %v2012_v38  ;;  %v10456_v1 = vrot.slane %v10440_v10, 9 }
 0x100   : > { %v1479_v13 = vpop.f32.mrf.mxu2  ;;  %v868_v29 = vpop.f32.mrf.mxu0  ;;  %v2757_v59 = vunpack.c.l.b16 %v2642_v11  ;;  %v2027_v39 = vrot.slane %v2025_v3, 4  ;;  %v2657_v3 = vrot.slane %v2655_v14, 4 }
 0x101   : > { %v12408_v19 = vadd.f32 %v1479_v13, %v1100_v49  ;;  %v2020_v49 = vshll.u32 %v10368_v46, 16  ;;  %v2018_v0 = vrot.slane %v2017_v9, 4  ;;  %v2650_v13 = vrot.slane %v2648_v2, 4  ;;  %v11427_v9 = vld [vmem:[%s11769_s16 + $0x30] sm:$0xff] }
 0x102   : > { %v1101_v33 = vpop.f32.mrf.mxu1  ;;  %v2787_v57 = vpack.c.b16 %v2758_v4, %v2757_v59  ;;  %v11501_v59 = vld [vmem:[%s15896_s1 + $0x228] sm:$0xff]  ;;  %v2030_v46 = vrot.slane %v2028_v32, 5 }
 0x103   : > { %v1102_v44 = vadd.f32 %v1101_v33, %v868_v29  ;;  %v2022_v37 = vrot.slane %v2020_v49, 5  ;;  %v2652_v40 = vsel %vm11853_vm5, %v2650_v13, %v2651_v51  ;;  %4287 = vmatpush.bf16.msra.mxu0 %v11501_v59  ;;  %v10441_v13 = vld [vmem:[%s11769_s16 + $0x3c] sm:$0xe] }
 0x105   : > { %v2023_v34 = vsel %vm11841_vm4, %v2018_v0, %v2022_v37 }
 0x106   : > { %v1141_v52 = vpop.f32.mrf.mxu3 }
 0x107   : > { %v12420_v53 = vadd.f32 %v1141_v52, %v12280_v48  ;;  %v2008_v48 = vrot.slane %v2007_v41, 4  ;;  %v10371_v41 = vld [vmem:[%s11769_s16 + $0x44] sm:$0x1] }
 0x108   : > { %v1481_v5 = vpop.f32.mrf.mxu2  ;;  %v871_v16 = vpop.f32.mrf.mxu0  ;;  %v2044_v37 = vshll.u32 %v10371_v41, 16  ;;  %v2658_v32 = vrot.slane %v10371_v41, 5 }
 0x109   : > { %v12423_v61 = vadd.f32 %v1481_v5, %v1102_v44  ;;  %v2013_v30 = vsel %vm11841_vm4, %v2008_v48, %v2012_v38  ;;  %v2034_v44 = vshll.u32 %v12433_v23, 16  ;;  %v2335_v38 = vunpack.c.l.b16 %v2023_v34  ;;  %v11467_v48 = vld [vmem:[%s11769_s16 + $0x3c] sm:$0xff] }
 0x10a   : > { %v1104_v45 = vpop.f32.mrf.mxu1  ;;  %v2334_v4 = vunpack.c.l.b16 %v2013_v30  ;;  %v2760_v5 = vunpack.c.l.b16 %v2652_v40  ;;  %v10457_v30 = vrot.slane %v10441_v13, 9 }
 0x10b   : > { %v1105_v7 = vadd.f32 %v1104_v45, %v871_v16  ;;  %1777 = vmatmul.bf16.gmra.mxu3 %v11426_v22  ;;  %2458 = vmatmul.bf16.gmra.mxu0 %v2362_v55  ;;  %v2036_v22 = vrot.slane %v2034_v44, 5  ;;  %v2040_v55 = vrot.slane %v2038_v31, 4  ;;  %v2031_v45 = vor.u32 %v2030_v46, %v2027_v39 }
 0x10c   : > { %v2363_v49 = vpack.c.b16 %v2335_v38, %v2334_v4  ;;  %v2659_v46 = vsel %vm11853_vm5, %v2657_v3, %v2658_v32  ;;  %v10442_v32 = vld [vmem:[%s11769_s16 + $0x48] sm:$0xe] }
 0x10d   : > { %2883 = vmatmul.bf16.gmra.mxu1 %v2787_v57  ;;  %3197 = vmatmul.bf16.gmra.mxu2 %v11466_v62  ;;  %v2041_v0 = vor.u32 %v2040_v55, %v2036_v22 }
 0x10e   : > { %v1144_v8 = vpop.f32.mrf.mxu3 }
 0x10f   : > { %v12436_v26 = vadd.f32 %v1144_v8, %v12307_v25  ;;  %v2649_v25 = vsel %vm11853_vm5, %v10456_v1, %v2648_v2  ;;  %v2042_v51 = vrot.slane %v2041_v0, 4  ;;  %v2046_v8 = vrot.slane %v2044_v37, 5  ;;  %v11428_v0 = vld [vmem:[%s11769_s16 + $0x3c] sm:$0xff] }
 0x110   : > { %v1484_v29 = vpop.f32.mrf.mxu2  ;;  %v873_v11 = vpop.f32.mrf.mxu0  ;;  %v2759_v52 = vunpack.c.l.b16 %v2649_v25 }
 0x111   : > { %v12440_v33 = vadd.f32 %v1484_v29, %v1105_v7  ;;  %v10372_v29 = vld [vmem:[%s11769_s16 + $0x48] sm:$0xf]  ;;  %v2047_v59 = vsel %vm11841_vm4, %v2042_v51, %v2046_v8 }
 0x112   : > { %v1106_v35 = vpop.f32.mrf.mxu1  ;;  %v2788_v10 = vpack.c.b16 %v2760_v5, %v2759_v52  ;;  %v2052_v25 = vshll.u32 %v10372_v29, 16 }
 0x113   : > { %v1107_v36 = vadd.f32 %v1106_v35, %v873_v11  ;;  %v12465_v11 = vld [vmem:[%s11769_s16 + $0x4c] sm:$0xf]  ;;  %v2049_v35 = vshrl.u32 %v10372_v29, 16 }
 0x114   : > { %v2058_v4 = vshll.u32 %v12465_v11, 16  ;;  %v2062_v38 = vshrl.u32 %v12465_v11, 16  ;;  %v2054_v41 = vrot.slane %v2052_v25, 5  ;;  %v10458_v25 = vrot.slane %v10442_v32, 9 }
 0x115   : > { %v2051_v55 = vrot.slane %v2049_v35, 4  ;;  %v11492_v35 = vld [vmem:[%s15896_s1 + $0x1e0] sm:$0xff] }
 0x116   : > { %v1146_v16 = vpop.f32.mrf.mxu3  ;;  %3863 = vmatpush.bf16.msra.mxu3 %v11492_v35  ;;  %v11469_v35 = vld [vmem:[%s11769_s16 + $0x54] sm:$0xff] }
 0x117   : > { %v12455_v57 = vadd.f32 %v1146_v16, %v12330_v54  ;;  %v2032_v54 = vrot.slane %v2031_v45, 4  ;;  %v10374_v45 = vld [vmem:[%s11769_s16 + $0x50] sm:$0x1] }
 0x118   : > { %v1486_v62 = vpop.f32.mrf.mxu2  ;;  %v876_v7 = vpop.f32.mrf.mxu0  ;;  %v2068_v8 = vshll.u32 %v10374_v45, 16 }
 0x119   : > { %v12458_v2 = vadd.f32 %v1486_v62, %v1107_v36  ;;  %v2037_v31 = vsel %vm11841_vm4, %v2032_v54, %v2036_v22  ;;  %v2337_v22 = vunpack.c.l.b16 %v2047_v59  ;;  %v2762_v62 = vunpack.c.l.b16 %v2659_v46  ;;  %v11468_v54 = vld [vmem:[%s11769_s16 + $0x48] sm:$0xff] }
 0x11a   : > { %v1109_v63 = vpop.f32.mrf.mxu1  ;;  %v2336_v5 = vunpack.c.l.b16 %v2037_v31  ;;  %v10375_v31 = vld [vmem:[%s11769_s16 + $0x54] sm:$0xf]  ;;  %v2665_v59 = vrot.slane %v10374_v45, 5  ;;  %v11500_v45 = vld [vmem:[%s15896_s1 + $0x220] sm:$0xff] }
 0x11b   : > { %v1110_v1 = vadd.f32 %v1109_v63, %v876_v7  ;;  %1782 = vmatmul.bf16.gmra.mxu3 %v11427_v9  ;;  %2463 = vmatmul.bf16.gmra.mxu0 %v2363_v49  ;;  %v2060_v9 = vrot.slane %v2058_v4, 5  ;;  %v2064_v49 = vrot.slane %v2062_v38, 4  ;;  %v2055_v63 = vor.u32 %v2054_v41, %v2051_v55  ;;  %v12497_v4 = vld [vmem:[%s11769_s16 + $0x58] sm:$0xf] }
 0x11c   : > { %v2364_v37 = vpack.c.b16 %v2337_v22, %v2336_v5  ;;  %v2073_v46 = vshrl.u32 %v10375_v31, 16  ;;  %v2082_v41 = vshll.u32 %v12497_v4, 16  ;;  %4288 = vmatpush.bf16.msra.mxu0 %v11500_v45 }
 0x11d   : > { %2888 = vmatmul.bf16.gmra.mxu1 %v2788_v10  ;;  %3202 = vmatmul.bf16.gmra.mxu2 %v11467_v48  ;;  %v2065_v51 = vor.u32 %v2064_v49, %v2060_v9 }
 0x11e   : > { %v1149_v34 = vpop.f32.mrf.mxu3 }
 0x11f   : > { %v12468_v44 = vadd.f32 %v1149_v34, %v12341_v17  ;;  %v2656_v17 = vsel %vm11853_vm5, %v10457_v30, %v2655_v14  ;;  %v2662_v30 = vrot.slane %v12465_v11, 5  ;;  %v2066_v34 = vrot.slane %v2065_v51, 4  ;;  %v10377_v51 = vld [vmem:[%s11769_s16 + $0x5c] sm:$0x1] }
 0x120   : > { %v1489_v23 = vpop.f32.mrf.mxu2  ;;  %v878_v36 = vpop.f32.mrf.mxu0  ;;  %v2761_v16 = vunpack.c.l.b16 %v2656_v17 }
 0x121   : > { %v12472_v40 = vadd.f32 %v1489_v23, %v1110_v1  ;;  %v2070_v23 = vrot.slane %v2068_v8, 5 }
 0x122   : > { %v1111_v39 = vpop.f32.mrf.mxu1  ;;  %v2789_v13 = vpack.c.b16 %v2762_v62, %v2761_v16  ;;  %v2086_v16 = vshrl.u32 %v12497_v4, 16 }
 0x123   : > { %v1112_v52 = vadd.f32 %v1111_v39, %v878_v36  ;;  %v2664_v36 = vrot.slane %v2662_v30, 4  ;;  %v2071_v55 = vsel %vm11841_vm4, %v2066_v34, %v2070_v23 }
 0x126   : > { %v1151_v7 = vpop.f32.mrf.mxu3 }
 0x127   : > { %v12484_v10 = vadd.f32 %v1151_v7, %v12356_v43  ;;  %v2056_v43 = vrot.slane %v2055_v63, 4 }
 0x128   : > { %v1491_v48 = vpop.f32.mrf.mxu2  ;;  %v881_v1 = vpop.f32.mrf.mxu0 }
 0x129   : > { %v12487_v14 = vadd.f32 %v1491_v48, %v1112_v52  ;;  %v2061_v17 = vsel %vm11841_vm4, %v2056_v43, %v2060_v9  ;;  %v2076_v52 = vshll.u32 %v10375_v31, 16  ;;  %v2666_v9 = vsel %vm11853_vm5, %v2664_v36, %v2665_v59 }
 0x12a   : > { %v1114_v29 = vpop.f32.mrf.mxu1  ;;  %v2338_v7 = vunpack.c.l.b16 %v2061_v17  ;;  %v2339_v48 = vunpack.c.l.b16 %v2071_v55  ;;  %v2092_v36 = vshll.u32 %v10377_v51, 16  ;;  %v10443_v17 = vld [vmem:[%s11769_s16 + $0x54] sm:$0xe] }
 0x12b   : > { %v1115_v3 = vadd.f32 %v1114_v29, %v881_v1  ;;  %1787 = vmatmul.bf16.gmra.mxu3 %v11428_v0  ;;  %2468 = vmatmul.bf16.gmra.mxu0 %v2364_v37  ;;  %v2075_v0 = vrot.slane %v2073_v46, 4  ;;  %v2078_v37 = vrot.slane %v2076_v52, 5  ;;  %v2764_v1 = vunpack.c.l.b16 %v2666_v9 }
 0x12c   : > { %v2365_v32 = vpack.c.b16 %v2339_v48, %v2338_v7  ;;  %v2094_v52 = vrot.slane %v2092_v36, 5  ;;  %v10459_v55 = vrot.slane %v10443_v17, 9 }
 0x12d   : > { %2893 = vmatmul.bf16.gmra.mxu1 %v2789_v13  ;;  %3207 = vmatmul.bf16.gmra.mxu2 %v11468_v54  ;;  %v2084_v13 = vrot.slane %v2082_v41, 5  ;;  %v2088_v54 = vrot.slane %v2086_v16, 4  ;;  %v2079_v43 = vor.u32 %v2078_v37, %v2075_v0  ;;  %v2672_v16 = vrot.slane %v10377_v51, 5 }
 0x12e   : > { %v1514_v11 = vpop.f32.mrf.mxu3 }
 0x12f   : > { %v12500_v39 = vadd.f32 %v1514_v11, %v12372_v20  ;;  %v2663_v20 = vsel %vm11853_vm5, %v10458_v25, %v2662_v30  ;;  %v2089_v25 = vor.u32 %v2088_v54, %v2084_v13  ;;  %v2669_v11 = vrot.slane %v12497_v4, 5 }
 0x130   : > { %v1494_v38 = vpop.f32.mrf.mxu2  ;;  %v883_v22 = vpop.f32.mrf.mxu0  ;;  %v2763_v63 = vunpack.c.l.b16 %v2663_v20 }
 0x131   : > { %v12504_v5 = vadd.f32 %v1494_v38, %v1115_v3  ;;  %v11429_v3 = vld [vmem:[%s11769_s16 + $0x48] sm:$0xff]  ;;  %v2090_v46 = vrot.slane %v2089_v25, 4  ;;  %v2671_v41 = vrot.slane %v2669_v11, 4 }
 0x132   : > { %v1116_v62 = vpop.f32.mrf.mxu1  ;;  %v2790_v31 = vpack.c.b16 %v2764_v1, %v2763_v63  ;;  %v10380_v25 = vld [vmem:[%s11769_s16 + $0x68] sm:$0x1] }
 0x133   : > { %v1117_v49 = vadd.f32 %v1116_v62, %v883_v22  ;;  %v10378_v22 = vld [vmem:[%s11769_s16 + $0x60] sm:$0xf]  ;;  %v12529_v62 = vld [vmem:[%s11769_s16 + $0x64] sm:$0xf]  ;;  %v2095_v37 = vsel %vm11841_vm4, %v2090_v46, %v2094_v52 }
 0x134   : > { %v2097_v45 = vshrl.u32 %v10378_v22, 16  ;;  %v2100_v7 = vshll.u32 %v10378_v22, 16  ;;  %v2106_v63 = vshll.u32 %v12529_v62, 16  ;;  %v2110_v1 = vshrl.u32 %v12529_v62, 16 }
 0x136   : > { %v1516_v8 = vpop.f32.mrf.mxu3 }
 0x137   : > { %v12519_v30 = vadd.f32 %v1516_v8, %v12391_v50  ;;  %v2080_v50 = vrot.slane %v2079_v43, 4 }
 0x138   : > { %v1496_v29 = vpop.f32.mrf.mxu2  ;;  %v886_v23 = vpop.f32.mrf.mxu0 }
 0x139   : > { %v12522_v34 = vadd.f32 %v1496_v29, %v1117_v49  ;;  %v2085_v4 = vsel %vm11841_vm4, %v2080_v50, %v2084_v13  ;;  %v2673_v13 = vsel %vm11853_vm5, %v2671_v41, %v2672_v16  ;;  %v2341_v29 = vunpack.c.l.b16 %v2095_v37  ;;  %v10381_v37 = vld [vmem:[%s11769_s16 + $0x6c] sm:$0xf] }
 0x13a   : > { %v1119_v59 = vpop.f32.mrf.mxu1  ;;  %v2340_v8 = vunpack.c.l.b16 %v2085_v4  ;;  %v2116_v16 = vshll.u32 %v10380_v25, 16 }
 0x13b   : > { %v1120_v38 = vadd.f32 %v1119_v59, %v886_v23  ;;  %1792 = vmatmul.bf16.gmra.mxu3 %v11429_v3  ;;  %2473 = vmatmul.bf16.gmra.mxu0 %v2365_v32  ;;  %v2099_v3 = vrot.slane %v2097_v45, 4  ;;  %v2102_v32 = vrot.slane %v2100_v7, 5  ;;  %v2766_v23 = vunpack.c.l.b16 %v2673_v13  ;;  %v10444_v45 = vld [vmem:[%s11769_s16 + $0x60] sm:$0xe]  ;;  %v12561_v13 = vld [vmem:[%s11769_s16 + $0x70] sm:$0xf] }
 0x13c   : > { %v2366_v17 = vpack.c.b16 %v2341_v29, %v2340_v8 }
 0x13d   : > { %2898 = vmatmul.bf16.gmra.mxu1 %v2790_v31  ;;  %3212 = vmatmul.bf16.gmra.mxu2 %v11469_v35  ;;  %v2108_v31 = vrot.slane %v2106_v63, 5  ;;  %v2112_v35 = vrot.slane %v2110_v1, 4  ;;  %v2103_v50 = vor.u32 %v2102_v32, %v2099_v3  ;;  %v11491_v63 = vld [vmem:[%s15896_s1 + $0x1d8] sm:$0xff]  ;;  %v10460_v1 = vrot.slane %v10444_v45, 9 }
 0x13e   : > { %v1519_v20 = vpop.f32.mrf.mxu3  ;;  %3864 = vmatpush.bf16.msra.mxu3 %v11491_v63  ;;  %v2121_v3 = vshrl.u32 %v10381_v37, 16  ;;  %v2124_v32 = vshll.u32 %v10381_v37, 16 }
 0x13f   : > { %v12532_v49 = vadd.f32 %v1519_v20, %v12404_v24  ;;  %v2670_v24 = vsel %vm11853_vm5, %v10459_v55, %v2669_v11  ;;  %v11430_v11 = vld [vmem:[%s11769_s16 + $0x54] sm:$0xff]  ;;  %v11470_v55 = vld [vmem:[%s11769_s16 + $0x60] sm:$0xff]  ;;  %v2113_v41 = vor.u32 %v2112_v35, %v2108_v31 }
 0x140   : > { %v1499_v9 = vpop.f32.mrf.mxu2  ;;  %v888_v0 = vpop.f32.mrf.mxu0  ;;  %v2765_v43 = vunpack.c.l.b16 %v2670_v24  ;;  %v2679_v24 = vrot.slane %v10380_v25, 5  ;;  %v2130_v25 = vshll.u32 %v12561_v13, 16 }
 0x141   : > { %v12536_v48 = vadd.f32 %v1499_v9, %v1120_v38  ;;  %v2676_v9 = vrot.slane %v12529_v62, 5  ;;  %v2114_v7 = vrot.slane %v2113_v41, 4 }
 0x142   : > { %v1121_v54 = vpop.f32.mrf.mxu1  ;;  %v2791_v22 = vpack.c.b16 %v2766_v23, %v2765_v43 }
 0x143   : > { %v1122_v51 = vadd.f32 %v1121_v54, %v888_v0  ;;  %v2118_v0 = vrot.slane %v2116_v16, 5  ;;  %v2678_v54 = vrot.slane %v2676_v9, 4 }
 0x145   : > { %v2119_v35 = vsel %vm11841_vm4, %v2114_v7, %v2118_v0  ;;  %v11431_v0 = vld [vmem:[%s11769_s16 + $0x60] sm:$0xff] }
 0x146   : > { %v1521_v36 = vpop.f32.mrf.mxu3 }
 0x147   : > { %v12548_v38 = vadd.f32 %v1521_v36, %v12420_v53  ;;  %v2104_v53 = vrot.slane %v2103_v50, 4  ;;  %v2134_v36 = vshrl.u32 %v12561_v13, 16 }
 0x148   : > { %v1501_v59 = vpop.f32.mrf.mxu2  ;;  %v891_v52 = vpop.f32.mrf.mxu0 }
 0x149   : > { %v12551_v46 = vadd.f32 %v1501_v59, %v1122_v51  ;;  %v2109_v29 = vsel %vm11841_vm4, %v2104_v53, %v2108_v31  ;;  %v2680_v31 = vsel %vm11853_vm5, %v2678_v54, %v2679_v24 }
 0x14a   : > { %v1124_v20 = vpop.f32.mrf.mxu1  ;;  %v2342_v50 = vunpack.c.l.b16 %v2109_v29  ;;  %v2768_v16 = vunpack.c.l.b16 %v2680_v31 }
 0x14b   : > { %v1125_v4 = vadd.f32 %v1124_v20, %v891_v52  ;;  %1797 = vmatmul.bf16.gmra.mxu3 %v11430_v11  ;;  %2478 = vmatmul.bf16.gmra.mxu0 %v2366_v17  ;;  %v11499_v11 = vld [vmem:[%s15896_s1 + $0x218] sm:$0xff]  ;;  %v2343_v52 = vunpack.c.l.b16 %v2119_v35  ;;  %v2132_v20 = vrot.slane %v2130_v25, 5  ;;  %v10445_v35 = vld [vmem:[%s11769_s16 + $0x6c] sm:$0xe] }
 0x14c   : > { %4289 = vmatpush.bf16.msra.mxu0 %v11499_v11 }
 0x14d   : > { %2903 = vmatmul.bf16.gmra.mxu1 %v2791_v22  ;;  %3217 = vmatmul.bf16.gmra.mxu2 %v11470_v55  ;;  %v2123_v22 = vrot.slane %v2121_v3, 4  ;;  %v2126_v55 = vrot.slane %v2124_v32, 5  ;;  %v2367_v37 = vpack.c.b16 %v2343_v52, %v2342_v50  ;;  %v2683_v32 = vrot.slane %v12561_v13, 5 }
 0x14e   : > { %v1524_v62 = vpop.f32.mrf.mxu3 }
 0x14f   : > { %v12564_v8 = vadd.f32 %v1524_v62, %v12436_v26  ;;  %v2677_v26 = vsel %vm11853_vm5, %v10460_v1, %v2676_v9  ;;  %v10383_v9 = vld [vmem:[%s11769_s16 + $0x74] sm:$0x1]  ;;  %v2127_v63 = vor.u32 %v2126_v55, %v2123_v22  ;;  %v11471_v62 = vld [vmem:[%s11769_s16 + $0x6c] sm:$0xff]  ;;  %v2685_v31 = vrot.slane %v2683_v32, 4 }
 0x150   : > { %v1504_v51 = vpop.f32.mrf.mxu2  ;;  %v893_v23 = vpop.f32.mrf.mxu0  ;;  %v2767_v41 = vunpack.c.l.b16 %v2677_v26  ;;  %v2140_v29 = vshll.u32 %v10383_v9, 16  ;;  %v10461_v26 = vrot.slane %v10445_v35, 9  ;;  %v2686_v11 = vrot.slane %v10383_v9, 5  ;;  %v10386_v35 = vld [vmem:[%s11769_s16 + $0x80] sm:$0x1] }
 0x151   : > { %v12568_v43 = vadd.f32 %v1504_v51, %v1125_v4  ;;  %v2136_v4 = vrot.slane %v2134_v36, 4 }
 0x152   : > { %v1126_v59 = vpop.f32.mrf.mxu1  ;;  %v2792_v24 = vpack.c.b16 %v2768_v16, %v2767_v41  ;;  %v2142_v36 = vrot.slane %v2140_v29, 5 }
 0x153   : > { %v1127_v17 = vadd.f32 %v1126_v59, %v893_v23  ;;  %v2137_v51 = vor.u32 %v2136_v4, %v2132_v20  ;;  %v10384_v59 = vld [vmem:[%s11769_s16 + $0x78] sm:$0xf] }
 0x154   : > { %v2145_v55 = vshrl.u32 %v10384_v59, 16  ;;  %v2148_v41 = vshll.u32 %v10384_v59, 16 }
 0x155   : > { %v2138_v25 = vrot.slane %v2137_v51, 4 }
 0x156   : > { %v1526_v45 = vpop.f32.mrf.mxu3 }
 0x157   : > { %v12583_v7 = vadd.f32 %v1526_v45, %v12455_v57  ;;  %v2128_v57 = vrot.slane %v2127_v63, 4  ;;  %v2143_v45 = vsel %vm11841_vm4, %v2138_v25, %v2142_v36 }
 0x158   : > { %v1506_v53 = vpop.f32.mrf.mxu2  ;;  %v896_v54 = vpop.f32.mrf.mxu0 }
 0x159   : > { %v12586_v1 = vadd.f32 %v1506_v53, %v1127_v17  ;;  %v12593_v17 = vld [vmem:[%s11769_s16 + $0x7c] sm:$0xf]  ;;  %v2133_v13 = vsel %vm11841_vm4, %v2128_v57, %v2132_v20  ;;  %v2687_v20 = vsel %vm11853_vm5, %v2685_v31, %v2686_v11 }
 0x15a   : > { %v1129_v3 = vpop.f32.mrf.mxu1  ;;  %v2154_v9 = vshll.u32 %v12593_v17, 16  ;;  %v2158_v53 = vshrl.u32 %v12593_v17, 16  ;;  %v2344_v63 = vunpack.c.l.b16 %v2133_v13  ;;  %v2770_v29 = vunpack.c.l.b16 %v2687_v20 }
 0x15b   : > { %v1130_v23 = vadd.f32 %v1129_v3, %v896_v54  ;;  %1802 = vmatmul.bf16.gmra.mxu3 %v11431_v0  ;;  %2483 = vmatmul.bf16.gmra.mxu0 %v2367_v37  ;;  %v2345_v54 = vunpack.c.l.b16 %v2143_v45  ;;  %v10446_v45 = vld [vmem:[%s11769_s16 + $0x78] sm:$0xe] }
 0x15c   : > { %v2156_v3 = vrot.slane %v2154_v9, 5  ;;  %v10462_v20 = vrot.slane %v10446_v45, 9 }
 0x15d   : > { %2908 = vmatmul.bf16.gmra.mxu1 %v2792_v24  ;;  %3222 = vmatmul.bf16.gmra.mxu2 %v11471_v62  ;;  %v2147_v24 = vrot.slane %v2145_v55, 4  ;;  %v2150_v62 = vrot.slane %v2148_v41, 5  ;;  %v2368_v59 = vpack.c.b16 %v2345_v54, %v2344_v63  ;;  %v2164_v55 = vshll.u32 %v10386_v35, 16  ;;  %v12625_v54 = vld [vmem:[%s11769_s16 + $0x88] sm:$0xf] }
 0x15e   : > { %v1529_v50 = vpop.f32.mrf.mxu3  ;;  %v2693_v63 = vrot.slane %v10386_v35, 5 }
 0x15f   : > { %v12596_v22 = vadd.f32 %v1529_v50, %v12468_v44  ;;  %v2684_v44 = vsel %vm11853_vm5, %v10461_v26, %v2683_v32  ;;  %v11432_v32 = vld [vmem:[%s11769_s16 + $0x6c] sm:$0xff]  ;;  %v2151_v26 = vor.u32 %v2150_v62, %v2147_v24 }
 0x160   : > { %v1509_v52 = vpop.f32.mrf.mxu2  ;;  %v898_v4 = vpop.f32.mrf.mxu0  ;;  %v2769_v51 = vunpack.c.l.b16 %v2684_v44  ;;  %v11490_v44 = vld [vmem:[%s15896_s1 + $0x1d0] sm:$0xff] }
 0x161   : > { %v12600_v16 = vadd.f32 %v1509_v52, %v1130_v23  ;;  %v2160_v23 = vrot.slane %v2158_v53, 4  ;;  %v11472_v52 = vld [vmem:[%s11769_s16 + $0x78] sm:$0xff]  ;;  %v2166_v53 = vrot.slane %v2164_v55, 5  ;;  %3865 = vmatpush.bf16.msra.mxu3 %v11490_v44 }
 0x162   : > { %v1131_v0 = vpop.f32.mrf.mxu1  ;;  %v2793_v50 = vpack.c.b16 %v2770_v29, %v2769_v51 }
 0x163   : > { %v1132_v37 = vadd.f32 %v1131_v0, %v898_v4  ;;  %v2161_v13 = vor.u32 %v2160_v23, %v2156_v3  ;;  %v2690_v4 = vrot.slane %v12593_v17, 5  ;;  %v10387_v0 = vld [vmem:[%s11769_s16 + $0x84] sm:$0xf]  ;;  %v11543_v17 = vld [vmem:[%s15897_s2 + $0x78] sm:$0xff] }
 0x164   : > { %v2169_v23 = vshrl.u32 %v10387_v0, 16  ;;  %6288 = vmatpush.bf16.msra.mxu2 %v11543_v17 }
 0x165   : > { %v2162_v9 = vrot.slane %v2161_v13, 4  ;;  %v11498_v13 = vld [vmem:[%s15896_s1 + $0x210] sm:$0xff] }
 0x166   : > { %v1531_v57 = vpop.f32.mrf.mxu3  ;;  %4290 = vmatpush.bf16.msra.mxu0 %v11498_v13 }
 0x167   : > { %v12612_v36 = vadd.f32 %v1531_v57, %v12484_v10  ;;  %v2152_v10 = vrot.slane %v2151_v26, 4  ;;  %v2172_v57 = vshll.u32 %v10387_v0, 16  ;;  %v2167_v35 = vsel %vm11841_vm4, %v2162_v9, %v2166_v53 }
 0x168   : > { %v1511_v25 = vpop.f32.mrf.mxu2  ;;  %v2449_v11 = vpop.f32.mrf.mxu0 }
 0x169   : > { %v12615_v31 = vadd.f32 %v1511_v25, %v1132_v37  ;;  %v2692_v37 = vrot.slane %v2690_v4, 4  ;;  %v2157_v29 = vsel %vm11841_vm4, %v2152_v10, %v2156_v3  ;;  %v2171_v10 = vrot.slane %v2169_v23, 4 }
 0x16a   : > { %v2874_v41 = vpop.f32.mrf.mxu1  ;;  %v2346_v55 = vunpack.c.l.b16 %v2157_v29  ;;  %v2174_v9 = vrot.slane %v2172_v57, 5 }
 0x16b   : > { %1807 = vmatmul.bf16.gmra.mxu3 %v11432_v32  ;;  %2488 = vmatmul.bf16.gmra.mxu0 %v2368_v59  ;;  %v2178_v32 = vshll.u32 %v12625_v54, 16  ;;  %v2182_v59 = vshrl.u32 %v12625_v54, 16  ;;  %v2694_v3 = vsel %vm11853_vm5, %v2692_v37, %v2693_v63  ;;  %v10389_v37 = vld [vmem:[%s11769_s16 + $0x8c] sm:$0x1] }
 0x16c   : > { %v2772_v53 = vunpack.c.l.b16 %v2694_v3  ;;  %v2175_v29 = vor.u32 %v2174_v9, %v2171_v10 }
 0x16d   : > { %2913 = vmatmul.bf16.gmra.mxu1 %v2793_v50  ;;  %3227 = vmatmul.bf16.gmra.mxu2 %v11472_v52  ;;  %v11511_v52 = vld [vmem:[%s15898_s3 + $0x38] sm:$0xff]  ;;  %v2180_v0 = vrot.slane %v2178_v32, 5  ;;  %v2184_v44 = vrot.slane %v2182_v59, 4  ;;  %v10447_v59 = vld [vmem:[%s11769_s16 + $0x84] sm:$0xe] }
 0x16e   : > { %v1768_v24 = vpop.f32.mrf.mxu3  ;;  %5623 = vmatpush.bf16.msra.mxu1 %v11511_v52  ;;  %v10463_v10 = vrot.slane %v10447_v59, 9 }
 0x16f   : > { %v1848_v62 = vadd.f32 %v1768_v24, %v12184_v15  ;;  %v2691_v15 = vsel %vm11853_vm5, %v10462_v20, %v2690_v4  ;;  %v11433_v24 = vld [vmem:[%s11769_s16 + $0x78] sm:$0xff] }
 0x170   : > { %v3188_v51 = vpop.f32.mrf.mxu2  ;;  %v2451_v25 = vpop.f32.mrf.mxu0  ;;  %v2771_v4 = vunpack.c.l.b16 %v2691_v15  ;;  %v2188_v15 = vshll.u32 %v10389_v37, 16 }
 0x171   : > { %v2529_v26 = vadd.f32 %v2449_v11, %v1848_v62  ;;  %v2347_v11 = vunpack.c.l.b16 %v2167_v35  ;;  %v11473_v35 = vld [vmem:[%s11769_s16 + $0x84] sm:$0xff] }
 0x172   : > { %v2876_v50 = vpop.f32.mrf.mxu1  ;;  %v2794_v57 = vpack.c.b16 %v2772_v53, %v2771_v4  ;;  %v2700_v4 = vrot.slane %v10389_v37, 5 }
 0x173   : > { %v2954_v45 = vadd.f32 %v2874_v41, %v2529_v26  ;;  %v2369_v62 = vpack.c.b16 %v2347_v11, %v2346_v55  ;;  %v2185_v26 = vor.u32 %v2184_v44, %v2180_v0  ;;  %v2190_v55 = vrot.slane %v2188_v15, 5 }
 0x175   : > { %v12647_v20 = vadd.f32 %v3188_v51, %v2954_v45  ;;  %v2697_v51 = vrot.slane %v12625_v54, 5  ;;  %v2186_v13 = vrot.slane %v2185_v26, 4  ;;  %v10390_v45 = vld [vmem:[%s11769_s16 + $0x90] sm:$0xf] }
 0x176   : > { %v1770_v63 = vpop.f32.mrf.mxu3 }
 0x177   : > { %v1849_v17 = vadd.f32 %v1770_v63, %v12215_v12  ;;  %v2176_v12 = vrot.slane %v2175_v29, 4  ;;  %v2699_v9 = vrot.slane %v2697_v51, 4  ;;  %v2193_v63 = vshrl.u32 %v10390_v45, 16 }
 0x178   : > { %v3190_v41 = vpop.f32.mrf.mxu2  ;;  %v2454_v23 = vpop.f32.mrf.mxu0 }
 0x179   : > { %v2530_v3 = vadd.f32 %v2451_v25, %v1849_v17  ;;  %v12659_v25 = vld [vmem:[%s11769_s16 + $0x94] sm:$0xf]  ;;  %v2196_v17 = vshll.u32 %v10390_v45, 16 }
 0x17a   : > { %v2879_v32 = vpop.f32.mrf.mxu1  ;;  %v2206_v37 = vshrl.u32 %v12659_v25, 16 }
 0x17b   : > { %1812 = vmatmul.bf16.gmra.mxu3 %v11433_v24  ;;  %2493 = vmatmul.bf16.gmra.mxu0 %v2369_v62  ;;  %v2955_v52 = vadd.f32 %v2876_v50, %v2530_v3  ;;  %v2181_v50 = vsel %vm11841_vm4, %v2176_v12, %v2180_v0  ;;  %v2191_v62 = vsel %vm11841_vm4, %v2186_v13, %v2190_v55  ;;  %v2195_v3 = vrot.slane %v2193_v63, 4  ;;  %v11474_v63 = vld [vmem:[%s11769_s16 + $0x90] sm:$0xff] }
 0x17c   : > { %v2701_v0 = vsel %vm11853_vm5, %v2699_v9, %v2700_v4  ;;  %v2349_v15 = vunpack.c.l.b16 %v2191_v62  ;;  %v2198_v59 = vrot.slane %v2196_v17, 5  ;;  %v2208_v55 = vrot.slane %v2206_v37, 4  ;;  %v10448_v37 = vld [vmem:[%s11769_s16 + $0x90] sm:$0xe] }
 0x17d   : > { %2918 = vmatmul.bf16.gmra.mxu1 %v2794_v57  ;;  %3232 = vmatmul.bf16.gmra.mxu2 %v11473_v35  ;;  %v12656_v11 = vadd.f32 %v3190_v41, %v2955_v52  ;;  %v2202_v41 = vshll.u32 %v12659_v25, 16  ;;  %v2348_v35 = vunpack.c.l.b16 %v2181_v50  ;;  %v2774_v12 = vunpack.c.l.b16 %v2701_v0 }
 0x17e   : > { %v1773_v53 = vpop.f32.mrf.mxu3  ;;  %v2199_v4 = vor.u32 %v2198_v59, %v2195_v3 }
 0x17f   : > { %v1850_v54 = vadd.f32 %v1773_v53, %v12255_v27  ;;  %v2698_v27 = vsel %vm11853_vm5, %v10463_v10, %v2697_v51  ;;  %v2204_v13 = vrot.slane %v2202_v41, 5  ;;  %v11434_v10 = vld [vmem:[%s11769_s16 + $0x84] sm:$0xff] }
 0x180   : > { %v3193_v44 = vpop.f32.mrf.mxu2  ;;  %v2456_v24 = vpop.f32.mrf.mxu0  ;;  %v2773_v52 = vunpack.c.l.b16 %v2698_v27 }
 0x181   : > { %v2531_v29 = vadd.f32 %v2454_v23, %v1850_v54  ;;  %v10392_v23 = vld [vmem:[%s11769_s16 + $0x98] sm:$0x1]  ;;  %v2370_v54 = vpack.c.b16 %v2349_v15, %v2348_v35  ;;  %v2209_v17 = vor.u32 %v2208_v55, %v2204_v13  ;;  %v11489_v15 = vld [vmem:[%s15896_s1 + $0x1c8] sm:$0xff] }
 0x182   : > { %v2881_v57 = vpop.f32.mrf.mxu1  ;;  %v2795_v50 = vpack.c.b16 %v2774_v12, %v2773_v52  ;;  %v2212_v62 = vshll.u32 %v10392_v23, 16  ;;  %v12687_v52 = vld [vmem:[%s11769_s16 + $0xa0] sm:$0xf]  ;;  %3866 = vmatpush.bf16.msra.mxu3 %v11489_v15 }
 0x183   : > { %v2956_v26 = vadd.f32 %v2879_v32, %v2531_v29  ;;  %v2210_v0 = vrot.slane %v2209_v17, 4 }
 0x184   : > { %v2214_v35 = vrot.slane %v2212_v62, 5  ;;  %v11510_v62 = vld [vmem:[%s15898_s3 + $0x30] sm:$0xff] }
 0x185   : > { %v12672_v45 = vadd.f32 %v3193_v44, %v2956_v26  ;;  %v2704_v44 = vrot.slane %v12659_v25, 5  ;;  %v10393_v26 = vld [vmem:[%s11769_s16 + $0x9c] sm:$0xf]  ;;  %v2707_v25 = vrot.slane %v10392_v23, 5  ;;  %5624 = vmatpush.bf16.msra.mxu1 %v11510_v62 }
 0x186   : > { %v1775_v53 = vpop.f32.mrf.mxu3  ;;  %v2215_v23 = vsel %vm11841_vm4, %v2210_v0, %v2214_v35 }
 0x187   : > { %v1851_v51 = vadd.f32 %v1775_v53, %v12286_v58  ;;  %v2200_v58 = vrot.slane %v2199_v4, 4  ;;  %v2706_v59 = vrot.slane %v2704_v44, 4  ;;  %v2226_v4 = vshll.u32 %v12687_v52, 16 }
 0x188   : > { %v3195_v9 = vpop.f32.mrf.mxu2  ;;  %v2459_v32 = vpop.f32.mrf.mxu0 }
 0x189   : > { %v2532_v29 = vadd.f32 %v2456_v24, %v1851_v51  ;;  %v10464_v24 = vrot.slane %v10448_v37, 9  ;;  %v2205_v51 = vsel %vm11841_vm4, %v2200_v58, %v2204_v13  ;;  %v2708_v13 = vsel %vm11853_vm5, %v2706_v59, %v2707_v25  ;;  %v10395_v59 = vld [vmem:[%s11769_s16 + $0xa4] sm:$0x1] }
 0x18a   : > { %v2884_v41 = vpop.f32.mrf.mxu1  ;;  %v2350_v37 = vunpack.c.l.b16 %v2205_v51  ;;  %v2776_v35 = vunpack.c.l.b16 %v2708_v13  ;;  %v10449_v13 = vld [vmem:[%s11769_s16 + $0x9c] sm:$0xe] }
 0x18b   : > { %1817 = vmatmul.bf16.gmra.mxu3 %v11434_v10  ;;  %2498 = vmatmul.bf16.gmra.mxu0 %v2370_v54  ;;  %v2957_v27 = vadd.f32 %v2881_v57, %v2532_v29  ;;  %v11542_v57 = vld [vmem:[%s15897_s2 + $0x70] sm:$0xff]  ;;  %v2217_v10 = vshrl.u32 %v10393_v26, 16  ;;  %v2220_v54 = vshll.u32 %v10393_v26, 16  ;;  %v11497_v29 = vld [vmem:[%s15896_s1 + $0x208] sm:$0xff]  ;;  %v2228_v26 = vrot.slane %v2226_v4, 5 }
 0x18c   : > { %6289 = vmatpush.bf16.msra.mxu2 %v11542_v57  ;;  %4291 = vmatpush.bf16.msra.mxu0 %v11497_v29  ;;  %v10396_v29 = vld [vmem:[%s11769_s16 + $0xa8] sm:$0xf] }
 0x18d   : > { %2923 = vmatmul.bf16.gmra.mxu1 %v2795_v50  ;;  %3237 = vmatmul.bf16.gmra.mxu2 %v11474_v63  ;;  %v12684_v3 = vadd.f32 %v3195_v9, %v2957_v27  ;;  %v2230_v50 = vshrl.u32 %v12687_v52, 16  ;;  %v2219_v58 = vrot.slane %v2217_v10, 4  ;;  %v2222_v0 = vrot.slane %v2220_v54, 5 }
 0x18e   : > { %v1778_v12 = vpop.f32.mrf.mxu3 }
 0x18f   : > { %v1852_v55 = vadd.f32 %v1778_v12, %v12316_v18  ;;  %v2705_v18 = vsel %vm11853_vm5, %v10464_v24, %v2704_v44  ;;  %v2232_v15 = vrot.slane %v2230_v50, 4  ;;  %v11435_v12 = vld [vmem:[%s11769_s16 + $0x90] sm:$0xff]  ;;  %v2223_v51 = vor.u32 %v2222_v0, %v2219_v58 }
 0x190   : > { %v3198_v53 = vpop.f32.mrf.mxu2  ;;  %v2461_v9 = vpop.f32.mrf.mxu0  ;;  %v2775_v44 = vunpack.c.l.b16 %v2705_v18  ;;  %v2236_v18 = vshll.u32 %v10395_v59, 16  ;;  %v10465_v0 = vrot.slane %v10449_v13, 9 }
 0x191   : > { %v2533_v63 = vadd.f32 %v2459_v32, %v1852_v55  ;;  %v2351_v32 = vunpack.c.l.b16 %v2215_v23  ;;  %v11475_v23 = vld [vmem:[%s11769_s16 + $0x9c] sm:$0xff] }
 0x192   : > { %v2886_v17 = vpop.f32.mrf.mxu1  ;;  %v2796_v54 = vpack.c.b16 %v2776_v35, %v2775_v44 }
 0x193   : > { %v2958_v27 = vadd.f32 %v2884_v41, %v2533_v63  ;;  %v2371_v55 = vpack.c.b16 %v2351_v32, %v2350_v37  ;;  %v2233_v63 = vor.u32 %v2232_v15, %v2228_v26  ;;  %v12719_v32 = vld [vmem:[%s11769_s16 + $0xac] sm:$0xf]  ;;  %v2241_v15 = vshrl.u32 %v10396_v29, 16 }
 0x195   : > { %v12709_v24 = vadd.f32 %v3198_v53, %v2958_v27  ;;  %v2711_v53 = vrot.slane %v12687_v52, 5  ;;  %v2234_v37 = vrot.slane %v2233_v63, 4  ;;  %v2238_v27 = vrot.slane %v2236_v18, 5 }
 0x196   : > { %v1780_v25 = vpop.f32.mrf.mxu3  ;;  %v2244_v52 = vshll.u32 %v10396_v29, 16  ;;  %v2243_v18 = vrot.slane %v2241_v15, 4 }
 0x197   : > { %v1853_v57 = vadd.f32 %v1780_v25, %v12332_v60  ;;  %v2224_v60 = vrot.slane %v2223_v51, 4  ;;  %v2713_v44 = vrot.slane %v2711_v53, 4 }
 0x198   : > { %v3200_v41 = vpop.f32.mrf.mxu2  ;;  %v2464_v10 = vpop.f32.mrf.mxu0 }
 0x199   : > { %v2534_v4 = vadd.f32 %v2461_v9, %v1853_v57  ;;  %v2714_v9 = vrot.slane %v10395_v59, 5  ;;  %v2229_v57 = vsel %vm11841_vm4, %v2224_v60, %v2228_v26  ;;  %v2246_v26 = vrot.slane %v2244_v52, 5 }
 0x19a   : > { %v2889_v50 = vpop.f32.mrf.mxu1  ;;  %v2352_v63 = vunpack.c.l.b16 %v2229_v57  ;;  %v2718_v57 = vrot.slane %v12719_v32, 5 }
 0x19b   : > { %1822 = vmatmul.bf16.gmra.mxu3 %v11435_v12  ;;  %2503 = vmatmul.bf16.gmra.mxu0 %v2371_v55  ;;  %v2959_v62 = vadd.f32 %v2886_v17, %v2534_v4  ;;  %v2250_v12 = vshll.u32 %v12719_v32, 16  ;;  %v2254_v55 = vshrl.u32 %v12719_v32, 16  ;;  %v11488_v32 = vld [vmem:[%s15896_s1 + $0x1c0] sm:$0xff] }
 0x19c   : > { %3867 = vmatpush.bf16.msra.mxu3 %v11488_v32  ;;  %v10401_v32 = vld [vmem:[%s11769_s16 + $0xbc] sm:$0x1] }
 0x19d   : > { %2928 = vmatmul.bf16.gmra.mxu1 %v2796_v54  ;;  %3242 = vmatmul.bf16.gmra.mxu2 %v11475_v23  ;;  %v12721_v58 = vadd.f32 %v3200_v41, %v2959_v62  ;;  %v2239_v41 = vsel %vm11841_vm4, %v2234_v37, %v2238_v27  ;;  %v2712_v23 = vsel %vm11853_vm5, %v10465_v0, %v2711_v53  ;;  %v10398_v62 = vld [vmem:[%s11769_s16 + $0xb0] sm:$0x1]  ;;  %v2252_v60 = vrot.slane %v2250_v12, 5 }
 0x19e   : > { %v1783_v35 = vpop.f32.mrf.mxu3  ;;  %v2353_v13 = vunpack.c.l.b16 %v2239_v41  ;;  %v2256_v29 = vrot.slane %v2254_v55, 4  ;;  %v2777_v37 = vunpack.c.l.b16 %v2712_v23  ;;  %v2247_v53 = vor.u32 %v2246_v26, %v2243_v18  ;;  %v11476_v55 = vld [vmem:[%s11769_s16 + $0xa8] sm:$0xff] }
 0x19f   : > { %v1854_v25 = vadd.f32 %v1783_v35, %v12345_v28  ;;  %v2715_v28 = vsel %vm11853_vm5, %v2713_v44, %v2714_v9  ;;  %v2260_v0 = vshll.u32 %v10398_v62, 16  ;;  %v11436_v9 = vld [vmem:[%s11769_s16 + $0x9c] sm:$0xff] }
 0x1a0   : > { %v3203_v17 = vpop.f32.mrf.mxu2  ;;  %v2466_v51 = vpop.f32.mrf.mxu0  ;;  %v2257_v52 = vor.u32 %v2256_v29, %v2252_v60  ;;  %v2248_v23 = vrot.slane %v2247_v53, 4  ;;  %v12749_v29 = vld [vmem:[%s11769_s16 + $0xb8] sm:$0xf] }
 0x1a1   : > { %v2535_v54 = vadd.f32 %v2464_v10, %v1854_v25  ;;  %v2778_v10 = vunpack.c.l.b16 %v2715_v28  ;;  %v2372_v25 = vpack.c.b16 %v2353_v13, %v2352_v63  ;;  %v2262_v28 = vrot.slane %v2260_v0, 5 }
 0x1a2   : > { %v2891_v59 = vpop.f32.mrf.mxu1  ;;  %v2258_v26 = vrot.slane %v2257_v52, 4  ;;  %v2720_v63 = vrot.slane %v2718_v57, 4  ;;  %v2274_v52 = vshll.u32 %v12749_v29, 16 }
 0x1a3   : > { %v2960_v4 = vadd.f32 %v2889_v50, %v2535_v54  ;;  %v10450_v50 = vld [vmem:[%s11769_s16 + $0xa8] sm:$0xe]  ;;  %v2797_v12 = vpack.c.b16 %v2778_v10, %v2777_v37 }
 0x1a4   : > { %v10466_v18 = vrot.slane %v10450_v50, 9  ;;  %v11541_v37 = vld [vmem:[%s15897_s2 + $0x68] sm:$0xff]  ;;  %v2263_v53 = vsel %vm11841_vm4, %v2258_v26, %v2262_v28  ;;  %v2276_v26 = vrot.slane %v2274_v52, 5 }
 0x1a5   : > { %v12735_v27 = vadd.f32 %v3203_v17, %v2960_v4  ;;  %v2721_v4 = vrot.slane %v10398_v62, 5  ;;  %6290 = vmatpush.bf16.msra.mxu2 %v11541_v37 }
 0x1a6   : > { %v1785_v35 = vpop.f32.mrf.mxu3  ;;  %v2719_v0 = vsel %vm11853_vm5, %v10466_v18, %v2718_v57  ;;  %v11496_v57 = vld [vmem:[%s15896_s1 + $0x200] sm:$0xff] }
 0x1a7   : > { %15913 = vst [vmem:[#allocation4_spill] sm:$0xff] %v12735_v27  ;;  %v1855_v44 = vadd.f32 %v1785_v35, %v12359_v42  ;;  %v2779_v28 = vunpack.c.l.b16 %v2719_v0  ;;  %4292 = vmatpush.bf16.msra.mxu0 %v11496_v57 }
 0x1a8   : > { %v3205_v15 = vpop.f32.mrf.mxu2  ;;  %v2469_v41 = vpop.f32.mrf.mxu0 }
 0x1a9   : > { %v2536_v54 = vadd.f32 %v2466_v51, %v1855_v44  ;;  %v10399_v51 = vld [vmem:[%s11769_s16 + $0xb4] sm:$0xf]  ;;  %v2722_v44 = vsel %vm11853_vm5, %v2720_v63, %v2721_v4 }
 0x1aa   : > { %v2894_v17 = vpop.f32.mrf.mxu1  ;;  %v2780_v18 = vunpack.c.l.b16 %v2722_v44  ;;  %v11477_v44 = vld [vmem:[%s11769_s16 + $0xb4] sm:$0xff] }
 0x1ab   : > { %1827 = vmatmul.bf16.gmra.mxu3 %v11436_v9  ;;  %2508 = vmatmul.bf16.gmra.mxu0 %v2372_v25  ;;  %v2961_v42 = vadd.f32 %v2891_v59, %v2536_v54  ;;  %v2253_v59 = vsel %vm11841_vm4, %v2248_v23, %v2252_v60  ;;  %v2265_v25 = vshrl.u32 %v10399_v51, 16  ;;  %v2278_v60 = vshrl.u32 %v12749_v29, 16 }
 0x1ac   : > { %v2355_v23 = vunpack.c.l.b16 %v2263_v53  ;;  %v2798_v0 = vpack.c.b16 %v2780_v18, %v2779_v28 }
 0x1ad   : > { %2933 = vmatmul.bf16.gmra.mxu1 %v2797_v12  ;;  %3247 = vmatmul.bf16.gmra.mxu2 %v11476_v55  ;;  %v12745_v13 = vadd.f32 %v3205_v15, %v2961_v42  ;;  %v2268_v15 = vshll.u32 %v10399_v51, 16  ;;  %v11509_v12 = vld [vmem:[%s15898_s3 + $0x28] sm:$0xff]  ;;  %v2354_v55 = vunpack.c.l.b16 %v2253_v59  ;;  %v2280_v63 = vrot.slane %v2278_v60, 4 }
 0x1ae   : > { %v1788_v10 = vpop.f32.mrf.mxu3  ;;  %5625 = vmatpush.bf16.msra.mxu1 %v11509_v12  ;;  %v10402_v12 = vld [vmem:[%s11769_s16 + $0xc0] sm:$0xf] }
 0x1af   : > { %15914 = vst [vmem:[#allocation5_spill] sm:$0xff] %v12745_v13  ;;  %v1856_v62 = vadd.f32 %v1788_v10, %v12376_v21  ;;  %v2270_v42 = vrot.slane %v2268_v15, 5  ;;  %v11437_v10 = vld [vmem:[%s11769_s16 + $0xa8] sm:$0xff]  ;;  %v2284_v15 = vshll.u32 %v10401_v32, 16 }
 0x1b0   : > { %v3208_v35 = vpop.f32.mrf.mxu2  ;;  %v2471_v9 = vpop.f32.mrf.mxu0 }
 0x1b1   : > { %v2537_v50 = vadd.f32 %v2469_v41, %v1856_v62  ;;  %v2267_v41 = vrot.slane %v2265_v25, 4  ;;  %v11508_v62 = vld [vmem:[%s15898_s3 + $0x20] sm:$0xff]  ;;  %v2281_v25 = vor.u32 %v2280_v63, %v2276_v26  ;;  %v2286_v28 = vrot.slane %v2284_v15, 5 }
 0x1b2   : > { %v2896_v21 = vpop.f32.mrf.mxu1  ;;  %5626 = vmatpush.bf16.msra.mxu1 %v11508_v62  ;;  %v2292_v63 = vshll.u32 %v10402_v12, 16  ;;  %v11506_v62 = vld [vmem:[%s15898_s3 + $0x10] sm:$0xff] }
 0x1b3   : > { %v2962_v54 = vadd.f32 %v2894_v17, %v2537_v50  ;;  %v2373_v17 = vpack.c.b16 %v2355_v23, %v2354_v55  ;;  %v10451_v50 = vld [vmem:[%s11769_s16 + $0xb4] sm:$0xe]  ;;  %v12788_v55 = vld [vmem:[%s11769_s16 + $0xc4] sm:$0xf] }
 0x1b4   : > { %v10467_v18 = vrot.slane %v10451_v50, 9  ;;  %v2294_v50 = vrot.slane %v2292_v63, 5 }
 0x1b5   : > { %v12771_v4 = vadd.f32 %v3208_v35, %v2962_v54  ;;  %v2271_v35 = vor.u32 %v2270_v42, %v2267_v41  ;;  %v11507_v54 = vld [vmem:[%s15898_s3 + $0x18] sm:$0xff]  ;;  %v2289_v42 = vshrl.u32 %v10402_v12, 16  ;;  %v10404_v12 = vld [vmem:[%s11769_s16 + $0xc8] sm:$0x1] }
 0x1b6   : > { %v1790_v51 = vpop.f32.mrf.mxu3  ;;  %5627 = vmatpush.bf16.msra.mxu1 %v11507_v54 }
 0x1b7   : > { %15915 = vst [vmem:[#allocation6_spill] sm:$0xff] %v12771_v4  ;;  %v1857_v37 = vadd.f32 %v1790_v51, %v12394_v6  ;;  %v2725_v6 = vrot.slane %v12749_v29, 5  ;;  %v2272_v23 = vrot.slane %v2271_v35, 4  ;;  %v2728_v29 = vrot.slane %v10401_v32, 5 }
 0x1b8   : > { %v12776_v59 = vpop.f32.mrf.mxu2  ;;  %v2474_v53 = vpop.f32.mrf.mxu0 }
 0x1b9   : > { %v2538_v52 = vadd.f32 %v2471_v9, %v1857_v37  ;;  %v2282_v9 = vrot.slane %v2281_v25, 4  ;;  %v2727_v41 = vrot.slane %v2725_v6, 4  ;;  %v2302_v37 = vshrl.u32 %v12788_v55, 16 }
 0x1ba   : > { %v2899_v60 = vpop.f32.mrf.mxu1  ;;  %v2277_v32 = vsel %vm11841_vm4, %v2272_v23, %v2276_v26  ;;  %v2726_v35 = vsel %vm11853_vm5, %v10467_v18, %v2725_v6  ;;  %5628 = vmatpush.bf16.msra.mxu1 %v11506_v62 }
 0x1bb   : > { %1832 = vmatmul.bf16.gmra.mxu3 %v11437_v10  ;;  %2513 = vmatmul.bf16.gmra.mxu0 %v2373_v17  ;;  %v12785_v57 = vadd.f32 %v2896_v21, %v2538_v52  ;;  %v2298_v21 = vshll.u32 %v12788_v55, 16  ;;  %v2291_v52 = vrot.slane %v2289_v42, 4  ;;  %v2356_v23 = vunpack.c.l.b16 %v2277_v32  ;;  %v10452_v32 = vld [vmem:[%s11769_s16 + $0xc0] sm:$0xe] }
 0x1bc   : > { %v2781_v6 = vunpack.c.l.b16 %v2726_v35 }
 0x1bd   : > { %2938 = vmatmul.bf16.gmra.mxu1 %v2798_v0  ;;  %3252 = vmatmul.bf16.gmra.mxu2 %v11477_v44  ;;  %v2287_v44 = vsel %vm11841_vm4, %v2282_v9, %v2286_v28  ;;  %v12808_v54 = vrot.slane %v2298_v21, 5 }
 0x1be   : > { %v1793_v51 = vpop.f32.mrf.mxu3  ;;  %v2357_v9 = vunpack.c.l.b16 %v2287_v44 }
 0x1bf   : > { %v1858_v10 = vadd.f32 %v1793_v51, %v12408_v19  ;;  %v2729_v19 = vsel %vm11853_vm5, %v2727_v41, %v2728_v29  ;;  %v2304_v51 = vrot.slane %v2302_v37, 4  ;;  %v2295_v41 = vor.u32 %v2294_v50, %v2291_v52  ;;  %v11438_v37 = vld [vmem:[%s11769_s16 + $0xb4] sm:$0xff] }
 0x1c0   : > { %v3213_v17 = vpop.f32.mrf.mxu2  ;;  %v2476_v0 = vpop.f32.mrf.mxu0  ;;  %v2782_v28 = vunpack.c.l.b16 %v2729_v19  ;;  %v2308_v29 = vshll.u32 %v10404_v12, 16 }
 0x1c1   : > { %v2539_v25 = vadd.f32 %v2474_v53, %v1858_v10  ;;  %v11505_v53 = vld [vmem:[%s15898_s3 + $0x8] sm:$0xff]  ;;  %v2305_v63 = vor.u32 %v2304_v51, %v12808_v54  ;;  %v2374_v10 = vpack.c.b16 %v2357_v9, %v2356_v23  ;;  %v2296_v50 = vrot.slane %v2295_v41, 4 }
 0x1c2   : > { %v2901_v15 = vpop.f32.mrf.mxu1  ;;  %5629 = vmatpush.bf16.msra.mxu1 %v11505_v53  ;;  %v2799_v35 = vpack.c.b16 %v2782_v28, %v2781_v6  ;;  %v2310_v51 = vrot.slane %v2308_v29, 5  ;;  %v2735_v9 = vrot.slane %v10404_v12, 5  ;;  %v10773_v28 = vld [vmem:[%s11769_s16 + $0xc] sm:$0xf]  ;;  %v11540_v12 = vld [vmem:[%s15897_s2 + $0x60] sm:$0xff] }
 0x1c3   : > { %v2964_v26 = vadd.f32 %v2899_v60, %v2539_v25  ;;  %v2732_v60 = vrot.slane %v12788_v55, 5  ;;  %v11478_v25 = vld [vmem:[%s11769_s16 + $0xc0] sm:$0xff]  ;;  %v10629_v55 = vld [vmem:[%s11769_s16 + $0x18] sm:$0xf]  ;;  %v2301_v29 = vsel %vm11841_vm4, %v2296_v50, %v12808_v54  ;;  %6291 = vmatpush.bf16.msra.mxu2 %v11540_v12 }
 0x1c4   : > { %v3349_v6 = vshrl.u32 %v10629_v55, 16 }
 0x1c5   : > { %v12813_v18 = vadd.f32 %v3213_v17, %v2964_v26  ;;  %v11504_v17 = vld [vmem:[%s15898_s3] sm:$0xff]  ;;  %v10468_v26 = vrot.slane %v10452_v32, 9  ;;  %v2734_v23 = vrot.slane %v2732_v60, 4 }
 0x1c6   : > { %v1795_v42 = vpop.f32.mrf.mxu3  ;;  %5630 = vmatpush.bf16.msra.mxu1 %v11504_v17  ;;  %v3351_v50 = vrot.slane %v3349_v6, 4 }
 0x1c7   : > { %15916 = vst [vmem:[#allocation7_spill] sm:$0xff] %v12813_v18  ;;  %v1859_v21 = vadd.f32 %v1795_v42, %v12423_v61  ;;  %v2306_v61 = vrot.slane %v2305_v63, 4  ;;  %v12826_v42 = vld [vmem:[%s11769_s16 + $0x1c] sm:$0xf]  ;;  %v10774_v63 = vld [vmem:[%s11769_s16 + $0x10] sm:$0xf] }
 0x1c8   : > { %v3215_v62 = vpop.f32.mrf.mxu2  ;;  %v2479_v44 = vpop.f32.mrf.mxu0  ;;  %v3362_v17 = vshrl.u32 %v12826_v42, 16 }
 0x1c9   : > { %v2540_v19 = vadd.f32 %v2476_v0, %v1859_v21  ;;  %v3352_v0 = vshll.u32 %v10629_v55, 16  ;;  %v5121_v55 = vshll.u32 %v10774_v63, 16 }
 0x1ca   : > { %v2904_v52 = vpop.f32.mrf.mxu1  ;;  %v3364_v4 = vrot.slane %v3362_v17, 4  ;;  %v10709_v17 = vld [vmem:[%s11769_s16 + $0x18] sm:$0xe] }
 0x1cb   : > { %1837 = vmatmul.bf16.gmra.mxu3 %v11438_v37  ;;  %2518 = vmatmul.bf16.gmra.mxu0 %v2374_v10  ;;  %v2965_v53 = vadd.f32 %v2901_v15, %v2540_v19  ;;  %v2311_v15 = vsel %vm11841_vm4, %v2306_v61, %v2310_v51  ;;  %v2733_v37 = vsel %vm11853_vm5, %v10468_v26, %v2732_v60  ;;  %v3354_v51 = vrot.slane %v3352_v0, 5 }
 0x1cc   : > { %v2736_v10 = vsel %vm11853_vm5, %v2734_v23, %v2735_v9  ;;  %v5125_v61 = vshrl.u32 %v10774_v63, 16  ;;  %v2359_v23 = vunpack.c.l.b16 %v2311_v15  ;;  %v2783_v9 = vunpack.c.l.b16 %v2733_v37  ;;  %v10775_v15 = vld [vmem:[%s11769_s16 + $0x14] sm:$0x1] }
 0x1cd   : > { %2943 = vmatmul.bf16.gmra.mxu1 %v2799_v35  ;;  %3257 = vmatmul.bf16.gmra.mxu2 %v11478_v25  ;;  %v12829_v41 = vadd.f32 %v3215_v62, %v2965_v53  ;;  %v3358_v62 = vshll.u32 %v12826_v42, 16  ;;  %v5112_v35 = vshrl.u32 %v10773_v28, 16  ;;  %v5115_v25 = vshll.u32 %v10773_v28, 16 }
 0x1ce   : > { %v1798_v21 = vpop.f32.mrf.mxu3  ;;  %v2358_v53 = vunpack.c.l.b16 %v2301_v29  ;;  %v3355_v12 = vor.u32 %v3354_v51, %v3351_v50  ;;  %v12848_v6 = vrot.slane %v5121_v55, 5  ;;  %v5127_v0 = vrot.slane %v5125_v61, 4  ;;  %v11479_v51 = vld [vmem:[%s11769_s16 + $0xcc] sm:$0xff] }
 0x1cf   : > { %15917 = vst [vmem:[#allocation8_spill] sm:$0xff] %v12829_v41  ;;  %v1860_v32 = vadd.f32 %v1798_v21, %v12440_v33  ;;  %v2784_v33 = vunpack.c.l.b16 %v2736_v10  ;;  %v10631_v41 = vld [vmem:[%s11769_s16 + $0x20] sm:$0x1]  ;;  %v3360_v18 = vrot.slane %v3358_v62, 5  ;;  %v5114_v28 = vrot.slane %v5112_v35, 4 }
 0x1d0   : > { %v3218_v54 = vpop.f32.mrf.mxu2  ;;  %v2481_v19 = vpop.f32.mrf.mxu0  ;;  %v5117_v13 = vrot.slane %v5115_v25, 5  ;;  %v3368_v63 = vshll.u32 %v10631_v41, 16  ;;  %v11439_v10 = vld [vmem:[%s11769_s16 + $0xc0] sm:$0xff]  ;;  %v4047_v35 = vrot.slane %v12826_v42, 5  ;;  %v5128_v61 = vor.u32 %v5127_v0, %v12848_v6 }
 0x1d1   : > { %v2541_v60 = vadd.f32 %v2479_v44, %v1860_v32  ;;  %v3365_v32 = vor.u32 %v3364_v4, %v3360_v18  ;;  %v2800_v50 = vpack.c.b16 %v2784_v33, %v2783_v9  ;;  %v12861_v9 = vld [vmem:[%s11769_s16 + $0x28] sm:$0xf]  ;;  %v10776_v33 = vld [vmem:[%s11769_s16 + $0x18] sm:$0xf] }
 0x1d2   : > { %v2906_v26 = vpop.f32.mrf.mxu1  ;;  %v5118_v55 = vor.u32 %v5117_v13, %v5114_v28 }
 0x1d3   : > { %v2966_v21 = vadd.f32 %v2904_v52, %v2541_v60  ;;  %v2375_v52 = vpack.c.b16 %v2359_v23, %v2358_v53  ;;  %v10725_v53 = vrot.slane %v10709_v17, 9  ;;  %v10632_v23 = vld [vmem:[%s11769_s16 + $0x24] sm:$0xf]  ;;  %v3366_v42 = vrot.slane %v3365_v32, 4 }
 0x1d4   : > { %v5119_v28 = vrot.slane %v5118_v55, 4  ;;  %v3386_v32 = vshrl.u32 %v12861_v9, 16  ;;  %v5136_v17 = vshrl.u32 %v10776_v33, 16 }
 0x1d5   : > { %v12850_v44 = vadd.f32 %v3218_v54, %v2966_v21  ;;  %v3356_v54 = vrot.slane %v3355_v12, 4  ;;  %v5129_v12 = vrot.slane %v5128_v61, 4 }
 0x1d6   : > { %v1800_v29 = vpop.f32.mrf.mxu3 }
 0x1d7   : > { %15918 = vst [vmem:[#allocation9_spill] sm:$0xff] %v12850_v44  ;;  %v1861_v37 = vadd.f32 %v1800_v29, %v12458_v2  ;;  %v5131_v2 = vshll.u32 %v10775_v15, 16  ;;  %v3370_v29 = vrot.slane %v3368_v63, 5  ;;  %v4049_v44 = vrot.slane %v4047_v35, 4 }
 0x1d8   : > { %v3220_v62 = vpop.f32.mrf.mxu2  ;;  %v2484_v25 = vpop.f32.mrf.mxu0  ;;  %v3361_v13 = vsel %vm11841_vm4, %v3356_v54, %v3360_v18  ;;  %v3373_v15 = vshrl.u32 %v10632_v23, 16  ;;  %v4048_v54 = vsel %vm11853_vm5, %v10725_v53, %v4047_v35  ;;  %v3388_v53 = vrot.slane %v3386_v32, 4 }
 0x1d9   : > { %v2542_v60 = vadd.f32 %v2481_v19, %v1861_v37  ;;  %v4050_v19 = vrot.slane %v10631_v41, 5  ;;  %v5133_v63 = vrot.slane %v5131_v2, 5  ;;  %v3376_v37 = vshll.u32 %v10632_v23, 16 }
 0x1da   : > { %v2909_v21 = vpop.f32.mrf.mxu1  ;;  %v3371_v41 = vsel %vm11841_vm4, %v3366_v42, %v3370_v29  ;;  %v3375_v29 = vrot.slane %v3373_v15, 4 }
 0x1db   : > { %1842 = vmatmul.bf16.gmra.mxu3 %v11439_v10  ;;  %2523 = vmatmul.bf16.gmra.mxu0 %v2375_v52  ;;  %v2967_v4 = vadd.f32 %v2906_v26, %v2542_v60  ;;  %v10777_v10 = vld [vmem:[%s11769_s16 + $0x1c] sm:$0xf]  ;;  %v3382_v52 = vshll.u32 %v12861_v9, 16  ;;  %v4051_v61 = vsel %vm11853_vm5, %v4049_v44, %v4050_v19  ;;  %v5124_v60 = vsel %vm11841_vm4, %v5119_v28, %v12848_v6 }
 0x1dc   : > { %v5145_v2 = vshll.u32 %v10777_v10, 16  ;;  %v5149_v23 = vshrl.u32 %v10777_v10, 16  ;;  %v3378_v42 = vrot.slane %v3376_v37, 5  ;;  %v4173_v6 = vunpack.c.l.b16 %v4048_v54  ;;  %v10778_v37 = vld [vmem:[%s11769_s16 + $0x20] sm:$0x1] }
 0x1dd   : > { %2948 = vmatmul.bf16.gmra.mxu1 %v2800_v50  ;;  %3262 = vmatmul.bf16.gmra.mxu2 %v11479_v51  ;;  %v12866_v0 = vadd.f32 %v3220_v62, %v2967_v4  ;;  %v5139_v50 = vshll.u32 %v10776_v33, 16  ;;  %v3748_v62 = vunpack.c.l.b16 %v3361_v13  ;;  %v5134_v33 = vsel %vm11841_vm4, %v5129_v12, %v5133_v63  ;;  %v10634_v13 = vld [vmem:[%s11769_s16 + $0x2c] sm:$0x1] }
 0x1de   : > { %v1803_v26 = vpop.f32.mrf.mxu3  ;;  %v12884_v35 = vrot.slane %v3382_v52, 5  ;;  %v4174_v28 = vunpack.c.l.b16 %v4051_v61  ;;  %v5511_v10 = vunpack.c.l.b16 %v5124_v60  ;;  %v5151_v27 = vrot.slane %v5149_v23, 4 }
 0x1df   : > { %15919 = vst [vmem:[#allocation10_spill] sm:$0xff] %v12866_v0  ;;  %v1862_v51 = vadd.f32 %v1803_v26, %v12472_v40  ;;  %v5138_v26 = vrot.slane %v5136_v17, 4  ;;  %v5141_v44 = vrot.slane %v5139_v50, 5  ;;  %v3749_v0 = vunpack.c.l.b16 %v3371_v41  ;;  %v10710_v17 = vld [vmem:[%s11769_s16 + $0x24] sm:$0xe] }
 0x1e0   : > { %v3223_v18 = vpop.f32.mrf.mxu2  ;;  %v2486_v55 = vpop.f32.mrf.mxu0  ;;  %v3379_v63 = vor.u32 %v3378_v42, %v3375_v29  ;;  %v3392_v15 = vshll.u32 %v10634_v13, 16  ;;  %v3389_v32 = vor.u32 %v3388_v53, %v12884_v35  ;;  %v4205_v61 = vpack.c.b16 %v4174_v28, %v4173_v6 }
 0x1e1   : > { %v2543_v4 = vadd.f32 %v2484_v25, %v1862_v51  ;;  %v5512_v25 = vunpack.c.l.b16 %v5134_v33  ;;  %v12886_v51 = vrot.slane %v5145_v2, 5  ;;  %v5142_v50 = vor.u32 %v5141_v44, %v5138_v26  ;;  %v10635_v33 = vld [vmem:[%s11769_s16 + $0x30] sm:$0xf] }
 0x1e2   : > { %v2911_v40 = vpop.f32.mrf.mxu1  ;;  %v3780_v54 = vpack.c.b16 %v3749_v0, %v3748_v62  ;;  %v3380_v53 = vrot.slane %v3379_v63, 4  ;;  %v3390_v26 = vrot.slane %v3389_v32, 4  ;;  %v4057_v0 = vrot.slane %v10634_v13, 5  ;;  %v10779_v63 = vld [vmem:[%s11769_s16 + $0x24] sm:$0xf] }
 0x1e3   : > { %v2968_v19 = vadd.f32 %v2909_v21, %v2543_v4  ;;  %v4054_v21 = vrot.slane %v12861_v9, 5  ;;  %v5543_v2 = vpack.c.b16 %v5512_v25, %v5511_v10  ;;  %v5152_v23 = vor.u32 %v5151_v27, %v12886_v51  ;;  %v12900_v9 = vld [vmem:[%s11769_s16 + $0x34] sm:$0xf] }
 0x1e4   : > { %v5155_v4 = vshll.u32 %v10778_v37, 16  ;;  %v5143_v62 = vrot.slane %v5142_v50, 4  ;;  %v3397_v27 = vshrl.u32 %v10635_v33, 16  ;;  %v3400_v6 = vshll.u32 %v10635_v33, 16 }
 0x1e5   : > { %v12888_v12 = vadd.f32 %v3223_v18, %v2968_v19  ;;  %v3394_v19 = vrot.slane %v3392_v15, 5  ;;  %v3406_v10 = vshll.u32 %v12900_v9, 16  ;;  %v3410_v25 = vshrl.u32 %v12900_v9, 16 }
 0x1e6   : > { %v1805_v52 = vpop.f32.mrf.mxu3  ;;  %v5157_v28 = vrot.slane %v5155_v4, 5  ;;  %v3385_v13 = vsel %vm11841_vm4, %v3380_v53, %v12884_v35  ;;  %v10780_v35 = vld [vmem:[%s11769_s16 + $0x28] sm:$0xf] }
 0x1e7   : > { %15920 = vst [vmem:[#allocation11_spill] sm:$0xff] %v12888_v12  ;;  %v1863_v41 = vadd.f32 %v1805_v52, %v12487_v14  ;;  %v10726_v12 = vrot.slane %v10710_v17, 9  ;;  %v4056_v14 = vrot.slane %v4054_v21, 4  ;;  %v3395_v37 = vsel %vm11841_vm4, %v3390_v26, %v3394_v19 }
 0x1e8   : > { %v12895_v60 = vpop.f32.mrf.mxu2  ;;  %v2489_v18 = vpop.f32.mrf.mxu0  ;;  %v5148_v17 = vsel %vm11841_vm4, %v5143_v62, %v12886_v51  ;;  %v3412_v33 = vrot.slane %v3410_v25, 4  ;;  %v3750_v19 = vunpack.c.l.b16 %v3385_v13  ;;  %v5173_v26 = vshrl.u32 %v10780_v35, 16  ;;  %v10711_v13 = vld [vmem:[%s11769_s16 + $0x30] sm:$0xe] }
 0x1e9   : > { %v2544_v29 = vadd.f32 %v2486_v55, %v1863_v41  ;;  %v5153_v55 = vrot.slane %v5152_v23, 4  ;;  %v4055_v52 = vsel %vm11853_vm5, %v10726_v12, %v4054_v21  ;;  %v4058_v32 = vsel %vm11853_vm5, %v4056_v14, %v4057_v0  ;;  %v12927_v12 = vld [vmem:[%s11769_s16 + $0x38] sm:$0x1] }
 0x1ea   : > { %v2914_v42 = vpop.f32.mrf.mxu1  ;;  %v12929_v21 = vrot.slane %v3406_v10, 5  ;;  %v3751_v14 = vunpack.c.l.b16 %v3395_v37  ;;  %v4175_v0 = vunpack.c.l.b16 %v4055_v52  ;;  %v4176_v62 = vunpack.c.l.b16 %v4058_v32 }
 0x1eb   : > { %3868 = vmatmul.bf16.vlgmr.msra.gmra.mxu3 %v3780_v54  ;;  %4293 = vmatmul.bf16.vlgmr.msra.gmra.mxu0 %v4205_v61  ;;  %v12902_v44 = vadd.f32 %v2911_v40, %v2544_v29  ;;  %v11539_v40 = vld [vmem:[%s15897_s2 + $0x58] sm:$0xff]  ;;  %v3399_v54 = vrot.slane %v3397_v27, 4  ;;  %v3402_v61 = vrot.slane %v3400_v6, 5  ;;  %v5158_v4 = vsel %vm11841_vm4, %v5153_v55, %v5157_v28 }
 0x1ec   : > { %6292 = vmatpush.bf16.msra.mxu2 %v11539_v40  ;;  %v5163_v29 = vshll.u32 %v10779_v63, 16  ;;  %v5513_v27 = vunpack.c.l.b16 %v5148_v17  ;;  %v5514_v55 = vunpack.c.l.b16 %v5158_v4  ;;  %v3416_v10 = vshll.u32 %v12927_v12, 16 }
 0x1ed   : > { %5631 = vmatmul.bf16.vlgmr.msra.gmra.mxu1 %v5543_v2  ;;  %v5160_v2 = vshrl.u32 %v10779_v63, 16  ;;  %v3403_v28 = vor.u32 %v3402_v61, %v3399_v54  ;;  %v3413_v25 = vor.u32 %v3412_v33, %v12929_v21  ;;  %v5175_v37 = vrot.slane %v5173_v26, 4 }
 0x1ee   : > { %v1808_v15 = vpop.f32.mrf.mxu3  ;;  %v3781_v32 = vpack.c.b16 %v3751_v14, %v3750_v19  ;;  %v4061_v17 = vrot.slane %v12900_v9, 5  ;;  %v5544_v61 = vpack.c.b16 %v5514_v55, %v5513_v27  ;;  %v3418_v33 = vrot.slane %v3416_v10, 5  ;;  %v10782_v10 = vld [vmem:[%s11769_s16 + $0x30] sm:$0xf] }
 0x1ef   : > { %v1864_v50 = vadd.f32 %v1808_v15, %v12504_v5  ;;  %v5169_v5 = vshll.u32 %v10780_v35, 16  ;;  %v5162_v63 = vrot.slane %v5160_v2, 4  ;;  %v10781_v15 = vld [vmem:[%s11769_s16 + $0x2c] sm:$0x1]  ;;  %v3404_v2 = vrot.slane %v3403_v28, 4 }
 0x1f0   : > { %v3228_v41 = vpop.f32.mrf.mxu2  ;;  %v2491_v23 = vpop.f32.mrf.mxu0  ;;  %v5179_v26 = vshll.u32 %v10781_v15, 16  ;;  %v4063_v28 = vrot.slane %v4061_v17, 4  ;;  %v10783_v15 = vld [vmem:[%s11769_s16 + $0x34] sm:$0xf] }
 0x1f1   : > { %v2545_v53 = vadd.f32 %v2489_v18, %v1864_v50  ;;  %v5165_v18 = vrot.slane %v5163_v29, 5  ;;  %v12937_v35 = vrot.slane %v5169_v5, 5  ;;  %v10638_v50 = vld [vmem:[%s11769_s16 + $0x3c] sm:$0xf]  ;;  %v12943_v29 = vld [vmem:[%s11769_s16 + $0x40] sm:$0xf]  ;;  %v3409_v55 = vsel %vm11841_vm4, %v3404_v2, %v12929_v21 }
 0x1f2   : > { %v2916_v51 = vpop.f32.mrf.mxu1  ;;  %v3421_v9 = vshrl.u32 %v10638_v50, 16  ;;  %v12964_v2 = vld [vmem:[%s11769_s16 + $0x44] sm:$0x1] }
 0x1f3   : > { %v2970_v6 = vadd.f32 %v2914_v42, %v2545_v53  ;;  %v4206_v42 = vpack.c.b16 %v4176_v62, %v4175_v0  ;;  %v3414_v53 = vrot.slane %v3413_v25, 4  ;;  %v5166_v5 = vor.u32 %v5165_v18, %v5162_v63 }
 0x1f4   : > { %v5176_v14 = vor.u32 %v5175_v37, %v12937_v35  ;;  %v3424_v0 = vshll.u32 %v10638_v50, 16  ;;  %v3434_v62 = vshrl.u32 %v12943_v29, 16  ;;  %v3423_v37 = vrot.slane %v3421_v9, 4 }
 0x1f5   : > { %v12933_v40 = vadd.f32 %v3228_v41, %v2970_v6  ;;  %v10727_v6 = vrot.slane %v10711_v13, 9  ;;  %v3419_v25 = vsel %vm11841_vm4, %v3414_v53, %v3418_v33  ;;  %v5167_v18 = vrot.slane %v5166_v5, 4 }
 0x1f6   : > { %v1810_v52 = vpop.f32.mrf.mxu3  ;;  %v5181_v13 = vrot.slane %v5179_v26, 5  ;;  %v3426_v21 = vrot.slane %v3424_v0, 5  ;;  %v5187_v50 = vshll.u32 %v10782_v10, 16  ;;  %v5197_v33 = vshrl.u32 %v10783_v15, 16 }
 0x1f7   : > { %15921 = vst [vmem:[#allocation12_spill] sm:$0xff] %v12933_v40  ;;  %v1865_v54 = vadd.f32 %v1810_v52, %v12522_v34  ;;  %v3430_v34 = vshll.u32 %v12943_v29, 16  ;;  %v4062_v63 = vsel %vm11853_vm5, %v10727_v6, %v4061_v17  ;;  %v5193_v17 = vshll.u32 %v10783_v15, 16 }
 0x1f8   : > { %v3230_v4 = vpop.f32.mrf.mxu2  ;;  %v2494_v41 = vpop.f32.mrf.mxu0  ;;  %v3753_v6 = vunpack.c.l.b16 %v3419_v25  ;;  %v4177_v26 = vunpack.c.l.b16 %v4062_v63  ;;  %v5172_v0 = vsel %vm11841_vm4, %v5167_v18, %v12937_v35  ;;  %v5199_v63 = vrot.slane %v5197_v33, 4 }
 0x1f9   : > { %v2546_v40 = vadd.f32 %v2491_v23, %v1865_v54  ;;  %v4064_v23 = vrot.slane %v12927_v12, 5  ;;  %v3436_v12 = vrot.slane %v3434_v62, 4  ;;  %v12976_v25 = vrot.slane %v5193_v17, 5 }
 0x1fa   : > { %v2919_v19 = vpop.f32.mrf.mxu1  ;;  %v5515_v15 = vunpack.c.l.b16 %v5172_v0 }
 0x1fb   : > { %3873 = vmatmul.bf16.gmra.mxu3 %v3781_v32  ;;  %4298 = vmatmul.bf16.gmra.mxu0 %v4206_v42  ;;  %v2971_v27 = vadd.f32 %v2916_v51, %v2546_v40  ;;  %v5177_v40 = vrot.slane %v5176_v14, 4  ;;  %v12960_v32 = vrot.slane %v3430_v34, 5  ;;  %v5184_v42 = vshrl.u32 %v10782_v10, 16 }
 0x1fc   : > { %v4065_v5 = vsel %vm11853_vm5, %v4063_v28, %v4064_v23  ;;  %v3427_v34 = vor.u32 %v3426_v21, %v3423_v37  ;;  %v5189_v10 = vrot.slane %v5187_v50, 5  ;;  %v10641_v37 = vld [vmem:[%s11769_s16 + $0x48] sm:$0xf] }
 0x1fd   : > { %5636 = vmatmul.bf16.gmra.mxu1 %v5544_v61  ;;  %v12958_v51 = vadd.f32 %v3230_v4, %v2971_v27  ;;  %v3752_v4 = vunpack.c.l.b16 %v3409_v55  ;;  %v3437_v62 = vor.u32 %v3436_v12, %v12960_v32  ;;  %v3440_v27 = vshll.u32 %v12964_v2, 16 }
 0x1fe   : > { %v1813_v52 = vpop.f32.mrf.mxu3  ;;  %v5186_v55 = vrot.slane %v5184_v42, 4  ;;  %v4178_v23 = vunpack.c.l.b16 %v4065_v5 }
 0x1ff   : > { %v1866_v54 = vadd.f32 %v1813_v52, %v12536_v48  ;;  %v5182_v48 = vsel %vm11841_vm4, %v5177_v40, %v5181_v13  ;;  %v3428_v52 = vrot.slane %v3427_v34, 4  ;;  %v10712_v13 = vld [vmem:[%s11769_s16 + $0x3c] sm:$0xe]  ;;  %v4068_v40 = vrot.slane %v12943_v29, 5  ;;  %v12986_v34 = vld [vmem:[%s11769_s16 + $0x4c] sm:$0xf] }
 0x200   : > { %v3233_v61 = vpop.f32.mrf.mxu2  ;;  %v2496_v53 = vpop.f32.mrf.mxu0  ;;  %v5516_v35 = vunpack.c.l.b16 %v5182_v48  ;;  %v3438_v12 = vrot.slane %v3437_v62, 4  ;;  %v3442_v42 = vrot.slane %v3440_v27, 5  ;;  %v5190_v50 = vor.u32 %v5189_v10, %v5186_v55 }
 0x201   : > { %v2547_v14 = vadd.f32 %v2494_v41, %v1866_v54  ;;  %v10784_v41 = vld [vmem:[%s11769_s16 + $0x38] sm:$0x1]  ;;  %v3782_v17 = vpack.c.b16 %v3753_v6, %v3752_v4  ;;  %v4207_v5 = vpack.c.b16 %v4178_v23, %v4177_v26  ;;  %v10728_v48 = vrot.slane %v10712_v13, 9  ;;  %v10785_v23 = vld [vmem:[%s11769_s16 + $0x3c] sm:$0xf] }
 0x202   : > { %v2921_v9 = vpop.f32.mrf.mxu1  ;;  %v5545_v0 = vpack.c.b16 %v5516_v35, %v5515_v15  ;;  %v3445_v29 = vshrl.u32 %v10641_v37, 16  ;;  %v4070_v4 = vrot.slane %v4068_v40, 4  ;;  %v4071_v6 = vrot.slane %v12964_v2, 5  ;;  %v10786_v35 = vld [vmem:[%s11769_s16 + $0x40] sm:$0xf] }
 0x203   : > { %v2972_v28 = vadd.f32 %v2919_v19, %v2547_v14  ;;  %v5203_v19 = vshll.u32 %v10784_v41, 16  ;;  %v3443_v26 = vsel %vm11841_vm4, %v3438_v12, %v3442_v42  ;;  %v5191_v55 = vrot.slane %v5190_v50, 4  ;;  %v11538_v42 = vld [vmem:[%s15897_s2 + $0x50] sm:$0xff] }
 0x204   : > { %v3458_v15 = vshrl.u32 %v12986_v34, 16  ;;  %v4069_v2 = vsel %vm11853_vm5, %v10728_v48, %v4068_v40  ;;  %v5211_v12 = vshll.u32 %v10785_v23, 16  ;;  %6293 = vmatpush.bf16.msra.mxu2 %v11538_v42 }
 0x205   : > { %v12978_v18 = vadd.f32 %v3233_v61, %v2972_v28  ;;  %v5200_v61 = vor.u32 %v5199_v63, %v12976_v25  ;;  %v3448_v28 = vshll.u32 %v10641_v37, 16  ;;  %v5205_v10 = vrot.slane %v5203_v19, 5 }
 0x206   : > { %v1815_v21 = vpop.f32.mrf.mxu3  ;;  %v13009_v19 = vunpack.c.l.b16 %v3443_v26  ;;  %v5196_v40 = vsel %vm11841_vm4, %v5191_v55, %v12976_v25  ;;  %v5213_v55 = vrot.slane %v5211_v12, 5  ;;  %v10713_v12 = vld [vmem:[%s11769_s16 + $0x48] sm:$0xe] }
 0x207   : > { %15922 = vst [vmem:[#allocation13_spill] sm:$0xff] %v12978_v18  ;;  %v1867_v54 = vadd.f32 %v1815_v21, %v12551_v46  ;;  %v3433_v46 = vsel %vm11841_vm4, %v3428_v52, %v12960_v32  ;;  %v5201_v63 = vrot.slane %v5200_v61, 4  ;;  %v3447_v52 = vrot.slane %v3445_v29, 4 }
 0x208   : > { %v3235_v33 = vpop.f32.mrf.mxu2  ;;  %v2499_v14 = vpop.f32.mrf.mxu0  ;;  %v12998_v32 = vunpack.c.l.b16 %v3433_v46  ;;  %v3450_v13 = vrot.slane %v3448_v28, 5  ;;  %v5208_v21 = vshrl.u32 %v10785_v23, 16  ;;  %v3460_v29 = vrot.slane %v3458_v15, 4  ;;  %v10644_v23 = vld [vmem:[%s11769_s16 + $0x54] sm:$0xf] }
 0x209   : > { %v2548_v62 = vadd.f32 %v2496_v53, %v1867_v54  ;;  %v3454_v53 = vshll.u32 %v12986_v34, 16  ;;  %v5217_v54 = vshll.u32 %v10786_v35, 16  ;;  %v5206_v61 = vsel %vm11841_vm4, %v5201_v63, %v5205_v10  ;;  %v13027_v15 = vld [vmem:[%s11769_s16 + $0x58] sm:$0xf] }
 0x20a   : > { %v2924_v27 = vpop.f32.mrf.mxu1  ;;  %v3451_v25 = vor.u32 %v3450_v13, %v3447_v52  ;;  %v5210_v26 = vrot.slane %v5208_v21, 4  ;;  %v5518_v10 = vunpack.c.l.b16 %v5206_v61  ;;  %v4075_v52 = vrot.slane %v12986_v34, 5  ;;  %v10787_v13 = vld [vmem:[%s11769_s16 + $0x44] sm:$0x1] }
 0x20b   : > { %3878 = vmatmul.bf16.gmra.mxu3 %v3782_v17  ;;  %4303 = vmatmul.bf16.gmra.mxu0 %v4207_v5  ;;  %v2973_v41 = vadd.f32 %v2921_v9, %v2548_v62  ;;  %v4072_v9 = vsel %vm11853_vm5, %v4070_v4, %v4071_v6  ;;  %v5221_v17 = vshrl.u32 %v10786_v35, 16  ;;  %v13020_v48 = vrot.slane %v3454_v53, 5 }
 0x20c   : > { %v4179_v62 = vunpack.c.l.b16 %v4069_v2  ;;  %v4180_v46 = vunpack.c.l.b16 %v4072_v9  ;;  %v13024_v63 = vrot.slane %v5217_v54, 5  ;;  %v3783_v2 = vpack.c.b16 %v13009_v19, %v12998_v32 }
 0x20d   : > { %5641 = vmatmul.bf16.gmra.mxu1 %v5545_v0  ;;  %v13002_v37 = vadd.f32 %v3235_v33, %v2973_v41  ;;  %v13018_v0 = vld [vmem:[%s11769_s16 + $0x50] sm:$0x1]  ;;  %v5223_v53 = vrot.slane %v5221_v17, 4  ;;  %v3452_v21 = vrot.slane %v3451_v25, 4  ;;  %v3469_v42 = vshrl.u32 %v10644_v23, 16 }
 0x20e   : > { %v1818_v50 = vpop.f32.mrf.mxu3  ;;  %v3464_v41 = vshll.u32 %v13018_v0, 16  ;;  %v4208_v9 = vpack.c.b16 %v4180_v46, %v4179_v62  ;;  %v5214_v54 = vor.u32 %v5213_v55, %v5210_v26  ;;  %v3478_v17 = vshll.u32 %v13027_v15, 16 }
 0x20f   : > { %15923 = vst [vmem:[#allocation14_spill] sm:$0xff] %v13002_v37  ;;  %v1868_v5 = vadd.f32 %v1818_v50, %v12568_v43  ;;  %v5517_v43 = vunpack.c.l.b16 %v5196_v40  ;;  %v3472_v50 = vshll.u32 %v10644_v23, 16  ;;  %v5224_v34 = vor.u32 %v5223_v53, %v13024_v63 }
 0x210   : > { %v3238_v33 = vpop.f32.mrf.mxu2  ;;  %v2501_v28 = vpop.f32.mrf.mxu0  ;;  %v3466_v19 = vrot.slane %v3464_v41, 5  ;;  %v5227_v61 = vshll.u32 %v10787_v13, 16  ;;  %v10729_v25 = vrot.slane %v10713_v12, 9  ;;  %v3457_v55 = vsel %vm11841_vm4, %v3452_v21, %v13020_v48  ;;  %v10789_v41 = vld [vmem:[%s11769_s16 + $0x4c] sm:$0xf] }
 0x211   : > { %v2549_v4 = vadd.f32 %v2499_v14, %v1868_v5  ;;  %v3461_v14 = vor.u32 %v3460_v29, %v13020_v48  ;;  %v5546_v32 = vpack.c.b16 %v5518_v10, %v5517_v43  ;;  %v4078_v23 = vrot.slane %v13018_v0, 5 }
 0x212   : > { %v2926_v6 = vpop.f32.mrf.mxu1  ;;  %v3471_v43 = vrot.slane %v3469_v42, 4  ;;  %v3474_v10 = vrot.slane %v3472_v50, 5  ;;  %v5215_v13 = vrot.slane %v5214_v54, 4  ;;  %v5225_v12 = vrot.slane %v5224_v34, 4 }
 0x213   : > { %v2974_v35 = vadd.f32 %v2924_v27, %v2549_v4  ;;  %v3482_v27 = vshrl.u32 %v13027_v15, 16  ;;  %v3462_v46 = vrot.slane %v3461_v14, 4  ;;  %v10788_v4 = vld [vmem:[%s11769_s16 + $0x48] sm:$0xf]  ;;  %v5241_v21 = vshll.u32 %v10789_v41, 16 }
 0x214   : > { %v5232_v37 = vshrl.u32 %v10788_v4, 16  ;;  %v5235_v18 = vshll.u32 %v10788_v4, 16  ;;  %v5245_v42 = vshrl.u32 %v10789_v41, 16  ;;  %v4076_v50 = vsel %vm11853_vm5, %v10729_v25, %v4075_v52  ;;  %v10790_v41 = vld [vmem:[%s11769_s16 + $0x50] sm:$0x1] }
 0x215   : > { %v13035_v40 = vadd.f32 %v3238_v33, %v2974_v35  ;;  %v4077_v33 = vrot.slane %v4075_v52, 4  ;;  %v3484_v14 = vrot.slane %v3482_v27, 4  ;;  %v3467_v0 = vsel %vm11841_vm4, %v3462_v46, %v3466_v19 }
 0x216   : > { %v1820_v5 = vpop.f32.mrf.mxu3  ;;  %v4082_v52 = vrot.slane %v13027_v15, 5  ;;  %v5234_v34 = vrot.slane %v5232_v37, 4  ;;  %v3757_v46 = vunpack.c.l.b16 %v3467_v0  ;;  %v13072_v25 = vrot.slane %v5241_v21, 5 }
 0x217   : > { %15924 = vst [vmem:[#allocation15_spill] sm:$0xff] %v13035_v40  ;;  %v1869_v29 = vadd.f32 %v1820_v5, %v12586_v1  ;;  %v13047_v1 = vrot.slane %v3478_v17, 5  ;;  %v5229_v5 = vrot.slane %v5227_v61, 5  ;;  %v13050_v40 = vld [vmem:[%s11769_s16 + $0x5c] sm:$0x1]  ;;  %v4079_v54 = vsel %vm11853_vm5, %v4077_v33, %v4078_v23 }
 0x218   : > { %v3240_v62 = vpop.f32.mrf.mxu2  ;;  %v2504_v26 = vpop.f32.mrf.mxu0  ;;  %v3475_v17 = vor.u32 %v3474_v10, %v3471_v43  ;;  %v5237_v61 = vrot.slane %v5235_v18, 5  ;;  %v5247_v33 = vrot.slane %v5245_v42, 4  ;;  %v4182_v23 = vunpack.c.l.b16 %v4079_v54 }
 0x219   : > { %v2550_v53 = vadd.f32 %v2501_v28, %v1869_v29  ;;  %v13054_v28 = vunpack.c.l.b16 %v3457_v55  ;;  %v5230_v19 = vsel %vm11841_vm4, %v5225_v12, %v5229_v5  ;;  %v4181_v55 = vunpack.c.l.b16 %v4076_v50 }
 0x21a   : > { %v2929_v35 = vpop.f32.mrf.mxu1  ;;  %v3476_v10 = vrot.slane %v3475_v17, 4  ;;  %v5520_v37 = vunpack.c.l.b16 %v5230_v19  ;;  %v4084_v5 = vrot.slane %v4082_v52, 4  ;;  %v5238_v0 = vor.u32 %v5237_v61, %v5234_v34 }
 0x21b   : > { %3883 = vmatmul.bf16.gmra.mxu3 %v3783_v2  ;;  %4308 = vmatmul.bf16.gmra.mxu0 %v4208_v9  ;;  %v2975_v48 = vadd.f32 %v2926_v6, %v2550_v53  ;;  %v5220_v6 = vsel %vm11841_vm4, %v5215_v13, %v13024_v63  ;;  %v3485_v2 = vor.u32 %v3484_v14, %v13047_v1  ;;  %v3488_v9 = vshll.u32 %v13050_v40, 16  ;;  %v10714_v63 = vld [vmem:[%s11769_s16 + $0x54] sm:$0xe]  ;;  %v10647_v13 = vld [vmem:[%s11769_s16 + $0x60] sm:$0xf] }
 0x21c   : > { %v5519_v43 = vunpack.c.l.b16 %v5220_v6  ;;  %v13077_v14 = vld [vmem:[%s11769_s16 + $0x64] sm:$0xf]  ;;  %v10730_v12 = vrot.slane %v10714_v63, 9  ;;  %v3784_v42 = vpack.c.b16 %v3757_v46, %v13054_v28  ;;  %v5248_v50 = vor.u32 %v5247_v33, %v13072_v25 }
 0x21d   : > { %5646 = vmatmul.bf16.gmra.mxu1 %v5546_v32  ;;  %v13060_v27 = vadd.f32 %v3240_v62, %v2975_v48  ;;  %v3486_v18 = vrot.slane %v3485_v2, 4  ;;  %v4085_v48 = vrot.slane %v13050_v40, 5  ;;  %v5251_v54 = vshll.u32 %v10790_v41, 16 }
 0x21e   : > { %v1823_v32 = vpop.f32.mrf.mxu3  ;;  %v3496_v17 = vshll.u32 %v10647_v13, 16  ;;  %v3502_v6 = vshll.u32 %v13077_v14, 16  ;;  %v3506_v2 = vshrl.u32 %v13077_v14, 16  ;;  %v4209_v19 = vpack.c.b16 %v4182_v23, %v4181_v55 }
 0x21f   : > { %v1870_v29 = vadd.f32 %v1823_v32, %v12600_v16  ;;  %v3490_v16 = vrot.slane %v3488_v9, 5  ;;  %v10791_v9 = vld [vmem:[%s11769_s16 + $0x54] sm:$0xf]  ;;  %v3481_v40 = vsel %vm11841_vm4, %v3476_v10, %v13047_v1  ;;  %v4083_v34 = vsel %vm11853_vm5, %v10730_v12, %v4082_v52  ;;  %v13100_v52 = vld [vmem:[%s11769_s16 + $0x68] sm:$0x1] }
 0x220   : > { %v3243_v62 = vpop.f32.mrf.mxu2  ;;  %v2506_v4 = vpop.f32.mrf.mxu0  ;;  %v4086_v61 = vsel %vm11853_vm5, %v4084_v5, %v4085_v48  ;;  %v5239_v46 = vrot.slane %v5238_v0, 4  ;;  %v5249_v33 = vrot.slane %v5248_v50, 4  ;;  %v5253_v55 = vrot.slane %v5251_v54, 5  ;;  %v10792_v5 = vld [vmem:[%s11769_s16 + $0x58] sm:$0xf] }
 0x221   : > { %v2551_v53 = vadd.f32 %v2504_v26, %v1870_v29  ;;  %v3493_v26 = vshrl.u32 %v10647_v13, 16  ;;  %v5547_v29 = vpack.c.b16 %v5520_v37, %v5519_v43  ;;  %v3491_v28 = vsel %vm11841_vm4, %v3486_v18, %v3490_v16 }
 0x222   : > { %v2931_v15 = vpop.f32.mrf.mxu1  ;;  %v5256_v23 = vshrl.u32 %v10791_v9, 16  ;;  %v3498_v10 = vrot.slane %v3496_v17, 5  ;;  %v13097_v41 = vrot.slane %v3502_v6, 5  ;;  %v13102_v16 = vunpack.c.l.b16 %v3481_v40 }
 0x223   : > { %v2976_v21 = vadd.f32 %v2929_v35, %v2551_v53  ;;  %v3495_v43 = vrot.slane %v3493_v26, 4  ;;  %v3508_v53 = vrot.slane %v3506_v2, 4  ;;  %v13104_v13 = vunpack.c.l.b16 %v3491_v28  ;;  %v11537_v2 = vld [vmem:[%s15897_s2 + $0x48] sm:$0xff] }
 0x224   : > { %v4184_v12 = vunpack.c.l.b16 %v4086_v61  ;;  %v5244_v0 = vsel %vm11841_vm4, %v5239_v46, %v13072_v25  ;;  %v3512_v26 = vshll.u32 %v13100_v52, 16  ;;  %v4089_v25 = vrot.slane %v13077_v14, 5  ;;  %v10650_v28 = vld [vmem:[%s11769_s16 + $0x6c] sm:$0xf]  ;;  %v10794_v14 = vld [vmem:[%s11769_s16 + $0x60] sm:$0xf]  ;;  %6294 = vmatpush.bf16.msra.mxu2 %v11537_v2 }
 0x225   : > { %v13085_v32 = vadd.f32 %v3243_v62, %v2976_v21  ;;  %v5259_v21 = vshll.u32 %v10791_v9, 16  ;;  %v3499_v50 = vor.u32 %v3498_v10, %v3495_v43  ;;  %v3509_v54 = vor.u32 %v3508_v53, %v13097_v41 }
 0x226   : > { %v1825_v35 = vpop.f32.mrf.mxu3  ;;  %v5265_v17 = vshll.u32 %v10792_v5, 16  ;;  %v5269_v6 = vshrl.u32 %v10792_v5, 16  ;;  %v13126_v40 = vunpack.c.l.b16 %v5244_v0  ;;  %v3514_v10 = vrot.slane %v3512_v26, 5 }
 0x227   : > { %v1871_v62 = vadd.f32 %v1825_v35, %v12615_v31  ;;  %v4183_v31 = vunpack.c.l.b16 %v4083_v34  ;;  %v13132_v34 = vld [vmem:[%s11769_s16 + $0x70] sm:$0xf]  ;;  %v3500_v43 = vrot.slane %v3499_v50, 4  ;;  %v3510_v5 = vrot.slane %v3509_v54, 4 }
 0x228   : > { %v3245_v63 = vpop.f32.mrf.mxu2  ;;  %v2509_v1 = vpop.f32.mrf.mxu0  ;;  %v3526_v53 = vshll.u32 %v13132_v34, 16  ;;  %v13140_v2 = vrot.slane %v5265_v17, 5  ;;  %v4092_v50 = vrot.slane %v13100_v52, 5 }
 0x229   : > { %v2552_v37 = vadd.f32 %v2506_v4, %v1871_v62  ;;  %v5254_v4 = vsel %vm11841_vm4, %v5249_v33, %v5253_v55  ;;  %v10715_v62 = vld [vmem:[%s11769_s16 + $0x60] sm:$0xe]  ;;  %v3517_v33 = vshrl.u32 %v10650_v28, 16  ;;  %v3520_v55 = vshll.u32 %v10650_v28, 16 }
 0x22a   : > { %v2934_v18 = vpop.f32.mrf.mxu1  ;;  %v13128_v35 = vunpack.c.l.b16 %v5254_v4  ;;  %v10731_v0 = vrot.slane %v10715_v62, 9  ;;  %v4091_v4 = vrot.slane %v4089_v25, 4 }
 0x22b   : > { %3888 = vmatmul.bf16.gmra.mxu3 %v3784_v42  ;;  %4313 = vmatmul.bf16.gmra.mxu0 %v4209_v19  ;;  %v2977_v48 = vadd.f32 %v2931_v15, %v2552_v37  ;;  %v13114_v42 = vrot.slane %v5256_v23, 4  ;;  %v3530_v37 = vshrl.u32 %v13132_v34, 16  ;;  %v3519_v26 = vrot.slane %v3517_v33, 4 }
 0x22c   : > { %v3522_v19 = vrot.slane %v3520_v55, 5  ;;  %v5548_v55 = vpack.c.b16 %v13128_v35, %v13126_v40  ;;  %v13168_v40 = vsel %vm11853_vm5, %v10731_v0, %v4089_v25  ;;  %v13172_v35 = vsel %vm11853_vm5, %v4091_v4, %v4092_v50 }
 0x22d   : > { %5651 = vmatmul.bf16.gmra.mxu1 %v5547_v29  ;;  %v13116_v15 = vadd.f32 %v3245_v63, %v2977_v48  ;;  %v13124_v29 = vpack.c.b16 %v4184_v12, %v4183_v31  ;;  %v5261_v63 = vrot.slane %v5259_v21, 5  ;;  %v5283_v48 = vshll.u32 %v10794_v14, 16  ;;  %v10793_v21 = vld [vmem:[%s11769_s16 + $0x5c] sm:$0x1] }
 0x22e   : > { %v1828_v9 = vpop.f32.mrf.mxu3  ;;  %v3532_v62 = vrot.slane %v3530_v37, 4  ;;  %v3523_v37 = vor.u32 %v3522_v19, %v3519_v26  ;;  %v4096_v19 = vrot.slane %v13132_v34, 5  ;;  %v15926_v0 = vpack.c.b16 %v13104_v13, %v13102_v16 }
 0x22f   : > { %15925 = vst [vmem:[#allocation16_spill] sm:$0xff] %v13116_v15  ;;  %v1872_v61 = vadd.f32 %v1828_v9, %v12500_v39  ;;  %v5280_v39 = vshrl.u32 %v10794_v14, 16  ;;  %v5271_v9 = vrot.slane %v5269_v6, 4  ;;  %v10795_v15 = vld [vmem:[%s11769_s16 + $0x64] sm:$0xf]  ;;  %v5262_v54 = vor.u32 %v5261_v63, %v13114_v42 }
 0x230   : > { %v3248_v46 = vpop.f32.mrf.mxu2  ;;  %v2511_v23 = vpop.f32.mrf.mxu0  ;;  %v13151_v14 = vrot.slane %v3526_v53, 5  ;;  %v5285_v6 = vrot.slane %v5283_v48, 5  ;;  %v5275_v42 = vshll.u32 %v10793_v21, 16  ;;  %v5289_v63 = vshll.u32 %v10795_v15, 16 }
 0x231   : > { %v2553_v31 = vadd.f32 %v2509_v1, %v1872_v61  ;;  %v3505_v1 = vsel %vm11841_vm4, %v3500_v43, %v13097_v41  ;;  %v13149_v61 = vld [vmem:[%s11769_s16 + $0x74] sm:$0x1]  ;;  %v5282_v52 = vrot.slane %v5280_v39, 4  ;;  %v5272_v41 = vor.u32 %v5271_v9, %v13140_v2  ;;  %v10716_v9 = vld [vmem:[%s11769_s16 + $0x6c] sm:$0xe] }
 0x232   : > { %v2936_v12 = vpop.f32.mrf.mxu1  ;;  %v3533_v39 = vor.u32 %v3532_v62, %v13151_v14  ;;  %v5263_v21 = vrot.slane %v5262_v54, 4  ;;  %v5293_v25 = vshrl.u32 %v10795_v15, 16  ;;  %v3524_v50 = vrot.slane %v3523_v37, 4  ;;  %v13197_v37 = vld [vmem:[%s11769_s16 + $0x7c] sm:$0xf] }
 0x233   : > { %v2978_v28 = vadd.f32 %v2934_v18, %v2553_v31  ;;  %v3515_v18 = vsel %vm11841_vm4, %v3510_v5, %v3514_v10  ;;  %v3536_v10 = vshll.u32 %v13149_v61, 16  ;;  %v5286_v26 = vor.u32 %v5285_v6, %v5282_v52 }
 0x234   : > { %v13164_v5 = vunpack.c.l.b16 %v3515_v18  ;;  %v5277_v18 = vrot.slane %v5275_v42, 5  ;;  %v3534_v34 = vrot.slane %v3533_v39, 4  ;;  %v10732_v62 = vrot.slane %v10716_v9, 9 }
 0x235   : > { %v13153_v17 = vadd.f32 %v3248_v46, %v2978_v28  ;;  %v13161_v46 = vunpack.c.l.b16 %v3505_v1  ;;  %v10796_v28 = vld [vmem:[%s11769_s16 + $0x68] sm:$0x1]  ;;  %v5273_v1 = vrot.slane %v5272_v41, 4  ;;  %v3538_v54 = vrot.slane %v3536_v10, 5 }
 0x236   : > { %v1830_v33 = vpop.f32.mrf.mxu3  ;;  %v5295_v52 = vrot.slane %v5293_v25, 4  ;;  %v5299_v6 = vshll.u32 %v10796_v28, 16  ;;  %v4098_v41 = vrot.slane %v4096_v19, 4  ;;  %v4099_v16 = vrot.slane %v13149_v61, 5 }
 0x237   : > { %v1873_v43 = vadd.f32 %v1830_v33, %v12519_v30  ;;  %v13178_v33 = vrot.slane %v5289_v63, 5  ;;  %v5287_v13 = vrot.slane %v5286_v26, 4  ;;  %v5268_v42 = vsel %vm11841_vm4, %v5263_v21, %v13140_v2 }
 0x238   : > { %v3250_v53 = vpop.f32.mrf.mxu2  ;;  %v2514_v31 = vpop.f32.mrf.mxu0  ;;  %v5301_v28 = vrot.slane %v5299_v6, 5  ;;  %v3554_v2 = vshrl.u32 %v13197_v37, 16 }
 0x239   : > { %v2554_v30 = vadd.f32 %v2511_v23, %v1873_v43  ;;  %v4185_v23 = vunpack.c.l.b16 %v13168_v40  ;;  %v5296_v63 = vor.u32 %v5295_v52, %v13178_v33  ;;  %v10653_v43 = vld [vmem:[%s11769_s16 + $0x78] sm:$0xf] }
 0x23a   : > { %v2939_v48 = vpop.f32.mrf.mxu1  ;;  %v3541_v40 = vshrl.u32 %v10653_v43, 16  ;;  %v3544_v39 = vshll.u32 %v10653_v43, 16 }
 0x23b   : > { %3893 = vmatmul.bf16.gmra.mxu3 %v15926_v0  ;;  %4318 = vmatmul.bf16.gmra.mxu0 %v13124_v29  ;;  %v2979_v4 = vadd.f32 %v2936_v12, %v2554_v30  ;;  %v4186_v12 = vunpack.c.l.b16 %v13172_v35  ;;  %v3550_v35 = vshll.u32 %v13197_v37, 16  ;;  %v5297_v9 = vrot.slane %v5296_v63, 4 }
 0x23c   : > { %v3546_v25 = vrot.slane %v3544_v39, 5  ;;  %v3539_v63 = vsel %vm11841_vm4, %v3534_v34, %v3538_v54 }
 0x23d   : > { %5656 = vmatmul.bf16.gmra.mxu1 %v5548_v55  ;;  %v13185_v15 = vadd.f32 %v3250_v53, %v2979_v4  ;;  %v5278_v55 = vsel %vm11841_vm4, %v5273_v1, %v5277_v18  ;;  %v10797_v53 = vld [vmem:[%s11769_s16 + $0x6c] sm:$0xf]  ;;  %v3543_v18 = vrot.slane %v3541_v40, 4  ;;  %v5523_v4 = vunpack.c.l.b16 %v5268_v42 }
 0x23e   : > { %v1833_v29 = vpop.f32.mrf.mxu3  ;;  %v5304_v21 = vshrl.u32 %v10797_v53, 16  ;;  %v5307_v0 = vshll.u32 %v10797_v53, 16  ;;  %v5524_v52 = vunpack.c.l.b16 %v5278_v55  ;;  %v13210_v43 = vrot.slane %v3550_v35, 5  ;;  %v10799_v35 = vld [vmem:[%s11769_s16 + $0x74] sm:$0x1] }
 0x23f   : > { %v1874_v10 = vadd.f32 %v1833_v29, %v12532_v49  ;;  %v3786_v49 = vpack.c.b16 %v13164_v5, %v13161_v46  ;;  %v3529_v29 = vsel %vm11841_vm4, %v3524_v50, %v13151_v14  ;;  %v4097_v53 = vsel %vm11853_vm5, %v10732_v62, %v4096_v19 }
 0x240   : > { %v3253_v61 = vpop.f32.mrf.mxu2  ;;  %v2516_v30 = vpop.f32.mrf.mxu0  ;;  %v4100_v46 = vsel %vm11853_vm5, %v4098_v41, %v4099_v16  ;;  %v5292_v5 = vsel %vm11841_vm4, %v5287_v13, %v13178_v33  ;;  %v5302_v14 = vsel %vm11841_vm4, %v5297_v9, %v5301_v28  ;;  %v3547_v54 = vor.u32 %v3546_v25, %v3543_v18 }
 0x241   : > { %v2555_v26 = vadd.f32 %v2514_v31, %v1874_v10  ;;  %v3556_v31 = vrot.slane %v3554_v2, 4  ;;  %v10798_v10 = vld [vmem:[%s11769_s16 + $0x70] sm:$0xf]  ;;  %v5306_v34 = vrot.slane %v5304_v21, 4  ;;  %v5309_v42 = vrot.slane %v5307_v0, 5 }
 0x242   : > { %v2941_v1 = vpop.f32.mrf.mxu1  ;;  %v4211_v19 = vpack.c.b16 %v4186_v12, %v4185_v23  ;;  %v5549_v62 = vpack.c.b16 %v5524_v52, %v5523_v4  ;;  %v13227_v40 = vunpack.c.l.b16 %v3529_v29  ;;  %v5313_v41 = vshll.u32 %v10798_v10, 16  ;;  %v10717_v0 = vld [vmem:[%s11769_s16 + $0x78] sm:$0xe] }
 0x243   : > { %v2980_v6 = vadd.f32 %v2939_v48, %v2555_v26  ;;  %v13223_v48 = vld [vmem:[%s11769_s16 + $0x80] sm:$0x1]  ;;  %v13230_v13 = vunpack.c.l.b16 %v3539_v63  ;;  %v3557_v39 = vor.u32 %v3556_v31, %v13210_v43  ;;  %v4187_v28 = vunpack.c.l.b16 %v4097_v53 }
 0x244   : > { %v4188_v2 = vunpack.c.l.b16 %v4100_v46  ;;  %v13235_v21 = vunpack.c.l.b16 %v5292_v5  ;;  %v13237_v23 = vunpack.c.l.b16 %v5302_v14  ;;  %v3548_v18 = vrot.slane %v3547_v54, 4  ;;  %v11536_v14 = vld [vmem:[%s15897_s2 + $0x40] sm:$0xff] }
 0x245   : > { %v13225_v50 = vadd.f32 %v3253_v61, %v2980_v6  ;;  %v3560_v61 = vshll.u32 %v13223_v48, 16  ;;  %v5310_v25 = vor.u32 %v5309_v42, %v5306_v34  ;;  %v13241_v4 = vrot.slane %v5313_v41, 5  ;;  %6295 = vmatpush.bf16.msra.mxu2 %v11536_v14 }
 0x246   : > { %v1835_v55 = vpop.f32.mrf.mxu3  ;;  %v5317_v52 = vshrl.u32 %v10798_v10, 16  ;;  %v5323_v29 = vshll.u32 %v10799_v35, 16  ;;  %v13245_v6 = vadd.f32 %v12776_v59, %v12785_v57  ;;  %v13247_v31 = vrot.slane %v3557_v39, 4 }
 0x247   : > { %v1875_v16 = vadd.f32 %v1835_v55, %v12548_v38  ;;  %v4103_v38 = vrot.slane %v13197_v37, 5  ;;  %v11688_v53 = vmov 0   ;;  %v13254_v10 = vpack.c.b16 %v4188_v2, %v4187_v28 }
 0x248   : > { %v3255_v33 = vpop.f32.mrf.mxu2  ;;  %v2519_v9 = vpop.f32.mrf.mxu0  ;;  %4474 = vst [vmem:[#allocation2] sm:$0xf] %v11688_v53  ;;  %v5319_v57 = vrot.slane %v5317_v52, 4  ;;  %v4106_v5 = vrot.slane %v13223_v48, 5  ;;  %v3553_v34 = vsel %vm11841_vm4, %v3548_v18, %v13210_v43  ;;  %v13269_v42 = vrot.slane %v5310_v25, 4 }
 0x249   : > { %v2556_v12 = vadd.f32 %v2516_v30, %v1875_v16  ;;  %v13249_v30 = vrot.slane %v3560_v61, 5  ;;  %4475 = vst [vmem:[#allocation2 + $0x4] sm:$0xf] %v11688_v53  ;;  %v4105_v46 = vrot.slane %v4103_v38, 4  ;;  %v10800_v61 = vld [vmem:[%s11769_s16 + $0x78] sm:$0xf]  ;;  %v13291_v14 = vunpack.c.l.b16 %v3553_v34 }
 0x24a   : > { %v2944_v26 = vpop.f32.mrf.mxu1  ;;  %4476 = vst [vmem:[#allocation2 + $0x8] sm:$0x1] %v11688_v53  ;;  %v5320_v55 = vor.u32 %v5319_v57, %v13241_v4  ;;  %v5331_v52 = vshll.u32 %v10800_v61, 16  ;;  %v10718_v34 = vld [vmem:[%s11769_s16 + $0x84] sm:$0xe] }
 0x24b   : > { %3898 = vmatmul.bf16.gmra.mxu3 %v3786_v49  ;;  %4323 = vmatmul.bf16.gmra.mxu0 %v4211_v19  ;;  %v2981_v63 = vadd.f32 %v2941_v1, %v2556_v12  ;;  %v10733_v49 = vrot.slane %v10717_v0, 9  ;;  %v13272_v19 = vrot.slane %v5323_v29, 5  ;;  %v3563_v16 = vsel %vm11841_vm4, %v13247_v31, %v13249_v30  ;;  %4478 = vst [vmem:[#allocation2 + $0xcc] sm:$0xf] %v11688_v53 }
 0x24c   : > { %v5321_v29 = vrot.slane %v5320_v55, 4  ;;  %4479 = vst [vmem:[#allocation2 + $0xd0] sm:$0xf] %v11688_v53 }
 0x24d   : > { %5661 = vmatmul.bf16.gmra.mxu1 %v5549_v62  ;;  %v13259_v1 = vadd.f32 %v3255_v33, %v2981_v63  ;;  %v10656_v62 = vld [vmem:[%s11769_s16 + $0x84] sm:$0xf]  ;;  %v13281_v33 = vld [vmem:[%s11769_s16 + $0x88] sm:$0xf]  ;;  %v13287_v63 = vld [vmem:[%s11769_s16 + $0x8c] sm:$0x1] }
 0x24e   : > { %v1838_v54 = vpop.f32.mrf.mxu3  ;;  %v3565_v43 = vshrl.u32 %v10656_v62, 16  ;;  %v3568_v39 = vshll.u32 %v10656_v62, 16  ;;  %v3574_v28 = vshll.u32 %v13281_v33, 16  ;;  %v3578_v2 = vshrl.u32 %v13281_v33, 16  ;;  %4480 = vst [vmem:[#allocation2 + $0xd4] sm:$0x1] %v11688_v53 }
 0x24f   : > { %v1876_v48 = vadd.f32 %v1838_v54, %v12564_v8  ;;  %v5328_v8 = vshrl.u32 %v10800_v61, 16  ;;  %v3584_v62 = vshll.u32 %v13287_v63, 16  ;;  %v4113_v53 = vrot.slane %v13287_v63, 5 }
 0x250   : > { %v3258_v41 = vpop.f32.mrf.mxu2  ;;  %v2521_v35 = vpop.f32.mrf.mxu0  ;;  %v3567_v25 = vrot.slane %v3565_v43, 4  ;;  %v3570_v0 = vrot.slane %v3568_v39, 5  ;;  %v13289_v31 = vrot.slane %v3574_v28, 5  ;;  %v3580_v30 = vrot.slane %v3578_v2, 4  ;;  %v10801_v43 = vld [vmem:[%s11769_s16 + $0x7c] sm:$0xf] }
 0x251   : > { %v2557_v12 = vadd.f32 %v2519_v9, %v1876_v48  ;;  %v4104_v9 = vsel %vm11853_vm5, %v10733_v49, %v4103_v38  ;;  %v5330_v55 = vrot.slane %v5328_v8, 4  ;;  %v5333_v39 = vrot.slane %v5331_v52, 5  ;;  %v4487_v49 = vld [vmem:[#allocation2 + $0xc] sm:$0x1] }
 0x252   : > { %v2946_v18 = vpop.f32.mrf.mxu1  ;;  %v3571_v54 = vor.u32 %v3570_v0, %v3567_v25  ;;  %v3581_v48 = vor.u32 %v3580_v30, %v13289_v31  ;;  %v4107_v28 = vsel %vm11853_vm5, %v4105_v46, %v4106_v5  ;;  %v15927_v38 = vmov 0  ;;  %v10802_v0 = vld [vmem:[%s11769_s16 + $0x80] sm:$0x1] }
 0x253   : > { %v2982_v57 = vadd.f32 %v2944_v26, %v2557_v12  ;;  %v5316_v26 = vsel %vm11841_vm4, %v13269_v42, %v13241_v4  ;;  %v15928_v38 = vsel %vm13308_vm8, 4294967295, %v15927_v38  ;;  %v5326_v46 = vsel %vm11841_vm4, %v5321_v29, %v13272_v19 }
 0x254   : > { %15929 = vst [vmem:[#allocation17_spill] sm:$0xff] %v15928_v38  ;;  %v4488_v5 = vsel %vm13308_vm8, 0, %v4487_v49  ;;  %v3572_v2 = vrot.slane %v3571_v54, 4  ;;  %v4110_v4 = vrot.slane %v13281_v33, 5  ;;  %v13321_v8 = vunpack.c.l.b16 %v3563_v16  ;;  %v4484_v54 = vld [vmem:[#allocation2] sm:$0x1] }
 0x255   : > { %v13298_v61 = vadd.f32 %v3258_v41, %v2982_v57  ;;  %4489 = vst [vmem:[#allocation2 + $0xc] sm:$0x1] %v4488_v5  ;;  %v3582_v12 = vrot.slane %v3581_v48, 4  ;;  %v3586_v25 = vrot.slane %v3584_v62, 5  ;;  %v4189_v19 = vunpack.c.l.b16 %v4104_v9  ;;  %v4540_v9 = vld [vmem:[#allocation2 + $0x8] sm:$0x1] }
 0x256   : > { %v1840_v41 = vpop.f32.mrf.mxu3  ;;  %v4190_v29 = vunpack.c.l.b16 %v4107_v28  ;;  %v5334_v57 = vor.u32 %v5333_v39, %v5330_v55  ;;  %v5337_v49 = vshll.u32 %v10801_v43, 16  ;;  %v13327_v37 = vunpack.c.l.b16 %v5316_v26  ;;  %v4490_v5 = vld [vmem:[#allocation2 + $0x18] sm:$0x1] }
 0x257   : > { %v1877_v42 = vadd.f32 %v1840_v41, %v12583_v7  ;;  %v13329_v7 = vunpack.c.l.b16 %v5326_v46  ;;  %v15931_v16 = vmov 0  ;;  %v10734_v62 = vrot.slane %v10718_v34, 9 }
 0x258   : > { %v2524_v52 = vpop.f32.mrf.mxu0  ;;  %v13324_v30 = vpop.f32.mrf.mxu2  ;;  %v15932_v16 = vsel %vm13333_vm10, 4294967295, %v15931_v16  ;;  %v3577_v48 = vsel %vm11841_vm4, %v3572_v2, %v13289_v31  ;;  %v5339_v55 = vrot.slane %v5337_v49, 5  ;;  %v5341_v39 = vshrl.u32 %v10801_v43, 16  ;;  %v5713_v31 = vld [vmem:[#allocation2 + $0x4] sm:$0xf] }
 0x259   : > { %15930 = vst [vmem:[#allocation18_spill] sm:$0xff] %v13324_v30  ;;  %v2558_v33 = vadd.f32 %v2521_v35, %v1877_v42  ;;  %v4112_v35 = vrot.slane %v4110_v4, 4  ;;  %v15934_v28 = vpack.c.b16 %v13230_v13, %v13227_v40  ;;  %v3587_v34 = vsel %vm11841_vm4, %v3582_v12, %v3586_v25 }
 0x25a   : > { %v2949_v59 = vpop.f32.mrf.mxu1  ;;  %15933 = vst [vmem:[#allocation19_spill] sm:$0xff] %v15932_v16  ;;  %v4485_v41 = vsel %vm13308_vm8, 0, %v4484_v54  ;;  %v15936_v43 = vpack.c.b16 %v13237_v23, %v13235_v21  ;;  %v5335_v46 = vrot.slane %v5334_v57, 4  ;;  %v5343_v40 = vrot.slane %v5341_v39, 4  ;;  %v4543_v23 = vld [vmem:[#allocation2 + $0x14] sm:$0x1] }
 0x25b   : > { %3903 = vmatmul.bf16.gmra.mxu3 %v15934_v28  ;;  %4328 = vmatmul.bf16.gmra.mxu0 %v13254_v10  ;;  %v13345_v26 = vadd.f32 %v2946_v18, %v2558_v33  ;;  %v5347_v13 = vshll.u32 %v10802_v0, 16  ;;  %4486 = vst [vmem:[#allocation2] sm:$0x1] %v4485_v41  ;;  %v4541_v10 = vsel %vm13333_vm10, 0, %v4540_v9  ;;  %v13359_v63 = vpack.c.b16 %v4190_v29, %v4189_v19  ;;  %v10659_v54 = vld [vmem:[%s11769_s16 + $0x90] sm:$0xf] }
 0x25c   : > { %v13363_v2 = vunpack.c.l.b16 %v3577_v48  ;;  %4542 = vst [vmem:[#allocation2 + $0x8] sm:$0x1] %v4541_v10  ;;  %v13367_v42 = vsel %vm11853_vm5, %v10734_v62, %v4110_v4  ;;  %v5344_v12 = vor.u32 %v5343_v40, %v5339_v55  ;;  %v5786_v25 = vshll.u32 %v5713_v31, 16  ;;  %v13380_v33 = vld [vmem:[%s11769_s16 + $0x94] sm:$0xf] }
 0x25d   : > { %15935 = vst [vmem:[#allocation20_spill] sm:$0xff] %v13345_v26  ;;  %5666 = vmatmul.bf16.gmra.mxu1 %v15936_v43  ;;  %v5790_v0 = vshrl.u32 %v5713_v31, 16  ;;  %v4544_v19 = vsel %vm13333_vm10, 0, %v4543_v23  ;;  %v13372_v29 = vunpack.c.l.b16 %v3587_v34  ;;  %v13376_v49 = vsel %vm11853_vm5, %v4112_v35, %v4113_v53 }
 0x25e   : > { %v1843_v21 = vpop.f32.mrf.mxu3  ;;  %4545 = vst [vmem:[#allocation2 + $0x14] sm:$0x1] %v4544_v19  ;;  %v5340_v4 = vsel %vm11841_vm4, %v5335_v46, %v5339_v55  ;;  %v5345_v62 = vrot.slane %v5344_v12, 4  ;;  %v5349_v48 = vrot.slane %v5347_v13, 5  ;;  %v3589_v41 = vshrl.u32 %v10659_v54, 16 }
 0x25f   : > { %v1878_v57 = vadd.f32 %v1843_v21, %v12596_v22  ;;  %v13384_v22 = vrot.slane %v5786_v25, 5  ;;  %v5792_v34 = vrot.slane %v5790_v0, 4  ;;  %v3592_v31 = vshll.u32 %v10659_v54, 16  ;;  %v13394_v21 = vld [vmem:[%s11769_s16 + $0x98] sm:$0x1] }
 0x260   : > { %v2526_v9 = vpop.f32.mrf.mxu0  ;;  %v3263_v35 = vpop.f32.mrf.mxu2  ;;  %v4191_v53 = vunpack.c.l.b16 %v13367_v42  ;;  %v4192_v43 = vunpack.c.l.b16 %v13376_v49  ;;  %v3598_v40 = vshll.u32 %v13380_v33, 16  ;;  %v3602_v10 = vshrl.u32 %v13380_v33, 16 }
 0x261   : > { %v2559_v39 = vadd.f32 %v2524_v52, %v1878_v57  ;;  %v13390_v46 = vunpack.c.l.b16 %v5340_v4  ;;  %v5793_v52 = vor.u32 %v5792_v34, %v13384_v22  ;;  %v3591_v23 = vrot.slane %v3589_v41, 4  ;;  %v10719_v4 = vld [vmem:[%s11769_s16 + $0x90] sm:$0xe] }
 0x262   : > { %v2951_v28 = vpop.f32.mrf.mxu1  ;;  %v5712_v13 = vld [vmem:[#allocation2] sm:$0xf]  ;;  %v3594_v42 = vrot.slane %v3592_v31, 5  ;;  %v3600_v57 = vrot.slane %v3598_v40, 5  ;;  %v5350_v49 = vsel %vm11841_vm4, %v5345_v62, %v5349_v48  ;;  %v3604_v26 = vrot.slane %v3602_v10, 4 }
 0x263   : > { %v2984_v55 = vadd.f32 %v2949_v59, %v2559_v39  ;;  %v5760_v12 = vld [vmem:[#allocation2 + $0x8] sm:$0x1]  ;;  %v5777_v25 = vshrl.u32 %v5712_v13, 16  ;;  %v5780_v0 = vshll.u32 %v5712_v13, 16  ;;  %v5794_v54 = vrot.slane %v5793_v52, 4 }
 0x264   : > { %v5796_v59 = vshll.u32 %v5760_v12, 16  ;;  %v3595_v30 = vor.u32 %v3594_v42, %v3591_v23  ;;  %v4491_v31 = vsel %vm13308_vm8, 0, %v4490_v5  ;;  %v13405_v62 = vunpack.c.l.b16 %v5350_v49 }
 0x265   : > { %v13396_v19 = vadd.f32 %v3263_v35, %v2984_v55  ;;  %v5779_v18 = vrot.slane %v5777_v25, 4  ;;  %v5782_v34 = vrot.slane %v5780_v0, 5  ;;  %v3608_v35 = vshll.u32 %v13394_v21, 16  ;;  %4492 = vst [vmem:[#allocation2 + $0x18] sm:$0x1] %v4491_v31 }
 0x266   : > { %v1845_v39 = vpop.f32.mrf.mxu3  ;;  %v5798_v40 = vrot.slane %v5796_v59, 5  ;;  %v3596_v13 = vrot.slane %v3595_v30, 4  ;;  %v3605_v52 = vor.u32 %v3604_v26, %v3600_v57  ;;  %v10735_v5 = vrot.slane %v10719_v4, 9  ;;  %v10803_v59 = vld [vmem:[%s11769_s16 + $0x84] sm:$0xf] }
 0x267   : > { %v1879_v41 = vadd.f32 %v1845_v39, %v12612_v36  ;;  %v5783_v48 = vor.u32 %v5782_v34, %v5779_v18  ;;  %v3610_v10 = vrot.slane %v3608_v35, 5  ;;  %v4117_v49 = vrot.slane %v13380_v33, 5 }
 0x268   : > { %v4294_v55 = vpop.f32.mrf.mxu0  ;;  %v5799_v36 = vsel %vm11841_vm4, %v5794_v54, %v5798_v40  ;;  %v3601_v0 = vsel %vm11841_vm4, %v3596_v13, %v3600_v57  ;;  %v3606_v42 = vrot.slane %v3605_v52, 4  ;;  %v13417_v30 = vadd.f32 %v12895_v60, %v12902_v44  ;;  %v10804_v54 = vld [vmem:[%s11769_s16 + $0x88] sm:$0xf]  ;;  %v13451_v40 = vld [vmem:[%s15899_s4] ss:$0 sm:$0xff] }
 0x269   : > { %v2560_v12 = vadd.f32 %v2526_v9, %v1879_v41  ;;  %v5784_v25 = vrot.slane %v5783_v48, 4  ;;  %v15938_v26 = vpack.c.b16 %v13321_v8, %v13291_v14  ;;  %v3789_v9 = vpack.c.b16 %v13372_v29, %v13363_v2  ;;  %v10662_v52 = vld [vmem:[%s11769_s16 + $0x9c] sm:$0xf] }
 0x26a   : > { %v13407_v23 = vpop.f32.mrf.mxu1  ;;  %v6177_v57 = vunpack.c.l.b16 %v5799_v36  ;;  %v15939_v33 = vpack.c.b16 %v13329_v7, %v13327_v37  ;;  %v13431_v4 = vpack.c.b16 %v4192_v43, %v4191_v53  ;;  %v5552_v60 = vpack.c.b16 %v13405_v62, %v13390_v46  ;;  %v10805_v7 = vld [vmem:[%s11769_s16 + $0x8c] sm:$0x1]  ;;  %v4546_v43 = vld [vmem:[#allocation2 + $0x20] sm:$0x1] }
 0x26b   : > { %15937 = vst [vmem:[#allocation21_spill] sm:$0xff] %v13407_v23  ;;  %3908 = vmatmul.bf16.gmra.mxu3 %v15938_v26  ;;  %4333 = vmatmul.bf16.gmra.mxu0 %v13359_v63  ;;  %v13423_v18 = vadd.f32 %v2951_v28, %v2560_v12  ;;  %v5789_v44 = vsel %vm11841_vm4, %v5784_v25, %v13384_v22  ;;  %v13438_v14 = vunpack.c.l.b16 %v3601_v0  ;;  %v5352_v28 = vshrl.u32 %v10803_v59, 16 }
 0x26c   : > { %v6176_v8 = vunpack.c.l.b16 %v5789_v44  ;;  %v3611_v63 = vsel %vm11841_vm4, %v3606_v42, %v3610_v10  ;;  %v13444_v37 = vsel %vm11853_vm5, %v10735_v5, %v4117_v49  ;;  %v4119_v39 = vrot.slane %v4117_v49, 4 }
 0x26d   : > { %5671 = vmatmul.bf16.gmra.mxu1 %v15939_v33  ;;  %v5355_v34 = vshll.u32 %v10803_v59, 16  ;;  %v5361_v41 = vshll.u32 %v10804_v54, 16  ;;  %v5365_v31 = vshrl.u32 %v10804_v54, 16  ;;  %v4547_v48 = vsel %vm13333_vm10, 0, %v4546_v43  ;;  %v10663_v59 = vld [vmem:[%s11769_s16 + $0xa0] sm:$0xf] }
 0x26e   : > { %v3869_v53 = vpop.f32.mrf.mxu3  ;;  %v6208_v35 = vpack.c.b16 %v6177_v57, %v6176_v8  ;;  %v4120_v13 = vrot.slane %v13394_v21, 5  ;;  %4548 = vst [vmem:[#allocation2 + $0x20] sm:$0x1] %v4547_v48  ;;  %v13457_v36 = vunpack.c.l.b16 %v3611_v63  ;;  %v5354_v10 = vrot.slane %v5352_v28, 4  ;;  %v13465_v28 = vld [vmem:[%s11769_s16 + $0xa4] sm:$0x1] }
 0x26f   : > { %v3949_v22 = vadd.f32 %v3869_v53, %v12647_v20  ;;  %v5357_v5 = vrot.slane %v5355_v34, 5  ;;  %v5363_v20 = vrot.slane %v5361_v41, 5  ;;  %v5367_v42 = vrot.slane %v5365_v31, 4 }
 0x270   : > { %v4296_v12 = vpop.f32.mrf.mxu0  ;;  %6296 = vmatmul.bf16.vlgmr.msra.gmra.mxu2 %v6208_v35  ;;  %v5371_v49 = vshll.u32 %v10805_v7, 16  ;;  %v3613_v26 = vshrl.u32 %v10662_v52, 16  ;;  %v4193_v21 = vunpack.c.l.b16 %v13444_v37  ;;  %v3616_v54 = vshll.u32 %v10662_v52, 16  ;;  %v10720_v7 = vld [vmem:[%s11769_s16 + $0x9c] sm:$0xe] }
 0x271   : > { %v4374_v25 = vadd.f32 %v4294_v55, %v3949_v22  ;;  %v5358_v57 = vor.u32 %v5357_v5, %v5354_v10  ;;  %v3622_v33 = vshll.u32 %v10663_v59, 16  ;;  %v5368_v8 = vor.u32 %v5367_v42, %v5363_v20  ;;  %v4493_v5 = vld [vmem:[#allocation2 + $0x24] sm:$0x1]  ;;  %v10665_v37 = vld [vmem:[%s11769_s16 + $0xa8] sm:$0xf] }
 0x272   : > { %v13459_v0 = vpop.f32.mrf.mxu1  ;;  %v5373_v63 = vrot.slane %v5371_v49, 5  ;;  %v3615_v55 = vrot.slane %v3613_v26, 4  ;;  %v3618_v43 = vrot.slane %v3616_v54, 5  ;;  %v3626_v41 = vshrl.u32 %v10663_v59, 16 }
 0x273   : > { %15940 = vst [vmem:[#allocation22_spill] sm:$0xff] %v13459_v0  ;;  %v4410_v44 = vadd.f32 %v13451_v40, %v4374_v25  ;;  %v5359_v53 = vrot.slane %v5358_v57, 4  ;;  %v3624_v34 = vrot.slane %v3622_v33, 5  ;;  %v13472_v35 = vsel %vm11853_vm5, %v4119_v39, %v4120_v13 }
 0x274   : > { %v5369_v48 = vrot.slane %v5368_v8, 4  ;;  %v3619_v25 = vor.u32 %v3618_v43, %v3615_v55  ;;  %v3628_v42 = vrot.slane %v3626_v41, 4  ;;  %v3632_v49 = vshll.u32 %v13465_v28, 16 }
 0x275   : > { %v4442_v31 = vmax.f32 %v4410_v44, 0.0  ;;  %v5364_v10 = vsel %vm11841_vm4, %v5359_v53, %v5363_v20  ;;  %v10736_v33 = vrot.slane %v10720_v7, 9  ;;  %v4494_v13 = vsel %vm13308_vm8, 0, %v4493_v5  ;;  %v10806_v20 = vld [vmem:[%s11769_s16 + $0x90] sm:$0xf]  ;;  %v11583_v7 = vld [vmem:[%s15897_s2 + $0x138] sm:$0xff] }
 0x276   : > { %v3871_v52 = vpop.f32.mrf.mxu3  ;;  %v5374_v54 = vsel %vm11841_vm4, %v5369_v48, %v5373_v63  ;;  %v3620_v44 = vrot.slane %v3619_v25, 4  ;;  %v3629_v8 = vor.u32 %v3628_v42, %v3624_v34  ;;  %v4124_v22 = vrot.slane %v10663_v59, 5  ;;  %4495 = vst [vmem:[#allocation2 + $0x24] sm:$0x1] %v4494_v13  ;;  %v4951_v42 = vld [vmem:[#allocation2 + $0xc] sm:$0xf]  ;;  %7892 = vmatpush.bf16.msrb.mxu2 %v11583_v7 }
 0x277   : > { %v4594_v26 = vpack.c.bf16 %v4442_v31, %v4442_v31  ;;  %v3950_v57 = vadd.f32 %v3871_v52, %v12656_v11  ;;  %v11535_v11 = vld [vmem:[%s15897_s2 + $0x38] sm:$0xff]  ;;  %v4194_v63 = vunpack.c.l.b16 %v13472_v35  ;;  %v13489_v41 = vunpack.c.l.b16 %v5364_v10  ;;  %v10807_v10 = vld [vmem:[%s11769_s16 + $0x94] sm:$0xf] }
 0x278   : > { %v4299_v39 = vpop.f32.mrf.mxu0  ;;  %v13494_v59 = vunpack.c.l.b16 %v5374_v54  ;;  %v3630_v31 = vrot.slane %v3629_v8, 4  ;;  %v3634_v48 = vrot.slane %v3632_v49, 5  ;;  %v13507_v35 = vsel %vm11853_vm5, %v10736_v33, %v4124_v22  ;;  %6521 = vmatpush.bf16.msrb.mxu3 %v11535_v11 }
 0x279   : > { %v4629_v53 = vshrl.u32 %v4594_v26, 16  ;;  %v4375_v55 = vadd.f32 %v4296_v12, %v3950_v57  ;;  %v3625_v12 = vsel %vm11841_vm4, %v3620_v44, %v3624_v34  ;;  %v4632_v5 = vshll.u32 %v4594_v26, 16 }
 0x27a   : > { %v13483_v43 = vpop.f32.mrf.mxu1  ;;  %v3635_v2 = vsel %vm11841_vm4, %v3630_v31, %v3634_v48  ;;  %v4126_v29 = vrot.slane %v4124_v22, 4  ;;  %v13523_v57 = vunpack.c.l.b16 %v3625_v12  ;;  %v5379_v13 = vshll.u32 %v10806_v20, 16  ;;  %v11551_v12 = vld [vmem:[%s15897_s2 + $0xb8] sm:$0xff] }
 0x27b   : > { %15941 = vst [vmem:[#allocation23_spill] sm:$0xff] %v13483_v43  ;;  %v13498_v52 = vrot.slane %v4629_v53, 7  ;;  %v4411_v25 = vadd.f32 %v13451_v40, %v4375_v55  ;;  %3913 = vmatmul.bf16.gmra.mxu3 %v3789_v9  ;;  %4338 = vmatmul.bf16.gmra.mxu0 %v13431_v4  ;;  %v4127_v9 = vrot.slane %v13465_v28, 5  ;;  %v5376_v4 = vshrl.u32 %v10806_v20, 16  ;;  %v10808_v55 = vld [vmem:[%s11769_s16 + $0x98] sm:$0x1] }
 0x27c   : > { %v13525_v54 = vunpack.c.l.b16 %v3635_v2  ;;  %v5385_v22 = vshll.u32 %v10807_v10, 16  ;;  %v13536_v7 = vpack.c.b16 %v4194_v63, %v4193_v21  ;;  %v5553_v20 = vpack.c.b16 %v13494_v59, %v13489_v41  ;;  %6898 = vmatpush.bf16.msrb.mxu0 %v11551_v12 }
 0x27d   : > { %5676 = vmatmul.bf16.gmra.mxu1 %v5552_v60  ;;  %v4634_v49 = vor.u32 %v4632_v5, %v13498_v52  ;;  %v4443_v26 = vmax.f32 %v4411_v25, 0.0  ;;  %v4635_v46 = vrot.slane %v13498_v52, 4  ;;  %v4549_v60 = vld [vmem:[#allocation2 + $0x2c] sm:$0x1]  ;;  %v5378_v33 = vrot.slane %v5376_v4, 4 }
 0x27e   : > { %v3874_v62 = vpop.f32.mrf.mxu3  ;;  %v4550_v53 = vsel %vm13333_vm10, 0, %v4549_v60  ;;  %v13548_v31 = vsel %vm11853_vm5, %v4126_v29, %v4127_v9  ;;  %v5381_v25 = vrot.slane %v5379_v13, 5  ;;  %v5387_v4 = vrot.slane %v5385_v22, 5  ;;  %v4955_v13 = vld [vmem:[#allocation2 + $0x14] sm:$0x1]  ;;  %v11631_v60 = vld [vmem:[%s15897_s2 + $0x238] sm:$0xff] }
 0x27f   : > { %v4952_v28 = vsel %vm13512_vm13, %v4634_v49, %v4951_v42  ;;  %v4595_v44 = vpack.c.bf16 %v4443_v26, %v4443_v26  ;;  %v3951_v8 = vadd.f32 %v3874_v62, %v12672_v45  ;;  %v11575_v45 = vld [vmem:[%s15897_s2 + $0xf8] sm:$0xff]  ;;  %4551 = vst [vmem:[#allocation2 + $0x2c] sm:$0x1] %v4550_v53  ;;  %v13557_v42 = vld [vmem:[%s11769_s16 + $0xac] sm:$0xf]  ;;  %v5389_v29 = vshrl.u32 %v10807_v10, 16 }
 0x280   : > { %4953 = vst [vmem:[#allocation2 + $0xc] sm:$0xf] %v4952_v28  ;;  %v4301_v11 = vpop.f32.mrf.mxu0  ;;  %7211 = vmatpush.bf16.msrb.mxu1 %v11575_v45  ;;  %v5395_v9 = vshll.u32 %v10808_v55, 16  ;;  %v5382_v62 = vor.u32 %v5381_v25, %v5378_v33  ;;  %v4196_v28 = vunpack.c.l.b16 %v13548_v31  ;;  %v3646_v22 = vshll.u32 %v13557_v42, 16 }
 0x281   : > { %v4637_v21 = vshrl.u32 %v4595_v44, 16  ;;  %v4376_v63 = vadd.f32 %v4299_v39, %v3951_v8  ;;  %v4640_v2 = vshll.u32 %v4595_v44, 16  ;;  %v3637_v39 = vshrl.u32 %v10665_v37, 16 }
 0x282   : > { %v13552_v52 = vpop.f32.mrf.mxu1  ;;  %v5391_v44 = vrot.slane %v5389_v29, 4  ;;  %v3640_v8 = vshll.u32 %v10665_v37, 16  ;;  %v5383_v12 = vrot.slane %v5382_v62, 4 }
 0x283   : > { %15944 = vst [vmem:[#allocation24_spill] sm:$0xff] %v13552_v52  ;;  %v4639_v49 = vrot.slane %v4637_v21, 7  ;;  %v4412_v26 = vadd.f32 %v13451_v40, %v4376_v63  ;;  %v5397_v21 = vrot.slane %v5395_v9, 5  ;;  %v3639_v63 = vrot.slane %v3637_v39, 4 }
 0x284   : > { %v5392_v33 = vor.u32 %v5391_v44, %v5387_v4  ;;  %v3642_v25 = vrot.slane %v3640_v8, 5  ;;  %v5388_v9 = vsel %vm11841_vm4, %v5383_v12, %v5387_v4  ;;  %v13587_v12 = vld [vmem:[%s11769_s16 + $0xa8] sm:$0xe] }
 0x285   : > { %v4642_v10 = vor.u32 %v4640_v2, %v4639_v49  ;;  %v4644_v53 = vrot.slane %v4639_v49, 4  ;;  %v4444_v55 = vmax.f32 %v4412_v26, 0.0  ;;  %v4496_v2 = vld [vmem:[#allocation2 + $0x30] sm:$0x1] }
 0x286   : > { %v3876_v45 = vpop.f32.mrf.mxu3  ;;  %v5393_v26 = vrot.slane %v5392_v33, 4  ;;  %v3643_v39 = vor.u32 %v3642_v25, %v3639_v63  ;;  %v4497_v4 = vsel %vm13308_vm8, 0, %v4496_v2  ;;  %v15948_v33 = vpack.c.b16 %v13457_v36, %v13438_v14 }
 0x287   : > { %v4643_v5 = vsel %vm13562_vm14, %v4635_v46, %v4642_v10  ;;  %v4956_v48 = vsel %vm13308_vm8, %v4644_v53, %v4955_v13  ;;  %v4596_v31 = vpack.c.bf16 %v4444_v55, %v4444_v55  ;;  %v3952_v37 = vadd.f32 %v3876_v45, %v12684_v3  ;;  %v5714_v29 = vld [vmem:[#allocation2 + $0xc] sm:$0xf]  ;;  %v13580_v10 = vld [vmem:[%s11769_s16 + $0xb0] sm:$0x1]  ;;  %4498 = vst [vmem:[#allocation2 + $0x30] sm:$0x1] %v4497_v4 }
 0x288   : > { %4954 = vst [vmem:[#allocation2 + $0x10] sm:$0xf] %v4643_v5  ;;  %v4304_v49 = vpop.f32.mrf.mxu0  ;;  %v5801_v62 = vshrl.u32 %v5714_v29, 16  ;;  %v13577_v13 = vunpack.c.l.b16 %v5388_v9  ;;  %v3648_v3 = vrot.slane %v3646_v22, 5  ;;  %v5398_v5 = vsel %vm11841_vm4, %v5393_v26, %v5397_v21  ;;  %v4958_v21 = vld [vmem:[#allocation2 + $0x18] sm:$0xf] }
 0x289   : > { %4957 = vst [vmem:[#allocation2 + $0x14] sm:$0x1] %v4956_v48  ;;  %v4646_v46 = vshrl.u32 %v4596_v31, 16  ;;  %v4377_v44 = vadd.f32 %v4301_v11, %v3952_v37  ;;  %v5804_v55 = vshll.u32 %v5714_v29, 16  ;;  %v4649_v11 = vshll.u32 %v4596_v31, 16 }
 0x28a   : > { %v13575_v8 = vpop.f32.mrf.mxu1  ;;  %v5803_v53 = vrot.slane %v5801_v62, 4  ;;  %v13596_v22 = vunpack.c.l.b16 %v5398_v5  ;;  %v3644_v25 = vrot.slane %v3643_v39, 4  ;;  %v3650_v31 = vshrl.u32 %v13557_v42, 16 }
 0x28b   : > { %15947 = vst [vmem:[#allocation25_spill] sm:$0xff] %v13575_v8  ;;  %v13589_v48 = vrot.slane %v4646_v46, 7  ;;  %v4413_v45 = vadd.f32 %v13451_v40, %v4377_v44  ;;  %3918 = vmatmul.bf16.gmra.mxu3 %v15948_v33  ;;  %4343 = vmatmul.bf16.gmra.mxu0 %v13536_v7  ;;  %v5806_v63 = vrot.slane %v5804_v55, 5  ;;  %v3656_v37 = vshll.u32 %v13580_v10, 16 }
 0x28c   : > { %v15949_v36 = vunpack.c.l.b16 %v13507_v35  ;;  %v10737_v2 = vrot.slane %v13587_v12, 9  ;;  %v5554_v41 = vpack.c.b16 %v13596_v22, %v13577_v13  ;;  %v4552_v35 = vld [vmem:[#allocation2 + $0x38] sm:$0x1] }
 0x28d   : > { %5681 = vmatmul.bf16.gmra.mxu1 %v5553_v20  ;;  %v4651_v29 = vor.u32 %v4649_v11, %v13589_v48  ;;  %v4445_v14 = vmax.f32 %v4413_v45, 0.0  ;;  %v4652_v9 = vrot.slane %v13589_v48, 4  ;;  %v5807_v59 = vor.u32 %v5806_v63, %v5803_v53 }
 0x28e   : > { %v13606_v7 = vpack.c.b16 %v4196_v28, %v15949_v36  ;;  %v3879_v26 = vpop.f32.mrf.mxu3  ;;  %v3652_v20 = vrot.slane %v3650_v31, 4  ;;  %v3658_v28 = vrot.slane %v3656_v37, 5  ;;  %v3649_v48 = vsel %vm11841_vm4, %v3644_v25, %v3648_v3 }
 0x28f   : > { %v4959_v62 = vsel %vm13512_vm13, %v4651_v29, %v4958_v21  ;;  %v4597_v39 = vpack.c.bf16 %v4445_v14, %v4445_v14  ;;  %v3953_v46 = vadd.f32 %v3879_v26, %v12709_v24  ;;  %v5715_v44 = vld [vmem:[#allocation2 + $0x10] sm:$0xf]  ;;  %v5808_v4 = vrot.slane %v5807_v59, 4 }
 0x290   : > { %4960 = vst [vmem:[#allocation2 + $0x18] sm:$0xf] %v4959_v62  ;;  %v4306_v5 = vpop.f32.mrf.mxu0  ;;  %v5761_v55 = vld [vmem:[#allocation2 + $0x14] sm:$0x1]  ;;  %v5810_v12 = vshll.u32 %v5715_v44, 16  ;;  %v3653_v11 = vor.u32 %v3652_v20, %v3648_v3  ;;  %v5814_v21 = vshrl.u32 %v5715_v44, 16  ;;  %v13627_v20 = vunpack.c.l.b16 %v3649_v48 }
 0x291   : > { %v4654_v53 = vshrl.u32 %v4597_v39, 16  ;;  %v4657_v45 = vshll.u32 %v4597_v39, 16  ;;  %v4378_v33 = vadd.f32 %v4304_v49, %v3953_v46  ;;  %v5820_v24 = vshll.u32 %v5761_v55, 16  ;;  %v4962_v3 = vld [vmem:[#allocation2 + $0x20] sm:$0x1] }
 0x292   : > { %v13617_v63 = vpop.f32.mrf.mxu1  ;;  %v5812_v31 = vrot.slane %v5810_v12, 5  ;;  %v4553_v37 = vsel %vm13333_vm10, 0, %v4552_v35  ;;  %v3654_v29 = vrot.slane %v3653_v11, 4  ;;  %v5816_v26 = vrot.slane %v5814_v21, 4 }
 0x293   : > { %15950 = vst [vmem:[#allocation26_spill] sm:$0xff] %v13617_v63  ;;  %v4656_v14 = vrot.slane %v4654_v53, 7  ;;  %v4414_v36 = vadd.f32 %v13451_v40, %v4378_v33  ;;  %v4131_v25 = vrot.slane %v13557_v42, 5  ;;  %v4134_v62 = vrot.slane %v13580_v10, 5  ;;  %v10810_v33 = vld [vmem:[%s11769_s16 + $0xa0] sm:$0xf] }
 0x294   : > { %4554 = vst [vmem:[#allocation2 + $0x38] sm:$0x1] %v4553_v37  ;;  %v5813_v49 = vsel %vm11841_vm4, %v5808_v4, %v5812_v31  ;;  %v3659_v59 = vsel %vm11841_vm4, %v3654_v29, %v3658_v28  ;;  %v5817_v35 = vor.u32 %v5816_v26, %v5812_v31  ;;  %v5822_v12 = vrot.slane %v5820_v24, 5 }
 0x295   : > { %v4659_v39 = vor.u32 %v4657_v45, %v4656_v14  ;;  %v4661_v46 = vrot.slane %v4656_v14, 4  ;;  %v4446_v44 = vmax.f32 %v4414_v36, 0.0  ;;  %v13630_v42 = vunpack.c.l.b16 %v3659_v59  ;;  %v10809_v45 = vld [vmem:[%s11769_s16 + $0x9c] sm:$0xf] }
 0x296   : > { %v3881_v55 = vpop.f32.mrf.mxu3  ;;  %v4132_v4 = vsel %vm11853_vm5, %v10737_v2, %v4131_v25  ;;  %v4133_v11 = vrot.slane %v4131_v25, 4  ;;  %v5818_v31 = vrot.slane %v5817_v35, 4  ;;  %v6178_v24 = vunpack.c.l.b16 %v5813_v49  ;;  %v11582_v25 = vld [vmem:[%s15897_s2 + $0x130] sm:$0xff] }
 0x297   : > { %v4660_v28 = vsel %vm13562_vm14, %v4652_v9, %v4659_v39  ;;  %v4963_v48 = vsel %vm13308_vm8, %v4661_v46, %v4962_v3  ;;  %v4598_v53 = vpack.c.bf16 %v4446_v44, %v4446_v44  ;;  %v3954_v10 = vadd.f32 %v3881_v55, %v12721_v58  ;;  %v11534_v58 = vld [vmem:[%s15897_s2 + $0x30] sm:$0xff]  ;;  %v10811_v55 = vld [vmem:[%s11769_s16 + $0xa4] sm:$0x1]  ;;  %7893 = vmatpush.bf16.msrb.mxu2 %v11582_v25 }
 0x298   : > { %4961 = vst [vmem:[#allocation2 + $0x1c] sm:$0xf] %v4660_v28  ;;  %v4309_v21 = vpop.f32.mrf.mxu0  ;;  %v3792_v37 = vpack.c.b16 %v13630_v42, %v13627_v20  ;;  %v4135_v2 = vsel %vm11853_vm5, %v4133_v11, %v4134_v62  ;;  %v4197_v26 = vunpack.c.l.b16 %v4132_v4  ;;  %v5823_v3 = vsel %vm11841_vm4, %v5818_v31, %v5822_v12  ;;  %v5716_v4 = vld [vmem:[#allocation2 + $0x18] sm:$0xf]  ;;  %v4965_v11 = vld [vmem:[#allocation2 + $0x24] sm:$0xf]  ;;  %6522 = vmatpush.bf16.msrb.mxu3 %v11534_v58 }
 0x299   : > { %4964 = vst [vmem:[#allocation2 + $0x20] sm:$0x1] %v4963_v48  ;;  %v4663_v9 = vshrl.u32 %v4598_v53, 16  ;;  %v4666_v29 = vshll.u32 %v4598_v53, 16  ;;  %v4379_v14 = vadd.f32 %v4306_v5, %v3954_v10  ;;  %v5400_v49 = vshrl.u32 %v10809_v45, 16 }
 0x29a   : > { %v13645_v36 = vpop.f32.mrf.mxu1  ;;  %v5403_v59 = vshll.u32 %v10809_v45, 16  ;;  %v5409_v62 = vshll.u32 %v10810_v33, 16  ;;  %v15952_v46 = vpack.c.b16 %v13525_v54, %v13523_v57  ;;  %v6179_v44 = vunpack.c.l.b16 %v5823_v3 }
 0x29b   : > { %15951 = vst [vmem:[#allocation27_spill] sm:$0xff] %v13645_v36  ;;  %v13655_v39 = vrot.slane %v4663_v9, 7  ;;  %v4415_v5 = vadd.f32 %v13451_v40, %v4379_v14  ;;  %4348 = vmatmul.bf16.gmra.mxu0 %v13606_v7  ;;  %v4198_v35 = vunpack.c.l.b16 %v4135_v2  ;;  %v5402_v12 = vrot.slane %v5400_v49, 4 }
 0x29c   : > { %3923 = vmatmul.bf16.gmra.mxu3 %v15952_v46  ;;  %v5405_v28 = vrot.slane %v5403_v59, 5  ;;  %v5411_v48 = vrot.slane %v5409_v62, 5  ;;  %v5413_v53 = vshrl.u32 %v10810_v33, 16  ;;  %v6209_v7 = vpack.c.b16 %v6179_v44, %v6178_v24 }
 0x29d   : > { %5686 = vmatmul.bf16.gmra.mxu1 %v5554_v41  ;;  %v4668_v10 = vor.u32 %v4666_v29, %v13655_v39  ;;  %v4669_v57 = vrot.slane %v13655_v39, 4  ;;  %v4447_v54 = vmax.f32 %v4415_v5, 0.0  ;;  %v5419_v9 = vshll.u32 %v10811_v55, 16  ;;  %v15953_v41 = vld [vmem:[#allocation4_spill] sm:$0xff] }
 0x29e   : > { %v3884_v45 = vpop.f32.mrf.mxu3  ;;  %v5406_v31 = vor.u32 %v5405_v28, %v5402_v12  ;;  %v5415_v2 = vrot.slane %v5413_v53, 4  ;;  %v5825_v14 = vshrl.u32 %v5716_v4, 16  ;;  %6301 = vmatmul.bf16.gmra.mxu2 %v6209_v7  ;;  %v5828_v3 = vshll.u32 %v5716_v4, 16  ;;  %v11574_v4 = vld [vmem:[%s15897_s2 + $0xf0] sm:$0xff]  ;;  %v4499_v7 = vld [vmem:[#allocation2 + $0x3c] sm:$0x1] }
 0x29f   : > { %v4966_v13 = vsel %vm13512_vm13, %v4668_v10, %v4965_v11  ;;  %v4599_v22 = vpack.c.bf16 %v4447_v54, %v4447_v54  ;;  %v3955_v58 = vadd.f32 %v3884_v45, %v15953_v41  ;;  %v5717_v33 = vld [vmem:[#allocation2 + $0x1c] sm:$0xf]  ;;  %v13671_v49 = vpack.c.b16 %v4198_v35, %v4197_v26  ;;  %v11550_v11 = vld [vmem:[%s15897_s2 + $0xb0] sm:$0xff]  ;;  %7212 = vmatpush.bf16.msrb.mxu1 %v11574_v4  ;;  %v4969_v45 = vld [vmem:[#allocation2 + $0x2c] sm:$0x1] }
 0x2a0   : > { %4967 = vst [vmem:[#allocation2 + $0x24] sm:$0xf] %v4966_v13  ;;  %v4311_v29 = vpop.f32.mrf.mxu0  ;;  %v5407_v24 = vrot.slane %v5406_v31, 4  ;;  %v5416_v25 = vor.u32 %v5415_v2, %v5411_v48  ;;  %v5421_v59 = vrot.slane %v5419_v9, 5  ;;  %v5762_v62 = vld [vmem:[#allocation2 + $0x20] sm:$0x1]  ;;  %6899 = vmatpush.bf16.msrb.mxu0 %v11550_v11 }
 0x2a1   : > { %v4671_v39 = vshrl.u32 %v4599_v22, 16  ;;  %v4674_v5 = vshll.u32 %v4599_v22, 16  ;;  %v4380_v46 = vadd.f32 %v4309_v21, %v3955_v58  ;;  %v5827_v55 = vrot.slane %v5825_v14, 4  ;;  %v4555_v58 = vld [vmem:[#allocation2 + $0x44] sm:$0x1] }
 0x2a2   : > { %v13673_v44 = vpop.f32.mrf.mxu1  ;;  %v5412_v26 = vsel %vm11841_vm4, %v5407_v24, %v5411_v48  ;;  %v5417_v35 = vrot.slane %v5416_v25, 4  ;;  %v5830_v12 = vrot.slane %v5828_v3, 5  ;;  %v5834_v28 = vshll.u32 %v5717_v33, 16  ;;  %v10668_v11 = vld [vmem:[%s11769_s16 + $0xb4] sm:$0xf] }
 0x2a3   : > { %15954 = vst [vmem:[#allocation4_spill] sm:$0xff] %v13673_v44  ;;  %v4673_v53 = vrot.slane %v4671_v39, 7  ;;  %v4416_v21 = vadd.f32 %v13451_v40, %v4380_v46  ;;  %v5535_v10 = vunpack.c.l.b16 %v5412_v26  ;;  %v5838_v54 = vshrl.u32 %v5717_v33, 16  ;;  %v15955_v46 = vld [vmem:[#allocation5_spill] sm:$0xff]  ;;  %v10669_v4 = vld [vmem:[%s11769_s16 + $0xb8] sm:$0xf] }
 0x2a4   : > { %v5422_v31 = vsel %vm11841_vm4, %v5417_v35, %v5421_v59  ;;  %v5831_v2 = vor.u32 %v5830_v12, %v5827_v55  ;;  %v5836_v9 = vrot.slane %v5834_v28, 5  ;;  %v5844_v14 = vshll.u32 %v5762_v62, 16 }
 0x2a5   : > { %v4676_v48 = vor.u32 %v4674_v5, %v4673_v53  ;;  %v4678_v13 = vrot.slane %v4673_v53, 4  ;;  %v4448_v22 = vmax.f32 %v4416_v21, 0.0  ;;  %v5536_v41 = vunpack.c.l.b16 %v5422_v31 }
 0x2a6   : > { %v3886_v3 = vpop.f32.mrf.mxu3  ;;  %v5832_v24 = vrot.slane %v5831_v2, 4  ;;  %v5840_v33 = vrot.slane %v5838_v54, 4  ;;  %v5846_v25 = vrot.slane %v5844_v14, 5  ;;  %v4500_v39 = vsel %vm13308_vm8, 0, %v4499_v7 }
 0x2a7   : > { %v4677_v59 = vsel %vm13562_vm14, %v4669_v57, %v4676_v48  ;;  %v4970_v62 = vsel %vm13308_vm8, %v4678_v13, %v4969_v45  ;;  %v4600_v5 = vpack.c.bf16 %v4448_v22, %v4448_v22  ;;  %v3956_v55 = vadd.f32 %v3886_v3, %v15955_v46  ;;  %4501 = vst [vmem:[#allocation2 + $0x3c] sm:$0x1] %v4500_v39  ;;  %v13700_v57 = vld [vmem:[%s11769_s16 + $0xbc] sm:$0x1] }
 0x2a8   : > { %4968 = vst [vmem:[#allocation2 + $0x28] sm:$0xf] %v4677_v59  ;;  %v4314_v26 = vpop.f32.mrf.mxu0  ;;  %v5555_v35 = vpack.c.b16 %v5536_v41, %v5535_v10  ;;  %v5837_v12 = vsel %vm11841_vm4, %v5832_v24, %v5836_v9  ;;  %v5841_v28 = vor.u32 %v5840_v33, %v5836_v9  ;;  %v4556_v53 = vsel %vm13333_vm10, 0, %v4555_v58  ;;  %v10722_v41 = vld [vmem:[%s11769_s16 + $0xb4] sm:$0xe] }
 0x2a9   : > { %4971 = vst [vmem:[#allocation2 + $0x2c] sm:$0x1] %v4970_v62  ;;  %v4680_v21 = vshrl.u32 %v4600_v5, 16  ;;  %v4683_v54 = vshll.u32 %v4600_v5, 16  ;;  %v4381_v7 = vadd.f32 %v4311_v29, %v3956_v55  ;;  %v6180_v31 = vunpack.c.l.b16 %v5837_v12  ;;  %v4972_v58 = vld [vmem:[#allocation2 + $0x30] sm:$0xf] }
 0x2aa   : > { %v13702_v45 = vpop.f32.mrf.mxu1  ;;  %v5842_v2 = vrot.slane %v5841_v28, 4  ;;  %4557 = vst [vmem:[#allocation2 + $0x44] sm:$0x1] %v4556_v53  ;;  %v3661_v10 = vshrl.u32 %v10668_v11, 16  ;;  %v3664_v14 = vshll.u32 %v10668_v11, 16  ;;  %v3670_v48 = vshll.u32 %v10669_v4, 16 }
 0x2ab   : > { %15956 = vst [vmem:[#allocation5_spill] sm:$0xff] %v13702_v45  ;;  %v13704_v13 = vrot.slane %v4680_v21, 7  ;;  %v4417_v9 = vadd.f32 %v13451_v40, %v4381_v7  ;;  %4353 = vmatmul.bf16.gmra.mxu0 %v13671_v49  ;;  %v3674_v22 = vshrl.u32 %v10669_v4, 16  ;;  %v3680_v29 = vshll.u32 %v13700_v57, 16  ;;  %v10812_v11 = vld [vmem:[%s11769_s16 + $0xa8] sm:$0xf] }
 0x2ac   : > { %3928 = vmatmul.bf16.gmra.mxu3 %v3792_v37  ;;  %v5847_v3 = vsel %vm11841_vm4, %v5842_v2, %v5846_v25  ;;  %v3663_v24 = vrot.slane %v3661_v10, 4  ;;  %v3666_v33 = vrot.slane %v3664_v14, 5  ;;  %v3672_v39 = vrot.slane %v3670_v48, 5  ;;  %v15957_v28 = vld [vmem:[#allocation6_spill] sm:$0xff] }
 0x2ad   : > { %5691 = vmatmul.bf16.gmra.mxu1 %v5555_v35  ;;  %v4685_v59 = vor.u32 %v4683_v54, %v13704_v13  ;;  %v4686_v20 = vrot.slane %v13704_v13, 4  ;;  %v4449_v42 = vmax.f32 %v4417_v9, 0.0  ;;  %v6181_v37 = vunpack.c.l.b16 %v5847_v3 }
 0x2ae   : > { %v3889_v49 = vpop.f32.mrf.mxu3  ;;  %v3667_v62 = vor.u32 %v3666_v33, %v3663_v24  ;;  %v3676_v5 = vrot.slane %v3674_v22, 4  ;;  %v3682_v46 = vrot.slane %v3680_v29, 5  ;;  %v10738_v55 = vrot.slane %v10722_v41, 9  ;;  %v10813_v33 = vld [vmem:[%s11769_s16 + $0xac] sm:$0xf] }
 0x2af   : > { %v4973_v35 = vsel %vm13512_vm13, %v4685_v59, %v4972_v58  ;;  %v4601_v12 = vpack.c.bf16 %v4449_v42, %v4449_v42  ;;  %v6210_v25 = vpack.c.b16 %v6181_v37, %v6180_v31  ;;  %v3957_v53 = vadd.f32 %v3889_v49, %v15957_v28  ;;  %v4976_v59 = vld [vmem:[#allocation2 + $0x38] sm:$0x1] }
 0x2b0   : > { %4974 = vst [vmem:[#allocation2 + $0x30] sm:$0xf] %v4973_v35  ;;  %v4316_v21 = vpop.f32.mrf.mxu0  ;;  %v3668_v54 = vrot.slane %v3667_v62, 4  ;;  %v3677_v7 = vor.u32 %v3676_v5, %v3672_v39  ;;  %v4138_v2 = vrot.slane %v10669_v4, 5  ;;  %v4141_v10 = vrot.slane %v13700_v57, 5 }
 0x2b1   : > { %v4688_v14 = vshrl.u32 %v4601_v12, 16  ;;  %v4691_v48 = vshll.u32 %v4601_v12, 16  ;;  %6306 = vmatmul.bf16.gmra.mxu2 %v6210_v25  ;;  %v4382_v13 = vadd.f32 %v4314_v26, %v3957_v53  ;;  %v5424_v22 = vshrl.u32 %v10812_v11, 16 }
 0x2b2   : > { %v13722_v9 = vpop.f32.mrf.mxu1  ;;  %v3673_v31 = vsel %vm11841_vm4, %v3668_v54, %v3672_v39  ;;  %v3678_v29 = vrot.slane %v3677_v7, 4  ;;  %v4139_v41 = vsel %vm11853_vm5, %v10738_v55, %v4138_v2  ;;  %v4140_v58 = vrot.slane %v4138_v2, 4 }
 0x2b3   : > { %15958 = vst [vmem:[#allocation6_spill] sm:$0xff] %v13722_v9  ;;  %v4690_v3 = vrot.slane %v4688_v14, 7  ;;  %v4418_v4 = vadd.f32 %v13451_v40, %v4382_v13  ;;  %v3774_v24 = vunpack.c.l.b16 %v3673_v31  ;;  %v4199_v57 = vunpack.c.l.b16 %v4139_v41 }
 0x2b4   : > { %v3683_v26 = vsel %vm11841_vm4, %v3678_v29, %v3682_v46  ;;  %v4142_v42 = vsel %vm11853_vm5, %v4140_v58, %v4141_v10  ;;  %v5426_v39 = vrot.slane %v5424_v22, 4  ;;  %v5427_v37 = vshll.u32 %v10812_v11, 16  ;;  %v10814_v10 = vld [vmem:[%s11769_s16 + $0xb0] sm:$0x1]  ;;  %v5718_v11 = vld [vmem:[#allocation2 + $0x24] sm:$0xf] }
 0x2b5   : > { %v4693_v49 = vor.u32 %v4691_v48, %v4690_v3  ;;  %v4695_v62 = vrot.slane %v4690_v3, 4  ;;  %v4450_v5 = vmax.f32 %v4418_v4, 0.0  ;;  %v3775_v55 = vunpack.c.l.b16 %v3683_v26  ;;  %v5719_v29 = vld [vmem:[#allocation2 + $0x28] sm:$0xf] }
 0x2b6   : > { %v3891_v35 = vpop.f32.mrf.mxu3  ;;  %v4200_v12 = vunpack.c.l.b16 %v4142_v42  ;;  %v5429_v25 = vrot.slane %v5427_v37, 5  ;;  %v5433_v28 = vshll.u32 %v10813_v33, 16  ;;  %v5437_v53 = vshrl.u32 %v10813_v33, 16 }
 0x2b7   : > { %v4694_v54 = vsel %vm13562_vm14, %v4686_v20, %v4693_v49  ;;  %v4977_v46 = vsel %vm13308_vm8, %v4695_v62, %v4976_v59  ;;  %v4602_v7 = vpack.c.bf16 %v4450_v5, %v4450_v5  ;;  %v3958_v2 = vadd.f32 %v3891_v35, %v13245_v6  ;;  %v11533_v6 = vld [vmem:[%s15897_s2 + $0x28] sm:$0xff] }
 0x2b8   : > { %4975 = vst [vmem:[#allocation2 + $0x34] sm:$0xf] %v4694_v54  ;;  %v4319_v14 = vpop.f32.mrf.mxu0  ;;  %v3793_v48 = vpack.c.b16 %v3775_v55, %v3774_v24  ;;  %v4218_v13 = vpack.c.b16 %v4200_v12, %v4199_v57  ;;  %v5430_v22 = vor.u32 %v5429_v25, %v5426_v39  ;;  %v5435_v31 = vrot.slane %v5433_v28, 5  ;;  %v4979_v57 = vld [vmem:[#allocation2 + $0x3c] sm:$0xf]  ;;  %6523 = vmatpush.bf16.msrb.mxu3 %v11533_v6 }
 0x2b9   : > { %4978 = vst [vmem:[#allocation2 + $0x38] sm:$0x1] %v4977_v46  ;;  %v4697_v41 = vshrl.u32 %v4602_v7, 16  ;;  %v4700_v58 = vshll.u32 %v4602_v7, 16  ;;  %v4383_v3 = vadd.f32 %v4316_v21, %v3958_v2  ;;  %v5439_v4 = vrot.slane %v5437_v53, 4 }
 0x2ba   : > { %v13740_v20 = vpop.f32.mrf.mxu1  ;;  %v5431_v33 = vrot.slane %v5430_v22, 4  ;;  %v5443_v59 = vshll.u32 %v10814_v10, 16  ;;  %v5849_v26 = vshrl.u32 %v5718_v11, 16  ;;  %v5852_v42 = vshll.u32 %v5718_v11, 16  ;;  %v5763_v5 = vld [vmem:[#allocation2 + $0x2c] sm:$0x1] }
 0x2bb   : > { %15959 = vst [vmem:[#allocation28_spill] sm:$0xff] %v13740_v20  ;;  %v13745_v24 = vrot.slane %v4697_v41, 7  ;;  %v4419_v39 = vadd.f32 %v13451_v40, %v4383_v3  ;;  %4358 = vmatmul.bf16.gmra.mxu0 %v4218_v13  ;;  %v5440_v37 = vor.u32 %v5439_v4, %v5435_v31  ;;  %v5858_v21 = vshll.u32 %v5719_v29, 16  ;;  %v4502_v11 = vld [vmem:[#allocation2 + $0x48] sm:$0x1] }
 0x2bc   : > { %3933 = vmatmul.bf16.gmra.mxu3 %v3793_v48  ;;  %v5436_v49 = vsel %vm11841_vm4, %v5431_v33, %v5435_v31  ;;  %v5445_v62 = vrot.slane %v5443_v59, 5  ;;  %v5851_v55 = vrot.slane %v5849_v26, 4  ;;  %v5854_v35 = vrot.slane %v5852_v42, 5  ;;  %v10671_v41 = vld [vmem:[%s11769_s16 + $0xc0] sm:$0xf]  ;;  %v15960_v33 = vld [vmem:[#allocation7_spill] sm:$0xff] }
 0x2bd   : > { %v4702_v12 = vor.u32 %v4700_v58, %v13745_v24  ;;  %v4703_v25 = vrot.slane %v13745_v24, 4  ;;  %v4451_v28 = vmax.f32 %v4419_v39, 0.0  ;;  %v5441_v53 = vrot.slane %v5440_v37, 4  ;;  %v13758_v58 = vld [vmem:[%s11769_s16 + $0xc4] sm:$0xf] }
 0x2be   : > { %v5537_v54 = vunpack.c.l.b16 %v5436_v49  ;;  %v5855_v46 = vor.u32 %v5854_v35, %v5851_v55  ;;  %v5860_v7 = vrot.slane %v5858_v21, 5  ;;  %v5862_v2 = vshrl.u32 %v5719_v29, 16  ;;  %v3894_v10 = vpop.f32.mrf.mxu3  ;;  %v4558_v26 = vld [vmem:[#allocation2 + $0x50] sm:$0x1]  ;;  %v11581_v21 = vld [vmem:[%s15897_s2 + $0x128] sm:$0xff] }
 0x2bf   : > { %v4980_v48 = vsel %vm13512_vm13, %v4702_v12, %v4979_v57  ;;  %v4603_v13 = vpack.c.bf16 %v4451_v28, %v4451_v28  ;;  %v5446_v22 = vsel %vm11841_vm4, %v5441_v53, %v5445_v62  ;;  %v5868_v31 = vshll.u32 %v5763_v5, 16  ;;  %v4983_v12 = vld [vmem:[#allocation2 + $0x44] sm:$0x1]  ;;  %7894 = vmatpush.bf16.msrb.mxu2 %v11581_v21 }
 0x2c0   : > { %4981 = vst [vmem:[#allocation2 + $0x3c] sm:$0xf] %v4980_v48  ;;  %v5538_v3 = vunpack.c.l.b16 %v5446_v22  ;;  %v5856_v4 = vrot.slane %v5855_v46, 4  ;;  %v5864_v6 = vrot.slane %v5862_v2, 4  ;;  %v3959_v59 = vadd.f32 %v3894_v10, %v15960_v33  ;;  %v4321_v29 = vpop.f32.mrf.mxu0  ;;  %v10673_v48 = vld [vmem:[%s11769_s16 + $0xc8] sm:$0x1] }
 0x2c1   : > { %v4705_v42 = vshrl.u32 %v4603_v13, 16  ;;  %v4708_v24 = vshll.u32 %v4603_v13, 16  ;;  %v5870_v39 = vrot.slane %v5868_v31, 5  ;;  %v4503_v57 = vsel %vm13308_vm8, 0, %v4502_v11 }
 0x2c2   : > { %v13763_v37 = vpop.f32.mrf.mxu1  ;;  %v5556_v49 = vpack.c.b16 %v5538_v3, %v5537_v54  ;;  %v5861_v62 = vsel %vm11841_vm4, %v5856_v4, %v5860_v7  ;;  %v5865_v5 = vor.u32 %v5864_v6, %v5860_v7  ;;  %v4384_v55 = vadd.f32 %v4319_v14, %v3959_v59  ;;  %4504 = vst [vmem:[#allocation2 + $0x48] sm:$0x1] %v4503_v57  ;;  %v10723_v59 = vld [vmem:[%s11769_s16 + $0xc0] sm:$0xe] }
 0x2c3   : > { %15961 = vst [vmem:[#allocation7_spill] sm:$0xff] %v13763_v37  ;;  %v4707_v35 = vrot.slane %v4705_v42, 7  ;;  %v6182_v28 = vunpack.c.l.b16 %v5861_v62  ;;  %v4559_v53 = vsel %vm13333_vm10, 0, %v4558_v26  ;;  %v3685_v46 = vshrl.u32 %v10671_v41, 16  ;;  %v15962_v42 = vld [vmem:[#allocation8_spill] sm:$0xff] }
 0x2c4   : > { %5696 = vmatmul.bf16.gmra.mxu1 %v5556_v49  ;;  %v5866_v2 = vrot.slane %v5865_v5, 4  ;;  %v4420_v54 = vadd.f32 %v13451_v40, %v4384_v55  ;;  %4560 = vst [vmem:[#allocation2 + $0x50] sm:$0x1] %v4559_v53  ;;  %v3688_v10 = vshll.u32 %v10671_v41, 16  ;;  %v3694_v7 = vshll.u32 %v13758_v58, 16 }
 0x2c5   : > { %v4710_v14 = vor.u32 %v4708_v24, %v4707_v35  ;;  %v4712_v11 = vrot.slane %v4707_v35, 4  ;;  %v3687_v13 = vrot.slane %v3685_v46, 4  ;;  %v3698_v22 = vshrl.u32 %v13758_v58, 16  ;;  %v10815_v46 = vld [vmem:[%s11769_s16 + $0xb4] sm:$0xf] }
 0x2c6   : > { %v5871_v31 = vsel %vm11841_vm4, %v5866_v2, %v5870_v39  ;;  %v4452_v3 = vmax.f32 %v4420_v54, 0.0  ;;  %v3896_v4 = vpop.f32.mrf.mxu3  ;;  %v3690_v6 = vrot.slane %v3688_v10, 5  ;;  %v3696_v33 = vrot.slane %v3694_v7, 5  ;;  %v11549_v7 = vld [vmem:[%s15897_s2 + $0xa8] sm:$0xff] }
 0x2c7   : > { %v4711_v40 = vsel %vm13562_vm14, %v4703_v25, %v4710_v14  ;;  %v4984_v41 = vsel %vm13308_vm8, %v4712_v11, %v4983_v12  ;;  %v6183_v26 = vunpack.c.l.b16 %v5871_v31  ;;  %v3960_v24 = vadd.f32 %v3896_v4, %v15962_v42  ;;  %v11573_v14 = vld [vmem:[%s15897_s2 + $0xe8] sm:$0xff]  ;;  %6900 = vmatpush.bf16.msrb.mxu0 %v11549_v7 }
 0x2c8   : > { %4982 = vst [vmem:[#allocation2 + $0x40] sm:$0xf] %v4711_v40  ;;  %v4604_v57 = vpack.c.bf16 %v4452_v3, %v4452_v3  ;;  %v13784_v21 = vpop.f32.mrf.mxu0  ;;  %v3691_v39 = vor.u32 %v3690_v6, %v3687_v13  ;;  %v3700_v49 = vrot.slane %v3698_v22, 4  ;;  %v3704_v62 = vshll.u32 %v10673_v48, 16  ;;  %7213 = vmatpush.bf16.msrb.mxu1 %v11573_v14  ;;  %v11532_v6 = vld [vmem:[%s15897_s2 + $0x20] sm:$0xff] }
 0x2c9   : > { %4985 = vst [vmem:[#allocation2 + $0x44] sm:$0x1] %v4984_v41  ;;  %v6211_v5 = vpack.c.b16 %v6183_v26, %v6182_v28  ;;  %v4385_v55 = vadd.f32 %v4321_v29, %v3960_v24  ;;  %v10739_v25 = vrot.slane %v10723_v59, 9  ;;  %v4145_v53 = vrot.slane %v13758_v58, 5  ;;  %v13799_v29 = vld [vmem:[%s15899_s4] ss:$0 sm:$0xff]  ;;  %6524 = vmatpush.bf16.msrb.mxu3 %v11532_v6 }
 0x2ca   : > { %v13786_v35 = vpop.f32.mrf.mxu1  ;;  %v4714_v12 = vshrl.u32 %v4604_v57, 16  ;;  %v4717_v2 = vshll.u32 %v4604_v57, 16  ;;  %v3692_v54 = vrot.slane %v3691_v39, 4  ;;  %v3701_v10 = vor.u32 %v3700_v49, %v3696_v33  ;;  %v11548_v59 = vld [vmem:[%s15897_s2 + $0xa0] sm:$0xff]  ;;  %v4986_v41 = vld [vmem:[#allocation2 + $0x48] sm:$0xf] }
 0x2cb   : > { %15963 = vst [vmem:[#allocation8_spill] sm:$0xff] %v13786_v35  ;;  %6311 = vmatmul.bf16.gmra.mxu2 %v6211_v5  ;;  %v4421_v58 = vadd.f32 %v13799_v29, %v4385_v55  ;;  %v3706_v28 = vrot.slane %v3704_v62, 5  ;;  %v4146_v11 = vsel %vm11853_vm5, %v10739_v25, %v4145_v53  ;;  %v4147_v13 = vrot.slane %v4145_v53, 4  ;;  %v11572_v40 = vld [vmem:[%s15897_s2 + $0xe0] sm:$0xff]  ;;  %6901 = vmatpush.bf16.msrb.mxu0 %v11548_v59  ;;  %v5764_v35 = vld [vmem:[#allocation2 + $0x38] sm:$0x1] }
 0x2cc   : > { %v13804_v22 = vrot.slane %v4714_v12, 7  ;;  %v3697_v31 = vsel %vm11841_vm4, %v3692_v54, %v3696_v33  ;;  %v3702_v3 = vrot.slane %v3701_v10, 4  ;;  %v4148_v4 = vrot.slane %v10673_v48, 5  ;;  %v10816_v48 = vld [vmem:[%s11769_s16 + $0xb8] sm:$0xf]  ;;  %7214 = vmatpush.bf16.msrb.mxu1 %v11572_v40 }
 0x2cd   : > { %v4453_v26 = vmax.f32 %v4421_v58, 0.0  ;;  %v3776_v33 = vunpack.c.l.b16 %v3697_v31  ;;  %v4201_v42 = vunpack.c.l.b16 %v4146_v11  ;;  %v5448_v24 = vshrl.u32 %v10815_v46, 16  ;;  %v10817_v12 = vld [vmem:[%s11769_s16 + $0xbc] sm:$0x1]  ;;  %v5720_v10 = vld [vmem:[#allocation2 + $0x30] sm:$0xf] }
 0x2ce   : > { %v4719_v57 = vor.u32 %v4717_v2, %v13804_v22  ;;  %v4720_v39 = vrot.slane %v13804_v22, 4  ;;  %v3707_v49 = vsel %vm11841_vm4, %v3702_v3, %v3706_v28  ;;  %v4149_v62 = vsel %vm11853_vm5, %v4147_v13, %v4148_v4  ;;  %v3899_v5 = vpop.f32.mrf.mxu3  ;;  %v5721_v11 = vld [vmem:[#allocation2 + $0x34] sm:$0xf] }
 0x2cf   : > { %v4605_v55 = vpack.c.bf16 %v4453_v26, %v4453_v26  ;;  %v3777_v25 = vunpack.c.l.b16 %v3707_v49  ;;  %v4202_v53 = vunpack.c.l.b16 %v4149_v62  ;;  %v5450_v54 = vrot.slane %v5448_v24, 4  ;;  %v4990_v62 = vld [vmem:[#allocation2 + $0x50] sm:$0x1] }
 0x2d0   : > { %v4987_v7 = vsel %vm13512_vm13, %v4719_v57, %v4986_v41  ;;  %v5451_v2 = vshll.u32 %v10815_v46, 16  ;;  %v5457_v14 = vshll.u32 %v10816_v48, 16  ;;  %v5461_v58 = vshrl.u32 %v10816_v48, 16  ;;  %v13827_v22 = vpop.f32.mrf.mxu0 }
 0x2d1   : > { %4988 = vst [vmem:[#allocation2 + $0x48] sm:$0xf] %v4987_v7  ;;  %v4722_v28 = vshrl.u32 %v4605_v55, 16  ;;  %v4725_v13 = vshll.u32 %v4605_v55, 16  ;;  %v3794_v31 = vpack.c.b16 %v3777_v25, %v3776_v33  ;;  %v4219_v3 = vpack.c.b16 %v4202_v53, %v4201_v42 }
 0x2d2   : > { %v13829_v4 = vpop.f32.mrf.mxu1  ;;  %v5453_v6 = vrot.slane %v5451_v2, 5  ;;  %v5459_v26 = vrot.slane %v5457_v14, 5  ;;  %v5463_v24 = vrot.slane %v5461_v58, 4  ;;  %v5467_v49 = vshll.u32 %v10817_v12, 16  ;;  %v11531_v12 = vld [vmem:[%s15897_s2 + $0x18] sm:$0xff] }
 0x2d3   : > { %15964 = vst [vmem:[#allocation29_spill] sm:$0xff] %v13829_v4  ;;  %v4724_v41 = vrot.slane %v4722_v28, 7  ;;  %3938 = vmatmul.bf16.gmra.mxu3 %v3794_v31  ;;  %4363 = vmatmul.bf16.gmra.mxu0 %v4219_v3  ;;  %v5873_v46 = vshrl.u32 %v5720_v10, 16  ;;  %v5876_v48 = vshll.u32 %v5720_v10, 16  ;;  %v5882_v57 = vshll.u32 %v5721_v11, 16  ;;  %v11547_v2 = vld [vmem:[%s15897_s2 + $0x98] sm:$0xff] }
 0x2d4   : > { %v5454_v59 = vor.u32 %v5453_v6, %v5450_v54  ;;  %v5464_v40 = vor.u32 %v5463_v24, %v5459_v26  ;;  %v5469_v7 = vrot.slane %v5467_v49, 5  ;;  %v5886_v55 = vshrl.u32 %v5721_v11, 16  ;;  %v11571_v54 = vld [vmem:[%s15897_s2 + $0xd8] sm:$0xff]  ;;  %v4505_v24 = vld [vmem:[#allocation2 + $0x54] sm:$0x1]  ;;  %6525 = vmatpush.bf16.msrb.mxu3 %v11531_v12  ;;  %6902 = vmatpush.bf16.msrb.mxu0 %v11547_v2 }
 0x2d5   : > { %v4727_v33 = vor.u32 %v4725_v13, %v4724_v41  ;;  %v4729_v42 = vrot.slane %v4724_v41, 4  ;;  %v5875_v25 = vrot.slane %v5873_v46, 4  ;;  %v5878_v53 = vrot.slane %v5876_v48, 5  ;;  %v15965_v48 = vld [vmem:[#allocation9_spill] sm:$0xff]  ;;  %7215 = vmatpush.bf16.msrb.mxu1 %v11571_v54  ;;  %v10675_v12 = vld [vmem:[%s11769_s16 + $0xd0] sm:$0xf] }
 0x2d6   : > { %v5455_v10 = vrot.slane %v5454_v59, 4  ;;  %v5465_v14 = vrot.slane %v5464_v40, 4  ;;  %v5884_v58 = vrot.slane %v5882_v57, 5  ;;  %v5888_v11 = vrot.slane %v5886_v55, 4  ;;  %v3901_v28 = vpop.f32.mrf.mxu3 }
 0x2d7   : > { %v4728_v13 = vsel %vm13562_vm14, %v4720_v39, %v4727_v33  ;;  %v4991_v31 = vsel %vm13308_vm8, %v4729_v42, %v4990_v62  ;;  %v5879_v3 = vor.u32 %v5878_v53, %v5875_v25  ;;  %v5892_v6 = vshll.u32 %v5764_v35, 16  ;;  %v4561_v39 = vld [vmem:[#allocation2 + $0x5c] sm:$0x1]  ;;  %v10674_v62 = vld [vmem:[%s11769_s16 + $0xcc] sm:$0xf]  ;;  %v15967_v25 = vld [vmem:[#allocation10_spill] sm:$0xff] }
 0x2d8   : > { %4989 = vst [vmem:[#allocation2 + $0x4c] sm:$0xf] %v4728_v13  ;;  %v5460_v49 = vsel %vm11841_vm4, %v5455_v10, %v5459_v26  ;;  %v5470_v41 = vsel %vm11841_vm4, %v5465_v14, %v5469_v7  ;;  %v5889_v46 = vor.u32 %v5888_v11, %v5884_v58  ;;  %v3961_v57 = vadd.f32 %v3899_v5, %v15965_v48  ;;  %v13849_v59 = vpop.f32.mrf.mxu0  ;;  %v10676_v11 = vld [vmem:[%s11769_s16 + $0xd4] sm:$0x1] }
 0x2d9   : > { %4992 = vst [vmem:[#allocation2 + $0x50] sm:$0x1] %v4991_v31  ;;  %v5539_v35 = vunpack.c.l.b16 %v5460_v49  ;;  %v5540_v40 = vunpack.c.l.b16 %v5470_v41  ;;  %v5880_v55 = vrot.slane %v5879_v3, 4  ;;  %v5894_v33 = vrot.slane %v5892_v6, 5  ;;  %v10724_v3 = vld [vmem:[%s11769_s16 + $0xcc] sm:$0xe] }
 0x2da   : > { %v13852_v42 = vpop.f32.mrf.mxu1  ;;  %v5890_v26 = vrot.slane %v5889_v46, 4  ;;  %v4386_v7 = vadd.f32 %v13784_v21, %v3961_v57  ;;  %v4506_v5 = vsel %vm13308_vm8, 0, %v4505_v24  ;;  %v3962_v53 = vadd.f32 %v3901_v28, %v15967_v25 }
 0x2db   : > { %15966 = vst [vmem:[#allocation9_spill] sm:$0xff] %v13852_v42  ;;  %v5557_v2 = vpack.c.b16 %v5540_v40, %v5539_v35  ;;  %v5885_v10 = vsel %vm11841_vm4, %v5880_v55, %v5884_v58  ;;  %v4562_v14 = vsel %vm13333_vm10, 0, %v4561_v39  ;;  %v3709_v54 = vshrl.u32 %v10674_v62, 16  ;;  %v10818_v39 = vld [vmem:[%s11769_s16 + $0xc0] sm:$0xf] }
 0x2dc   : > { %4507 = vst [vmem:[#allocation2 + $0x54] sm:$0x1] %v4506_v5  ;;  %v5895_v21 = vsel %vm11841_vm4, %v5890_v26, %v5894_v33  ;;  %v6184_v13 = vunpack.c.l.b16 %v5885_v10  ;;  %v4422_v31 = vadd.f32 %v13799_v29, %v4386_v7  ;;  %v4387_v28 = vadd.f32 %v13827_v22, %v3962_v53  ;;  %v11570_v10 = vld [vmem:[%s15897_s2 + $0xd0] sm:$0xff]  ;;  %v11568_v42 = vld [vmem:[%s15897_s2 + $0xc0] sm:$0xff] }
 0x2dd   : > { %4563 = vst [vmem:[#allocation2 + $0x5c] sm:$0x1] %v4562_v14  ;;  %5701 = vmatmul.bf16.gmra.mxu1 %v5557_v2  ;;  %v6185_v6 = vunpack.c.l.b16 %v5895_v21  ;;  %v3711_v58 = vrot.slane %v3709_v54, 4  ;;  %v3712_v24 = vshll.u32 %v10674_v62, 16  ;;  %v3718_v49 = vshll.u32 %v10675_v12, 16  ;;  %v11530_v62 = vld [vmem:[%s15897_s2 + $0x10] sm:$0xff] }
 0x2de   : > { %v4454_v41 = vmax.f32 %v4422_v31, 0.0  ;;  %v4423_v46 = vadd.f32 %v13799_v29, %v4387_v28  ;;  %v3722_v48 = vshrl.u32 %v10675_v12, 16  ;;  %v3728_v57 = vshll.u32 %v10676_v11, 16  ;;  %v13871_v35 = vpop.f32.mrf.mxu3  ;;  %v11546_v2 = vld [vmem:[%s15897_s2 + $0x90] sm:$0xff]  ;;  %6526 = vmatpush.bf16.msrb.mxu3 %v11530_v62  ;;  %7216 = vmatpush.bf16.msrb.mxu1 %v11570_v10 }
 0x2df   : > { %v6212_v40 = vpack.c.b16 %v6185_v6, %v6184_v13  ;;  %v3714_v55 = vrot.slane %v3712_v24, 5  ;;  %v3720_v33 = vrot.slane %v3718_v49, 5  ;;  %v10740_v26 = vrot.slane %v10724_v3, 9  ;;  %6903 = vmatpush.bf16.msrb.mxu0 %v11546_v2  ;;  %v11529_v49 = vld [vmem:[%s15897_s2 + $0x8] sm:$0xff] }
 0x2e0   : > { %v4606_v22 = vpack.c.bf16 %v4454_v41, %v4454_v41  ;;  %v4455_v7 = vmax.f32 %v4423_v46, 0.0  ;;  %v3724_v5 = vrot.slane %v3722_v48, 4  ;;  %v3730_v25 = vrot.slane %v3728_v57, 5  ;;  %v13873_v53 = vpop.f32.mrf.mxu0  ;;  %v11569_v48 = vld [vmem:[%s15897_s2 + $0xc8] sm:$0xff] }
 0x2e1   : > { %6316 = vmatmul.bf16.gmra.mxu2 %v6212_v40  ;;  %v3715_v14 = vor.u32 %v3714_v55, %v3711_v58  ;;  %v4152_v54 = vrot.slane %v10675_v12, 5  ;;  %v4155_v21 = vrot.slane %v10676_v11, 5  ;;  %v5472_v13 = vshrl.u32 %v10818_v39, 16  ;;  %v11545_v58 = vld [vmem:[%s15897_s2 + $0x88] sm:$0xff] }
 0x2e2   : > { %v13884_v31 = vpop.f32.mrf.mxu1  ;;  %v4731_v28 = vshrl.u32 %v4606_v22, 16  ;;  %v4734_v3 = vshll.u32 %v4606_v22, 16  ;;  %v4607_v6 = vpack.c.bf16 %v4455_v7, %v4455_v7  ;;  %v3725_v24 = vor.u32 %v3724_v5, %v3720_v33  ;;  %6527 = vmatpush.bf16.msrb.mxu3 %v11529_v49  ;;  %7217 = vmatpush.bf16.msrb.mxu1 %v11569_v48  ;;  %v13922_v48 = vld [vmem:[#allocation2 + $0x44] sm:$0x1] }
 0x2e3   : > { %15968 = vst [vmem:[#allocation10_spill] sm:$0xff] %v13884_v31  ;;  %v3716_v12 = vrot.slane %v3715_v14, 4  ;;  %v4153_v11 = vsel %vm11853_vm5, %v10740_v26, %v4152_v54  ;;  %v4154_v41 = vrot.slane %v4152_v54, 4  ;;  %v5474_v46 = vrot.slane %v5472_v13, 4  ;;  %v4993_v7 = vld [vmem:[#allocation2 + $0x54] sm:$0xf]  ;;  %6904 = vmatpush.bf16.msrb.mxu0 %v11545_v58 }
 0x2e4   : > { %v4733_v57 = vrot.slane %v4731_v28, 7  ;;  %v4739_v40 = vshrl.u32 %v4607_v6, 16  ;;  %v4742_v55 = vshll.u32 %v4607_v6, 16  ;;  %v3726_v22 = vrot.slane %v3725_v24, 4  ;;  %v10819_v26 = vld [vmem:[%s11769_s16 + $0xc4] sm:$0xf] }
 0x2e5   : > { %v3721_v5 = vsel %vm11841_vm4, %v3716_v12, %v3720_v33  ;;  %v4156_v62 = vsel %vm11853_vm5, %v4154_v41, %v4155_v21  ;;  %v4203_v2 = vunpack.c.l.b16 %v4153_v11  ;;  %v5475_v14 = vshll.u32 %v10818_v39, 16  ;;  %v5722_v31 = vld [vmem:[#allocation2 + $0x3c] sm:$0xf]  ;;  %v11528_v33 = vld [vmem:[%s15897_s2] sm:$0xff]  ;;  %v10820_v11 = vld [vmem:[%s11769_s16 + $0xc8] sm:$0x1] }
 0x2e6   : > { %v4736_v10 = vor.u32 %v4734_v3, %v4733_v57  ;;  %v4737_v54 = vrot.slane %v4733_v57, 4  ;;  %v4741_v13 = vrot.slane %v4739_v40, 7  ;;  %v3731_v28 = vsel %vm11841_vm4, %v3726_v22, %v3730_v25  ;;  %v13904_v6 = vpop.f32.mrf.mxu3  ;;  %v11544_v21 = vld [vmem:[%s15897_s2 + $0x80] sm:$0xff]  ;;  %v4997_v39 = vld [vmem:[#allocation2 + $0x5c] sm:$0x1]  ;;  %6528 = vmatpush.bf16.msrb.mxu3 %v11528_v33  ;;  %7218 = vmatpush.bf16.msrb.mxu1 %v11568_v42 }
 0x2e7   : > { %v3778_v3 = vunpack.c.l.b16 %v3721_v5  ;;  %v3779_v24 = vunpack.c.l.b16 %v3731_v28  ;;  %v4204_v12 = vunpack.c.l.b16 %v4156_v62  ;;  %v5477_v41 = vrot.slane %v5475_v14, 5  ;;  %v13915_v40 = vld [vmem:[#allocation2 + $0x40] sm:$0xf]  ;;  %6905 = vmatpush.bf16.msrb.mxu0 %v11544_v21 }
 0x2e8   : > { %v4994_v25 = vsel %vm13512_vm13, %v4736_v10, %v4993_v7  ;;  %v4744_v49 = vor.u32 %v4742_v55, %v4741_v13  ;;  %v4746_v58 = vrot.slane %v4741_v13, 4  ;;  %v5481_v57 = vshll.u32 %v10819_v26, 16  ;;  %v13917_v22 = vpop.f32.mrf.mxu0  ;;  %v11580_v55 = vld [vmem:[%s15897_s2 + $0x120] sm:$0xff] }
 0x2e9   : > { %4995 = vst [vmem:[#allocation2 + $0x54] sm:$0xf] %v4994_v25  ;;  %v3795_v5 = vpack.c.b16 %v3779_v24, %v3778_v3  ;;  %v4220_v62 = vpack.c.b16 %v4204_v12, %v4203_v2  ;;  %v5478_v28 = vor.u32 %v5477_v41, %v5474_v46  ;;  %v5485_v14 = vshrl.u32 %v10819_v26, 16  ;;  %v4508_v3 = vld [vmem:[#allocation2 + $0x60] sm:$0x1]  ;;  %7895 = vmatpush.bf16.msrb.mxu2 %v11580_v55 }
 0x2ea   : > { %v13924_v4 = vpop.f32.mrf.mxu1  ;;  %v4745_v7 = vsel %vm13562_vm14, %v4737_v54, %v4744_v49  ;;  %v4998_v10 = vsel %vm13308_vm8, %v4746_v58, %v4997_v39  ;;  %v5483_v13 = vrot.slane %v5481_v57, 5  ;;  %v5491_v25 = vshll.u32 %v10820_v11, 16  ;;  %v4564_v58 = vld [vmem:[#allocation2 + $0x68] sm:$0x1]  ;;  %v6610_v57 = vld [vmem:[#allocation2] sm:$0xe] }
 0x2eb   : > { %15969 = vst [vmem:[#allocation30_spill] sm:$0xff] %v13924_v4  ;;  %3943 = vmatmul.bf16.gmra.mxu3 %v3795_v5  ;;  %4368 = vmatmul.bf16.gmra.mxu0 %v4220_v62  ;;  %v5479_v46 = vrot.slane %v5478_v28, 4  ;;  %v5487_v2 = vrot.slane %v5485_v14, 4  ;;  %v5897_v26 = vshrl.u32 %v5722_v31, 16  ;;  %v5900_v24 = vshll.u32 %v5722_v31, 16 }
 0x2ec   : > { %4996 = vst [vmem:[#allocation2 + $0x58] sm:$0xf] %v4745_v7  ;;  %v5493_v12 = vrot.slane %v5491_v25, 5  ;;  %v5906_v41 = vshll.u32 %v13915_v40, 16  ;;  %v5910_v54 = vshrl.u32 %v13915_v40, 16  ;;  %v5916_v39 = vshll.u32 %v13922_v48, 16 }
 0x2ed   : > { %4999 = vst [vmem:[#allocation2 + $0x5c] sm:$0x1] %v4998_v10  ;;  %v5484_v33 = vsel %vm11841_vm4, %v5479_v46, %v5483_v13  ;;  %v5488_v21 = vor.u32 %v5487_v2, %v5483_v13  ;;  %v5899_v11 = vrot.slane %v5897_v26, 4  ;;  %v5902_v49 = vrot.slane %v5900_v24, 5  ;;  %v15970_v25 = vld [vmem:[#allocation11_spill] sm:$0xff] }
 0x2ee   : > { %v5541_v5 = vunpack.c.l.b16 %v5484_v33  ;;  %v5908_v31 = vrot.slane %v5906_v41, 5  ;;  %v5912_v62 = vrot.slane %v5910_v54, 4  ;;  %v5918_v28 = vrot.slane %v5916_v39, 5  ;;  %v13938_v14 = vpop.f32.mrf.mxu3  ;;  %v11669_v39 = vld [vmem:[#allocation2 + $0x4] sm:$0xf] }
 0x2ef   : > { %v5489_v7 = vrot.slane %v5488_v21, 4  ;;  %v5903_v10 = vor.u32 %v5902_v49, %v5899_v11  ;;  %v3963_v42 = vadd.f32 %v13871_v35, %v15970_v25  ;;  %v4509_v55 = vsel %vm13308_vm8, 0, %v4508_v3  ;;  %v6611_v4 = vld [vmem:[#allocation2 + $0xc] sm:$0xe] }
 0x2f0   : > { %v5913_v46 = vor.u32 %v5912_v62, %v5908_v31  ;;  %4510 = vst [vmem:[#allocation2 + $0x60] sm:$0x1] %v4509_v55  ;;  %v3964_v13 = vadd.f32 %v13904_v6, %v13417_v30  ;;  %v4565_v2 = vsel %vm13333_vm10, 0, %v4564_v58  ;;  %v10981_v26 = vrot.slane %v6610_v57, 9  ;;  %v13948_v24 = vpop.f32.mrf.mxu0  ;;  %v11670_v6 = vld [vmem:[#allocation2 + $0x8] sm:$0x1] }
 0x2f1   : > { %v5494_v41 = vsel %vm11841_vm4, %v5489_v7, %v5493_v12  ;;  %v5904_v54 = vrot.slane %v5903_v10, 4  ;;  %v4388_v35 = vadd.f32 %v13849_v59, %v3963_v42  ;;  %4566 = vst [vmem:[#allocation2 + $0x68] sm:$0x1] %v4565_v2  ;;  %v6660_v3 = vrot.slane %v11669_v39, 5  ;;  %v5724_v62 = vld [vmem:[#allocation2 + $0x48] sm:$0xf] }
 0x2f2   : > { %v13953_v33 = vpop.f32.mrf.mxu1  ;;  %v5542_v21 = vunpack.c.l.b16 %v5494_v41  ;;  %v5914_v11 = vrot.slane %v5913_v46, 4  ;;  %v4389_v30 = vadd.f32 %v13873_v53, %v3964_v13  ;;  %v6663_v49 = vrot.slane %v11670_v6, 5  ;;  %v13964_v53 = vld [vmem:[#allocation2 + $0x4c] sm:$0xf] }
 0x2f3   : > { %15971 = vst [vmem:[#allocation11_spill] sm:$0xff] %v13953_v33  ;;  %v5909_v58 = vsel %vm11841_vm4, %v5904_v54, %v5908_v31  ;;  %v4424_v57 = vadd.f32 %v13799_v29, %v4388_v35  ;;  %v6661_v12 = vsel %vm11853_vm5, %v10981_v26, %v6660_v3  ;;  %v6662_v59 = vrot.slane %v6660_v3, 4  ;;  %v13968_v3 = vld [vmem:[#allocation2 + $0x50] sm:$0x1] }
 0x2f4   : > { %v5558_v7 = vpack.c.b16 %v5542_v21, %v5541_v5  ;;  %v5919_v10 = vsel %vm11841_vm4, %v5914_v11, %v5918_v28  ;;  %v6186_v25 = vunpack.c.l.b16 %v5909_v58  ;;  %v4425_v42 = vadd.f32 %v13799_v29, %v4389_v30  ;;  %v11512_v28 = vld [vmem:[#allocation2] sm:$0xff] }
 0x2f5   : > { %v6187_v55 = vunpack.c.l.b16 %v5919_v10  ;;  %v4456_v46 = vmax.f32 %v4424_v57, 0.0  ;;  %v6664_v31 = vsel %vm11853_vm5, %v6662_v59, %v6663_v49  ;;  %v6786_v13 = vunpack.c.l.b16 %v6661_v12  ;;  %v4511_v57 = vld [vmem:[#allocation2 + $0x6c] sm:$0x1] }
 0x2f6   : > { %5706 = vmatmul.bf16.gmra.mxu1 %v5558_v7  ;;  %v4457_v2 = vmax.f32 %v4425_v42, 0.0  ;;  %v6787_v26 = vunpack.c.l.b16 %v6664_v31  ;;  %v5921_v41 = vshrl.u32 %v5724_v62, 16  ;;  %v5924_v54 = vshll.u32 %v5724_v62, 16  ;;  %v3911_v5 = vpop.f32.mrf.mxu3 }
 0x2f7   : > { %v6213_v35 = vpack.c.b16 %v6187_v55, %v6186_v25  ;;  %v4608_v39 = vpack.c.bf16 %v4456_v46, %v4456_v46  ;;  %v5930_v21 = vshll.u32 %v13964_v53, 16  ;;  %v5934_v11 = vshrl.u32 %v13964_v53, 16  ;;  %v5000_v31 = vld [vmem:[#allocation2 + $0x60] sm:$0xf] }
 0x2f8   : > { %v4609_v30 = vpack.c.bf16 %v4457_v2, %v4457_v2  ;;  %v6818_v6 = vpack.c.b16 %v6787_v26, %v6786_v13  ;;  %v5923_v58 = vrot.slane %v5921_v41, 4  ;;  %v5926_v49 = vrot.slane %v5924_v54, 5  ;;  %v13972_v12 = vpop.f32.mrf.mxu0  ;;  %v15972_v13 = vld [vmem:[#allocation12_spill] sm:$0xff] }
 0x2f9   : > { %6321 = vmatmul.bf16.gmra.mxu2 %v6213_v35  ;;  %v4748_v59 = vshrl.u32 %v4608_v39, 16  ;;  %v5932_v62 = vrot.slane %v5930_v21, 5  ;;  %v5936_v7 = vrot.slane %v5934_v11, 4  ;;  %v4751_v10 = vshll.u32 %v4608_v39, 16 }
 0x2fa   : > { %v4756_v25 = vshrl.u32 %v4609_v30, 16  ;;  %v5927_v42 = vor.u32 %v5926_v49, %v5923_v58  ;;  %v5940_v55 = vshll.u32 %v13968_v3, 16  ;;  %v3965_v26 = vadd.f32 %v13938_v14, %v15972_v13  ;;  %v13979_v54 = vpop.f32.mrf.mxu1  ;;  %v5004_v49 = vld [vmem:[#allocation2 + $0x68] sm:$0x1] }
 0x2fb   : > { %v4750_v46 = vrot.slane %v4748_v59, 7  ;;  %6529 = vmatmul.bf16.vlgmr.msrb.gmra.mxu3 %v11512_v28  ;;  %6906 = vmatmul.bf16.vlgmr.msrb.gmra.mxu0 %v6818_v6  ;;  %v5937_v2 = vor.u32 %v5936_v7, %v5932_v62  ;;  %v4512_v41 = vsel %vm13308_vm8, 0, %v4511_v57  ;;  %15973 = vst [vmem:[#allocation12_spill] sm:$0xff] %v13979_v54  ;;  %v4759_v21 = vshll.u32 %v4609_v30, 16  ;;  %v4567_v57 = vld [vmem:[#allocation2 + $0x74] sm:$0x1] }
 0x2fc   : > { %v4758_v35 = vrot.slane %v4756_v25, 7  ;;  %v5928_v39 = vrot.slane %v5927_v42, 4  ;;  %4513 = vst [vmem:[#allocation2 + $0x6c] sm:$0x1] %v4512_v41  ;;  %v3966_v11 = vadd.f32 %v3911_v5, %v12958_v51  ;;  %v5942_v28 = vrot.slane %v5940_v55, 5 }
 0x2fd   : > { %v4753_v58 = vor.u32 %v4751_v10, %v4750_v46  ;;  %v5938_v59 = vrot.slane %v5937_v2, 4  ;;  %v4390_v6 = vadd.f32 %v13917_v22, %v3965_v26  ;;  %v4754_v7 = vrot.slane %v4750_v46, 4  ;;  %v5726_v22 = vld [vmem:[#allocation2 + $0x54] sm:$0xf]  ;;  %v13996_v46 = vld [vmem:[#allocation2 + $0x58] sm:$0xf] }
 0x2fe   : > { %v4761_v33 = vor.u32 %v4759_v21, %v4758_v35  ;;  %v4763_v14 = vrot.slane %v4758_v35, 4  ;;  %v4391_v13 = vadd.f32 %v13948_v24, %v3966_v11  ;;  %v3914_v54 = vpop.f32.mrf.mxu3  ;;  %v5933_v51 = vsel %vm11841_vm4, %v5928_v39, %v5932_v62  ;;  %v11671_v41 = vld [vmem:[#allocation2 + $0x10] sm:$0xf]  ;;  %v11672_v39 = vld [vmem:[#allocation2 + $0x14] sm:$0x1] }
 0x2ff   : > { %v5001_v30 = vsel %vm13512_vm13, %v4753_v58, %v5000_v31  ;;  %v5943_v5 = vsel %vm11841_vm4, %v5938_v59, %v5942_v28  ;;  %v4426_v10 = vadd.f32 %v13799_v29, %v4390_v6  ;;  %v4568_v2 = vsel %vm13333_vm10, 0, %v4567_v57 }
 0x300   : > { %5002 = vst [vmem:[#allocation2 + $0x60] sm:$0xf] %v5001_v30  ;;  %v4762_v25 = vsel %vm13562_vm14, %v4754_v7, %v4761_v33  ;;  %v5005_v24 = vsel %vm13308_vm8, %v4763_v14, %v5004_v49  ;;  %v6189_v42 = vunpack.c.l.b16 %v5943_v5  ;;  %v4427_v55 = vadd.f32 %v13799_v29, %v4391_v13  ;;  %v13998_v31 = vpop.f32.mrf.mxu0  ;;  %v11552_v7 = vld [vmem:[#allocation2 + $0xc] sm:$0xff] }
 0x301   : > { %5003 = vst [vmem:[#allocation2 + $0x64] sm:$0xf] %v4762_v25  ;;  %v4458_v62 = vmax.f32 %v4426_v10, 0.0  ;;  %v10982_v26 = vrot.slane %v6611_v4, 9  ;;  %v6667_v35 = vrot.slane %v11671_v41, 5  ;;  %v6188_v33 = vunpack.c.l.b16 %v5933_v51 }
 0x302   : > { %5006 = vst [vmem:[#allocation2 + $0x68] sm:$0x1] %v5005_v24  ;;  %v4459_v21 = vmax.f32 %v4427_v55, 0.0  ;;  %v6670_v11 = vrot.slane %v11672_v39, 5  ;;  %v5945_v58 = vshrl.u32 %v5726_v22, 16  ;;  %v5948_v6 = vshll.u32 %v5726_v22, 16  ;;  %v14007_v25 = vpop.f32.mrf.mxu1 }
 0x303   : > { %v4610_v49 = vpack.c.bf16 %v4458_v62, %v4458_v62  ;;  %4569 = vst [vmem:[#allocation2 + $0x74] sm:$0x1] %v4568_v2  ;;  %v6668_v59 = vsel %vm11853_vm5, %v10982_v26, %v6667_v35  ;;  %v6669_v28 = vrot.slane %v6667_v35, 4  ;;  %v5954_v4 = vshll.u32 %v13996_v46, 16  ;;  %v4514_v10 = vld [vmem:[#allocation2 + $0x78] sm:$0x1] }
 0x304   : > { %v4611_v14 = vpack.c.bf16 %v4459_v21, %v4459_v21  ;;  %v5947_v13 = vrot.slane %v5945_v58, 4  ;;  %v6214_v57 = vpack.c.b16 %v6189_v42, %v6188_v33  ;;  %v5950_v5 = vrot.slane %v5948_v6, 5  ;;  %15974 = vst [vmem:[#allocation31_spill] sm:$0xff] %v14007_v25  ;;  %v14009_v22 = vld [vmem:[#allocation2 + $0x5c] sm:$0x1] }
 0x305   : > { %v4765_v30 = vshrl.u32 %v4610_v49, 16  ;;  %v6671_v51 = vsel %vm11853_vm5, %v6669_v28, %v6670_v11  ;;  %v4768_v24 = vshll.u32 %v4610_v49, 16  ;;  %v6788_v62 = vunpack.c.l.b16 %v6668_v59  ;;  %v4570_v33 = vld [vmem:[#allocation2 + $0x80] sm:$0x1]  ;;  %v5007_v39 = vld [vmem:[#allocation2 + $0x6c] sm:$0xf] }
 0x306   : > { %7219 = vmatmul.bf16.vlgmr.msrb.gmra.mxu1 %v11552_v7  ;;  %v4773_v55 = vshrl.u32 %v4611_v14, 16  ;;  %v6789_v2 = vunpack.c.l.b16 %v6671_v51  ;;  %v3916_v26 = vpop.f32.mrf.mxu3  ;;  %v5951_v35 = vor.u32 %v5950_v5, %v5947_v13  ;;  %v5956_v21 = vrot.slane %v5954_v4, 5  ;;  %v15975_v28 = vld [vmem:[#allocation13_spill] sm:$0xff]  ;;  %v11579_v4 = vld [vmem:[%s15897_s2 + $0x118] sm:$0xff] }
 0x307   : > { %v4767_v41 = vrot.slane %v4765_v30, 7  ;;  %v5958_v42 = vshrl.u32 %v13996_v46, 16  ;;  %v4776_v58 = vshll.u32 %v4611_v14, 16  ;;  %v3967_v6 = vadd.f32 %v3914_v54, %v15975_v28  ;;  %v11513_v51 = vld [vmem:[#allocation2 + $0xc] sm:$0xff]  ;;  %7896 = vmatpush.bf16.msrb.mxu2 %v11579_v4 }
 0x308   : > { %v4775_v11 = vrot.slane %v4773_v55, 7  ;;  %v4515_v49 = vsel %vm13308_vm8, 0, %v4514_v10  ;;  %v14015_v7 = vpop.f32.mrf.mxu0  ;;  %v6819_v25 = vpack.c.b16 %v6789_v2, %v6788_v62  ;;  %v5964_v13 = vshll.u32 %v14009_v22, 16  ;;  %v5728_v2 = vld [vmem:[#allocation2 + $0x60] sm:$0xf] }
 0x309   : > { %6326 = vmatmul.bf16.gmra.mxu2 %v6214_v57  ;;  %v4770_v59 = vor.u32 %v4768_v24, %v4767_v41  ;;  %v5960_v30 = vrot.slane %v5958_v42, 4  ;;  %4516 = vst [vmem:[#allocation2 + $0x78] sm:$0x1] %v4515_v49  ;;  %v4771_v14 = vrot.slane %v4767_v41, 4  ;;  %v4392_v10 = vadd.f32 %v13972_v12, %v3967_v6  ;;  %v11673_v6 = vld [vmem:[#allocation2 + $0x1c] sm:$0xf] }
 0x30a   : > { %v4778_v5 = vor.u32 %v4776_v58, %v4775_v11  ;;  %v4780_v54 = vrot.slane %v4775_v11, 4  ;;  %v5011_v55 = vld [vmem:[#allocation2 + $0x74] sm:$0x1]  ;;  %v5952_v24 = vrot.slane %v5951_v35, 4  ;;  %v4571_v12 = vsel %vm13333_vm10, 0, %v4570_v33 }
 0x30b   : > { %v5008_v57 = vsel %vm13512_vm13, %v4770_v59, %v5007_v39  ;;  %6534 = vmatmul.bf16.gmra.mxu3 %v11513_v51  ;;  %6911 = vmatmul.bf16.gmra.mxu0 %v6819_v25  ;;  %v5961_v62 = vor.u32 %v5960_v30, %v5956_v21  ;;  %v4428_v11 = vadd.f32 %v13799_v29, %v4392_v10  ;;  %v6612_v58 = vld [vmem:[#allocation2 + $0x18] sm:$0xe]  ;;  %v5966_v25 = vrot.slane %v5964_v13, 5  ;;  %v15976_v35 = vld [vmem:[#allocation14_spill] sm:$0xff]  ;;  %v14034_v30 = vld [vmem:[#allocation2 + $0x64] sm:$0xf]  ;;  %v14039_v13 = vpop.f32.mrf.mxu1 }
 0x30c   : > { %5009 = vst [vmem:[#allocation2 + $0x6c] sm:$0xf] %v5008_v57  ;;  %v4779_v42 = vsel %vm13562_vm14, %v4771_v14, %v4778_v5  ;;  %v5012_v41 = vsel %vm13308_vm8, %v4780_v54, %v5011_v55  ;;  %v3968_v28 = vadd.f32 %v3916_v26, %v15976_v35  ;;  %v6674_v49 = vrot.slane %v11673_v6, 5  ;;  %v4517_v35 = vld [vmem:[#allocation2 + $0x84] sm:$0x1] }
 0x30d   : > { %5010 = vst [vmem:[#allocation2 + $0x70] sm:$0xf] %v4779_v42  ;;  %v5962_v39 = vrot.slane %v5961_v62, 4  ;;  %v5957_v59 = vsel %vm11841_vm4, %v5952_v24, %v5956_v21  ;;  %v4460_v51 = vmax.f32 %v4428_v11, 0.0  ;;  %v5969_v14 = vshrl.u32 %v5728_v2, 16  ;;  %v14041_v42 = vpop.f32.mrf.mxu2 }
 0x30e   : > { %5013 = vst [vmem:[#allocation2 + $0x74] sm:$0x1] %v5012_v41  ;;  %v3919_v5 = vpop.f32.mrf.mxu3  ;;  %v4393_v4 = vadd.f32 %v13998_v31, %v3968_v28  ;;  %v6676_v26 = vrot.slane %v6674_v49, 4  ;;  %v5972_v54 = vshll.u32 %v5728_v2, 16  ;;  %v10983_v57 = vrot.slane %v6612_v58, 9 }
 0x30f   : > { %v5967_v33 = vsel %vm11841_vm4, %v5962_v39, %v5966_v25  ;;  %4572 = vst [vmem:[#allocation2 + $0x80] sm:$0x1] %v4571_v12  ;;  %v4612_v10 = vpack.c.bf16 %v4460_v51, %v4460_v51  ;;  %v11674_v62 = vld [vmem:[#allocation2 + $0x20] sm:$0x1]  ;;  %v6190_v41 = vunpack.c.l.b16 %v5957_v59  ;;  %v5978_v39 = vshll.u32 %v14034_v30, 16  ;;  %v11553_v59 = vld [vmem:[#allocation2 + $0x18] sm:$0xff] }
 0x310   : > { %15977 = vst [vmem:[#allocation13_spill] sm:$0xff] %v14039_v13  ;;  %v6191_v55 = vunpack.c.l.b16 %v5967_v33  ;;  %v6677_v21 = vrot.slane %v11674_v62, 5  ;;  %v4346_v24 = vpop.f32.mrf.mxu0  ;;  %v4429_v11 = vadd.f32 %v13799_v29, %v4393_v4  ;;  %v6675_v31 = vsel %vm11853_vm5, %v10983_v57, %v6674_v49  ;;  %v15978_v13 = vld [vmem:[#allocation15_spill] sm:$0xff]  ;;  %v14053_v57 = vld [vmem:[#allocation2 + $0x68] sm:$0x1] }
 0x311   : > { %v4782_v25 = vshrl.u32 %v4612_v10, 16  ;;  %v5971_v12 = vrot.slane %v5969_v14, 4  ;;  %v5974_v28 = vrot.slane %v5972_v54, 5  ;;  %v14049_v6 = vrot.slane %v5978_v39, 5  ;;  %v5014_v20 = vld [vmem:[#allocation2 + $0x78] sm:$0xf] }
 0x312   : > { %v6678_v2 = vsel %vm11853_vm5, %v6676_v26, %v6677_v21  ;;  %v4461_v58 = vmax.f32 %v4429_v11, 0.0  ;;  %v5982_v51 = vshrl.u32 %v14034_v30, 16  ;;  %v6215_v33 = vpack.c.b16 %v6191_v55, %v6190_v41  ;;  %v4573_v55 = vld [vmem:[#allocation2 + $0x8c] sm:$0x1] }
 0x313   : > { %v4784_v4 = vrot.slane %v4782_v25, 7  ;;  %v4785_v62 = vshll.u32 %v4612_v10, 16  ;;  %v3969_v37 = vadd.f32 %v3919_v5, %v15978_v13  ;;  %v6791_v49 = vunpack.c.l.b16 %v6678_v2 }
 0x314   : > { %v4613_v9 = vpack.c.bf16 %v4461_v58, %v4461_v58  ;;  %v5984_v26 = vrot.slane %v5982_v51, 4  ;;  %v4518_v14 = vsel %vm13308_vm8, 0, %v4517_v35  ;;  %v6790_v10 = vunpack.c.l.b16 %v6675_v31 }
 0x315   : > { %v4787_v54 = vor.u32 %v4785_v62, %v4784_v4  ;;  %v4394_v21 = vadd.f32 %v14015_v7, %v3969_v37  ;;  %4519 = vst [vmem:[#allocation2 + $0x84] sm:$0x1] %v4518_v14  ;;  %v5975_v39 = vor.u32 %v5974_v28, %v5971_v12  ;;  %v5988_v2 = vshll.u32 %v14053_v57, 16  ;;  %v6613_v37 = vld [vmem:[#allocation2 + $0x24] sm:$0xe]  ;;  %v14066_v12 = vpop.f32.mrf.mxu2  ;;  %v11514_v28 = vld [vmem:[#allocation2 + $0x18] sm:$0xff]  ;;  %v14068_v62 = vpop.f32.mrf.mxu1 }
 0x316   : > { %7224 = vmatmul.bf16.gmra.mxu1 %v11553_v59  ;;  %v3921_v11 = vpop.f32.mrf.mxu3  ;;  %v4790_v41 = vshrl.u32 %v4613_v9, 16  ;;  %v5985_v5 = vor.u32 %v5984_v26, %v14049_v6  ;;  %v5018_v25 = vld [vmem:[#allocation2 + $0x80] sm:$0x1]  ;;  %v4793_v31 = vshll.u32 %v4613_v9, 16  ;;  %v6820_v59 = vpack.c.b16 %v6791_v49, %v6790_v10  ;;  %15979 = vst [vmem:[#allocation14_spill] sm:$0xff] %v14068_v62 }
 0x317   : > { %v5015_v13 = vsel %vm13512_vm13, %v4787_v54, %v5014_v20  ;;  %v4430_v35 = vadd.f32 %v13799_v29, %v4394_v21  ;;  %v3970_v58 = vadd.f32 %v3921_v11, %v13060_v27  ;;  %v4574_v20 = vsel %vm13333_vm10, 0, %v4573_v55  ;;  %v11675_v27 = vld [vmem:[#allocation2 + $0x28] sm:$0xf]  ;;  %v5730_v10 = vld [vmem:[#allocation2 + $0x6c] sm:$0xf] }
 0x318   : > { %v14064_v51 = vpop.f32.mrf.mxu0  ;;  %5016 = vst [vmem:[#allocation2 + $0x78] sm:$0xf] %v5015_v13  ;;  %v4792_v7 = vrot.slane %v4790_v41, 7  ;;  %v5986_v26 = vrot.slane %v5985_v5, 4  ;;  %v6681_v21 = vrot.slane %v11675_v27, 5  ;;  %v4788_v11 = vrot.slane %v4784_v4, 4 }
 0x319   : > { %6331 = vmatmul.bf16.gmra.mxu2 %v6215_v33  ;;  %v4462_v14 = vmax.f32 %v4430_v35, 0.0  ;;  %v4395_v54 = vadd.f32 %v4346_v24, %v3970_v58  ;;  %4575 = vst [vmem:[#allocation2 + $0x8c] sm:$0x1] %v4574_v20  ;;  %v5976_v9 = vrot.slane %v5975_v39, 4  ;;  %v5990_v41 = vrot.slane %v5988_v2, 5 }
 0x31a   : > { %v4795_v33 = vor.u32 %v4793_v31, %v4792_v7  ;;  %v4797_v13 = vrot.slane %v4792_v7, 4  ;;  %v14073_v62 = vld [vmem:[#allocation2 + $0x70] sm:$0xf]  ;;  %v10984_v5 = vrot.slane %v6613_v37, 9  ;;  %v6683_v35 = vrot.slane %v6681_v21, 4 }
 0x31b   : > { %6539 = vmatmul.bf16.gmra.mxu3 %v11514_v28  ;;  %6916 = vmatmul.bf16.gmra.mxu0 %v6820_v59  ;;  %v4614_v45 = vpack.c.bf16 %v4462_v14, %v4462_v14  ;;  %v4431_v49 = vadd.f32 %v13799_v29, %v4395_v54  ;;  %v5981_v4 = vsel %vm11841_vm4, %v5976_v9, %v14049_v6  ;;  %v11676_v7 = vld [vmem:[#allocation2 + $0x2c] sm:$0x1]  ;;  %v5993_v28 = vshrl.u32 %v5730_v10, 16  ;;  %v4520_v9 = vld [vmem:[#allocation2 + $0x90] sm:$0x1] }
 0x31c   : > { %v4796_v55 = vsel %vm13562_vm14, %v4788_v11, %v4795_v33  ;;  %v5019_v24 = vsel %vm13308_vm8, %v4797_v13, %v5018_v25  ;;  %v5991_v39 = vsel %vm11841_vm4, %v5986_v26, %v5990_v41  ;;  %v6684_v31 = vrot.slane %v11676_v7, 5  ;;  %v5021_v26 = vld [vmem:[#allocation2 + $0x84] sm:$0xf] }
 0x31d   : > { %5017 = vst [vmem:[#allocation2 + $0x7c] sm:$0xf] %v4796_v55  ;;  %v4799_v2 = vshrl.u32 %v4614_v45, 16  ;;  %v4463_v29 = vmax.f32 %v4431_v49, 0.0  ;;  %v5996_v59 = vshll.u32 %v5730_v10, 16  ;;  %v6002_v25 = vshll.u32 %v14073_v62, 16 }
 0x31e   : > { %5020 = vst [vmem:[#allocation2 + $0x80] sm:$0x1] %v5019_v24  ;;  %v4802_v14 = vshll.u32 %v4614_v45, 16  ;;  %v6006_v6 = vshrl.u32 %v14073_v62, 16  ;;  %v6192_v27 = vunpack.c.l.b16 %v5981_v4  ;;  %v6193_v11 = vunpack.c.l.b16 %v5991_v39  ;;  %v4576_v55 = vld [vmem:[#allocation2 + $0x98] sm:$0x1]  ;;  %v14093_v24 = vpop.f32.mrf.mxu2  ;;  %v14095_v4 = vpop.f32.mrf.mxu1 }
 0x31f   : > { %v3924_v58 = vpop.f32.mrf.mxu3  ;;  %v4801_v20 = vrot.slane %v4799_v2, 7  ;;  %v4615_v54 = vpack.c.bf16 %v4463_v29, %v4463_v29  ;;  %v14086_v33 = vrot.slane %v6002_v25, 5  ;;  %v6682_v10 = vsel %vm11853_vm5, %v10984_v5, %v6681_v21  ;;  %15980 = vst [vmem:[#allocation15_spill] sm:$0xff] %v14095_v4  ;;  %v11554_v25 = vld [vmem:[#allocation2 + $0x24] sm:$0xff] }
 0x320   : > { %v4351_v37 = vpop.f32.mrf.mxu0  ;;  %v3971_v13 = vadd.f32 %v3924_v58, %v13085_v32  ;;  %v6685_v45 = vsel %vm11853_vm5, %v6683_v35, %v6684_v31  ;;  %v5995_v39 = vrot.slane %v5993_v28, 4  ;;  %v5998_v29 = vrot.slane %v5996_v59, 5  ;;  %v5025_v31 = vld [vmem:[#allocation2 + $0x8c] sm:$0x1] }
 0x321   : > { %v4804_v41 = vor.u32 %v4802_v14, %v4801_v20  ;;  %v4807_v49 = vshrl.u32 %v4615_v54, 16  ;;  %v4810_v2 = vshll.u32 %v4615_v54, 16  ;;  %v6008_v7 = vrot.slane %v6006_v6, 4  ;;  %v14099_v14 = vld [vmem:[#allocation2 + $0x74] sm:$0x1] }
 0x322   : > { %v4396_v21 = vadd.f32 %v14064_v51, %v3971_v13  ;;  %v4521_v5 = vsel %vm13308_vm8, 0, %v4520_v9  ;;  %v6216_v35 = vpack.c.b16 %v6193_v11, %v6192_v27  ;;  %v6793_v54 = vunpack.c.l.b16 %v6685_v45  ;;  %v14110_v51 = vld [vmem:[%s15899_s4] ss:$0 sm:$0xff] }
 0x323   : > { %v5022_v32 = vsel %vm13512_vm13, %v4804_v41, %v5021_v26  ;;  %v4809_v58 = vrot.slane %v4807_v49, 7  ;;  %v6009_v28 = vor.u32 %v6008_v7, %v14086_v33  ;;  %v4577_v59 = vsel %vm13333_vm10, 0, %v4576_v55  ;;  %4522 = vst [vmem:[#allocation2 + $0x90] sm:$0x1] %v4521_v5  ;;  %v15981_v45 = vld [vmem:[#allocation16_spill] sm:$0xff]  ;;  %v11578_v5 = vld [vmem:[%s15897_s2 + $0x110] sm:$0xff] }
 0x324   : > { %5023 = vst [vmem:[#allocation2 + $0x84] sm:$0xf] %v5022_v32  ;;  %v4805_v6 = vrot.slane %v4801_v20, 4  ;;  %v4432_v13 = vadd.f32 %v14110_v51, %v4396_v21  ;;  %v6792_v11 = vunpack.c.l.b16 %v6682_v10  ;;  %v5999_v9 = vor.u32 %v5998_v29, %v5995_v39  ;;  %v11678_v32 = vld [vmem:[#allocation2 + $0x34] sm:$0xf]  ;;  %v11515_v21 = vld [vmem:[#allocation2 + $0x24] sm:$0xff]  ;;  %7897 = vmatpush.bf16.msrb.mxu2 %v11578_v5 }
 0x325   : > { %v4812_v26 = vor.u32 %v4810_v2, %v4809_v58  ;;  %v4814_v41 = vrot.slane %v4809_v58, 4  ;;  %v6012_v49 = vshll.u32 %v14099_v14, 16  ;;  %4578 = vst [vmem:[#allocation2 + $0x98] sm:$0x1] %v4577_v59  ;;  %v6688_v58 = vrot.slane %v11678_v32, 5 }
 0x326   : > { %7229 = vmatmul.bf16.gmra.mxu1 %v11554_v25  ;;  %v4464_v2 = vmax.f32 %v4432_v13, 0.0  ;;  %v6614_v25 = vld [vmem:[#allocation2 + $0x30] sm:$0xe]  ;;  %v6821_v10 = vpack.c.b16 %v6793_v54, %v6792_v11  ;;  %v6010_v39 = vrot.slane %v6009_v28, 4  ;;  %v14124_v13 = vpop.f32.mrf.mxu2  ;;  %v4523_v11 = vld [vmem:[#allocation2 + $0x9c] sm:$0x1] }
 0x327   : > { %v3926_v27 = vpop.f32.mrf.mxu3  ;;  %v4813_v20 = vsel %vm13562_vm14, %v4805_v6, %v4812_v26  ;;  %v5026_v55 = vsel %vm13308_vm8, %v4814_v41, %v5025_v31  ;;  %v14122_v26 = vld [vmem:[#allocation2 + $0x7c] sm:$0xf]  ;;  %v6000_v31 = vrot.slane %v5999_v9, 4  ;;  %v6014_v41 = vrot.slane %v6012_v49, 5 }
 0x328   : > { %v3972_v7 = vadd.f32 %v3926_v27, %v15981_v45  ;;  %5024 = vst [vmem:[#allocation2 + $0x88] sm:$0xf] %v4813_v20  ;;  %v4616_v59 = vpack.c.bf16 %v4464_v2, %v4464_v2  ;;  %v4354_v6 = vpop.f32.mrf.mxu0  ;;  %v10985_v54 = vrot.slane %v6614_v25, 9  ;;  %v5732_v27 = vld [vmem:[#allocation2 + $0x78] sm:$0xf]  ;;  %v14132_v20 = vpop.f32.mrf.mxu1  ;;  %v6026_v49 = vshll.u32 %v14122_v26, 16 }
 0x329   : > { %6336 = vmatmul.bf16.gmra.mxu2 %v6216_v35  ;;  %5027 = vst [vmem:[#allocation2 + $0x8c] sm:$0x1] %v5026_v55  ;;  %v6005_v45 = vsel %vm11841_vm4, %v6000_v31, %v14086_v33  ;;  %v11679_v25 = vld [vmem:[#allocation2 + $0x38] sm:$0x1]  ;;  %v6017_v4 = vshrl.u32 %v5732_v27, 16 }
 0x32a   : > { %v4397_v29 = vadd.f32 %v4351_v37, %v3972_v7  ;;  %v4816_v28 = vshrl.u32 %v4616_v59, 16  ;;  %v6690_v37 = vrot.slane %v6688_v58, 4  ;;  %v6015_v7 = vsel %vm11841_vm4, %v6010_v39, %v6014_v41  ;;  %15982 = vst [vmem:[#allocation16_spill] sm:$0xff] %v14132_v20  ;;  %v4579_v31 = vld [vmem:[#allocation2 + $0xa4] sm:$0x1] }
 0x32b   : > { %6544 = vmatmul.bf16.gmra.mxu3 %v11515_v21  ;;  %6921 = vmatmul.bf16.gmra.mxu0 %v6821_v10  ;;  %v4819_v2 = vshll.u32 %v4616_v59, 16  ;;  %v6691_v32 = vrot.slane %v11679_v25, 5  ;;  %v6030_v21 = vshrl.u32 %v14122_v26, 16  ;;  %v4524_v39 = vsel %vm13308_vm8, 0, %v4523_v11 }
 0x32c   : > { %v4433_v35 = vadd.f32 %v14110_v51, %v4397_v29  ;;  %v4818_v55 = vrot.slane %v4816_v28, 7  ;;  %v5028_v29 = vld [vmem:[#allocation2 + $0x90] sm:$0xf]  ;;  %v6195_v41 = vunpack.c.l.b16 %v6015_v7  ;;  %v6020_v59 = vshll.u32 %v5732_v27, 16  ;;  %4525 = vst [vmem:[#allocation2 + $0x9c] sm:$0x1] %v4524_v39 }
 0x32d   : > { %v6692_v28 = vsel %vm11853_vm5, %v6690_v37, %v6691_v32  ;;  %v14141_v20 = vrot.slane %v6026_v49, 5  ;;  %v6032_v44 = vrot.slane %v6030_v21, 4  ;;  %v6689_v11 = vsel %vm11853_vm5, %v10985_v54, %v6688_v58  ;;  %v11555_v37 = vld [vmem:[#allocation2 + $0x30] sm:$0xff]  ;;  %v5032_v21 = vld [vmem:[#allocation2 + $0x98] sm:$0x1] }
 0x32e   : > { %v4465_v9 = vmax.f32 %v4433_v35, 0.0  ;;  %v4821_v35 = vor.u32 %v4819_v2, %v4818_v55  ;;  %v4580_v7 = vsel %vm13333_vm10, 0, %v4579_v31  ;;  %v6019_v49 = vrot.slane %v6017_v4, 4 }
 0x32f   : > { %v3929_v10 = vpop.f32.mrf.mxu3  ;;  %4581 = vst [vmem:[#allocation2 + $0xa4] sm:$0x1] %v4580_v7  ;;  %v6033_v31 = vor.u32 %v6032_v44, %v14141_v20  ;;  %v6695_v44 = vrot.slane %v13915_v40, 5 }
 0x330   : > { %v4617_v5 = vpack.c.bf16 %v4465_v9, %v4465_v9  ;;  %v3973_v33 = vadd.f32 %v3929_v10, %v13153_v17  ;;  %v6194_v9 = vunpack.c.l.b16 %v6005_v45  ;;  %v5029_v17 = vsel %vm13512_vm13, %v4821_v35, %v5028_v29  ;;  %v14147_v10 = vld [vmem:[#allocation2 + $0x80] sm:$0x1]  ;;  %v4356_v39 = vpop.f32.mrf.mxu0  ;;  %v14152_v35 = vpop.f32.mrf.mxu2 }
 0x331   : > { %5030 = vst [vmem:[#allocation2 + $0x90] sm:$0xf] %v5029_v17  ;;  %v4822_v45 = vrot.slane %v4818_v55, 4  ;;  %v6022_v29 = vrot.slane %v6020_v59, 5  ;;  %v14164_v17 = vld [vmem:[#allocation2 + $0x88] sm:$0xf] }
 0x332   : > { %v4824_v25 = vshrl.u32 %v4617_v5, 16  ;;  %v4398_v36 = vadd.f32 %v4354_v6, %v3973_v33  ;;  %v4827_v2 = vshll.u32 %v4617_v5, 16  ;;  %v6217_v6 = vpack.c.b16 %v6195_v41, %v6194_v9  ;;  %v14160_v41 = vpop.f32.mrf.mxu1 }
 0x333   : > { %v6795_v33 = vunpack.c.l.b16 %v6692_v28  ;;  %v6036_v5 = vshll.u32 %v14147_v10, 16  ;;  %15983 = vst [vmem:[#allocation32_spill] sm:$0xff] %v14160_v41  ;;  %v6794_v28 = vunpack.c.l.b16 %v6689_v11 }
 0x334   : > { %v4826_v27 = vrot.slane %v4824_v25, 7  ;;  %v4434_v32 = vadd.f32 %v14110_v51, %v4398_v36  ;;  %v11516_v25 = vld [vmem:[#allocation2 + $0x30] sm:$0xff] }
 0x335   : > { %v6822_v7 = vpack.c.b16 %v6795_v33, %v6794_v28  ;;  %v6054_v33 = vshrl.u32 %v14164_v17, 16 }
 0x336   : > { %v4829_v58 = vor.u32 %v4827_v2, %v4826_v27  ;;  %v4831_v54 = vrot.slane %v4826_v27, 4  ;;  %v4466_v63 = vmax.f32 %v4434_v32, 0.0  ;;  %7234 = vmatmul.bf16.gmra.mxu1 %v11555_v37  ;;  %v6023_v37 = vor.u32 %v6022_v29, %v6019_v49  ;;  %v4526_v32 = vld [vmem:[#allocation2 + $0xa8] sm:$0x1] }
 0x337   : > { %v3931_v4 = vpop.f32.mrf.mxu3  ;;  %v6034_v27 = vrot.slane %v6033_v31, 4  ;;  %v4527_v49 = vsel %vm13308_vm8, 0, %v4526_v32 }
 0x338   : > { %v4830_v36 = vsel %vm13562_vm14, %v4822_v45, %v4829_v58  ;;  %v5033_v55 = vsel %vm13308_vm8, %v4831_v54, %v5032_v21  ;;  %v4618_v59 = vpack.c.bf16 %v4466_v63, %v4466_v63  ;;  %v3974_v9 = vadd.f32 %v3931_v4, %v13185_v15  ;;  %v5734_v58 = vld [vmem:[#allocation2 + $0x84] sm:$0xf]  ;;  %v4582_v15 = vld [vmem:[#allocation2 + $0xb0] sm:$0x1]  ;;  %v5035_v54 = vld [vmem:[#allocation2 + $0x9c] sm:$0xf] }
 0x339   : > { %5031 = vst [vmem:[#allocation2 + $0x94] sm:$0xf] %v4830_v36  ;;  %6341 = vmatmul.bf16.gmra.mxu2 %v6217_v6  ;;  %v6038_v45 = vrot.slane %v6036_v5, 5  ;;  %v6050_v6 = vshll.u32 %v14164_v17, 16  ;;  %v6024_v29 = vrot.slane %v6023_v37, 4  ;;  %v6697_v5 = vrot.slane %v6695_v44, 4  ;;  %v4359_v36 = vpop.f32.mrf.mxu0 }
 0x33a   : > { %5034 = vst [vmem:[#allocation2 + $0x98] sm:$0x1] %v5033_v55  ;;  %v4833_v2 = vshrl.u32 %v4618_v59, 16  ;;  %v4399_v21 = vadd.f32 %v4356_v39, %v3974_v9  ;;  %v4836_v11 = vshll.u32 %v4618_v59, 16  ;;  %v6615_v55 = vld [vmem:[#allocation2 + $0x3c] sm:$0xe] }
 0x33b   : > { %6549 = vmatmul.bf16.gmra.mxu3 %v11516_v25  ;;  %6926 = vmatmul.bf16.gmra.mxu0 %v6822_v7  ;;  %v6039_v39 = vsel %vm11841_vm4, %v6034_v27, %v6038_v45  ;;  %4528 = vst [vmem:[#allocation2 + $0xa8] sm:$0x1] %v4527_v49  ;;  %v6041_v28 = vshrl.u32 %v5734_v58, 16  ;;  %v6044_v59 = vshll.u32 %v5734_v58, 16  ;;  %v4583_v9 = vsel %vm13333_vm10, 0, %v4582_v15  ;;  %v14183_v27 = vpop.f32.mrf.mxu2  ;;  %v14189_v15 = vpop.f32.mrf.mxu1 }
 0x33c   : > { %v14166_v63 = vrot.slane %v4833_v2, 7  ;;  %v4435_v40 = vadd.f32 %v14110_v51, %v4399_v21  ;;  %v6029_v7 = vsel %vm11841_vm4, %v6024_v29, %v14141_v20  ;;  %4584 = vst [vmem:[#allocation2 + $0xb0] sm:$0x1] %v4583_v9  ;;  %v6698_v45 = vrot.slane %v13922_v48, 5  ;;  %v14193_v29 = vld [vmem:[#allocation2 + $0x8c] sm:$0x1] }
 0x33d   : > { %v14187_v21 = vrot.slane %v6050_v6, 5  ;;  %v6197_v58 = vunpack.c.l.b16 %v6039_v39  ;;  %15984 = vst [vmem:[#allocation33_spill] sm:$0xff] %v14189_v15  ;;  %v11556_v48 = vld [vmem:[#allocation2 + $0x3c] sm:$0xff]  ;;  %v6622_v38 = vld [vmem:[#allocation2 + $0x90] sm:$0xe] }
 0x33e   : > { %v4838_v31 = vor.u32 %v4836_v11, %v14166_v63  ;;  %v4467_v4 = vmax.f32 %v4435_v40, 0.0  ;;  %v6056_v11 = vrot.slane %v6054_v33, 4  ;;  %v10986_v40 = vrot.slane %v6615_v55, 9  ;;  %v5039_v55 = vld [vmem:[#allocation2 + $0xa4] sm:$0x1] }
 0x33f   : > { %v3934_v25 = vpop.f32.mrf.mxu3 }
 0x340   : > { %v5036_v37 = vsel %vm13512_vm13, %v4838_v31, %v5035_v54  ;;  %v3975_v2 = vadd.f32 %v3934_v25, %v13225_v50  ;;  %v4619_v32 = vpack.c.bf16 %v4467_v4, %v4467_v4  ;;  %v6699_v54 = vsel %vm11853_vm5, %v6697_v5, %v6698_v45 }
 0x341   : > { %5037 = vst [vmem:[#allocation2 + $0x9c] sm:$0xf] %v5036_v37  ;;  %v6043_v50 = vrot.slane %v6041_v28, 4  ;;  %v6046_v31 = vrot.slane %v6044_v59, 5  ;;  %v6196_v25 = vunpack.c.l.b16 %v6029_v7  ;;  %v6696_v33 = vsel %vm11853_vm5, %v10986_v40, %v6695_v44 }
 0x342   : > { %v4400_v20 = vadd.f32 %v4359_v36, %v3975_v2  ;;  %v4841_v49 = vshrl.u32 %v4619_v32, 16  ;;  %v4844_v9 = vshll.u32 %v4619_v32, 16  ;;  %v6057_v39 = vor.u32 %v6056_v11, %v14187_v21 }
 0x343   : > { %v6218_v36 = vpack.c.b16 %v6197_v58, %v6196_v25  ;;  %v6797_v37 = vunpack.c.l.b16 %v6699_v54  ;;  %v6060_v5 = vshll.u32 %v14193_v29, 16  ;;  %v4839_v28 = vrot.slane %v14166_v63, 4  ;;  %v11517_v58 = vld [vmem:[#allocation2 + $0x3c] sm:$0xff]  ;;  %v4361_v54 = vpop.f32.mrf.mxu0  ;;  %v14207_v63 = vpop.f32.mrf.mxu2 }
 0x344   : > { %v4436_v4 = vadd.f32 %v14110_v51, %v4400_v20  ;;  %v4843_v6 = vrot.slane %v4841_v49, 7  ;;  %v6047_v45 = vor.u32 %v6046_v31, %v6043_v50  ;;  %v6796_v49 = vunpack.c.l.b16 %v6696_v33  ;;  %v14214_v33 = vpop.f32.mrf.mxu1 }
 0x345   : > { %v6058_v40 = vrot.slane %v6057_v39, 4  ;;  %v6702_v25 = vrot.slane %v13964_v53, 5  ;;  %15985 = vst [vmem:[#allocation34_spill] sm:$0xff] %v14214_v33  ;;  %v14435_v33 = vld [vmem:[#allocation2 + $0x2c] sm:$0x1] }
 0x346   : > { %v4468_v2 = vmax.f32 %v4436_v4, 0.0  ;;  %7239 = vmatmul.bf16.gmra.mxu1 %v11556_v48  ;;  %v4846_v59 = vor.u32 %v4844_v9, %v4843_v6  ;;  %v4848_v7 = vrot.slane %v4843_v6, 4  ;;  %v6823_v50 = vpack.c.b16 %v6797_v37, %v6796_v49  ;;  %v14209_v48 = vld [vmem:[#allocation2 + $0x94] sm:$0xf] }
 0x347   : > { %v3936_v20 = vpop.f32.mrf.mxu3  ;;  %v6048_v6 = vrot.slane %v6047_v45, 4  ;;  %v6062_v9 = vrot.slane %v6060_v5, 5  ;;  %v4529_v37 = vld [vmem:[#allocation2 + $0xb4] sm:$0x1]  ;;  %v6078_v49 = vshrl.u32 %v14209_v48, 16 }
 0x348   : > { %v4620_v32 = vpack.c.bf16 %v4468_v2, %v4468_v2  ;;  %v3976_v15 = vadd.f32 %v3936_v20, %v13259_v1  ;;  %v4847_v44 = vsel %vm13562_vm14, %v4839_v28, %v4846_v59  ;;  %v5040_v11 = vsel %vm13308_vm8, %v4848_v7, %v5039_v55  ;;  %v11577_v1 = vld [vmem:[%s15897_s2 + $0x108] sm:$0xff] }
 0x349   : > { %6346 = vmatmul.bf16.gmra.mxu2 %v6218_v36  ;;  %5038 = vst [vmem:[#allocation2 + $0xa0] sm:$0xf] %v4847_v44  ;;  %v6616_v55 = vld [vmem:[#allocation2 + $0x48] sm:$0xe]  ;;  %v6063_v2 = vsel %vm11841_vm4, %v6058_v40, %v6062_v9  ;;  %v6704_v59 = vrot.slane %v6702_v25, 4  ;;  %v6074_v7 = vshll.u32 %v14209_v48, 16  ;;  %v6053_v44 = vsel %vm11841_vm4, %v6048_v6, %v14187_v21 }
 0x34a   : > { %v4850_v31 = vshrl.u32 %v4620_v32, 16  ;;  %v4401_v4 = vadd.f32 %v4361_v54, %v3976_v15  ;;  %5041 = vst [vmem:[#allocation2 + $0xa4] sm:$0x1] %v5040_v11  ;;  %v4853_v39 = vshll.u32 %v4620_v32, 16  ;;  %v4585_v15 = vld [vmem:[#allocation2 + $0xbc] sm:$0x1]  ;;  %7898 = vmatpush.bf16.msrb.mxu2 %v11577_v1 }
 0x34b   : > { %6554 = vmatmul.bf16.gmra.mxu3 %v11517_v58  ;;  %6931 = vmatmul.bf16.gmra.mxu0 %v6823_v50  ;;  %v5042_v28 = vld [vmem:[#allocation2 + $0xa8] sm:$0xf]  ;;  %v4530_v5 = vsel %vm13308_vm8, 0, %v4529_v37  ;;  %v4586_v32 = vsel %vm13333_vm10, 0, %v4585_v15  ;;  %v6705_v40 = vrot.slane %v13968_v3, 5  ;;  %v6199_v50 = vunpack.c.l.b16 %v6063_v2 }
 0x34c   : > { %v4852_v53 = vrot.slane %v4850_v31, 7  ;;  %v4437_v36 = vadd.f32 %v14110_v51, %v4401_v4  ;;  %4531 = vst [vmem:[#allocation2 + $0xb4] sm:$0x1] %v4530_v5  ;;  %v5736_v54 = vld [vmem:[#allocation2 + $0x90] sm:$0xf]  ;;  %v10987_v31 = vrot.slane %v6616_v55, 9 }
 0x34d   : > { %4587 = vst [vmem:[#allocation2 + $0xbc] sm:$0x1] %v4586_v32  ;;  %v6706_v1 = vsel %vm11853_vm5, %v6704_v59, %v6705_v40  ;;  %v14233_v9 = vrot.slane %v6074_v7, 5  ;;  %v6065_v37 = vshrl.u32 %v5736_v54, 16  ;;  %v6068_v21 = vshll.u32 %v5736_v54, 16  ;;  %v11557_v2 = vld [vmem:[#allocation2 + $0x48] sm:$0xff]  ;;  %v14241_v7 = vpop.f32.mrf.mxu1 }
 0x34e   : > { %v4855_v45 = vor.u32 %v4853_v39, %v4852_v53  ;;  %v4469_v20 = vmax.f32 %v4437_v36, 0.0  ;;  %v6080_v39 = vrot.slane %v6078_v49, 4  ;;  %v6198_v36 = vunpack.c.l.b16 %v6053_v44  ;;  %v14235_v6 = vpop.f32.mrf.mxu2  ;;  %v5046_v55 = vld [vmem:[#allocation2 + $0xb0] sm:$0x1]  ;;  %v14239_v32 = vld [vmem:[#allocation2 + $0x98] sm:$0x1] }
 0x34f   : > { %v6703_v3 = vsel %vm11853_vm5, %v10987_v31, %v6702_v25  ;;  %v4856_v59 = vrot.slane %v4852_v53, 4  ;;  %15986 = vst [vmem:[#allocation35_spill] sm:$0xff] %v14241_v7  ;;  %v6070_v54 = vrot.slane %v6068_v21, 5  ;;  %v6084_v31 = vshll.u32 %v14239_v32, 16  ;;  %v4532_v21 = vld [vmem:[#allocation2 + $0xc0] sm:$0x1] }
 0x350   : > { %v5043_v11 = vsel %vm13512_vm13, %v4855_v45, %v5042_v28  ;;  %v4621_v58 = vpack.c.bf16 %v4469_v20, %v4469_v20  ;;  %v6219_v5 = vpack.c.b16 %v6199_v50, %v6198_v36  ;;  %v4364_v45 = vpop.f32.mrf.mxu0  ;;  %v6799_v20 = vunpack.c.l.b16 %v6706_v1  ;;  %v11518_v1 = vld [vmem:[#allocation2 + $0x48] sm:$0xff] }
 0x351   : > { %5044 = vst [vmem:[#allocation2 + $0xa8] sm:$0xf] %v5043_v11  ;;  %v6081_v11 = vor.u32 %v6080_v39, %v14233_v9  ;;  %v6798_v40 = vunpack.c.l.b16 %v6703_v3  ;;  %v6086_v3 = vrot.slane %v6084_v31, 5 }
 0x352   : > { %v4858_v4 = vshrl.u32 %v4621_v58, 16  ;;  %v4861_v28 = vshll.u32 %v4621_v58, 16  ;;  %v6067_v58 = vrot.slane %v6065_v37, 4  ;;  %v6709_v37 = vrot.slane %v13996_v46, 5 }
 0x353   : > { %v6824_v39 = vpack.c.b16 %v6799_v20, %v6798_v40  ;;  %v6082_v36 = vrot.slane %v6081_v11, 4 }
 0x354   : > { %v4860_v15 = vrot.slane %v4858_v4, 7  ;;  %v6711_v11 = vrot.slane %v6709_v37, 4 }
 0x355   : > { %v6087_v46 = vsel %vm11841_vm4, %v6082_v36, %v6086_v3 }
 0x356   : > { %v4863_v49 = vor.u32 %v4861_v28, %v4860_v15  ;;  %v4865_v44 = vrot.slane %v4860_v15, 4  ;;  %7244 = vmatmul.bf16.gmra.mxu1 %v11557_v2  ;;  %v3939_v4 = vpop.f32.mrf.mxu3  ;;  %v6071_v28 = vor.u32 %v6070_v54, %v6067_v58 }
 0x357   : > { %v3977_v53 = vadd.f32 %v3939_v4, %v13298_v61  ;;  %v4533_v61 = vsel %vm13308_vm8, 0, %v4532_v21  ;;  %v5738_v4 = vld [vmem:[#allocation2 + $0x9c] sm:$0xf] }
 0x358   : > { %v4864_v25 = vsel %vm13562_vm14, %v4856_v59, %v4863_v49  ;;  %v5047_v50 = vsel %vm13308_vm8, %v4865_v44, %v5046_v55  ;;  %v14252_v55 = vld [vmem:[#allocation2 + $0xa0] sm:$0xf]  ;;  %4534 = vst [vmem:[#allocation2 + $0xc0] sm:$0x1] %v4533_v61  ;;  %v15988_v59 = vld [vmem:[#allocation18_spill] sm:$0xff]  ;;  %v14258_v49 = vpop.f32.mrf.mxu2  ;;  %v6072_v40 = vrot.slane %v6071_v28, 4  ;;  %v4366_v58 = vpop.f32.mrf.mxu0 }
 0x359   : > { %5045 = vst [vmem:[#allocation2 + $0xac] sm:$0xf] %v4864_v25  ;;  %6351 = vmatmul.bf16.gmra.mxu2 %v6219_v5  ;;  %v4402_v15 = vadd.f32 %v4364_v45, %v3977_v53  ;;  %v15987_v5 = vld [vmem:[#allocation20_spill] sm:$0xff]  ;;  %v6617_v44 = vld [vmem:[#allocation2 + $0x54] sm:$0xe]  ;;  %v6098_v25 = vshll.u32 %v14252_v55, 16 }
 0x35a   : > { %5048 = vst [vmem:[#allocation2 + $0xb0] sm:$0x1] %v5047_v50  ;;  %v3297_v20 = vadd.f32 %v15988_v59, %v15987_v5  ;;  %v6102_v50 = vshrl.u32 %v14252_v55, 16  ;;  %v14264_v31 = vpop.f32.mrf.mxu1  ;;  %v6077_v36 = vsel %vm11841_vm4, %v6072_v40, %v14233_v9  ;;  %v10988_v21 = vrot.slane %v6617_v44, 9  ;;  %v4588_v28 = vld [vmem:[#allocation2 + $0xc8] sm:$0x1] }
 0x35b   : > { %6559 = vmatmul.bf16.gmra.mxu3 %v11518_v1  ;;  %6936 = vmatmul.bf16.gmra.mxu0 %v6824_v39  ;;  %v4438_v2 = vadd.f32 %v14110_v51, %v4402_v15  ;;  %15989 = vst [vmem:[#allocation20_spill] sm:$0xff] %v14264_v31  ;;  %v6712_v39 = vrot.slane %v14009_v22, 5  ;;  %v6201_v15 = vunpack.c.l.b16 %v6087_v46  ;;  %v6089_v5 = vshrl.u32 %v5738_v4, 16  ;;  %v11558_v46 = vld [vmem:[#allocation2 + $0x54] sm:$0xff] }
 0x35c   : > { %v6092_v59 = vshll.u32 %v5738_v4, 16  ;;  %v14272_v7 = vrot.slane %v6098_v25, 5  ;;  %v4589_v22 = vsel %vm13333_vm10, 0, %v4588_v28  ;;  %v5049_v44 = vld [vmem:[#allocation2 + $0xb4] sm:$0xf]  ;;  %v6710_v40 = vsel %vm11853_vm5, %v10988_v21, %v6709_v37 }
 0x35d   : > { %v4470_v45 = vmax.f32 %v4438_v2, 0.0  ;;  %v6713_v61 = vsel %vm11853_vm5, %v6711_v11, %v6712_v39  ;;  %4590 = vst [vmem:[#allocation2 + $0xc8] sm:$0x1] %v4589_v22 }
 0x35e   : > { %v3941_v54 = vpop.f32.mrf.mxu3  ;;  %v6801_v25 = vunpack.c.l.b16 %v6713_v61  ;;  %v6094_v39 = vrot.slane %v6092_v59, 5  ;;  %v11519_v61 = vld [vmem:[#allocation2 + $0x54] sm:$0xff]  ;;  %v6716_v59 = vrot.slane %v14034_v30, 5 }
 0x35f   : > { %v4622_v53 = vpack.c.bf16 %v4470_v45, %v4470_v45  ;;  %v3978_v1 = vadd.f32 %v3941_v54, %v3297_v20  ;;  %v6104_v45 = vrot.slane %v6102_v50, 4  ;;  %v6200_v20 = vunpack.c.l.b16 %v6077_v36 }
 0x360   : > { %v6091_v50 = vrot.slane %v6089_v5, 4 }
 0x361   : > { %v4867_v3 = vshrl.u32 %v4622_v53, 16  ;;  %v4403_v2 = vadd.f32 %v4366_v58, %v3978_v1  ;;  %v4870_v31 = vshll.u32 %v4622_v53, 16  ;;  %v6220_v11 = vpack.c.b16 %v6201_v15, %v6200_v20  ;;  %v14279_v1 = vld [vmem:[#allocation2 + $0xa4] sm:$0x1] }
 0x362   : > { %v6105_v36 = vor.u32 %v6104_v45, %v14272_v7  ;;  %v14287_v15 = vpop.f32.mrf.mxu1  ;;  %v6095_v45 = vor.u32 %v6094_v39, %v6091_v50 }
 0x363   : > { %v4869_v54 = vrot.slane %v4867_v3, 7  ;;  %v4439_v9 = vadd.f32 %v14110_v51, %v4403_v2  ;;  %v6800_v3 = vunpack.c.l.b16 %v6710_v40  ;;  %15990 = vst [vmem:[#allocation18_spill] sm:$0xff] %v14287_v15  ;;  %v5053_v40 = vld [vmem:[#allocation2 + $0xbc] sm:$0x1] }
 0x364   : > { %v14284_v2 = vpop.f32.mrf.mxu2  ;;  %v6106_v22 = vrot.slane %v6105_v36, 4  ;;  %v6096_v30 = vrot.slane %v6095_v45, 4  ;;  %v6618_v36 = vld [vmem:[#allocation2 + $0x60] sm:$0xe] }
 0x365   : > { %v4872_v58 = vor.u32 %v4870_v31, %v4869_v54  ;;  %v4471_v4 = vmax.f32 %v4439_v9, 0.0  ;;  %v6108_v31 = vshll.u32 %v14279_v1, 16  ;;  %v6825_v5 = vpack.c.b16 %v6801_v25, %v6800_v3 }
 0x366   : > { %7249 = vmatmul.bf16.gmra.mxu1 %v11558_v46  ;;  %v14290_v46 = vld [vmem:[#allocation2 + $0xac] sm:$0xf]  ;;  %v6718_v25 = vrot.slane %v6716_v59, 4  ;;  %v6101_v45 = vsel %vm11841_vm4, %v6096_v30, %v14272_v7  ;;  %v11559_v30 = vld [vmem:[#allocation2 + $0x60] sm:$0xff] }
 0x367   : > { %v5050_v53 = vsel %vm13512_vm13, %v4872_v58, %v5049_v44  ;;  %v4623_v28 = vpack.c.bf16 %v4471_v4, %v4471_v4  ;;  %v11576_v44 = vld [vmem:[%s15897_s2 + $0x100] sm:$0xff]  ;;  %v4873_v58 = vrot.slane %v4869_v54, 4  ;;  %v6126_v3 = vshrl.u32 %v14290_v46, 16 }
 0x368   : > { %5051 = vst [vmem:[#allocation2 + $0xb4] sm:$0xf] %v5050_v53  ;;  %v4369_v37 = vpop.f32.mrf.mxu0  ;;  %7899 = vmatpush.bf16.msrb.mxu2 %v11576_v44  ;;  %v10989_v44 = vrot.slane %v6618_v36, 9 }
 0x369   : > { %6356 = vmatmul.bf16.gmra.mxu2 %v6220_v11  ;;  %v4875_v21 = vshrl.u32 %v4623_v28, 16  ;;  %v4878_v9 = vshll.u32 %v4623_v28, 16  ;;  %v6110_v11 = vrot.slane %v6108_v31, 5  ;;  %v6122_v28 = vshll.u32 %v14290_v46, 16 }
 0x36b   : > { %v4877_v20 = vrot.slane %v4875_v21, 7  ;;  %6564 = vmatmul.bf16.gmra.mxu3 %v11519_v61  ;;  %6941 = vmatmul.bf16.gmra.mxu0 %v6825_v5  ;;  %v6111_v50 = vsel %vm11841_vm4, %v6106_v22, %v6110_v11  ;;  %v6719_v61 = vrot.slane %v14053_v57, 5  ;;  %v5740_v5 = vld [vmem:[#allocation2 + $0xa8] sm:$0xf]  ;;  %v6128_v57 = vrot.slane %v6126_v3, 4 }
 0x36c   : > { %9737 = vmatpush.bf16.msra.mxu2 %v11631_v60 }
 0x36d   : > { %v4880_v4 = vor.u32 %v4878_v9, %v4877_v20  ;;  %v4882_v53 = vrot.slane %v4877_v20, 4  ;;  %v6203_v20 = vunpack.c.l.b16 %v6111_v50  ;;  %v6720_v11 = vsel %vm11853_vm5, %v6718_v25, %v6719_v61 }
 0x36e   : > { %v3944_v39 = vpop.f32.mrf.mxu3  ;;  %v3299_v50 = vadd.f32 %v14041_v42, %v13423_v18  ;;  %v11520_v42 = vld [vmem:[#allocation2 + $0x60] sm:$0xff] }
 0x36f   : > { %v4881_v21 = vsel %vm13562_vm14, %v4873_v58, %v4880_v4  ;;  %v5054_v54 = vsel %vm13308_vm8, %v4882_v53, %v5053_v40  ;;  %v3979_v31 = vadd.f32 %v3944_v39, %v13396_v19  ;;  %v14310_v58 = vpop.f32.mrf.mxu2  ;;  %v6113_v40 = vshrl.u32 %v5740_v5, 16 }
 0x370   : > { %5052 = vst [vmem:[#allocation2 + $0xb8] sm:$0xf] %v4881_v21  ;;  %v4371_v22 = vpop.f32.mrf.mxu0  ;;  %v6116_v19 = vshll.u32 %v5740_v5, 16  ;;  %v14312_v4 = vrot.slane %v6122_v28, 5  ;;  %v6202_v39 = vunpack.c.l.b16 %v6101_v45  ;;  %v6803_v21 = vunpack.c.l.b16 %v6720_v11 }
 0x371   : > { %5055 = vst [vmem:[#allocation2 + $0xbc] sm:$0x1] %v5054_v54  ;;  %v4404_v9 = vadd.f32 %v4369_v37, %v3979_v31  ;;  %v6717_v37 = vsel %vm11853_vm5, %v10989_v44, %v6716_v59  ;;  %v14321_v54 = vld [vmem:[#allocation2 + $0xb0] sm:$0x1]  ;;  %v6115_v3 = vrot.slane %v6113_v40, 4  ;;  %v6723_v11 = vrot.slane %v14073_v62, 5 }
 0x372   : > { %v6221_v25 = vpack.c.b16 %v6203_v20, %v6202_v39  ;;  %v6118_v31 = vrot.slane %v6116_v19, 5  ;;  %v6129_v61 = vor.u32 %v6128_v57, %v14312_v4  ;;  %v6132_v59 = vshll.u32 %v14321_v54, 16  ;;  %v11591_v62 = vld [vmem:[%s15897_s2 + $0x178] sm:$0xff] }
 0x373   : > { %v14314_v53 = vpop.f32.mrf.mxu1  ;;  %v4440_v7 = vadd.f32 %v14110_v51, %v4404_v9  ;;  %v6802_v9 = vunpack.c.l.b16 %v6717_v37  ;;  %8317 = vmatpush.bf16.msra.mxu3 %v11591_v62 }
 0x374   : > { %15991 = vst [vmem:[#allocation36_spill] sm:$0xff] %v14314_v53  ;;  %v6119_v39 = vor.u32 %v6118_v31, %v6115_v3  ;;  %v6725_v3 = vrot.slane %v6723_v11, 4 }
 0x375   : > { %v4472_v36 = vmax.f32 %v4440_v7, 0.0  ;;  %v6826_v20 = vpack.c.b16 %v6803_v21, %v6802_v9  ;;  %v6130_v7 = vrot.slane %v6129_v61, 4 }
 0x376   : > { %7254 = vmatmul.bf16.gmra.mxu1 %v11559_v30  ;;  %v3946_v28 = vpop.f32.mrf.mxu3  ;;  %v6120_v31 = vrot.slane %v6119_v39, 4 }
 0x377   : > { %v4624_v5 = vpack.c.bf16 %v4472_v36, %v4472_v36  ;;  %v3980_v45 = vadd.f32 %v3946_v28, %v3299_v50  ;;  %v14329_v37 = vld [vmem:[#allocation2 + $0xb8] sm:$0xf]  ;;  %v5056_v50 = vld [vmem:[#allocation2 + $0xc0] sm:$0xf]  ;;  %v6619_v28 = vld [vmem:[#allocation2 + $0x6c] sm:$0xe] }
 0x378   : > { %v6907_v53 = vpop.f32.mrf.mxu0 }
 0x379   : > { %6361 = vmatmul.bf16.gmra.mxu2 %v6221_v25  ;;  %v4884_v44 = vshrl.u32 %v4624_v5, 16  ;;  %v4405_v18 = vadd.f32 %v4371_v22, %v3980_v45  ;;  %v4887_v40 = vshll.u32 %v4624_v5, 16  ;;  %v6134_v22 = vrot.slane %v6132_v59, 5 }
 0x37a   : > { %v6146_v5 = vshll.u32 %v14329_v37, 16  ;;  %v6150_v45 = vshrl.u32 %v14329_v37, 16 }
 0x37b   : > { %v4886_v30 = vrot.slane %v4884_v44, 7  ;;  %v14326_v19 = vpop.f32.mrf.mxu1  ;;  %v4441_v57 = vadd.f32 %v14110_v51, %v4405_v18  ;;  %6569 = vmatmul.bf16.gmra.mxu3 %v11520_v42  ;;  %6946 = vmatmul.bf16.gmra.mxu0 %v6826_v20  ;;  %v6135_v51 = vsel %vm11841_vm4, %v6130_v7, %v6134_v22  ;;  %v6726_v18 = vrot.slane %v14099_v14, 5  ;;  %v5742_v42 = vld [vmem:[#allocation2 + $0xb4] sm:$0xf] }
 0x37c   : > { %15992 = vst [vmem:[#allocation37_spill] sm:$0xff] %v14326_v19  ;;  %v14331_v25 = vpop.f32.mrf.mxu2  ;;  %v6125_v20 = vsel %vm11841_vm4, %v6120_v31, %v14312_v4  ;;  %v10990_v7 = vrot.slane %v6619_v28, 9  ;;  %v6140_v62 = vshll.u32 %v5742_v42, 16  ;;  %v6152_v14 = vrot.slane %v6150_v45, 4  ;;  %v5060_v4 = vld [vmem:[#allocation2 + $0xc8] sm:$0x1] }
 0x37d   : > { %v4889_v36 = vor.u32 %v4887_v40, %v4886_v30  ;;  %v4473_v21 = vmax.f32 %v4441_v57, 0.0  ;;  %v6205_v57 = vunpack.c.l.b16 %v6135_v51  ;;  %v6727_v34 = vsel %vm11853_vm5, %v6725_v3, %v6726_v18  ;;  %v11560_v28 = vld [vmem:[#allocation2 + $0x6c] sm:$0xff] }
 0x37e   : > { %v6530_v61 = vpop.f32.mrf.mxu3  ;;  %v6805_v51 = vunpack.c.l.b16 %v6727_v34 }
 0x37f   : > { %v5057_v9 = vsel %vm13512_vm13, %v4889_v36, %v5056_v50  ;;  %v4625_v59 = vpack.c.bf16 %v4473_v21, %v4473_v21  ;;  %v6531_v44 = vadd.f32 %v6530_v61, %v14066_v12  ;;  %v6137_v50 = vshrl.u32 %v5742_v42, 16 }
 0x380   : > { %5058 = vst [vmem:[#allocation2 + $0xc0] sm:$0xf] %v5057_v9  ;;  %v6909_v39 = vpop.f32.mrf.mxu0  ;;  %v14351_v12 = vrot.slane %v6146_v5, 5  ;;  %v6204_v9 = vunpack.c.l.b16 %v6125_v20  ;;  %v14359_v5 = vld [vmem:[#allocation2 + $0xbc] sm:$0x1] }
 0x381   : > { %v4892_v40 = vshrl.u32 %v4625_v59, 16  ;;  %v14347_v22 = vadd.f32 %v6907_v53, %v6531_v44  ;;  %v4895_v21 = vshll.u32 %v4625_v59, 16  ;;  %v6724_v53 = vsel %vm11853_vm5, %v10990_v7, %v6723_v11 }
 0x382   : > { %v4890_v44 = vrot.slane %v4886_v30, 4  ;;  %v6222_v42 = vpack.c.b16 %v6205_v57, %v6204_v9  ;;  %v6139_v59 = vrot.slane %v6137_v50, 4  ;;  %v6153_v20 = vor.u32 %v6152_v14, %v14351_v12  ;;  %v11521_v50 = vld [vmem:[#allocation2 + $0x6c] sm:$0xff]  ;;  %v11615_v14 = vld [vmem:[%s15897_s2 + $0x1b8] sm:$0xff] }
 0x383   : > { %v4894_v36 = vrot.slane %v4892_v40, 7  ;;  %v14353_v61 = vpop.f32.mrf.mxu1  ;;  %v6142_v40 = vrot.slane %v6140_v62, 5  ;;  %v6804_v30 = vunpack.c.l.b16 %v6724_v53  ;;  %v6156_v57 = vshll.u32 %v14359_v5, 16  ;;  %v14381_v9 = vld [vmem:[#allocation2 + $0x10] sm:$0xf]  ;;  %8631 = vmatpush.bf16.msra.mxu0 %v11615_v14 }
 0x384   : > { %15993 = vst [vmem:[#allocation38_spill] sm:$0xff] %v14353_v61  ;;  %v14355_v31 = vpop.f32.mrf.mxu2 }
 0x385   : > { %v4897_v3 = vor.u32 %v4895_v21, %v4894_v36  ;;  %v4899_v18 = vrot.slane %v4894_v36, 4  ;;  %v6827_v62 = vpack.c.b16 %v6805_v51, %v6804_v30  ;;  %v6154_v36 = vrot.slane %v6153_v20, 4 }
 0x386   : > { %7259 = vmatmul.bf16.gmra.mxu1 %v11560_v28  ;;  %v6532_v45 = vpop.f32.mrf.mxu3  ;;  %v6733_v20 = vrot.slane %v14147_v10, 5 }
 0x387   : > { %v4898_v19 = vsel %vm13562_vm14, %v4890_v44, %v4897_v3  ;;  %v5061_v15 = vsel %vm13308_vm8, %v4899_v18, %v5060_v4  ;;  %v6533_v11 = vadd.f32 %v6532_v45, %v14093_v24  ;;  %v6143_v24 = vor.u32 %v6142_v40, %v6139_v59  ;;  %v11623_v4 = vld [vmem:[%s15897_s2 + $0x1f8] sm:$0xff]  ;;  %v7332_v18 = vld [vmem:[#allocation2 + $0xc] sm:$0xf] }
 0x388   : > { %5059 = vst [vmem:[#allocation2 + $0xc4] sm:$0xf] %v4898_v19  ;;  %v6912_v7 = vpop.f32.mrf.mxu0  ;;  %v6730_v19 = vrot.slane %v14122_v26, 5  ;;  %9312 = vmatpush.bf16.msra.mxu1 %v11623_v4  ;;  %v6620_v3 = vld [vmem:[#allocation2 + $0x78] sm:$0xe]  ;;  %v7394_v45 = vshrl.u32 %v14381_v9, 16 }
 0x389   : > { %5062 = vst [vmem:[#allocation2 + $0xc8] sm:$0x1] %v5061_v15  ;;  %6366 = vmatmul.bf16.gmra.mxu2 %v6222_v42  ;;  %v14368_v34 = vadd.f32 %v6909_v39, %v6533_v11  ;;  %v6158_v39 = vrot.slane %v6156_v57, 5  ;;  %v6144_v28 = vrot.slane %v6143_v24, 4  ;;  %v7390_v42 = vshll.u32 %v14381_v9, 16 }
 0x38a   : > { %v6732_v51 = vrot.slane %v6730_v19, 4  ;;  %v10991_v57 = vrot.slane %v6620_v3, 9 }
 0x38b   : > { %15994 = vst [vmem:[#allocation39_spill] sm:$0xff] %v14368_v34  ;;  %v14377_v21 = vpop.f32.mrf.mxu1  ;;  %6574 = vmatmul.bf16.gmra.mxu3 %v11521_v50  ;;  %6951 = vmatmul.bf16.gmra.mxu0 %v6827_v62  ;;  %v6159_v53 = vsel %vm11841_vm4, %v6154_v36, %v6158_v39  ;;  %v6149_v59 = vsel %vm11841_vm4, %v6144_v28, %v14351_v12  ;;  %v7381_v50 = vshrl.u32 %v7332_v18, 16  ;;  %v7384_v62 = vshll.u32 %v7332_v18, 16  ;;  %v11561_v12 = vld [vmem:[#allocation2 + $0x78] sm:$0xff] }
 0x38c   : > { %15995 = vst [vmem:[#allocation40_spill] sm:$0xff] %v14377_v21  ;;  %v14379_v15 = vpop.f32.mrf.mxu2  ;;  %v6207_v11 = vunpack.c.l.b16 %v6159_v53  ;;  %v6206_v14 = vunpack.c.l.b16 %v6149_v59  ;;  %v7392_v24 = vrot.slane %v7390_v42, 5  ;;  %v7396_v36 = vrot.slane %v7394_v45, 4  ;;  %v14405_v53 = vld [vmem:[#allocation2 + $0x14] sm:$0x1]  ;;  %v11522_v59 = vld [vmem:[#allocation2 + $0x78] sm:$0xff] }
 0x38d   : > { %v6731_v10 = vsel %vm11853_vm5, %v10991_v57, %v6730_v19  ;;  %v7400_v19 = vshll.u32 %v14405_v53, 16  ;;  %v6737_v57 = vrot.slane %v14164_v17, 5 }
 0x38e   : > { %v6535_v26 = vpop.f32.mrf.mxu3  ;;  %v6223_v4 = vpack.c.b16 %v6207_v11, %v6206_v14  ;;  %v6806_v3 = vunpack.c.l.b16 %v6731_v10  ;;  %v7397_v18 = vor.u32 %v7396_v36, %v7392_v24 }
 0x38f   : > { %v6536_v44 = vadd.f32 %v6535_v26, %v14124_v13  ;;  %v6734_v13 = vsel %vm11853_vm5, %v6732_v51, %v6733_v20  ;;  %v7383_v26 = vrot.slane %v7381_v50, 4  ;;  %v7386_v51 = vrot.slane %v7384_v62, 5  ;;  %v14416_v62 = vld [vmem:[#allocation2 + $0x1c] sm:$0xf] }
 0x390   : > { %v6914_v40 = vpop.f32.mrf.mxu0  ;;  %v7398_v50 = vrot.slane %v7397_v18, 4  ;;  %v7402_v36 = vrot.slane %v7400_v19, 5  ;;  %v6739_v17 = vrot.slane %v6737_v57, 4  ;;  %v14426_v18 = vld [vmem:[#allocation2 + $0x28] sm:$0xf] }
 0x391   : > { %v14395_v30 = vadd.f32 %v6912_v7, %v6536_v44  ;;  %v6807_v7 = vunpack.c.l.b16 %v6734_v13  ;;  %v7387_v11 = vor.u32 %v7386_v51, %v7383_v26  ;;  %v7335_v13 = vld [vmem:[#allocation2 + $0x18] sm:$0xf]  ;;  %v6621_v51 = vld [vmem:[#allocation2 + $0x84] sm:$0xe]  ;;  %v8093_v41 = vrot.slane %v14426_v18, 5 }
 0x392   : > { %v7408_v10 = vshll.u32 %v7335_v13, 16  ;;  %v8015_v19 = vld [vmem:[#allocation2 + $0x24] sm:$0xe] }
 0x393   : > { %15996 = vst [vmem:[#allocation41_spill] sm:$0xff] %v14395_v30  ;;  %v14399_v60 = vpop.f32.mrf.mxu1  ;;  %v6828_v20 = vpack.c.b16 %v6807_v7, %v6806_v3  ;;  %v7418_v3 = vshrl.u32 %v14416_v62, 16  ;;  %v11159_v43 = vrot.slane %v8015_v19, 9 }
 0x394   : > { %15997 = vst [vmem:[#allocation42_spill] sm:$0xff] %v14399_v60  ;;  %v14401_v39 = vpop.f32.mrf.mxu2  ;;  %v9435_v60 = vld [vmem:[#allocation2 + $0x30] sm:$0xe] }
 0x395   : > { %v7420_v52 = vrot.slane %v7418_v3, 4 }
 0x396   : > { %7264 = vmatmul.bf16.gmra.mxu1 %v11561_v12  ;;  %v6537_v28 = vpop.f32.mrf.mxu3  ;;  %v7405_v12 = vshrl.u32 %v7335_v13, 16 }
 0x397   : > { %v6538_v44 = vadd.f32 %v6537_v28, %v14152_v35  ;;  %v7403_v28 = vsel %vm11841_vm4, %v7398_v50, %v7402_v36  ;;  %v7410_v50 = vrot.slane %v7408_v10, 5 }
 0x398   : > { %v6917_v42 = vpop.f32.mrf.mxu0  ;;  %v7781_v36 = vunpack.c.l.b16 %v7403_v28  ;;  %v8095_v28 = vrot.slane %v8093_v41, 4 }
 0x399   : > { %6371 = vmatmul.bf16.gmra.mxu2 %v6223_v4  ;;  %v14408_v45 = vadd.f32 %v6914_v40, %v6538_v44  ;;  %v11590_v40 = vld [vmem:[%s15897_s2 + $0x170] sm:$0xff]  ;;  %v7388_v4 = vrot.slane %v7387_v11, 4  ;;  %v7414_v44 = vshll.u32 %v14416_v62, 16 }
 0x39a   : > { %8318 = vmatpush.bf16.msra.mxu3 %v11590_v40  ;;  %v7407_v40 = vrot.slane %v7405_v12, 4 }
 0x39b   : > { %15998 = vst [vmem:[#allocation43_spill] sm:$0xff] %v14408_v45  ;;  %v14412_v14 = vpop.f32.mrf.mxu1  ;;  %6579 = vmatmul.bf16.gmra.mxu3 %v11522_v59  ;;  %6956 = vmatmul.bf16.gmra.mxu0 %v6828_v20  ;;  %v6740_v20 = vrot.slane %v14193_v29, 5  ;;  %v7393_v11 = vsel %vm11841_vm4, %v7388_v4, %v7392_v24  ;;  %v14440_v29 = vrot.slane %v7414_v44, 5  ;;  %v14519_v45 = vld [vmem:[#allocation2 + $0x44] sm:$0x1] }
 0x39c   : > { %15999 = vst [vmem:[#allocation44_spill] sm:$0xff] %v14412_v14  ;;  %v14414_v35 = vpop.f32.mrf.mxu2  ;;  %v7780_v12 = vunpack.c.l.b16 %v7393_v11  ;;  %v7411_v3 = vor.u32 %v7410_v50, %v7407_v40  ;;  %v8016_v50 = vld [vmem:[#allocation2 + $0x30] sm:$0xe] }
 0x39d   : > { %v7421_v11 = vor.u32 %v7420_v52, %v14440_v29  ;;  %v11630_v52 = vld [vmem:[%s15897_s2 + $0x230] sm:$0xff] }
 0x39e   : > { %v6540_v7 = vpop.f32.mrf.mxu3  ;;  %9738 = vmatpush.bf16.msra.mxu2 %v11630_v52 }
 0x39f   : > { %v6541_v26 = vadd.f32 %v6540_v7, %v14183_v27  ;;  %v10992_v27 = vrot.slane %v6621_v51, 9  ;;  %v6741_v7 = vsel %vm11853_vm5, %v6739_v17, %v6740_v20  ;;  %v8094_v17 = vsel %vm11853_vm5, %v11159_v43, %v8093_v41  ;;  %v14449_v20 = vld [vmem:[#allocation2 + $0x20] sm:$0x1]  ;;  %v7338_v43 = vld [vmem:[#allocation2 + $0x24] sm:$0xf] }
 0x3a0   : > { %v6919_v59 = vpop.f32.mrf.mxu0  ;;  %v6809_v4 = vunpack.c.l.b16 %v6741_v7  ;;  %v7812_v51 = vpack.c.b16 %v7781_v36, %v7780_v12  ;;  %v11523_v7 = vld [vmem:[#allocation2 + $0x84] sm:$0xff]  ;;  %v14455_v41 = vld [vmem:[#allocation2 + $0x34] sm:$0xf]  ;;  %v8209_v23 = vunpack.c.l.b16 %v8094_v17  ;;  %v7424_v40 = vshll.u32 %v14449_v20, 16 }
 0x3a1   : > { %v14431_v13 = vadd.f32 %v6917_v42, %v6541_v26  ;;  %v11562_v42 = vld [vmem:[#allocation2 + $0x84] sm:$0xff]  ;;  %v6738_v10 = vsel %vm11853_vm5, %v10992_v27, %v6737_v57  ;;  %v8096_v26 = vrot.slane %v14435_v33, 5 }
 0x3a2   : > { %v6808_v0 = vunpack.c.l.b16 %v6738_v10  ;;  %v6744_v10 = vrot.slane %v14209_v48, 5  ;;  %v11160_v48 = vrot.slane %v8016_v50, 9 }
 0x3a3   : > { %16000 = vst [vmem:[#allocation45_spill] sm:$0xff] %v14431_v13  ;;  %v14438_v8 = vpop.f32.mrf.mxu1  ;;  %v8097_v57 = vsel %vm11853_vm5, %v8095_v28, %v8096_v26  ;;  %v7432_v26 = vshll.u32 %v7338_v43, 16 }
 0x3a4   : > { %16001 = vst [vmem:[#allocation46_spill] sm:$0xff] %v14438_v8  ;;  %v14442_v24 = vpop.f32.mrf.mxu2  ;;  %v6829_v12 = vpack.c.b16 %v6809_v4, %v6808_v0  ;;  %v7412_v0 = vrot.slane %v7411_v3, 4  ;;  %v7429_v4 = vshrl.u32 %v7338_v43, 16  ;;  %v8100_v3 = vrot.slane %v14455_v41, 5  ;;  %v14495_v8 = vld [vmem:[#allocation2 + $0x20] sm:$0x1] }
 0x3a5   : > { %v9502_v14 = vrot.slane %v14495_v8, 5 }
 0x3a6   : > { %7269 = vmatmul.bf16.gmra.mxu1 %v11562_v42  ;;  %v6542_v44 = vpop.f32.mrf.mxu3  ;;  %v8210_v42 = vunpack.c.l.b16 %v8097_v57  ;;  %v7442_v57 = vshrl.u32 %v14426_v18, 16  ;;  %v8102_v52 = vrot.slane %v8100_v3, 4 }
 0x3a7   : > { %v6543_v19 = vadd.f32 %v6542_v44, %v14207_v63  ;;  %v11614_v63 = vld [vmem:[%s15897_s2 + $0x1b0] sm:$0xff] }
 0x3a8   : > { %v6922_v27 = vpop.f32.mrf.mxu0  ;;  %v14467_v28 = vpack.c.b16 %v8210_v42, %v8209_v23  ;;  %8632 = vmatpush.bf16.msra.mxu0 %v11614_v63  ;;  %v11622_v23 = vld [vmem:[%s15897_s2 + $0x1f0] sm:$0xff]  ;;  %v6746_v42 = vrot.slane %v6744_v10, 4 }
 0x3a9   : > { %7900 = vmatmul.bf16.vlgmr.msrb.gmra.mxu2 %v7812_v51  ;;  %v14457_v36 = vadd.f32 %v6919_v59, %v6543_v19  ;;  %v7422_v59 = vrot.slane %v7421_v11, 4  ;;  %v14471_v51 = vld [vmem:[#allocation2 + $0x38] sm:$0x1]  ;;  %v7438_v19 = vshll.u32 %v14426_v18, 16  ;;  %v7417_v11 = vsel %vm11841_vm4, %v7412_v0, %v14440_v29  ;;  %9313 = vmatpush.bf16.msra.mxu1 %v11622_v23 }
 0x3aa   : > { %v8101_v18 = vsel %vm11853_vm5, %v11160_v48, %v8100_v3  ;;  %v8103_v63 = vrot.slane %v14471_v51, 5  ;;  %v7434_v29 = vrot.slane %v7432_v26, 5  ;;  %v6747_v0 = vrot.slane %v14239_v32, 5 }
 0x3ab   : > { %16002 = vst [vmem:[#allocation47_spill] sm:$0xff] %v14457_v36  ;;  %v14469_v17 = vpop.f32.mrf.mxu1  ;;  %6584 = vmatmul.bf16.gmra.mxu3 %v11523_v7  ;;  %6961 = vmatmul.bf16.gmra.mxu0 %v6829_v12  ;;  %v7426_v7 = vrot.slane %v7424_v40, 5  ;;  %v14484_v12 = vld [vmem:[#allocation2 + $0x1c] sm:$0xf]  ;;  %v14493_v23 = vrot.slane %v7438_v19, 5  ;;  %v7444_v36 = vrot.slane %v7442_v57, 4  ;;  %v8211_v13 = vunpack.c.l.b16 %v8101_v18 }
 0x3ac   : > { %16003 = vst [vmem:[#allocation48_spill] sm:$0xff] %v14469_v17  ;;  %v14473_v44 = vpop.f32.mrf.mxu2  ;;  %v7431_v17 = vrot.slane %v7429_v4, 4  ;;  %v8104_v48 = vsel %vm11853_vm5, %v8102_v52, %v8103_v63  ;;  %v6748_v4 = vsel %vm11853_vm5, %v6746_v42, %v6747_v0  ;;  %v9433_v57 = vld [vmem:[#allocation2 + $0x18] sm:$0xe] }
 0x3ad   : > { %v7427_v50 = vsel %vm11841_vm4, %v7422_v59, %v7426_v7  ;;  %v8212_v59 = vunpack.c.l.b16 %v8104_v48  ;;  %v10993_v7 = vrot.slane %v6622_v38, 9  ;;  %v14513_v38 = vld [vmem:[#allocation2 + $0x40] sm:$0xf]  ;;  %v6811_v63 = vunpack.c.l.b16 %v6748_v4  ;;  %v11524_v4 = vld [vmem:[#allocation2 + $0x90] sm:$0xff] }
 0x3ae   : > { %v6545_v43 = vpop.f32.mrf.mxu3  ;;  %v7783_v32 = vunpack.c.l.b16 %v7427_v50  ;;  %v7435_v42 = vor.u32 %v7434_v29, %v7431_v17  ;;  %v7445_v0 = vor.u32 %v7444_v36, %v14493_v23  ;;  %v8017_v50 = vld [vmem:[#allocation2 + $0x3c] sm:$0xe]  ;;  %v7448_v17 = vshll.u32 %v14435_v33, 16 }
 0x3af   : > { %v6546_v16 = vadd.f32 %v6545_v43, %v14235_v6  ;;  %v9499_v6 = vrot.slane %v14484_v12, 5  ;;  %v14506_v19 = vpack.c.b16 %v8212_v59, %v8211_v13  ;;  %v6745_v18 = vsel %vm11853_vm5, %v10993_v7, %v6744_v10 }
 0x3b0   : > { %v6924_v40 = vpop.f32.mrf.mxu0  ;;  %v11333_v59 = vrot.slane %v9433_v57, 9  ;;  %v8107_v10 = vrot.slane %v14513_v38, 5  ;;  %v11161_v29 = vrot.slane %v8017_v50, 9  ;;  %v8110_v50 = vrot.slane %v14519_v45, 5 }
 0x3b1   : > { %v14499_v3 = vadd.f32 %v6922_v27, %v6546_v16  ;;  %16006 = vst [vmem:[#allocation51_spill] sm:$0xff] %v14506_v19  ;;  %v9501_v43 = vrot.slane %v9499_v6, 4  ;;  %v11563_v16 = vld [vmem:[#allocation2 + $0x90] sm:$0xff]  ;;  %v7782_v27 = vunpack.c.l.b16 %v7417_v11  ;;  %v6810_v11 = vunpack.c.l.b16 %v6745_v18 }
 0x3b2   : > { %v9500_v36 = vsel %vm11853_vm5, %v11333_v59, %v9499_v6  ;;  %v8108_v33 = vsel %vm11853_vm5, %v11161_v29, %v8107_v10  ;;  %v8109_v18 = vrot.slane %v8107_v10, 4  ;;  %v14548_v10 = vld [vmem:[#allocation2 + $0x2c] sm:$0x1] }
 0x3b3   : > { %16004 = vst [vmem:[#allocation49_spill] sm:$0xff] %v14499_v3  ;;  %v14504_v26 = vpop.f32.mrf.mxu1  ;;  %v9503_v13 = vsel %vm11853_vm5, %v9501_v43, %v9502_v14  ;;  %v6830_v57 = vpack.c.b16 %v6811_v63, %v6810_v11  ;;  %v7446_v43 = vrot.slane %v7445_v0, 4  ;;  %v9434_v63 = vld [vmem:[#allocation2 + $0x24] sm:$0xe]  ;;  %v7450_v0 = vrot.slane %v7448_v17, 5 }
 0x3b4   : > { %16005 = vst [vmem:[#allocation50_spill] sm:$0xff] %v14504_v26  ;;  %v14509_v52 = vpop.f32.mrf.mxu2  ;;  %v7813_v26 = vpack.c.b16 %v7783_v32, %v7782_v27  ;;  %v7436_v32 = vrot.slane %v7435_v42, 4  ;;  %v14530_v27 = vld [vmem:[#allocation2 + $0x34] sm:$0xf]  ;;  %v8111_v59 = vsel %vm11853_vm5, %v8109_v18, %v8110_v50  ;;  %v6623_v50 = vld [vmem:[#allocation2 + $0x9c] sm:$0xe] }
 0x3b5   : > { %v8214_v29 = vunpack.c.l.b16 %v8111_v59  ;;  %v14558_v59 = vld [vmem:[#allocation2 + $0x38] sm:$0x1] }
 0x3b6   : > { %7274 = vmatmul.bf16.gmra.mxu1 %v11563_v16  ;;  %v6547_v48 = vpop.f32.mrf.mxu3  ;;  %v6751_v16 = vrot.slane %v14252_v55, 5  ;;  %v7441_v55 = vsel %vm11841_vm4, %v7436_v32, %v14493_v23  ;;  %v7451_v23 = vsel %vm11841_vm4, %v7446_v43, %v7450_v0 }
 0x3b7   : > { %v6548_v3 = vadd.f32 %v6547_v48, %v14258_v49  ;;  %v14527_v49 = vld [vmem:[#allocation2 + $0x28] sm:$0xf] }
 0x3b8   : > { %v6927_v7 = vpop.f32.mrf.mxu0  ;;  %v11589_v48 = vld [vmem:[%s15897_s2 + $0x168] sm:$0xff]  ;;  %v9506_v11 = vrot.slane %v14527_v49, 5 }
 0x3b9   : > { %7905 = vmatmul.bf16.gmra.mxu2 %v7813_v26  ;;  %v14525_v14 = vadd.f32 %v6924_v40, %v6548_v3  ;;  %v7341_v40 = vld [vmem:[#allocation2 + $0x30] sm:$0xf]  ;;  %v9625_v3 = vunpack.c.l.b16 %v9500_v36  ;;  %v9626_v26 = vunpack.c.l.b16 %v9503_v13  ;;  %v8213_v13 = vunpack.c.l.b16 %v8108_v33  ;;  %8319 = vmatpush.bf16.msra.mxu3 %v11589_v48 }
 0x3ba   : > { %v7453_v32 = vshrl.u32 %v7341_v40, 16  ;;  %v7466_v33 = vshrl.u32 %v14455_v41, 16  ;;  %v9508_v0 = vrot.slane %v9506_v11, 4  ;;  %v7785_v48 = vunpack.c.l.b16 %v7451_v23 }
 0x3bb   : > { %16007 = vst [vmem:[#allocation52_spill] sm:$0xff] %v14525_v14  ;;  %v14535_v6 = vpop.f32.mrf.mxu1  ;;  %6589 = vmatmul.bf16.gmra.mxu3 %v11524_v4  ;;  %6966 = vmatmul.bf16.gmra.mxu0 %v6830_v57  ;;  %v14550_v36 = vpack.c.b16 %v9626_v26, %v9625_v3  ;;  %v9513_v4 = vrot.slane %v14530_v27, 5  ;;  %v6753_v57 = vrot.slane %v6751_v16, 4  ;;  %v7462_v14 = vshll.u32 %v14455_v41, 16 }
 0x3bc   : > { %16008 = vst [vmem:[#allocation53_spill] sm:$0xff] %v14535_v6  ;;  %v14537_v42 = vpop.f32.mrf.mxu2  ;;  %v11334_v6 = vrot.slane %v9434_v63, 9  ;;  %v14560_v3 = vpack.c.b16 %v8214_v29, %v8213_v13  ;;  %v9509_v63 = vrot.slane %v14548_v10, 5  ;;  %v10994_v41 = vrot.slane %v6623_v50, 9 }
 0x3bd   : > { %16009 = vst [vmem:[#allocation54_spill] sm:$0xff] %v14550_v36  ;;  %v6754_v36 = vrot.slane %v14279_v1, 5  ;;  %v9515_v30 = vrot.slane %v9513_v4, 4  ;;  %v9516_v1 = vrot.slane %v14558_v59, 5 }
 0x3be   : > { %v6550_v17 = vpop.f32.mrf.mxu3  ;;  %16010 = vst [vmem:[#allocation55_spill] sm:$0xff] %v14560_v3  ;;  %v9507_v43 = vsel %vm11853_vm5, %v11334_v6, %v9506_v11  ;;  %v9510_v29 = vsel %vm11853_vm5, %v9508_v0, %v9509_v63  ;;  %v7784_v6 = vunpack.c.l.b16 %v7441_v55  ;;  %v14575_v11 = vrot.slane %v7462_v14, 5  ;;  %v8018_v14 = vld [vmem:[#allocation2 + $0x48] sm:$0xe] }
 0x3bf   : > { %v6551_v18 = vadd.f32 %v6550_v17, %v14284_v2  ;;  %v7456_v17 = vshll.u32 %v7341_v40, 16  ;;  %v6755_v13 = vsel %vm11853_vm5, %v6753_v57, %v6754_v36  ;;  %v9627_v23 = vunpack.c.l.b16 %v9507_v43  ;;  %v11564_v40 = vld [vmem:[#allocation2 + $0x9c] sm:$0xff]  ;;  %v14581_v36 = vld [vmem:[#allocation2 + $0x4c] sm:$0xf] }
 0x3c0   : > { %v6929_v26 = vpop.f32.mrf.mxu0  ;;  %v6752_v50 = vsel %vm11853_vm5, %v10994_v41, %v6751_v16  ;;  %v11335_v57 = vrot.slane %v9435_v60, 9  ;;  %v9517_v0 = vsel %vm11853_vm5, %v9515_v30, %v9516_v1  ;;  %v6813_v63 = vunpack.c.l.b16 %v6755_v13  ;;  %v14590_v41 = vld [vmem:[#allocation2 + $0x50] sm:$0x1]  ;;  %v7344_v1 = vld [vmem:[#allocation2 + $0x3c] sm:$0xf] }
 0x3c1   : > { %v14566_v2 = vadd.f32 %v6927_v7, %v6551_v18  ;;  %v9628_v7 = vunpack.c.l.b16 %v9510_v29  ;;  %v7458_v55 = vrot.slane %v7456_v17, 5  ;;  %v7814_v43 = vpack.c.b16 %v7785_v48, %v7784_v6  ;;  %v11525_v6 = vld [vmem:[#allocation2 + $0x9c] sm:$0xff] }
 0x3c2   : > { %v9514_v34 = vsel %vm11853_vm5, %v11335_v57, %v9513_v4  ;;  %v8114_v60 = vrot.slane %v14581_v36, 5  ;;  %v9630_v30 = vunpack.c.l.b16 %v9517_v0  ;;  %v7472_v17 = vshll.u32 %v14471_v51, 16 }
 0x3c3   : > { %16011 = vst [vmem:[#allocation56_spill] sm:$0xff] %v14566_v2  ;;  %v14573_v3 = vpop.f32.mrf.mxu1  ;;  %v7468_v2 = vrot.slane %v7466_v33, 4  ;;  %v14585_v21 = vpack.c.b16 %v9628_v7, %v9627_v23  ;;  %v6812_v33 = vunpack.c.l.b16 %v6752_v50  ;;  %v11162_v23 = vrot.slane %v8018_v14, 9 }
 0x3c4   : > { %16012 = vst [vmem:[#allocation57_spill] sm:$0xff] %v14573_v3  ;;  %v14577_v18 = vpop.f32.mrf.mxu2  ;;  %v7455_v3 = vrot.slane %v7453_v32, 4  ;;  %v9629_v50 = vunpack.c.l.b16 %v9514_v34  ;;  %v8116_v57 = vrot.slane %v8114_v60, 4 }
 0x3c5   : > { %16013 = vst [vmem:[#allocation58_spill] sm:$0xff] %v14585_v21  ;;  %v7469_v32 = vor.u32 %v7468_v2, %v14575_v11  ;;  %v6831_v4 = vpack.c.b16 %v6813_v63, %v6812_v33  ;;  %v6758_v2 = vrot.slane %v14290_v46, 5  ;;  %v8115_v51 = vsel %vm11853_vm5, %v11162_v23, %v8114_v60  ;;  %v11621_v46 = vld [vmem:[%s15897_s2 + $0x1e8] sm:$0xff] }
 0x3c6   : > { %7279 = vmatmul.bf16.gmra.mxu1 %v11564_v40  ;;  %v6552_v29 = vpop.f32.mrf.mxu3  ;;  %v7459_v7 = vor.u32 %v7458_v55, %v7455_v3  ;;  %v11613_v40 = vld [vmem:[%s15897_s2 + $0x1a8] sm:$0xff]  ;;  %v7477_v3 = vshrl.u32 %v7344_v1, 16  ;;  %v7480_v63 = vshll.u32 %v7344_v1, 16  ;;  %v14609_v55 = vld [vmem:[#allocation2 + $0x40] sm:$0xf]  ;;  %v14611_v14 = vpack.c.b16 %v9630_v30, %v9629_v50 }
 0x3c7   : > { %v6553_v16 = vadd.f32 %v6552_v29, %v14310_v58  ;;  %v11629_v58 = vld [vmem:[%s15897_s2 + $0x228] sm:$0xff]  ;;  %v7470_v34 = vrot.slane %v7469_v32, 4  ;;  %8633 = vmatpush.bf16.msra.mxu0 %v11613_v40  ;;  %v7490_v33 = vshrl.u32 %v14513_v38, 16  ;;  %v8215_v60 = vunpack.c.l.b16 %v8115_v51  ;;  %v9436_v30 = vld [vmem:[#allocation2 + $0x3c] sm:$0xe]  ;;  %9314 = vmatpush.bf16.msra.mxu1 %v11621_v46 }
 0x3c8   : > { %v6932_v13 = vpop.f32.mrf.mxu0  ;;  %16016 = vst [vmem:[#allocation61_spill] sm:$0xff] %v14611_v14  ;;  %9739 = vmatpush.bf16.msra.mxu2 %v11629_v58  ;;  %v7460_v23 = vrot.slane %v7459_v7, 4  ;;  %v6624_v32 = vld [vmem:[#allocation2 + $0xa8] sm:$0xe]  ;;  %v6760_v58 = vrot.slane %v6758_v2, 4  ;;  %v9520_v40 = vrot.slane %v14609_v55, 5 }
 0x3c9   : > { %7910 = vmatmul.bf16.gmra.mxu2 %v7814_v43  ;;  %v14595_v48 = vadd.f32 %v6929_v26, %v6553_v16  ;;  %v8117_v26 = vrot.slane %v14590_v41, 5  ;;  %v7486_v16 = vshll.u32 %v14513_v38, 16  ;;  %v7479_v14 = vrot.slane %v7477_v3, 4  ;;  %v7347_v46 = vld [vmem:[#allocation2 + $0x48] sm:$0xf] }
 0x3ca   : > { %v7482_v21 = vrot.slane %v7480_v63, 5  ;;  %v7465_v38 = vsel %vm11841_vm4, %v7460_v23, %v14575_v11  ;;  %v6761_v51 = vrot.slane %v14321_v54, 5  ;;  %v7492_v63 = vrot.slane %v7490_v33, 4  ;;  %v11565_v23 = vld [vmem:[#allocation2 + $0xa8] sm:$0xff]  ;;  %v11588_v33 = vld [vmem:[%s15897_s2 + $0x160] sm:$0xff] }
 0x3cb   : > { %16014 = vst [vmem:[#allocation59_spill] sm:$0xff] %v14595_v48  ;;  %v14607_v0 = vpop.f32.mrf.mxu1  ;;  %6594 = vmatmul.bf16.gmra.mxu3 %v11525_v6  ;;  %6971 = vmatmul.bf16.gmra.mxu0 %v6831_v4  ;;  %v8118_v29 = vsel %vm11853_vm5, %v8116_v57, %v8117_v26  ;;  %v7474_v6 = vrot.slane %v7472_v17, 5  ;;  %v14624_v57 = vld [vmem:[#allocation2 + $0x44] sm:$0x1]  ;;  %v14636_v3 = vrot.slane %v7486_v16, 5  ;;  %v7496_v48 = vshll.u32 %v14519_v45, 16 }
 0x3cc   : > { %16015 = vst [vmem:[#allocation60_spill] sm:$0xff] %v14607_v0  ;;  %v14613_v43 = vpop.f32.mrf.mxu2  ;;  %v8216_v1 = vunpack.c.l.b16 %v8118_v29  ;;  %v11336_v29 = vrot.slane %v9436_v30, 9  ;;  %8320 = vmatpush.bf16.msra.mxu3 %v11588_v33  ;;  %v11619_v45 = vld [vmem:[%s15897_s2 + $0x1d8] sm:$0xff] }
 0x3cd   : > { %v7475_v17 = vsel %vm11841_vm4, %v7470_v34, %v7474_v6  ;;  %v9523_v34 = vrot.slane %v14624_v57, 5  ;;  %v7786_v6 = vunpack.c.l.b16 %v7465_v38 }
 0x3ce   : > { %v6555_v4 = vpop.f32.mrf.mxu3  ;;  %v14626_v26 = vpack.c.b16 %v8216_v1, %v8215_v60  ;;  %v6762_v60 = vsel %vm11853_vm5, %v6760_v58, %v6761_v51  ;;  %v9521_v11 = vsel %vm11853_vm5, %v11336_v29, %v9520_v40  ;;  %v9522_v1 = vrot.slane %v9520_v40, 4  ;;  %v11620_v58 = vld [vmem:[%s15897_s2 + $0x1e0] sm:$0xff] }
 0x3cf   : > { %v6556_v50 = vadd.f32 %v6555_v4, %v14331_v25  ;;  %v10995_v25 = vrot.slane %v6624_v32, 9  ;;  %v7787_v54 = vunpack.c.l.b16 %v7475_v17  ;;  %v7501_v4 = vshrl.u32 %v7347_v46, 16  ;;  %v11612_v32 = vld [vmem:[%s15897_s2 + $0x1a0] sm:$0xff]  ;;  %9315 = vmatpush.bf16.msra.mxu1 %v11620_v58 }
 0x3d0   : > { %16017 = vst [vmem:[#allocation62_spill] sm:$0xff] %v14626_v26  ;;  %v6934_v7 = vpop.f32.mrf.mxu0  ;;  %v7504_v40 = vshll.u32 %v7347_v46, 16  ;;  %v9524_v38 = vsel %vm11853_vm5, %v9522_v1, %v9523_v34  ;;  %v6815_v17 = vunpack.c.l.b16 %v6762_v60  ;;  %v9631_v51 = vunpack.c.l.b16 %v9521_v11  ;;  %v11587_v46 = vld [vmem:[%s15897_s2 + $0x158] sm:$0xff]  ;;  %8634 = vmatpush.bf16.msra.mxu0 %v11612_v32 }
 0x3d1   : > { %v14634_v0 = vadd.f32 %v6932_v13, %v6556_v50  ;;  %v6759_v16 = vsel %vm11853_vm5, %v10995_v25, %v6758_v2  ;;  %v7510_v50 = vshll.u32 %v14581_v36, 16  ;;  %v7514_v2 = vshrl.u32 %v14581_v36, 16  ;;  %v14680_v34 = vld [vmem:[#allocation2 + $0x58] sm:$0xf]  ;;  %8321 = vmatpush.bf16.msra.mxu3 %v11587_v46 }
 0x3d2   : > { %v9632_v29 = vunpack.c.l.b16 %v9524_v38  ;;  %v7815_v26 = vpack.c.b16 %v7787_v54, %v7786_v6  ;;  %v6814_v60 = vunpack.c.l.b16 %v6759_v16  ;;  %v6765_v58 = vrot.slane %v14329_v37, 5  ;;  %v8019_v38 = vld [vmem:[#allocation2 + $0x54] sm:$0xe] }
 0x3d3   : > { %16018 = vst [vmem:[#allocation63_spill] sm:$0xff] %v14634_v0  ;;  %v14645_v13 = vpop.f32.mrf.mxu1  ;;  %v7493_v0 = vor.u32 %v7492_v63, %v14636_v3  ;;  %v14678_v63 = vrot.slane %v7504_v40, 5  ;;  %v14684_v54 = vrot.slane %v7510_v50, 5  ;;  %v7516_v16 = vrot.slane %v7514_v2, 4  ;;  %v14687_v40 = vld [vmem:[#allocation2 + $0x5c] sm:$0x1]  ;;  %9316 = vmatpush.bf16.msra.mxu1 %v11619_v45 }
 0x3d4   : > { %v14643_v30 = vpop.f32.mrf.mxu2  ;;  %16019 = vst [vmem:[#allocation64_spill] sm:$0xff] %v14645_v13  ;;  %v7483_v13 = vor.u32 %v7482_v21, %v7479_v14  ;;  %v14668_v36 = vpack.c.b16 %v9632_v29, %v9631_v51  ;;  %v11611_v21 = vld [vmem:[%s15897_s2 + $0x198] sm:$0xff]  ;;  %v14676_v14 = vrot.slane %v7501_v4, 4  ;;  %v6832_v6 = vpack.c.b16 %v6815_v17, %v6814_v60  ;;  %v11618_v2 = vld [vmem:[%s15897_s2 + $0x1d0] sm:$0xff]  ;;  %v8013_v51 = vld [vmem:[#allocation2 + $0xc] sm:$0xe] }
 0x3d5   : > { %v7494_v32 = vrot.slane %v7493_v0, 4  ;;  %v8752_v4 = vld [vmem:[#allocation2 + $0x18] sm:$0xf]  ;;  %v7498_v17 = vrot.slane %v7496_v48, 5  ;;  %8635 = vmatpush.bf16.msra.mxu0 %v11611_v21  ;;  %v7520_v37 = vshll.u32 %v14590_v41, 16  ;;  %v11586_v0 = vld [vmem:[%s15897_s2 + $0x150] sm:$0xff]  ;;  %v7517_v48 = vor.u32 %v7516_v16, %v14684_v54 }
 0x3d6   : > { %7284 = vmatmul.bf16.gmra.mxu1 %v11565_v23  ;;  %v6557_v25 = vpop.f32.mrf.mxu3  ;;  %16020 = vst [vmem:[#allocation65_spill] sm:$0xff] %v14668_v36  ;;  %v11526_v23 = vld [vmem:[#allocation2 + $0xa8] sm:$0xff]  ;;  %v7484_v33 = vrot.slane %v7483_v13, 4  ;;  %v11610_v13 = vld [vmem:[%s15897_s2 + $0x190] sm:$0xff]  ;;  %v11163_v29 = vrot.slane %v8019_v38, 9  ;;  %v6767_v60 = vrot.slane %v6765_v58, 4  ;;  %8322 = vmatpush.bf16.msra.mxu3 %v11586_v0 }
 0x3d7   : > { %v6558_v1 = vadd.f32 %v6557_v25, %v14355_v31  ;;  %v7499_v46 = vsel %vm11841_vm4, %v7494_v32, %v7498_v17  ;;  %v11585_v21 = vld [vmem:[%s15897_s2 + $0x148] sm:$0xff]  ;;  %v8079_v45 = vrot.slane %v14381_v9, 5  ;;  %v8804_v16 = vshll.u32 %v8752_v4, 16  ;;  %9317 = vmatpush.bf16.msra.mxu1 %v11618_v2 }
 0x3d8   : > { %v6937_v11 = vpop.f32.mrf.mxu0  ;;  %v7489_v50 = vsel %vm11841_vm4, %v7484_v33, %v14636_v3  ;;  %v7507_v3 = vor.u32 %v14678_v63, %v14676_v14  ;;  %v8124_v14 = vrot.slane %v14687_v40, 5  ;;  %v6768_v17 = vrot.slane %v14359_v5, 5  ;;  %v11609_v9 = vld [vmem:[%s15897_s2 + $0x188] sm:$0xff] }
 0x3d9   : > { %7915 = vmatmul.bf16.gmra.mxu2 %v7815_v26  ;;  %v14682_v31 = vadd.f32 %v6934_v7, %v6558_v1  ;;  %v8121_v26 = vrot.slane %v14680_v34, 5  ;;  %v7788_v32 = vunpack.c.l.b16 %v7489_v50  ;;  %8636 = vmatpush.bf16.msra.mxu0 %v11610_v13  ;;  %v11157_v0 = vrot.slane %v8013_v51, 9 }
 0x3da   : > { %v7518_v50 = vrot.slane %v7517_v48, 4  ;;  %v6769_v13 = vsel %vm11853_vm5, %v6767_v60, %v6768_v17  ;;  %8323 = vmatpush.bf16.msra.mxu3 %v11585_v21  ;;  %v8806_v51 = vrot.slane %v8804_v16, 5  ;;  %v11608_v48 = vld [vmem:[%s15897_s2 + $0x180] sm:$0xff]  ;;  %v8014_v17 = vld [vmem:[#allocation2 + $0x18] sm:$0xe] }
 0x3db   : > { %16021 = vst [vmem:[#allocation66_spill] sm:$0xff] %v14682_v31  ;;  %6599 = vmatmul.bf16.gmra.mxu3 %v11526_v23  ;;  %6976 = vmatmul.bf16.gmra.mxu0 %v6832_v6  ;;  %v8123_v41 = vrot.slane %v8121_v26, 4  ;;  %v14708_v25 = vpop.f32.mrf.mxu1  ;;  %v6625_v23 = vld [vmem:[#allocation2 + $0xb4] sm:$0xe]  ;;  %v8801_v6 = vshrl.u32 %v8752_v4, 16  ;;  %v8122_v33 = vsel %vm11853_vm5, %v11163_v29, %v8121_v26  ;;  %v7522_v29 = vrot.slane %v7520_v37, 5 }
 0x3dc   : > { %v14690_v7 = vpop.f32.mrf.mxu2  ;;  %16023 = vst [vmem:[#allocation68_spill] sm:$0xff] %v14708_v25  ;;  %v10996_v5 = vrot.slane %v6625_v23, 9  ;;  %v8217_v2 = vunpack.c.l.b16 %v8122_v33  ;;  %v11566_v25 = vld [vmem:[#allocation2 + $0xb4] sm:$0xff]  ;;  %v7508_v31 = vrot.slane %v7507_v3, 4  ;;  %v11584_v37 = vld [vmem:[%s15897_s2 + $0x140] sm:$0xff]  ;;  %v14752_v21 = vsel %vm11853_vm5, %v11157_v0, %v8079_v45 }
 0x3dd   : > { %16022 = vst [vmem:[#allocation67_spill] sm:$0xff] %v14690_v7  ;;  %v8125_v4 = vsel %vm11853_vm5, %v8123_v41, %v8124_v14  ;;  %v8081_v7 = vrot.slane %v8079_v45, 4  ;;  %v8803_v19 = vrot.slane %v8801_v6, 4  ;;  %8637 = vmatpush.bf16.msra.mxu0 %v11609_v9  ;;  %v11616_v3 = vld [vmem:[%s15897_s2 + $0x1c0] sm:$0xff]  ;;  %v8810_v41 = vshll.u32 %v14484_v12, 16 }
 0x3de   : > { %v6560_v1 = vpop.f32.mrf.mxu3  ;;  %v8218_v36 = vunpack.c.l.b16 %v8125_v4  ;;  %v14754_v14 = vld [vmem:[#allocation2 + $0x64] sm:$0xf]  ;;  %v7513_v6 = vsel %vm11841_vm4, %v7508_v31, %v14684_v54  ;;  %v7523_v16 = vsel %vm11841_vm4, %v7518_v50, %v7522_v29  ;;  %8324 = vmatpush.bf16.msra.mxu3 %v11584_v37  ;;  %v8020_v9 = vld [vmem:[#allocation2 + $0x60] sm:$0xe]  ;;  %v8205_v54 = vunpack.c.l.b16 %v14752_v21  ;;  %v14771_v4 = vld [vmem:[#allocation2 + $0x4c] sm:$0xf] }
 0x3df   : > { %v6561_v63 = vadd.f32 %v6560_v1, %v14379_v15  ;;  %v11617_v15 = vld [vmem:[%s15897_s2 + $0x1c8] sm:$0xff]  ;;  %v7789_v1 = vunpack.c.l.b16 %v7499_v46  ;;  %v8814_v46 = vshrl.u32 %v14484_v12, 16  ;;  %v8082_v12 = vrot.slane %v14405_v53, 5 }
 0x3e0   : > { %v6939_v38 = vpop.f32.mrf.mxu0  ;;  %9318 = vmatpush.bf16.msra.mxu1 %v11617_v15  ;;  %v14748_v60 = vpack.c.b16 %v8218_v36, %v8217_v2  ;;  %v8807_v45 = vor.u32 %v8806_v51, %v8803_v19  ;;  %v14769_v0 = vrot.slane %v8810_v41, 5  ;;  %v14775_v29 = vunpack.c.l.b16 %v7523_v16 }
 0x3e1   : > { %v14729_v26 = vadd.f32 %v6937_v11, %v6561_v63  ;;  %v6766_v11 = vsel %vm11853_vm5, %v10996_v5, %v6765_v58  ;;  %v6817_v58 = vunpack.c.l.b16 %v6769_v13  ;;  %v7816_v63 = vpack.c.b16 %v7789_v1, %v7788_v32  ;;  %8638 = vmatpush.bf16.msra.mxu0 %v11608_v48  ;;  %v11527_v1 = vld [vmem:[#allocation2 + $0xb4] sm:$0xff]  ;;  %v14781_v13 = vld [vmem:[#allocation2 + $0x68] sm:$0x1] }
 0x3e2   : > { %16025 = vst [vmem:[#allocation70_spill] sm:$0xff] %v14748_v60  ;;  %v6816_v33 = vunpack.c.l.b16 %v6766_v11  ;;  %v8083_v31 = vsel %vm11853_vm5, %v8081_v7, %v8082_v12  ;;  %v8816_v53 = vrot.slane %v8814_v46, 4  ;;  %v8820_v5 = vshll.u32 %v14495_v8, 16  ;;  %v11628_v7 = vld [vmem:[%s15897_s2 + $0x220] sm:$0xff] }
 0x3e3   : > { %16024 = vst [vmem:[#allocation69_spill] sm:$0xff] %v14729_v26  ;;  %v14764_v32 = vpop.f32.mrf.mxu1  ;;  %v14783_v2 = vunpack.c.l.b16 %v7513_v6  ;;  %v8086_v51 = vrot.slane %v14416_v62, 5  ;;  %v11164_v11 = vrot.slane %v8020_v9, 9  ;;  %v8808_v48 = vrot.slane %v8807_v45, 4  ;;  %9740 = vmatpush.bf16.msra.mxu2 %v11628_v7  ;;  %v9438_v26 = vld [vmem:[#allocation2 + $0x54] sm:$0xe] }
 0x3e4   : > { %v14733_v61 = vpop.f32.mrf.mxu2  ;;  %16026 = vst [vmem:[#allocation71_spill] sm:$0xff] %v14764_v32  ;;  %9319 = vmatpush.bf16.msra.mxu1 %v11616_v3  ;;  %v6833_v50 = vpack.c.b16 %v6817_v58, %v6816_v33  ;;  %v11158_v3 = vrot.slane %v8014_v17, 9  ;;  %v15904_v41 = vrot.slane %v14771_v4, 5  ;;  %v8817_v46 = vor.u32 %v8816_v53, %v14769_v0  ;;  %v14803_v17 = vld [vmem:[#allocation2 + $0x50] sm:$0x1] }
 0x3e5   : > { %v8131_v62 = vrot.slane %v14781_v13, 5  ;;  %v8089_v6 = vrot.slane %v14449_v20, 5  ;;  %v8088_v45 = vrot.slane %v8086_v51, 4 }
 0x3e6   : > { %7289 = vmatmul.bf16.gmra.mxu1 %v11566_v25  ;;  %v6562_v23 = vpop.f32.mrf.mxu3  ;;  %v8128_v25 = vrot.slane %v14754_v14, 5  ;;  %v14801_v33 = vsel %vm11853_vm5, %v11158_v3, %v8086_v51  ;;  %v9529_v53 = vrot.slane %v15904_v41, 4  ;;  %v8021_v41 = vld [vmem:[#allocation2 + $0x6c] sm:$0xe] }
 0x3e7   : > { %v6563_v36 = vadd.f32 %v6562_v23, %v14401_v39  ;;  %v8755_v39 = vld [vmem:[#allocation2 + $0x24] sm:$0xf]  ;;  %v8822_v23 = vrot.slane %v8820_v5, 5  ;;  %v7538_v5 = vshrl.u32 %v14680_v34, 16 }
 0x3e8   : > { %v6942_v15 = vpop.f32.mrf.mxu0  ;;  %v8130_v37 = vrot.slane %v8128_v25, 4  ;;  %v8825_v58 = vshrl.u32 %v8755_v39, 16  ;;  %v8129_v21 = vsel %vm11853_vm5, %v11164_v11, %v8128_v25  ;;  %v8828_v16 = vshll.u32 %v8755_v39, 16 }
 0x3e9   : > { %7920 = vmatmul.bf16.gmra.mxu2 %v7816_v63  ;;  %v14773_v19 = vadd.f32 %v6939_v38, %v6563_v36  ;;  %v8206_v38 = vunpack.c.l.b16 %v8083_v31  ;;  %v8813_v36 = vsel %vm11841_vm4, %v8808_v48, %v14769_v0  ;;  %v8219_v31 = vunpack.c.l.b16 %v8129_v21  ;;  %v7350_v0 = vld [vmem:[#allocation2 + $0x54] sm:$0xf]  ;;  %v14839_v63 = vld [vmem:[#allocation2 + $0x70] sm:$0xf] }
 0x3ea   : > { %v8132_v9 = vsel %vm11853_vm5, %v8130_v37, %v8131_v62  ;;  %v8827_v7 = vrot.slane %v8825_v58, 4  ;;  %v8830_v11 = vrot.slane %v8828_v16, 5  ;;  %v8838_v62 = vshrl.u32 %v14527_v49, 16 }
 0x3eb   : > { %16027 = vst [vmem:[#allocation72_spill] sm:$0xff] %v14773_v19  ;;  %6604 = vmatmul.bf16.gmra.mxu3 %v11527_v1  ;;  %6981 = vmatmul.bf16.gmra.mxu0 %v6833_v50  ;;  %v8220_v20 = vunpack.c.l.b16 %v8132_v9  ;;  %v8818_v1 = vrot.slane %v8817_v46, 4  ;;  %v7534_v50 = vshll.u32 %v14680_v34, 16  ;;  %v14817_v37 = vpop.f32.mrf.mxu1  ;;  %v8237_v3 = vpack.c.b16 %v8206_v38, %v8205_v54  ;;  %v9437_v34 = vld [vmem:[#allocation2 + $0x48] sm:$0xe]  ;;  %v11567_v54 = vld [vmem:[#allocation2 + $0xc0] sm:$0xff] }
 0x3ec   : > { %v14787_v8 = vpop.f32.mrf.mxu2  ;;  %16030 = vst [vmem:[#allocation75_spill] sm:$0xff] %v14817_v37  ;;  %v8834_v46 = vshll.u32 %v14527_v49, 16  ;;  %v7525_v58 = vshrl.u32 %v7350_v0, 16  ;;  %v14826_v16 = vsel %vm11853_vm5, %v8088_v45, %v8089_v6  ;;  %v14832_v38 = vunpack.c.l.b16 %v8813_v36 }
 0x3ed   : > { %v14814_v48 = vpack.c.b16 %v8220_v20, %v8219_v31  ;;  %v14834_v31 = vrot.slane %v7534_v50, 5  ;;  %v7540_v49 = vrot.slane %v7538_v5, 4  ;;  %v8844_v20 = vshll.u32 %v14548_v10, 16 }
 0x3ee   : > { %v6565_v12 = vpop.f32.mrf.mxu3  ;;  %v8831_v21 = vor.u32 %v8830_v11, %v8827_v7  ;;  %v11337_v6 = vrot.slane %v9437_v34, 9  ;;  %v14843_v36 = vrot.slane %v8834_v46, 5  ;;  %v8840_v50 = vrot.slane %v8838_v62, 4  ;;  %v14856_v62 = vld [vmem:[#allocation2 + $0x74] sm:$0x1] }
 0x3ef   : > { %v6566_v25 = vadd.f32 %v6565_v12, %v14414_v35  ;;  %16029 = vst [vmem:[#allocation74_spill] sm:$0xff] %v14814_v48  ;;  %v9530_v35 = vrot.slane %v14803_v17, 5  ;;  %v14822_v12 = vld [vmem:[#allocation2 + $0x58] sm:$0xf]  ;;  %v8135_v5 = vrot.slane %v14839_v63, 5  ;;  %v14854_v46 = vrot.slane %v8844_v20, 5 }
 0x3f0   : > { %v6944_v39 = vpop.f32.mrf.mxu0  ;;  %v9534_v45 = vrot.slane %v14822_v12, 5  ;;  %v8841_v20 = vor.u32 %v8840_v50, %v14843_v36  ;;  %v8858_v50 = vshll.u32 %v14530_v27, 16 }
 0x3f1   : > { %v14812_v51 = vadd.f32 %v6942_v15, %v6566_v25  ;;  %v7528_v15 = vshll.u32 %v7350_v0, 16  ;;  %v9531_v9 = vsel %vm11853_vm5, %v9529_v53, %v9530_v35  ;;  %v8823_v0 = vsel %vm11841_vm4, %v8818_v1, %v8822_v23  ;;  %v14858_v35 = vld [vmem:[#allocation2 + $0x5c] sm:$0x1] }
 0x3f2   : > { %v16031_v1 = vrot.slane %v14771_v4, 5  ;;  %v14851_v34 = vunpack.c.l.b16 %v8823_v0  ;;  %v9634_v37 = vunpack.c.l.b16 %v9531_v9  ;;  %v8758_v0 = vld [vmem:[#allocation2 + $0x30] sm:$0xf]  ;;  %v8137_v19 = vrot.slane %v8135_v5, 4 }
 0x3f3   : > { %16028 = vst [vmem:[#allocation73_spill] sm:$0xff] %v14812_v51  ;;  %v7527_v51 = vrot.slane %v7525_v58, 4  ;;  %v7530_v23 = vrot.slane %v7528_v15, 5  ;;  %v11592_v15 = vld [vmem:[#allocation2 + $0x18] sm:$0xff]  ;;  %v8842_v60 = vrot.slane %v8841_v20, 4 }
 0x3f4   : > { %v14830_v25 = vpop.f32.mrf.mxu2  ;;  %v9528_v7 = vsel %vm11853_vm5, %v11337_v6, %v16031_v1  ;;  %v14865_v6 = vrot.slane %v8831_v21, 4  ;;  %v9536_v1 = vrot.slane %v9534_v45, 4  ;;  %v14873_v21 = vpop.f32.mrf.mxu1 }
 0x3f5   : > { %v9633_v32 = vunpack.c.l.b16 %v9528_v7  ;;  %v7531_v9 = vor.u32 %v7530_v23, %v7527_v51  ;;  %16034 = vst [vmem:[#allocation77_spill] sm:$0xff] %v14873_v21 }
 0x3f6   : > { %7294 = vmatmul.bf16.gmra.mxu1 %v11567_v54  ;;  %v6567_v53 = vpop.f32.mrf.mxu3  ;;  %v7541_v54 = vor.u32 %v7540_v49, %v14834_v31  ;;  %v7544_v49 = vshll.u32 %v14687_v40, 16 }
 0x3f7   : > { %v6568_v10 = vadd.f32 %v6567_v53, %v14442_v24  ;;  %v16032_v24 = vpack.c.b16 %v14775_v29, %v14783_v2  ;;  %v11165_v53 = vrot.slane %v8021_v41, 9  ;;  %v8138_v2 = vrot.slane %v14856_v62, 5 }
 0x3f8   : > { %v6947_v11 = vpop.f32.mrf.mxu0  ;;  %v7542_v40 = vrot.slane %v7541_v54, 4  ;;  %v14878_v7 = vpack.c.b16 %v9634_v37, %v9633_v32  ;;  %v7532_v54 = vrot.slane %v7531_v9, 4  ;;  %v7558_v37 = vshll.u32 %v14754_v14, 16 }
 0x3f9   : > { %7925 = vmatmul.bf16.gmra.mxu2 %v16032_v24  ;;  %v14863_v58 = vadd.f32 %v6944_v39, %v6568_v10  ;;  %v8136_v29 = vsel %vm11853_vm5, %v11165_v53, %v8135_v5  ;;  %v9537_v39 = vrot.slane %v14858_v35, 5  ;;  %v8849_v10 = vshrl.u32 %v8758_v0, 16 }
 0x3fa   : > { %16035 = vst [vmem:[#allocation78_spill] sm:$0xff] %v14878_v7  ;;  %v8139_v51 = vsel %vm11853_vm5, %v8137_v19, %v8138_v2  ;;  %v11338_v5 = vrot.slane %v9438_v26, 9  ;;  %v7546_v24 = vrot.slane %v7544_v49, 5  ;;  %v8852_v53 = vshll.u32 %v8758_v0, 16  ;;  %v7353_v26 = vld [vmem:[#allocation2 + $0x60] sm:$0xf] }
 0x3fb   : > { %16033 = vst [vmem:[#allocation76_spill] sm:$0xff] %v14863_v58  ;;  %8325 = vmatmul.bf16.vlgmr.msra.gmra.mxu3 %v8237_v3  ;;  %8639 = vmatmul.bf16.vlgmr.msra.gmra.mxu0 %v11592_v15  ;;  %v8862_v3 = vshrl.u32 %v14530_v27, 16  ;;  %v9538_v23 = vsel %vm11853_vm5, %v9536_v1, %v9537_v39  ;;  %v8221_v58 = vunpack.c.l.b16 %v8136_v29  ;;  %v8222_v21 = vunpack.c.l.b16 %v8139_v51  ;;  %v14901_v2 = vld [vmem:[#allocation2 + $0x64] sm:$0xf] }
 0x3fc   : > { %v14875_v41 = vpop.f32.mrf.mxu2  ;;  %v9535_v32 = vsel %vm11853_vm5, %v11338_v5, %v9534_v45  ;;  %v7547_v27 = vsel %vm11841_vm4, %v7542_v40, %v7546_v24  ;;  %v7562_v1 = vshrl.u32 %v14754_v14, 16  ;;  %v8851_v9 = vrot.slane %v8849_v10, 4  ;;  %v14922_v24 = vpop.f32.mrf.mxu1 }
 0x3fd   : > { %v14892_v49 = vpack.c.b16 %v8222_v21, %v8221_v58  ;;  %v14896_v29 = vrot.slane %v8858_v50, 5  ;;  %v7537_v45 = vsel %vm11841_vm4, %v7532_v54, %v14834_v31  ;;  %v8854_v20 = vrot.slane %v8852_v53, 5 }
 0x3fe   : > { %v6570_v15 = vpop.f32.mrf.mxu3  ;;  %v9635_v39 = vunpack.c.l.b16 %v9535_v32  ;;  %v9636_v40 = vunpack.c.l.b16 %v9538_v23  ;;  %v7793_v51 = vunpack.c.l.b16 %v7547_v27  ;;  %v8847_v14 = vsel %vm11841_vm4, %v8842_v60, %v14854_v46  ;;  %v14919_v46 = vld [vmem:[#allocation2 + $0x7c] sm:$0xf] }
 0x3ff   : > { %v6571_v48 = vadd.f32 %v6570_v15, %v14473_v44  ;;  %v8864_v44 = vrot.slane %v8862_v3, 4  ;;  %v9232_v21 = vpack.c.b16 %v14851_v34, %v14832_v38  ;;  %v14910_v10 = vrot.slane %v7558_v37, 5 }
 0x400   : > { %v6949_v19 = vpop.f32.mrf.mxu0  ;;  %v7564_v31 = vrot.slane %v7562_v1, 4  ;;  %v14912_v50 = vpack.c.b16 %v9636_v40, %v9635_v39  ;;  %v7792_v3 = vunpack.c.l.b16 %v7537_v45  ;;  %v8837_v5 = vsel %vm11841_vm4, %v14865_v6, %v14843_v36  ;;  %v8761_v45 = vld [vmem:[#allocation2 + $0x3c] sm:$0xf]  ;;  %v14932_v39 = vld [vmem:[#allocation2 + $0x68] sm:$0x1] }
 0x401   : > { %v14894_v0 = vadd.f32 %v6947_v11, %v6571_v48  ;;  %v7549_v48 = vshrl.u32 %v7353_v26, 16  ;;  %v7552_v11 = vshll.u32 %v7353_v26, 16  ;;  %v8865_v60 = vor.u32 %v8864_v44, %v14896_v29  ;;  %v8022_v26 = vld [vmem:[#allocation2 + $0x78] sm:$0xe] }
 0x402   : > { %16036 = vst [vmem:[#allocation79_spill] sm:$0xff] %v14912_v50  ;;  %v9541_v23 = vrot.slane %v14901_v2, 5  ;;  %v14924_v34 = vunpack.c.l.b16 %v8847_v14  ;;  %v8855_v15 = vor.u32 %v8854_v20, %v8851_v9  ;;  %v8868_v53 = vshll.u32 %v14558_v59, 16  ;;  %v11627_v14 = vld [vmem:[%s15897_s2 + $0x218] sm:$0xff]  ;;  %v8023_v50 = vld [vmem:[#allocation2 + $0x84] sm:$0xe] }
 0x403   : > { %v8142_v54 = vrot.slane %v14919_v46, 5  ;;  %v7818_v32 = vpack.c.b16 %v7793_v51, %v7792_v3  ;;  %v7551_v6 = vrot.slane %v7549_v48, 4  ;;  %v7554_v27 = vrot.slane %v7552_v11, 5  ;;  %v14943_v48 = vld [vmem:[#allocation2 + $0x80] sm:$0x1]  ;;  %9741 = vmatpush.bf16.msra.mxu2 %v11627_v14 }
 0x404   : > { %v14906_v58 = vpop.f32.mrf.mxu2  ;;  %v14929_v1 = vunpack.c.l.b16 %v8837_v5  ;;  %v7565_v44 = vor.u32 %v7564_v31, %v14910_v10  ;;  %v16038_v59 = vunpack.c.l.b16 %v14801_v33  ;;  %v16039_v20 = vunpack.c.l.b16 %v14826_v16  ;;  %v7356_v14 = vld [vmem:[#allocation2 + $0x6c] sm:$0xf] }
 0x405   : > { %v8866_v51 = vrot.slane %v8865_v60, 4  ;;  %v9543_v11 = vrot.slane %v9541_v23, 4  ;;  %v11166_v33 = vrot.slane %v8022_v26, 9  ;;  %v8144_v31 = vrot.slane %v8142_v54, 4  ;;  %v9439_v60 = vld [vmem:[#allocation2 + $0x60] sm:$0xe] }
 0x406   : > { %9320 = vmatmul.bf16.vlgmr.msra.gmra.mxu1 %v9232_v21  ;;  %v6572_v38 = vpop.f32.mrf.mxu3  ;;  %v8238_v40 = vpack.c.b16 %v16039_v20, %v16038_v59  ;;  %v7568_v21 = vshll.u32 %v14781_v13, 16  ;;  %v7555_v16 = vor.u32 %v7554_v27, %v7551_v6  ;;  %v8856_v3 = vrot.slane %v8855_v15, 4 }
 0x407   : > { %v6573_v36 = vadd.f32 %v6572_v38, %v14509_v52  ;;  %v11593_v52 = vld [vmem:[#allocation2 + $0x24] sm:$0xff]  ;;  %v8870_v5 = vrot.slane %v8868_v53, 5  ;;  %v9544_v38 = vrot.slane %v14932_v39, 5  ;;  %v8873_v59 = vshrl.u32 %v8761_v45, 16 }
 0x408   : > { %v6952_v37 = vpop.f32.mrf.mxu0  ;;  %v8145_v13 = vrot.slane %v14943_v48, 5  ;;  %v8882_v15 = vshll.u32 %v14609_v55, 16  ;;  %v7570_v6 = vrot.slane %v7568_v21, 5  ;;  %v7582_v21 = vshll.u32 %v14839_v63, 16 }
 0x409   : > { %7930 = vmatmul.bf16.gmra.mxu2 %v7818_v32  ;;  %v14934_v9 = vadd.f32 %v6949_v19, %v6573_v36  ;;  %v9233_v19 = vpack.c.b16 %v14924_v34, %v14929_v1  ;;  %v7566_v36 = vrot.slane %v7565_v44, 4  ;;  %v8143_v34 = vsel %vm11853_vm5, %v11166_v33, %v8142_v54 }
 0x40a   : > { %v8871_v26 = vsel %vm11841_vm4, %v8866_v51, %v8870_v5  ;;  %v8876_v1 = vshll.u32 %v8761_v45, 16  ;;  %v9545_v53 = vsel %vm11853_vm5, %v9543_v11, %v9544_v38  ;;  %v8886_v44 = vshrl.u32 %v14609_v55, 16  ;;  %v14965_v45 = vpop.f32.mrf.mxu1 }
 0x40b   : > { %16037 = vst [vmem:[#allocation80_spill] sm:$0xff] %v14934_v9  ;;  %8330 = vmatmul.bf16.gmra.mxu3 %v8238_v40  ;;  %8644 = vmatmul.bf16.gmra.mxu0 %v11593_v52  ;;  %v8146_v20 = vsel %vm11853_vm5, %v8144_v31, %v8145_v13  ;;  %v11339_v40 = vrot.slane %v9439_v60, 9  ;;  %v7556_v54 = vrot.slane %v7555_v16, 4  ;;  %v8223_v33 = vunpack.c.l.b16 %v8143_v34 }
 0x40c   : > { %v14951_v32 = vpop.f32.mrf.mxu2  ;;  %v8224_v51 = vunpack.c.l.b16 %v8146_v20  ;;  %16040 = vst [vmem:[#allocation81_spill] sm:$0xff] %v14965_v45  ;;  %v7571_v5 = vsel %vm11841_vm4, %v7566_v36, %v7570_v6  ;;  %v7586_v55 = vshrl.u32 %v14839_v63, 16  ;;  %v8875_v60 = vrot.slane %v8873_v59, 4  ;;  %v8764_v6 = vld [vmem:[#allocation2 + $0x48] sm:$0xf] }
 0x40d   : > { %v9542_v31 = vsel %vm11853_vm5, %v11339_v40, %v9541_v23  ;;  %v7561_v36 = vsel %vm11841_vm4, %v7556_v54, %v14910_v10  ;;  %v14985_v34 = vunpack.c.l.b16 %v8871_v26  ;;  %v7573_v63 = vshrl.u32 %v7356_v14, 16  ;;  %v14995_v54 = vld [vmem:[#allocation2 + $0x88] sm:$0xf] }
 0x40e   : > { %v6575_v27 = vpop.f32.mrf.mxu3  ;;  %v14980_v38 = vpack.c.b16 %v8224_v51, %v8223_v33  ;;  %v8878_v13 = vrot.slane %v8876_v1, 5  ;;  %v7795_v23 = vunpack.c.l.b16 %v7571_v5  ;;  %v9637_v20 = vunpack.c.l.b16 %v9542_v31 }
 0x40f   : > { %v6576_v52 = vadd.f32 %v6575_v27, %v14537_v42  ;;  %v8861_v42 = vsel %vm11841_vm4, %v8856_v3, %v14896_v29  ;;  %v14987_v27 = vld [vmem:[#allocation2 + $0x70] sm:$0xf]  ;;  %v9638_v40 = vunpack.c.l.b16 %v9545_v53  ;;  %v14991_v29 = vrot.slane %v7582_v21, 5 }
 0x410   : > { %v6954_v11 = vpop.f32.mrf.mxu0  ;;  %v7588_v3 = vrot.slane %v7586_v55, 4  ;;  %v14993_v59 = vrot.slane %v8882_v15, 5  ;;  %v8888_v33 = vrot.slane %v8886_v44, 4  ;;  %v7794_v10 = vunpack.c.l.b16 %v7561_v36 }
 0x411   : > { %v14975_v16 = vadd.f32 %v6952_v37, %v6576_v52  ;;  %v7576_v37 = vshll.u32 %v7356_v14, 16  ;;  %v8897_v26 = vshrl.u32 %v8764_v6, 16  ;;  %v14997_v1 = vpack.c.b16 %v9638_v40, %v9637_v20  ;;  %v15007_v40 = vld [vmem:[#allocation2 + $0x74] sm:$0x1] }
 0x412   : > { %v9548_v51 = vrot.slane %v14987_v27, 5  ;;  %v15000_v5 = vunpack.c.l.b16 %v8861_v42  ;;  %v8879_v53 = vor.u32 %v8878_v13, %v8875_v60  ;;  %v8900_v31 = vshll.u32 %v8764_v6, 16 }
 0x413   : > { %16041 = vst [vmem:[#allocation82_spill] sm:$0xff] %v14975_v16  ;;  %v8149_v21 = vrot.slane %v14995_v54, 5  ;;  %v7819_v55 = vpack.c.b16 %v7795_v23, %v7794_v10  ;;  %v7575_v44 = vrot.slane %v7573_v63, 4  ;;  %v7578_v36 = vrot.slane %v7576_v37, 5  ;;  %v11594_v16 = vld [vmem:[#allocation2 + $0x30] sm:$0xff]  ;;  %v15016_v23 = vpop.f32.mrf.mxu1 }
 0x414   : > { %v14989_v52 = vpop.f32.mrf.mxu2  ;;  %16042 = vst [vmem:[#allocation83_spill] sm:$0xff] %v14997_v1  ;;  %v8889_v60 = vor.u32 %v8888_v33, %v14993_v59  ;;  %v15012_v13 = vrot.slane %v8897_v26, 4  ;;  %v9440_v63 = vld [vmem:[#allocation2 + $0x6c] sm:$0xe]  ;;  %v9550_v6 = vrot.slane %v9548_v51, 4  ;;  %v7592_v37 = vshll.u32 %v14856_v62, 16 }
 0x415   : > { %16044 = vst [vmem:[#allocation85_spill] sm:$0xff] %v15016_v23  ;;  %v8902_v10 = vrot.slane %v8900_v31, 5  ;;  %v8892_v33 = vshll.u32 %v14624_v57, 16  ;;  %v9551_v26 = vrot.slane %v15007_v40, 5  ;;  %v15026_v1 = vld [vmem:[#allocation2 + $0x7c] sm:$0xf] }
 0x416   : > { %9325 = vmatmul.bf16.gmra.mxu1 %v9233_v19  ;;  %v6577_v14 = vpop.f32.mrf.mxu3  ;;  %v7589_v19 = vor.u32 %v7588_v3, %v14991_v29  ;;  %v8151_v3 = vrot.slane %v8149_v21, 4  ;;  %v11340_v31 = vrot.slane %v9440_v63, 9 }
 0x417   : > { %v6578_v15 = vadd.f32 %v6577_v14, %v14577_v18  ;;  %v15014_v18 = vld [vmem:[#allocation2 + $0x8c] sm:$0x1]  ;;  %v11167_v14 = vrot.slane %v8023_v50, 9  ;;  %v9552_v57 = vsel %vm11853_vm5, %v9550_v6, %v9551_v26 }
 0x418   : > { %v6957_v7 = vpop.f32.mrf.mxu0  ;;  %v7590_v20 = vrot.slane %v7589_v19, 4  ;;  %v8152_v50 = vrot.slane %v15014_v18, 5  ;;  %v8903_v19 = vor.u32 %v8902_v10, %v15012_v13  ;;  %v7606_v13 = vshll.u32 %v14919_v46, 16 }
 0x419   : > { %7935 = vmatmul.bf16.gmra.mxu2 %v7819_v55  ;;  %v15009_v42 = vadd.f32 %v6954_v11, %v6578_v15  ;;  %v7579_v11 = vor.u32 %v7578_v36, %v7575_v44  ;;  %v15020_v55 = vrot.slane %v8879_v53, 4  ;;  %v8150_v62 = vsel %vm11853_vm5, %v11167_v14, %v8149_v21 }
 0x41a   : > { %v8910_v53 = vshrl.u32 %v14771_v4, 16  ;;  %v7594_v44 = vrot.slane %v7592_v37, 5  ;;  %v9549_v21 = vsel %vm11853_vm5, %v11340_v31, %v9548_v51  ;;  %v8225_v14 = vunpack.c.l.b16 %v8150_v62  ;;  %v9441_v31 = vld [vmem:[#allocation2 + $0x78] sm:$0xe] }
 0x41b   : > { %16043 = vst [vmem:[#allocation84_spill] sm:$0xff] %v15009_v42  ;;  %8335 = vmatmul.bf16.gmra.mxu3 %v14467_v28  ;;  %8649 = vmatmul.bf16.gmra.mxu0 %v11594_v16  ;;  %v8890_v28 = vrot.slane %v8889_v60, 4  ;;  %v8906_v16 = vshll.u32 %v14771_v4, 16  ;;  %v8153_v42 = vsel %vm11853_vm5, %v8151_v3, %v8152_v50  ;;  %v7359_v60 = vld [vmem:[#allocation2 + $0x78] sm:$0xf]  ;;  %v9555_v4 = vrot.slane %v15026_v1, 5 }
 0x41c   : > { %v15024_v15 = vpop.f32.mrf.mxu2  ;;  %v8226_v23 = vunpack.c.l.b16 %v8153_v42  ;;  %v7580_v9 = vrot.slane %v7579_v11, 4  ;;  %v7595_v6 = vsel %vm11841_vm4, %v7590_v20, %v7594_v44  ;;  %v7610_v10 = vshrl.u32 %v14919_v46, 16  ;;  %v15048_v50 = vld [vmem:[#allocation2 + $0x80] sm:$0x1] }
 0x41d   : > { %v8908_v26 = vrot.slane %v8906_v16, 5  ;;  %v8912_v51 = vrot.slane %v8910_v53, 4  ;;  %v7597_v11 = vshrl.u32 %v7359_v60, 16  ;;  %v9639_v62 = vunpack.c.l.b16 %v9549_v21 }
 0x41e   : > { %v6580_v36 = vpop.f32.mrf.mxu3  ;;  %v7585_v42 = vsel %vm11841_vm4, %v7580_v9, %v14991_v29  ;;  %v9640_v20 = vunpack.c.l.b16 %v9552_v57  ;;  %v7797_v44 = vunpack.c.l.b16 %v7595_v6  ;;  %v7600_v45 = vshll.u32 %v7359_v60, 16 }
 0x41f   : > { %v6581_v63 = vadd.f32 %v6580_v36, %v14613_v43  ;;  %v15050_v43 = vpack.c.b16 %v8226_v23, %v8225_v14  ;;  %v8894_v36 = vrot.slane %v8892_v33, 5  ;;  %v9557_v46 = vrot.slane %v9555_v4, 4 }
 0x420   : > { %v6959_v37 = vpop.f32.mrf.mxu0  ;;  %v15059_v53 = vrot.slane %v7606_v13, 5  ;;  %v7612_v23 = vrot.slane %v7610_v10, 4  ;;  %v9558_v14 = vrot.slane %v15048_v50, 5  ;;  %v7796_v9 = vunpack.c.l.b16 %v7585_v42 }
 0x421   : > { %v15046_v3 = vadd.f32 %v6957_v7, %v6581_v63  ;;  %v15055_v7 = vpop.f32.mrf.mxu1  ;;  %v15061_v63 = vpack.c.b16 %v9640_v20, %v9639_v62  ;;  %v8885_v29 = vsel %vm11841_vm4, %v15020_v55, %v14993_v59  ;;  %v8895_v33 = vsel %vm11841_vm4, %v8890_v28, %v8894_v36  ;;  %v15076_v59 = vld [vmem:[#allocation2 + $0x88] sm:$0xf] }
 0x422   : > { %16046 = vst [vmem:[#allocation87_spill] sm:$0xff] %v15055_v7  ;;  %v11341_v57 = vrot.slane %v9441_v31, 9  ;;  %v16048_v21 = vpack.c.b16 %v14985_v34, %v15000_v5  ;;  %v7599_v6 = vrot.slane %v7597_v11, 4  ;;  %v8904_v13 = vrot.slane %v8903_v19, 4 }
 0x423   : > { %16045 = vst [vmem:[#allocation86_spill] sm:$0xff] %v15046_v3  ;;  %v8913_v10 = vor.u32 %v8912_v51, %v8908_v26  ;;  %v9559_v42 = vsel %vm11853_vm5, %v9557_v46, %v9558_v14  ;;  %v7820_v62 = vpack.c.b16 %v7797_v44, %v7796_v9  ;;  %v15080_v31 = vunpack.c.l.b16 %v8895_v33  ;;  %v11595_v51 = vld [vmem:[#allocation2 + $0x3c] sm:$0xff] }
 0x424   : > { %v15057_v16 = vpop.f32.mrf.mxu2  ;;  %16047 = vst [vmem:[#allocation88_spill] sm:$0xff] %v15061_v63  ;;  %v7602_v63 = vrot.slane %v7600_v45, 5  ;;  %v9556_v55 = vsel %vm11853_vm5, %v11341_v57, %v9555_v4  ;;  %v7613_v34 = vor.u32 %v7612_v23, %v15059_v53  ;;  %v8916_v5 = vshll.u32 %v14803_v17, 16  ;;  %v11626_v45 = vld [vmem:[%s15897_s2 + $0x210] sm:$0xff]  ;;  %v9442_v23 = vld [vmem:[#allocation2 + $0x84] sm:$0xe] }
 0x425   : > { %v15086_v11 = vunpack.c.l.b16 %v8885_v29  ;;  %v9642_v4 = vunpack.c.l.b16 %v9559_v42  ;;  %v7616_v44 = vshll.u32 %v14943_v48, 16  ;;  %v8914_v36 = vrot.slane %v8913_v10, 4  ;;  %v16051_v9 = vld [vmem:[#allocation51_spill] sm:$0xff]  ;;  %9742 = vmatpush.bf16.msra.mxu2 %v11626_v45  ;;  %v15100_v48 = vld [vmem:[#allocation2 + $0x8c] sm:$0x1] }
 0x426   : > { %9330 = vmatmul.bf16.gmra.mxu1 %v16048_v21  ;;  %v6582_v60 = vpop.f32.mrf.mxu3  ;;  %v9641_v46 = vunpack.c.l.b16 %v9556_v55  ;;  %v9562_v17 = vrot.slane %v15076_v59, 5  ;;  %v7603_v29 = vor.u32 %v7602_v63, %v7599_v6  ;;  %v7614_v57 = vrot.slane %v7613_v34, 4  ;;  %v7362_v45 = vld [vmem:[#allocation2 + $0x84] sm:$0xf] }
 0x427   : > { %v6583_v20 = vadd.f32 %v6582_v60, %v14643_v30  ;;  %v8909_v30 = vsel %vm11841_vm4, %v8904_v13, %v8908_v26  ;;  %v9235_v33 = vpack.c.b16 %v15080_v31, %v15086_v11  ;;  %v8918_v21 = vrot.slane %v8916_v5, 5 }
 0x428   : > { %v6962_v28 = vpop.f32.mrf.mxu0  ;;  %v15102_v60 = vpack.c.b16 %v9642_v4, %v9641_v46  ;;  %v15106_v10 = vunpack.c.l.b16 %v8909_v30  ;;  %v11342_v42 = vrot.slane %v9442_v23, 9  ;;  %v7618_v63 = vrot.slane %v7616_v44, 5 }
 0x429   : > { %7940 = vmatmul.bf16.gmra.mxu2 %v7820_v62  ;;  %v15084_v19 = vadd.f32 %v6959_v37, %v6583_v20  ;;  %v16050_v37 = vld [vmem:[#allocation38_spill] sm:$0xff]  ;;  %v9564_v62 = vrot.slane %v9562_v17, 4  ;;  %v15108_v20 = vpop.f32.mrf.mxu1  ;;  %v8919_v55 = vsel %vm11841_vm4, %v8914_v36, %v8918_v21  ;;  %v8930_v31 = vshll.u32 %v14822_v12, 16 }
 0x42a   : > { %v7300_v14 = vadd.f32 %v16050_v37, %v14347_v22  ;;  %16052 = vst [vmem:[#allocation38_spill] sm:$0xff] %v15102_v60  ;;  %v8767_v22 = vld [vmem:[#allocation2 + $0x54] sm:$0xf]  ;;  %v8934_v34 = vshrl.u32 %v14822_v12, 16  ;;  %v7604_v5 = vrot.slane %v7603_v29, 4  ;;  %v9563_v30 = vsel %vm11853_vm5, %v11342_v42, %v9562_v17  ;;  %v16056_v42 = vld [vmem:[#allocation39_spill] sm:$0xff] }
 0x42b   : > { %16049 = vst [vmem:[#allocation89_spill] sm:$0xff] %v15084_v19  ;;  %8340 = vmatmul.bf16.gmra.mxu3 %v16051_v9  ;;  %8654 = vmatmul.bf16.gmra.mxu0 %v11595_v51  ;;  %v16054_v51 = vld [vmem:[#allocation67_spill] sm:$0xff]  ;;  %v9565_v4 = vrot.slane %v15100_v48, 5  ;;  %v7619_v44 = vsel %vm11841_vm4, %v7614_v57, %v7618_v63  ;;  %v7630_v23 = vshll.u32 %v14995_v54, 16  ;;  %v7634_v36 = vshrl.u32 %v14995_v54, 16  ;;  %v16057_v63 = vld [vmem:[#allocation40_spill] sm:$0xff] }
 0x42c   : > { %v7901_v26 = vpop.f32.mrf.mxu2  ;;  %16053 = vst [vmem:[#allocation51_spill] sm:$0xff] %v15108_v20  ;;  %v8921_v37 = vshrl.u32 %v8767_v22, 16  ;;  %v7609_v12 = vsel %vm11841_vm4, %v7604_v5, %v15059_v53  ;;  %v8924_v9 = vshll.u32 %v8767_v22, 16  ;;  %v7621_v29 = vshrl.u32 %v7362_v45, 16  ;;  %v15133_v19 = vld [vmem:[#allocation2 + $0x94] sm:$0xf] }
 0x42d   : > { %v15104_v13 = vadd.f32 %v7901_v26, %v7300_v14  ;;  %v9566_v17 = vsel %vm11853_vm5, %v9564_v62, %v9565_v4  ;;  %v7624_v26 = vshll.u32 %v7362_v45, 16  ;;  %v9643_v21 = vunpack.c.l.b16 %v9563_v30  ;;  %v15139_v62 = vld [vmem:[#allocation2 + $0x94] sm:$0xf]  ;;  %v16061_v20 = vld [vmem:[#allocation41_spill] sm:$0xff] }
 0x42e   : > { %v6585_v6 = vpop.f32.mrf.mxu3  ;;  %v9644_v57 = vunpack.c.l.b16 %v9566_v17  ;;  %v15131_v54 = vrot.slane %v8930_v31, 5  ;;  %v8936_v60 = vrot.slane %v8934_v34, 4  ;;  %v15137_v22 = vrot.slane %v7630_v23, 5  ;;  %v8770_v34 = vld [vmem:[#allocation2 + $0x60] sm:$0xf] }
 0x42f   : > { %v6586_v11 = vadd.f32 %v6585_v6, %v16054_v51  ;;  %v7301_v6 = vadd.f32 %v16057_v63, %v16056_v42  ;;  %v7799_v51 = vunpack.c.l.b16 %v7619_v44  ;;  %v7636_v5 = vrot.slane %v7634_v36, 4  ;;  %v9443_v17 = vld [vmem:[#allocation2 + $0x90] sm:$0xe]  ;;  %v15150_v63 = vld [vmem:[#allocation2 + $0x98] sm:$0x1] }
 0x430   : > { %v6964_v46 = vpop.f32.mrf.mxu0  ;;  %v15141_v45 = vpack.c.b16 %v9644_v57, %v9643_v21  ;;  %v7798_v4 = vunpack.c.l.b16 %v7609_v12  ;;  %v15145_v44 = vrot.slane %v8921_v37, 4  ;;  %v15147_v31 = vrot.slane %v8924_v9, 5  ;;  %v15154_v12 = vld [vmem:[#allocation2 + $0x98] sm:$0x1] }
 0x431   : > { %v15125_v14 = vadd.f32 %v6962_v28, %v6586_v11  ;;  %v15135_v28 = vunpack.c.l.b16 %v8919_v55  ;;  %v8024_v11 = vld [vmem:[#allocation2 + $0x90] sm:$0xe]  ;;  %v7623_v42 = vrot.slane %v7621_v29, 4  ;;  %v7626_v23 = vrot.slane %v7624_v26, 5 }
 0x432   : > { %16058 = vst [vmem:[#allocation39_spill] sm:$0xff] %v15141_v45  ;;  %v8940_v36 = vshll.u32 %v14858_v35, 16  ;;  %v8156_v21 = vrot.slane %v15133_v19, 5  ;;  %v7821_v57 = vpack.c.b16 %v7799_v51, %v7798_v4  ;;  %v11168_v37 = vrot.slane %v8024_v11, 9  ;;  %v11596_v51 = vld [vmem:[#allocation2 + $0x48] sm:$0xff] }
 0x433   : > { %16055 = vst [vmem:[#allocation67_spill] sm:$0xff] %v15125_v14  ;;  %v9569_v9 = vrot.slane %v15139_v62, 5  ;;  %v7637_v29 = vor.u32 %v7636_v5, %v15137_v22  ;;  %v8937_v26 = vor.u32 %v8936_v60, %v15131_v54  ;;  %v8945_v35 = vshrl.u32 %v8770_v34, 16  ;;  %v16062_v60 = vld [vmem:[#allocation42_spill] sm:$0xff] }
 0x434   : > { %v7903_v53 = vpop.f32.mrf.mxu2  ;;  %v11343_v45 = vrot.slane %v9443_v17, 9  ;;  %v8158_v4 = vrot.slane %v8156_v21, 4  ;;  %v8159_v11 = vrot.slane %v15150_v63, 5  ;;  %v9572_v5 = vrot.slane %v15154_v12, 5  ;;  %v16063_v17 = vld [vmem:[#allocation55_spill] sm:$0xff] }
 0x435   : > { %v15143_v30 = vadd.f32 %v7903_v53, %v7301_v6  ;;  %v15157_v53 = vpop.f32.mrf.mxu1  ;;  %v9571_v3 = vrot.slane %v9569_v9, 4  ;;  %v7302_v7 = vadd.f32 %v16062_v60, %v16061_v20  ;;  %v8927_v20 = vor.u32 %v15147_v31, %v15145_v44 }
 0x436   : > { %9335 = vmatmul.bf16.gmra.mxu1 %v9235_v33  ;;  %v6587_v55 = vpop.f32.mrf.mxu3  ;;  %16059 = vst [vmem:[#allocation40_spill] sm:$0xff] %v15157_v53  ;;  %v7640_v53 = vshll.u32 %v15014_v18, 16  ;;  %v7654_v44 = vshll.u32 %v15133_v19, 16  ;;  %v7658_v31 = vshrl.u32 %v15133_v19, 16 }
 0x437   : > { %v6588_v6 = vadd.f32 %v6587_v55, %v14733_v61  ;;  %v8157_v61 = vsel %vm11853_vm5, %v11168_v37, %v8156_v21  ;;  %v7627_v55 = vor.u32 %v7626_v23, %v7623_v42  ;;  %v9570_v21 = vsel %vm11853_vm5, %v11343_v45, %v9569_v9 }
 0x438   : > { %v6967_v33 = vpop.f32.mrf.mxu0  ;;  %v7638_v42 = vrot.slane %v7637_v29, 4  ;;  %v8227_v23 = vunpack.c.l.b16 %v8157_v61  ;;  %v9573_v37 = vsel %vm11853_vm5, %v9571_v3, %v9572_v5  ;;  %v7642_v60 = vrot.slane %v7640_v53, 5  ;;  %v7365_v5 = vld [vmem:[#allocation2 + $0x90] sm:$0xf] }
 0x439   : > { %7945 = vmatmul.bf16.gmra.mxu2 %v7821_v57  ;;  %v15161_v14 = vadd.f32 %v6964_v46, %v6588_v6  ;;  %v8948_v46 = vshll.u32 %v8770_v34, 16  ;;  %v8160_v57 = vsel %vm11853_vm5, %v8158_v4, %v8159_v11  ;;  %v9646_v34 = vunpack.c.l.b16 %v9573_v37  ;;  %v15205_v37 = vld [vmem:[#allocation2 + $0xa0] sm:$0xf] }
 0x43a   : > { %v8228_v18 = vunpack.c.l.b16 %v8160_v57  ;;  %v8938_v4 = vrot.slane %v8937_v26, 4  ;;  %v9645_v45 = vunpack.c.l.b16 %v9570_v21  ;;  %v7628_v9 = vrot.slane %v7627_v55, 4  ;;  %v16066_v21 = vld [vmem:[#allocation43_spill] sm:$0xff] }
 0x43b   : > { %16060 = vst [vmem:[#allocation90_spill] sm:$0xff] %v15161_v14  ;;  %8345 = vmatmul.bf16.gmra.mxu3 %v16063_v17  ;;  %8659 = vmatmul.bf16.gmra.mxu0 %v11596_v51  ;;  %v8942_v51 = vrot.slane %v8940_v36, 5  ;;  %v8947_v61 = vrot.slane %v8945_v35, 4  ;;  %v8950_v57 = vrot.slane %v8948_v46, 5  ;;  %v7643_v3 = vsel %vm11841_vm4, %v7638_v42, %v7642_v60 }
 0x43c   : > { %v7906_v6 = vpop.f32.mrf.mxu2  ;;  %v15181_v11 = vpack.c.b16 %v8228_v18, %v8227_v23  ;;  %v15188_v36 = vpack.c.b16 %v9646_v34, %v9645_v45  ;;  %v8954_v26 = vshll.u32 %v14901_v2, 16  ;;  %v8958_v55 = vshrl.u32 %v14901_v2, 16 }
 0x43d   : > { %v15177_v14 = vadd.f32 %v7906_v6, %v7302_v7  ;;  %v9236_v35 = vpack.c.b16 %v15135_v28, %v15106_v10  ;;  %v7633_v46 = vsel %vm11841_vm4, %v7628_v9, %v15137_v22  ;;  %v8943_v19 = vsel %vm11841_vm4, %v8938_v4, %v8942_v51  ;;  %v16067_v6 = vld [vmem:[#allocation44_spill] sm:$0xff]  ;;  %v8025_v4 = vld [vmem:[#allocation2 + $0x9c] sm:$0xe] }
 0x43e   : > { %v6590_v17 = vpop.f32.mrf.mxu3  ;;  %16064 = vst [vmem:[#allocation41_spill] sm:$0xff] %v15188_v36  ;;  %v7801_v42 = vunpack.c.l.b16 %v7643_v3  ;;  %v7645_v23 = vshrl.u32 %v7365_v5, 16  ;;  %v7648_v18 = vshll.u32 %v7365_v5, 16  ;;  %v8928_v34 = vrot.slane %v8927_v20, 4 }
 0x43f   : > { %v6591_v29 = vadd.f32 %v6590_v17, %v14787_v8  ;;  %v15194_v8 = vpop.f32.mrf.mxu1  ;;  %v15207_v60 = vrot.slane %v7654_v44, 5  ;;  %v7660_v10 = vrot.slane %v7658_v31, 4  ;;  %v8951_v28 = vor.u32 %v8950_v57, %v8947_v61  ;;  %v15220_v31 = vld [vmem:[#allocation2 + $0xa4] sm:$0x1] }
 0x440   : > { %v6969_v7 = vpop.f32.mrf.mxu0  ;;  %v7800_v22 = vunpack.c.l.b16 %v7633_v46  ;;  %v15211_v45 = vrot.slane %v8954_v26, 5  ;;  %v8960_v51 = vrot.slane %v8958_v55, 4  ;;  %v15216_v3 = vunpack.c.l.b16 %v8943_v19 }
 0x441   : > { %v15190_v53 = vadd.f32 %v6967_v33, %v6591_v29  ;;  %v7303_v33 = vadd.f32 %v16067_v6, %v16066_v21  ;;  %v8933_v29 = vsel %vm11841_vm4, %v8928_v34, %v15131_v54  ;;  %v8163_v20 = vrot.slane %v15205_v37, 5  ;;  %v11597_v54 = vld [vmem:[#allocation2 + $0x54] sm:$0xff] }
 0x442   : > { %v7822_v5 = vpack.c.b16 %v7801_v42, %v7800_v22  ;;  %v7647_v57 = vrot.slane %v7645_v23, 4  ;;  %v7650_v44 = vrot.slane %v7648_v18, 5  ;;  %v7661_v55 = vor.u32 %v7660_v10, %v15207_v60  ;;  %v16069_v18 = vld [vmem:[#allocation45_spill] sm:$0xff]  ;;  %v16071_v10 = vld [vmem:[#allocation62_spill] sm:$0xff] }
 0x443   : > { %16065 = vst [vmem:[#allocation42_spill] sm:$0xff] %v15190_v53  ;;  %v11169_v46 = vrot.slane %v8025_v4, 9  ;;  %v15226_v19 = vunpack.c.l.b16 %v8933_v29  ;;  %v15228_v6 = vrot.slane %v8951_v28, 4  ;;  %v7664_v42 = vshll.u32 %v15150_v63, 16  ;;  %v15243_v4 = vld [vmem:[#allocation2 + $0xa0] sm:$0xf] }
 0x444   : > { %v7908_v2 = vpop.f32.mrf.mxu2  ;;  %v8165_v23 = vrot.slane %v8163_v20, 4  ;;  %v7651_v22 = vor.u32 %v7650_v44, %v7647_v57  ;;  %v7662_v29 = vrot.slane %v7661_v55, 4  ;;  %v15340_v53 = vld [vmem:[#allocation2 + $0xac] sm:$0xf] }
 0x445   : > { %v15209_v17 = vadd.f32 %v7908_v2, %v7303_v33  ;;  %v11625_v33 = vld [vmem:[%s15897_s2 + $0x208] sm:$0xff]  ;;  %v16070_v2 = vld [vmem:[#allocation46_spill] sm:$0xff]  ;;  %v9237_v28 = vpack.c.b16 %v15216_v3, %v15226_v19 }
 0x446   : > { %9340 = vmatmul.bf16.gmra.mxu1 %v9236_v35  ;;  %v6592_v9 = vpop.f32.mrf.mxu3  ;;  %v8964_v35 = vshll.u32 %v14932_v39, 16  ;;  %v8164_v39 = vsel %vm11853_vm5, %v11169_v46, %v8163_v20  ;;  %v7304_v34 = vadd.f32 %v16070_v2, %v16069_v18  ;;  %v8957_v20 = vsel %vm11841_vm4, %v15228_v6, %v15211_v45  ;;  %9743 = vmatpush.bf16.msra.mxu2 %v11625_v33  ;;  %v7368_v18 = vld [vmem:[#allocation2 + $0x9c] sm:$0xf] }
 0x447   : > { %v6593_v61 = vadd.f32 %v6592_v9, %v14830_v25  ;;  %v8961_v25 = vor.u32 %v8960_v51, %v15211_v45  ;;  %v8773_v51 = vld [vmem:[#allocation2 + $0x6c] sm:$0xf]  ;;  %v15245_v63 = vpop.f32.mrf.mxu1  ;;  %v8229_v57 = vunpack.c.l.b16 %v8164_v39  ;;  %v7652_v36 = vrot.slane %v7651_v22, 4 }
 0x448   : > { %v6972_v26 = vpop.f32.mrf.mxu0  ;;  %16072 = vst [vmem:[#allocation43_spill] sm:$0xff] %v15245_v63  ;;  %v8969_v2 = vshrl.u32 %v8773_v51, 16  ;;  %v8972_v55 = vshll.u32 %v8773_v51, 16  ;;  %v7678_v39 = vshll.u32 %v15205_v37, 16  ;;  %v7669_v22 = vshrl.u32 %v7368_v18, 16 }
 0x449   : > { %7950 = vmatmul.bf16.gmra.mxu2 %v7822_v5  ;;  %v15224_v21 = vadd.f32 %v6969_v7, %v6593_v61  ;;  %v8166_v7 = vrot.slane %v15220_v31, 5  ;;  %v8966_v5 = vrot.slane %v8964_v35, 5  ;;  %v8962_v3 = vrot.slane %v8961_v25, 4 }
 0x44a   : > { %v8978_v35 = vshll.u32 %v14987_v27, 16  ;;  %v7672_v51 = vshll.u32 %v7368_v18, 16  ;;  %v15283_v18 = vrot.slane %v7678_v39, 5 }
 0x44b   : > { %16068 = vst [vmem:[#allocation55_spill] sm:$0xff] %v15224_v21  ;;  %8350 = vmatmul.bf16.gmra.mxu3 %v16071_v10  ;;  %8664 = vmatmul.bf16.gmra.mxu0 %v11597_v54  ;;  %v8167_v61 = vsel %vm11853_vm5, %v8165_v23, %v8166_v7  ;;  %v7666_v54 = vrot.slane %v7664_v42, 5  ;;  %v15905_v10 = vrot.slane %v15243_v4, 5  ;;  %v7682_v42 = vshrl.u32 %v15205_v37, 16  ;;  %v15265_v7 = vld [vmem:[#allocation2 + $0xa4] sm:$0x1] }
 0x44c   : > { %v7911_v9 = vpop.f32.mrf.mxu2  ;;  %v8230_v44 = vunpack.c.l.b16 %v8167_v61  ;;  %v8982_v23 = vshrl.u32 %v14987_v27, 16  ;;  %v8974_v61 = vrot.slane %v8972_v55, 5  ;;  %v16075_v27 = vld [vmem:[#allocation48_spill] sm:$0xff]  ;;  %v15280_v21 = vld [vmem:[#allocation2 + $0xac] sm:$0xf]  ;;  %v7671_v55 = vrot.slane %v7669_v22, 4 }
 0x44d   : > { %v15253_v46 = vadd.f32 %v7911_v9, %v7304_v34  ;;  %v7667_v33 = vsel %vm11841_vm4, %v7662_v29, %v7666_v54  ;;  %v8967_v9 = vsel %vm11841_vm4, %v8962_v3, %v8966_v5  ;;  %v8971_v29 = vrot.slane %v8969_v2, 4 }
 0x44e   : > { %v6595_v19 = vpop.f32.mrf.mxu3  ;;  %v15258_v6 = vpack.c.b16 %v8230_v44, %v8229_v57  ;;  %v9578_v37 = vrot.slane %v15905_v10, 4  ;;  %v16074_v57 = vld [vmem:[#allocation47_spill] sm:$0xff]  ;;  %v7803_v54 = vunpack.c.l.b16 %v7667_v33  ;;  %v7684_v5 = vrot.slane %v7682_v42, 4 }
 0x44f   : > { %v6596_v45 = vadd.f32 %v6595_v19, %v14875_v41  ;;  %v7657_v41 = vsel %vm11841_vm4, %v7652_v36, %v15207_v60  ;;  %v7305_v44 = vadd.f32 %v16075_v27, %v16074_v57  ;;  %v15278_v19 = vrot.slane %v8978_v35, 5  ;;  %v15291_v35 = vpop.f32.mrf.mxu1 }
 0x450   : > { %v6974_v25 = vpop.f32.mrf.mxu0  ;;  %v9579_v36 = vrot.slane %v15265_v7, 5  ;;  %v8984_v3 = vrot.slane %v8982_v23, 4  ;;  %16076 = vst [vmem:[#allocation45_spill] sm:$0xff] %v15291_v35  ;;  %v8170_v27 = vrot.slane %v15280_v21, 5  ;;  %v8975_v42 = vor.u32 %v8974_v61, %v8971_v29  ;;  %v8026_v23 = vld [vmem:[#allocation2 + $0xa8] sm:$0xe] }
 0x451   : > { %v15270_v34 = vadd.f32 %v6972_v26, %v6596_v45  ;;  %v7802_v26 = vunpack.c.l.b16 %v7657_v41  ;;  %v7674_v45 = vrot.slane %v7672_v51, 5  ;;  %v15295_v41 = vunpack.c.l.b16 %v8967_v9  ;;  %v16078_v61 = vld [vmem:[#allocation49_spill] sm:$0xff] }
 0x452   : > { %v15289_v57 = vsel %vm11853_vm5, %v9578_v37, %v9579_v36  ;;  %v15297_v22 = vunpack.c.l.b16 %v8957_v20  ;;  %v7685_v51 = vor.u32 %v7684_v5, %v15283_v18  ;;  %v11598_v36 = vld [vmem:[#allocation2 + $0x60] sm:$0xff]  ;;  %v11170_v9 = vrot.slane %v8026_v23, 9 }
 0x453   : > { %16073 = vst [vmem:[#allocation44_spill] sm:$0xff] %v15270_v34  ;;  %v7823_v10 = vpack.c.b16 %v7803_v54, %v7802_v26  ;;  %v8985_v54 = vor.u32 %v8984_v3, %v15278_v19  ;;  %v15304_v26 = vld [vmem:[#allocation2 + $0xb0] sm:$0x1]  ;;  %v8172_v29 = vrot.slane %v8170_v27, 4  ;;  %v8988_v5 = vshll.u32 %v15007_v40, 16 }
 0x454   : > { %v7913_v60 = vpop.f32.mrf.mxu2  ;;  %v16080_v34 = vld [vmem:[#allocation70_spill] sm:$0xff]  ;;  %v8171_v3 = vsel %vm11853_vm5, %v11170_v9, %v8170_v27 }
 0x455   : > { %v15285_v2 = vadd.f32 %v7913_v60, %v7305_v44  ;;  %v7688_v60 = vshll.u32 %v15220_v31, 16 }
 0x456   : > { %9345 = vmatmul.bf16.gmra.mxu1 %v9237_v28  ;;  %v6597_v33 = vpop.f32.mrf.mxu3  ;;  %v7675_v28 = vor.u32 %v7674_v45, %v7671_v55  ;;  %v7686_v55 = vrot.slane %v7685_v51, 4  ;;  %v8173_v45 = vrot.slane %v15304_v26, 5 }
 0x457   : > { %v6598_v39 = vadd.f32 %v6597_v33, %v14906_v58  ;;  %v9444_v58 = vld [vmem:[#allocation2 + $0x9c] sm:$0xe]  ;;  %v16079_v33 = vld [vmem:[#allocation50_spill] sm:$0xff]  ;;  %v15327_v9 = vpop.f32.mrf.mxu1 }
 0x458   : > { %v6977_v44 = vpop.f32.mrf.mxu0  ;;  %v7306_v20 = vadd.f32 %v16079_v33, %v16078_v61  ;;  %v7676_v61 = vrot.slane %v7675_v28, 4  ;;  %v7690_v33 = vrot.slane %v7688_v60, 5  ;;  %v8174_v40 = vsel %vm11853_vm5, %v8172_v29, %v8173_v45  ;;  %16082 = vst [vmem:[#allocation62_spill] sm:$0xff] %v15327_v9 }
 0x459   : > { %7955 = vmatmul.bf16.gmra.mxu2 %v7823_v10  ;;  %v15300_v37 = vadd.f32 %v6974_v25, %v6598_v39  ;;  %v9238_v10 = vpack.c.b16 %v15295_v41, %v15297_v22  ;;  %v8976_v25 = vrot.slane %v8975_v42, 4  ;;  %v11344_v39 = vrot.slane %v9444_v58, 9  ;;  %v8776_v58 = vld [vmem:[#allocation2 + $0x78] sm:$0xf] }
 0x45a   : > { %v7702_v41 = vshll.u32 %v15280_v21, 16  ;;  %v7706_v42 = vshrl.u32 %v15280_v21, 16  ;;  %v16081_v22 = vrot.slane %v15243_v4, 5  ;;  %v8231_v28 = vunpack.c.l.b16 %v8171_v3 }
 0x45b   : > { %16077 = vst [vmem:[#allocation46_spill] sm:$0xff] %v15300_v37  ;;  %8355 = vmatmul.bf16.gmra.mxu3 %v16080_v34  ;;  %8669 = vmatmul.bf16.gmra.mxu0 %v11598_v36  ;;  %v8986_v34 = vrot.slane %v8985_v54, 4  ;;  %v7371_v36 = vld [vmem:[#allocation2 + $0xa8] sm:$0xf]  ;;  %v8232_v60 = vunpack.c.l.b16 %v8174_v40  ;;  %v9648_v54 = vunpack.c.l.b16 %v15289_v57  ;;  %v7681_v21 = vsel %vm11841_vm4, %v7676_v61, %v15283_v18  ;;  %v16084_v18 = vld [vmem:[#allocation52_spill] sm:$0xff] }
 0x45c   : > { %v7916_v31 = vpop.f32.mrf.mxu2  ;;  %v9577_v27 = vsel %vm11853_vm5, %v11344_v39, %v16081_v22  ;;  %v7691_v29 = vsel %vm11841_vm4, %v7686_v55, %v7690_v33  ;;  %v7693_v45 = vshrl.u32 %v7371_v36, 16  ;;  %v15338_v40 = vrot.slane %v7702_v41, 5  ;;  %v16085_v61 = vld [vmem:[#allocation53_spill] sm:$0xff] }
 0x45d   : > { %v15315_v23 = vadd.f32 %v7916_v31, %v7306_v20  ;;  %v8990_v31 = vrot.slane %v8988_v5, 5  ;;  %v9647_v3 = vunpack.c.l.b16 %v9577_v27  ;;  %v7708_v57 = vrot.slane %v7706_v42, 4 }
 0x45e   : > { %v6600_v37 = vpop.f32.mrf.mxu3  ;;  %v8993_v22 = vshrl.u32 %v8776_v58, 16  ;;  %v8996_v9 = vshll.u32 %v8776_v58, 16  ;;  %v7307_v35 = vadd.f32 %v16085_v61, %v16084_v18  ;;  %v7805_v55 = vunpack.c.l.b16 %v7691_v29 }
 0x45f   : > { %v6601_v51 = vadd.f32 %v6600_v37, %v14951_v32  ;;  %v7696_v32 = vshll.u32 %v7371_v36, 16  ;;  %v15336_v37 = vpack.c.b16 %v8232_v60, %v8231_v28  ;;  %v8991_v5 = vsel %vm11841_vm4, %v8986_v34, %v8990_v31 }
 0x460   : > { %v6979_v20 = vpop.f32.mrf.mxu0  ;;  %v7804_v36 = vunpack.c.l.b16 %v7681_v21  ;;  %v8981_v41 = vsel %vm11841_vm4, %v8976_v25, %v15278_v19  ;;  %v9002_v42 = vshll.u32 %v15026_v1, 16  ;;  %v9006_v27 = vshrl.u32 %v15026_v1, 16  ;;  %v8027_v1 = vld [vmem:[#allocation2 + $0xb4] sm:$0xe] }
 0x461   : > { %v15334_v39 = vadd.f32 %v6977_v44, %v6601_v51  ;;  %v15346_v44 = vpack.c.b16 %v9648_v54, %v9647_v3  ;;  %v15353_v51 = vld [vmem:[#allocation2 + $0xb8] sm:$0xf]  ;;  %v7695_v28 = vrot.slane %v7693_v45, 4  ;;  %v7698_v60 = vrot.slane %v7696_v32, 5 }
 0x462   : > { %v9583_v34 = vrot.slane %v15340_v53, 5  ;;  %v15358_v29 = vunpack.c.l.b16 %v8991_v5  ;;  %v7709_v21 = vor.u32 %v7708_v57, %v15338_v40  ;;  %v8995_v31 = vrot.slane %v8993_v22, 4  ;;  %v15368_v5 = vld [vmem:[#allocation2 + $0xb0] sm:$0x1] }
 0x463   : > { %16083 = vst [vmem:[#allocation47_spill] sm:$0xff] %v15334_v39  ;;  %v8998_v19 = vrot.slane %v8996_v9, 5  ;;  %v7824_v25 = vpack.c.b16 %v7805_v55, %v7804_v36  ;;  %v8177_v18 = vrot.slane %v15353_v51, 5  ;;  %v15363_v61 = vunpack.c.l.b16 %v8981_v41  ;;  %v11599_v9 = vld [vmem:[#allocation2 + $0x6c] sm:$0xff]  ;;  %v15372_v55 = vld [vmem:[#allocation2 + $0xbc] sm:$0x1]  ;;  %v15377_v36 = vpop.f32.mrf.mxu1 }
 0x464   : > { %16086 = vst [vmem:[#allocation48_spill] sm:$0xff] %v15346_v44  ;;  %v7918_v33 = vpop.f32.mrf.mxu2  ;;  %v7712_v45 = vshll.u32 %v15304_v26, 16  ;;  %v15366_v32 = vrot.slane %v9002_v42, 5  ;;  %v7699_v22 = vor.u32 %v7698_v60, %v7695_v28  ;;  %v7710_v41 = vrot.slane %v7709_v21, 4  ;;  %v16091_v28 = vld [vmem:[#allocation74_spill] sm:$0xff] }
 0x465   : > { %v15355_v58 = vadd.f32 %v7918_v33, %v7307_v35  ;;  %v9585_v33 = vrot.slane %v9583_v34, 4  ;;  %16088 = vst [vmem:[#allocation50_spill] sm:$0xff] %v15377_v36  ;;  %v8999_v42 = vor.u32 %v8998_v19, %v8995_v31  ;;  %v9012_v60 = vshll.u32 %v15048_v50, 16  ;;  %v7374_v44 = vld [vmem:[#allocation2 + $0xb4] sm:$0xf] }
 0x466   : > { %9350 = vmatmul.bf16.gmra.mxu1 %v9238_v10  ;;  %v6602_v54 = vpop.f32.mrf.mxu3  ;;  %v9008_v10 = vrot.slane %v9006_v27, 4  ;;  %v11171_v27 = vrot.slane %v8027_v1, 9  ;;  %v9586_v39 = vrot.slane %v15368_v5, 5  ;;  %v7714_v63 = vrot.slane %v7712_v45, 5  ;;  %v16141_v47 = vld [vmem:[#allocation46_spill] sm:$0xff] }
 0x467   : > { %v6603_v3 = vadd.f32 %v6602_v54, %v14989_v52  ;;  %v11624_v52 = vld [vmem:[%s15897_s2 + $0x200] sm:$0xff]  ;;  %v9445_v54 = vld [vmem:[#allocation2 + $0xa8] sm:$0xe]  ;;  %v8180_v31 = vrot.slane %v15372_v55, 5  ;;  %v7700_v1 = vrot.slane %v7699_v22, 4  ;;  %v7717_v45 = vshrl.u32 %v7374_v44, 16 }
 0x468   : > { %v6982_v35 = vpop.f32.mrf.mxu0  ;;  %v9009_v26 = vor.u32 %v9008_v10, %v15366_v32  ;;  %9744 = vmatpush.bf16.msra.mxu2 %v11624_v52  ;;  %v8178_v21 = vsel %vm11853_vm5, %v11171_v27, %v8177_v18  ;;  %v9587_v50 = vsel %vm11853_vm5, %v9585_v33, %v9586_v39  ;;  %v15399_v52 = vld [vmem:[#allocation2 + $0xb8] sm:$0xf]  ;;  %v15406_v33 = vrot.slane %v8999_v42, 4 }
 0x469   : > { %7960 = vmatmul.bf16.gmra.mxu2 %v7824_v25  ;;  %v15370_v57 = vadd.f32 %v6979_v20, %v6603_v3  ;;  %v16089_v20 = vld [vmem:[#allocation56_spill] sm:$0xff]  ;;  %v16090_v25 = vld [vmem:[#allocation57_spill] sm:$0xff]  ;;  %v7705_v39 = vsel %vm11841_vm4, %v7700_v1, %v15338_v40  ;;  %v9650_v40 = vunpack.c.l.b16 %v9587_v50  ;;  %v9446_v1 = vld [vmem:[#allocation2 + $0xb4] sm:$0xe]  ;;  %v9590_v42 = vrot.slane %v15399_v52, 5 }
 0x46a   : > { %v7308_v3 = vadd.f32 %v16090_v25, %v16089_v20  ;;  %v7715_v20 = vsel %vm11841_vm4, %v7710_v41, %v7714_v63 }
 0x46b   : > { %16087 = vst [vmem:[#allocation49_spill] sm:$0xff] %v15370_v57  ;;  %8360 = vmatmul.bf16.gmra.mxu3 %v16091_v28  ;;  %8674 = vmatmul.bf16.gmra.mxu0 %v11599_v9  ;;  %v8179_v57 = vrot.slane %v8177_v18, 4  ;;  %v11345_v9 = vrot.slane %v9445_v54, 9  ;;  %v7720_v28 = vshll.u32 %v7374_v44, 16  ;;  %v7726_v44 = vshll.u32 %v15353_v51, 16 }
 0x46c   : > { %v7921_v36 = vpop.f32.mrf.mxu2  ;;  %v15414_v54 = vrot.slane %v9012_v60, 5  ;;  %v15427_v60 = vld [vmem:[#allocation2 + $0xc4] sm:$0xf] }
 0x46d   : > { %v15390_v19 = vadd.f32 %v7921_v36, %v7308_v3  ;;  %v8181_v10 = vsel %vm11853_vm5, %v8179_v57, %v8180_v31  ;;  %v8233_v36 = vunpack.c.l.b16 %v8178_v21  ;;  %v9584_v22 = vsel %vm11853_vm5, %v11345_v9, %v9583_v34  ;;  %v15418_v21 = vld [vmem:[#allocation2 + $0xbc] sm:$0x1] }
 0x46e   : > { %v6605_v25 = vpop.f32.mrf.mxu3  ;;  %v8234_v27 = vunpack.c.l.b16 %v8181_v10  ;;  %v7730_v57 = vshrl.u32 %v15353_v51, 16  ;;  %v7807_v34 = vunpack.c.l.b16 %v7715_v20  ;;  %v9649_v31 = vunpack.c.l.b16 %v9584_v22  ;;  %v16094_v9 = vld [vmem:[#allocation59_spill] sm:$0xff] }
 0x46f   : > { %16092 = vst [vmem:[#allocation70_spill] sm:$0xff] %v15390_v19  ;;  %v6606_v18 = vadd.f32 %v6605_v25, %v15024_v15  ;;  %v15412_v15 = vrot.slane %v9009_v26, 4  ;;  %v16095_v25 = vld [vmem:[#allocation60_spill] sm:$0xff]  ;;  %v7806_v51 = vunpack.c.l.b16 %v7705_v39  ;;  %v15425_v26 = vrot.slane %v7720_v28, 5 }
 0x470   : > { %v6984_v63 = vpop.f32.mrf.mxu0  ;;  %v15416_v3 = vpack.c.b16 %v8234_v27, %v8233_v36  ;;  %v7309_v10 = vadd.f32 %v16095_v25, %v16094_v9  ;;  %v15429_v36 = vpop.f32.mrf.mxu1  ;;  %v15431_v27 = vrot.slane %v7726_v44, 5  ;;  %v7732_v50 = vrot.slane %v7730_v57, 4  ;;  %v15441_v28 = vld [vmem:[#allocation2 + $0xc4] sm:$0xf]  ;;  %v9447_v25 = vld [vmem:[#allocation2 + $0xc0] sm:$0xe] }
 0x471   : > { %v15410_v41 = vadd.f32 %v6982_v35, %v6606_v18  ;;  %v15423_v35 = vrot.slane %v7717_v45, 4  ;;  %v8028_v18 = vld [vmem:[#allocation2 + $0xc0] sm:$0xe]  ;;  %16096 = vst [vmem:[#allocation53_spill] sm:$0xff] %v15429_v36  ;;  %v15433_v22 = vpack.c.b16 %v9650_v40, %v9649_v31  ;;  %v9592_v19 = vrot.slane %v9590_v42, 4 }
 0x472   : > { %v9015_v45 = vsel %vm11841_vm4, %v15412_v15, %v15414_v54  ;;  %v11346_v39 = vrot.slane %v9446_v1, 9  ;;  %v9593_v9 = vrot.slane %v15418_v21, 5  ;;  %v16099_v44 = vpack.c.b16 %v15358_v29, %v15363_v61  ;;  %v16102_v36 = vld [vmem:[#allocation64_spill] sm:$0xff] }
 0x473   : > { %16093 = vst [vmem:[#allocation52_spill] sm:$0xff] %v15410_v41  ;;  %v7825_v57 = vpack.c.b16 %v7807_v34, %v7806_v51  ;;  %v9026_v40 = vshll.u32 %v15076_v59, 16  ;;  %v9597_v29 = vrot.slane %v15441_v28, 5  ;;  %v7723_v34 = vor.u32 %v15425_v26, %v15423_v35 }
 0x474   : > { %v7923_v20 = vpop.f32.mrf.mxu2  ;;  %16097 = vst [vmem:[#allocation56_spill] sm:$0xff] %v15433_v22  ;;  %v9591_v54 = vsel %vm11853_vm5, %v11346_v39, %v9590_v42  ;;  %v9594_v1 = vsel %vm11853_vm5, %v9592_v19, %v9593_v9  ;;  %v7733_v51 = vor.u32 %v7732_v50, %v15431_v27  ;;  %v11347_v22 = vrot.slane %v9447_v25, 9  ;;  %v11600_v42 = vld [vmem:[#allocation2 + $0x78] sm:$0xff] }
 0x475   : > { %v15435_v41 = vadd.f32 %v7923_v20, %v7309_v10  ;;  %v15448_v10 = vld [vmem:[#allocation2 + $0xc8] sm:$0x1]  ;;  %v11172_v20 = vrot.slane %v8028_v18, 9  ;;  %v9030_v18 = vshrl.u32 %v15076_v59, 16  ;;  %v7736_v26 = vshll.u32 %v15372_v55, 16 }
 0x476   : > { %9355 = vmatmul.bf16.gmra.mxu1 %v16099_v44  ;;  %v6607_v31 = vpop.f32.mrf.mxu3  ;;  %v15461_v44 = vld [vmem:[#allocation2 + $0xc8] sm:$0x1]  ;;  %v8187_v9 = vrot.slane %v15448_v10, 5  ;;  %v9651_v50 = vunpack.c.l.b16 %v9591_v54  ;;  %v9652_v59 = vunpack.c.l.b16 %v9594_v1  ;;  %v9598_v25 = vsel %vm11853_vm5, %v11347_v22, %v9597_v29 }
 0x477   : > { %16098 = vst [vmem:[#allocation57_spill] sm:$0xff] %v15435_v41  ;;  %v8184_v41 = vrot.slane %v15427_v60, 5  ;;  %v6608_v15 = vadd.f32 %v6607_v31, %v15057_v16  ;;  %v16101_v31 = vld [vmem:[#allocation63_spill] sm:$0xff]  ;;  %v9217_v54 = vunpack.c.l.b16 %v9015_v45  ;;  %v7750_v45 = vshll.u32 %v15427_v60, 16 }
 0x478   : > { %v8640_v61 = vpop.f32.mrf.mxu0  ;;  %v7310_v35 = vadd.f32 %v16102_v36, %v16101_v31  ;;  %v15477_v31 = vpack.c.b16 %v9652_v59, %v9651_v50  ;;  %v15487_v1 = vpop.f32.mrf.mxu1  ;;  %v15492_v59 = vrot.slane %v9026_v40, 5  ;;  %v16104_v40 = vld [vmem:[#allocation66_spill] sm:$0xff] }
 0x479   : > { %7965 = vmatmul.bf16.gmra.mxu2 %v7825_v57  ;;  %v15463_v16 = vadd.f32 %v6984_v63, %v6608_v15  ;;  %v8185_v19 = vsel %vm11853_vm5, %v11172_v20, %v8184_v41  ;;  %v8186_v39 = vrot.slane %v8184_v41, 4  ;;  %v9599_v57 = vrot.slane %v9597_v29, 4 }
 0x47a   : > { %v9600_v41 = vrot.slane %v15461_v44, 5  ;;  %v7734_v15 = vrot.slane %v7733_v51, 4  ;;  %v7738_v29 = vrot.slane %v7736_v26, 5  ;;  %v8779_v51 = vld [vmem:[#allocation2 + $0x84] sm:$0xf]  ;;  %v7754_v26 = vshrl.u32 %v15427_v60, 16 }
 0x47b   : > { %16100 = vst [vmem:[#allocation74_spill] sm:$0xff] %v15463_v16  ;;  %8365 = vmatmul.bf16.gmra.mxu3 %v14892_v49  ;;  %8679 = vmatmul.bf16.gmra.mxu0 %v11600_v42  ;;  %v8188_v63 = vsel %vm11853_vm5, %v8186_v39, %v8187_v9  ;;  %v8235_v16 = vunpack.c.l.b16 %v8185_v19  ;;  %v9005_v49 = vsel %vm11841_vm4, %v15406_v33, %v15366_v32  ;;  %v9653_v39 = vunpack.c.l.b16 %v9598_v25 }
 0x47c   : > { %v7926_v20 = vpop.f32.mrf.mxu2  ;;  %v8236_v36 = vunpack.c.l.b16 %v8188_v63  ;;  %v9601_v22 = vsel %vm11853_vm5, %v9599_v57, %v9600_v41  ;;  %v9032_v63 = vrot.slane %v9030_v18, 4  ;;  %v7739_v32 = vsel %vm11841_vm4, %v7734_v15, %v7738_v29  ;;  %v16105_v18 = vld [vmem:[#allocation68_spill] sm:$0xff] }
 0x47d   : > { %v15479_v55 = vadd.f32 %v7926_v20, %v7310_v35  ;;  %v9654_v9 = vunpack.c.l.b16 %v9601_v22  ;;  %v7724_v35 = vrot.slane %v7723_v34, 4  ;;  %v9017_v25 = vshrl.u32 %v8779_v51, 16  ;;  %v7377_v20 = vld [vmem:[#allocation2 + $0xc0] sm:$0xf] }
 0x47e   : > { %v8326_v42 = vpop.f32.mrf.mxu3  ;;  %v15489_v19 = vpack.c.b16 %v8236_v36, %v8235_v16  ;;  %v9216_v16 = vunpack.c.l.b16 %v9005_v49  ;;  %v9020_v34 = vshll.u32 %v8779_v51, 16  ;;  %v7311_v15 = vadd.f32 %v16105_v18, %v16104_v40 }
 0x47f   : > { %v8406_v50 = vadd.f32 %v8326_v42, %v15104_v13  ;;  %v15498_v57 = vpack.c.b16 %v9654_v9, %v9653_v39  ;;  %v7729_v13 = vsel %vm11841_vm4, %v7724_v35, %v15431_v27  ;;  %v7809_v22 = vunpack.c.l.b16 %v7739_v32 }
 0x480   : > { %v8642_v33 = vpop.f32.mrf.mxu0  ;;  %v9240_v36 = vpack.c.b16 %v9217_v54, %v9216_v16  ;;  %v9033_v29 = vor.u32 %v9032_v63, %v15492_v59  ;;  %v7741_v42 = vshrl.u32 %v7377_v20, 16  ;;  %v7744_v39 = vshll.u32 %v7377_v20, 16  ;;  %v15512_v32 = vpop.f32.mrf.mxu1 }
 0x481   : > { %16103 = vst [vmem:[#allocation59_spill] sm:$0xff] %v15498_v57  ;;  %v15500_v41 = vadd.f32 %v8640_v61, %v8406_v50  ;;  %v7752_v49 = vrot.slane %v7750_v45, 5  ;;  %v7756_v61 = vrot.slane %v7754_v26, 4  ;;  %v7808_v51 = vunpack.c.l.b16 %v7729_v13  ;;  %v11601_v13 = vld [vmem:[#allocation2 + $0x84] sm:$0xff] }
 0x482   : > { %v9019_v50 = vrot.slane %v9017_v25, 4  ;;  %v9022_v56 = vrot.slane %v9020_v34, 5  ;;  %v9036_v27 = vshll.u32 %v15100_v48, 16  ;;  %v9034_v16 = vrot.slane %v9033_v29, 4  ;;  %v16107_v48 = vld [vmem:[#allocation71_spill] sm:$0xff] }
 0x483   : > { %v7826_v35 = vpack.c.b16 %v7809_v22, %v7808_v51  ;;  %v7743_v40 = vrot.slane %v7741_v42, 4  ;;  %v7746_v20 = vrot.slane %v7744_v39, 5  ;;  %v7757_v45 = vor.u32 %v7756_v61, %v7752_v49  ;;  %v8782_v42 = vld [vmem:[#allocation2 + $0x90] sm:$0xf] }
 0x484   : > { %v7928_v60 = vpop.f32.mrf.mxu2  ;;  %v9023_v25 = vor.u32 %v9022_v56, %v9019_v50  ;;  %v9038_v34 = vrot.slane %v9036_v27, 5  ;;  %v7760_v18 = vshll.u32 %v15448_v10, 16  ;;  %v9050_v56 = vshll.u32 %v15139_v62, 16 }
 0x485   : > { %v15508_v9 = vadd.f32 %v7928_v60, %v7311_v15  ;;  %v16106_v15 = vld [vmem:[#allocation69_spill] sm:$0xff]  ;;  %v7747_v22 = vor.u32 %v7746_v20, %v7743_v40  ;;  %v7758_v29 = vrot.slane %v7757_v45, 4  ;;  %v9054_v10 = vshrl.u32 %v15139_v62, 16 }
 0x486   : > { %9360 = vmatmul.bf16.gmra.mxu1 %v9240_v36  ;;  %v8328_v57 = vpop.f32.mrf.mxu3  ;;  %v7312_v36 = vadd.f32 %v16107_v48, %v16106_v15  ;;  %v7762_v39 = vrot.slane %v7760_v18, 5  ;;  %v9044_v40 = vshll.u32 %v8782_v42, 16  ;;  %v9052_v45 = vrot.slane %v9050_v56, 5  ;;  %v16109_v18 = vld [vmem:[#allocation75_spill] sm:$0xff] }
 0x487   : > { %v8407_v54 = vadd.f32 %v8328_v57, %v15143_v30  ;;  %v9039_v57 = vsel %vm11841_vm4, %v9034_v16, %v9038_v34  ;;  %v7748_v27 = vrot.slane %v7747_v22, 4  ;;  %v9041_v16 = vshrl.u32 %v8782_v42, 16  ;;  %v16108_v34 = vld [vmem:[#allocation72_spill] sm:$0xff] }
 0x488   : > { %v8645_v63 = vpop.f32.mrf.mxu0  ;;  %v9219_v51 = vunpack.c.l.b16 %v9039_v57  ;;  %v9056_v62 = vrot.slane %v9054_v10, 4  ;;  %v9046_v57 = vrot.slane %v9044_v40, 5  ;;  %v9060_v10 = vshll.u32 %v15154_v12, 16 }
 0x489   : > { %7970 = vmatmul.bf16.gmra.mxu2 %v7826_v35  ;;  %v15514_v26 = vadd.f32 %v8642_v33, %v8407_v54  ;;  %v9024_v33 = vrot.slane %v9023_v25, 4  ;;  %v7763_v35 = vsel %vm11841_vm4, %v7758_v29, %v7762_v39 }
 0x48a   : > { %v7811_v15 = vunpack.c.l.b16 %v7763_v35  ;;  %v9057_v29 = vor.u32 %v9056_v62, %v9052_v45 }
 0x48b   : > { %8370 = vmatmul.bf16.gmra.mxu3 %v14980_v38  ;;  %8684 = vmatmul.bf16.gmra.mxu0 %v11601_v13  ;;  %v9029_v38 = vsel %vm11841_vm4, %v9024_v33, %v15492_v59  ;;  %v15534_v13 = vpop.f32.mrf.mxu1  ;;  %v7753_v59 = vsel %vm11841_vm4, %v7748_v27, %v7752_v49  ;;  %v16111_v27 = vld [vmem:[#allocation77_spill] sm:$0xff] }
 0x48c   : > { %v7931_v30 = vpop.f32.mrf.mxu2  ;;  %v9218_v25 = vunpack.c.l.b16 %v9029_v38  ;;  %v9058_v38 = vrot.slane %v9057_v29, 4 }
 0x48d   : > { %v15522_v60 = vadd.f32 %v7931_v30, %v7312_v36  ;;  %v9043_v30 = vrot.slane %v9041_v16, 4  ;;  %v9062_v16 = vrot.slane %v9060_v10, 5 }
 0x48e   : > { %v8331_v61 = vpop.f32.mrf.mxu3  ;;  %v9241_v36 = vpack.c.b16 %v9219_v51, %v9218_v25 }
 0x48f   : > { %v8408_v50 = vadd.f32 %v8331_v61, %v15177_v14  ;;  %v7313_v14 = vadd.f32 %v16109_v18, %v16108_v34  ;;  %v9047_v49 = vor.u32 %v9046_v57, %v9043_v30  ;;  %v11602_v61 = vld [vmem:[#allocation2 + $0x90] sm:$0xff]  ;;  %v9063_v12 = vsel %vm11841_vm4, %v9058_v38, %v9062_v16 }
 0x490   : > { %v8647_v54 = vpop.f32.mrf.mxu0  ;;  %v9078_v34 = vshrl.u32 %v15243_v4, 16  ;;  %v16113_v16 = vld [vmem:[#allocation54_spill] sm:$0xff] }
 0x491   : > { %v15532_v20 = vadd.f32 %v8645_v63, %v8408_v50  ;;  %v7810_v63 = vunpack.c.l.b16 %v7753_v59  ;;  %v16110_v50 = vld [vmem:[#allocation73_spill] sm:$0xff]  ;;  %v9074_v59 = vshll.u32 %v15243_v4, 16 }
 0x492   : > { %v7314_v35 = vadd.f32 %v16111_v27, %v16110_v50  ;;  %v9084_v27 = vshll.u32 %v15265_v7, 16 }
 0x493   : > { %v7827_v42 = vpack.c.b16 %v7811_v15, %v7810_v63  ;;  %v15549_v40 = vpop.f32.mrf.mxu1  ;;  %v9221_v15 = vunpack.c.l.b16 %v9063_v12  ;;  %v9076_v57 = vrot.slane %v9074_v59, 5  ;;  %v9080_v63 = vrot.slane %v9078_v34, 4  ;;  %v16114_v12 = vld [vmem:[#allocation81_spill] sm:$0xff] }
 0x494   : > { %v7933_v48 = vpop.f32.mrf.mxu2  ;;  %v9086_v59 = vrot.slane %v9084_v27, 5 }
 0x495   : > { %v15540_v22 = vadd.f32 %v7933_v48, %v7313_v14 }
 0x496   : > { %9365 = vmatmul.bf16.gmra.mxu1 %v9241_v36  ;;  %v8333_v33 = vpop.f32.mrf.mxu3 }
 0x497   : > { %v8409_v56 = vadd.f32 %v8333_v33, %v15209_v17  ;;  %v9048_v17 = vrot.slane %v9047_v49, 4  ;;  %v16112_v33 = vld [vmem:[#allocation76_spill] sm:$0xff] }
 0x498   : > { %v8650_v51 = vpop.f32.mrf.mxu0 }
 0x499   : > { %7975 = vmatmul.bf16.gmra.mxu2 %v7827_v42  ;;  %v15544_v39 = vadd.f32 %v8647_v54, %v8409_v56  ;;  %v8785_v54 = vld [vmem:[#allocation2 + $0x9c] sm:$0xf]  ;;  %v7315_v42 = vadd.f32 %v14922_v24, %v16112_v33 }
 0x49a   : > { %v9065_v48 = vshrl.u32 %v8785_v54, 16  ;;  %v9068_v36 = vshll.u32 %v8785_v54, 16  ;;  %v7316_v54 = vadd.f32 %v16114_v12, %v14894_v0 }
 0x49b   : > { %8375 = vmatmul.bf16.gmra.mxu3 %v15050_v43  ;;  %8689 = vmatmul.bf16.gmra.mxu0 %v11602_v61  ;;  %v9053_v43 = vsel %vm11841_vm4, %v9048_v17, %v9052_v45  ;;  %v9081_v45 = vor.u32 %v9080_v63, %v9076_v57 }
 0x49c   : > { %v7936_v62 = vpop.f32.mrf.mxu2  ;;  %v9220_v29 = vunpack.c.l.b16 %v9053_v43  ;;  %v9067_v49 = vrot.slane %v9065_v48, 4  ;;  %v9070_v61 = vrot.slane %v9068_v36, 5 }
 0x49d   : > { %v15551_v25 = vadd.f32 %v7936_v62, %v7314_v35  ;;  %v11603_v62 = vld [vmem:[#allocation2 + $0x9c] sm:$0xff]  ;;  %v9082_v17 = vrot.slane %v9081_v45, 4  ;;  %v16116_v45 = vld [vmem:[#allocation85_spill] sm:$0xff] }
 0x49e   : > { %v8336_v18 = vpop.f32.mrf.mxu3  ;;  %v9242_v10 = vpack.c.b16 %v9221_v15, %v9220_v29  ;;  %v9071_v35 = vor.u32 %v9070_v61, %v9067_v49  ;;  %v9102_v15 = vshrl.u32 %v15340_v53, 16  ;;  %v16115_v61 = vld [vmem:[#allocation80_spill] sm:$0xff] }
 0x49f   : > { %v8410_v14 = vadd.f32 %v8336_v18, %v15253_v46  ;;  %v15566_v46 = vpop.f32.mrf.mxu1  ;;  %v9087_v7 = vsel %vm11841_vm4, %v9082_v17, %v9086_v59  ;;  %v9108_v17 = vshll.u32 %v15368_v5, 16  ;;  %v16117_v59 = vld [vmem:[#allocation58_spill] sm:$0xff] }
 0x4a0   : > { %v8652_v4 = vpop.f32.mrf.mxu0  ;;  %v9072_v18 = vrot.slane %v9071_v35, 4  ;;  %v9223_v29 = vunpack.c.l.b16 %v9087_v7 }
 0x4a1   : > { %v15560_v30 = vadd.f32 %v8650_v51, %v8410_v14  ;;  %v9098_v14 = vshll.u32 %v15340_v53, 16  ;;  %v7317_v53 = vadd.f32 %v16116_v45, %v16115_v61 }
 0x4a2   : > { %v9077_v0 = vsel %vm11841_vm4, %v9072_v18, %v9076_v57  ;;  %v11604_v18 = vld [vmem:[#allocation2 + $0xa8] sm:$0xff] }
 0x4a3   : > { %v9222_v49 = vunpack.c.l.b16 %v9077_v0 }
 0x4a4   : > { %v7938_v56 = vpop.f32.mrf.mxu2 }
 0x4a5   : > { %v15564_v38 = vadd.f32 %v7938_v56, %v7315_v42 }
 0x4a6   : > { %9370 = vmatmul.bf16.gmra.mxu1 %v9242_v10  ;;  %v8338_v50 = vpop.f32.mrf.mxu3  ;;  %v9100_v10 = vrot.slane %v9098_v14, 5  ;;  %v16118_v14 = vld [vmem:[#allocation82_spill] sm:$0xff] }
 0x4a7   : > { %v8411_v51 = vadd.f32 %v8338_v50, %v15285_v2  ;;  %v8788_v2 = vld [vmem:[#allocation2 + $0xa8] sm:$0xf]  ;;  %v15585_v63 = vpop.f32.mrf.mxu1 }
 0x4a8   : > { %v8655_v48 = vpop.f32.mrf.mxu0  ;;  %v9089_v33 = vshrl.u32 %v8788_v2, 16  ;;  %v9092_v42 = vshll.u32 %v8788_v2, 16 }
 0x4a9   : > { %9745 = vmatmul.bf16.vlgmr.msra.gmra.mxu2 %v16113_v16  ;;  %v15571_v24 = vadd.f32 %v8652_v4, %v8411_v51  ;;  %v9104_v4 = vrot.slane %v9102_v15, 4  ;;  %v9243_v51 = vpack.c.b16 %v9223_v29, %v9222_v49  ;;  %v16119_v15 = vld [vmem:[#allocation87_spill] sm:$0xff]  ;;  %v8791_v29 = vld [vmem:[#allocation2 + $0xb4] sm:$0xf] }
 0x4aa   : > { %v9091_v27 = vrot.slane %v9089_v33, 4  ;;  %v9094_v35 = vrot.slane %v9092_v42, 5  ;;  %v9122_v33 = vshll.u32 %v15399_v52, 16  ;;  %v9126_v42 = vshrl.u32 %v15399_v52, 16 }
 0x4ab   : > { %8380 = vmatmul.bf16.gmra.mxu3 %v15181_v11  ;;  %8694 = vmatmul.bf16.gmra.mxu0 %v11603_v62  ;;  %v9113_v61 = vshrl.u32 %v8791_v29, 16 }
 0x4ac   : > { %v7941_v34 = vpop.f32.mrf.mxu2  ;;  %v9124_v45 = vrot.slane %v9122_v33, 5 }
 0x4ad   : > { %v15576_v43 = vadd.f32 %v7941_v34, %v7316_v54  ;;  %v9095_v54 = vor.u32 %v9094_v35, %v9091_v27  ;;  %v16121_v27 = vld [vmem:[#allocation51_spill] sm:$0xff] }
 0x4ae   : > { %v8341_v36 = vpop.f32.mrf.mxu3 }
 0x4af   : > { %v8412_v11 = vadd.f32 %v8341_v36, %v15315_v23  ;;  %v9105_v23 = vor.u32 %v9104_v4, %v9100_v10  ;;  %v15598_v2 = vpop.f32.mrf.mxu1  ;;  %v9110_v36 = vrot.slane %v9108_v17, 5  ;;  %v9096_v0 = vrot.slane %v9095_v54, 4 }
 0x4b0   : > { %v8657_v12 = vpop.f32.mrf.mxu0  ;;  %v9115_v17 = vrot.slane %v9113_v61, 4 }
 0x4b1   : > { %v15587_v56 = vadd.f32 %v8655_v48, %v8412_v11  ;;  %v9106_v7 = vrot.slane %v9105_v23, 4  ;;  %v7318_v48 = vadd.f32 %v16119_v15, %v16118_v14  ;;  %v9101_v4 = vsel %vm11841_vm4, %v9096_v0, %v9100_v10  ;;  %v16123_v15 = vld [vmem:[#allocation86_spill] sm:$0xff] }
 0x4b2   : > { %v9132_v10 = vshll.u32 %v15418_v21, 16  ;;  %v8794_v21 = vld [vmem:[#allocation2 + $0xc0] sm:$0xf] }
 0x4b3   : > { %v9111_v11 = vsel %vm11841_vm4, %v9106_v7, %v9110_v36  ;;  %v11605_v7 = vld [vmem:[#allocation2 + $0xb4] sm:$0xff] }
 0x4b4   : > { %v7943_v50 = vpop.f32.mrf.mxu2  ;;  %v9225_v49 = vunpack.c.l.b16 %v9111_v11 }
 0x4b5   : > { %v15591_v57 = vadd.f32 %v7943_v50, %v7317_v53  ;;  %v9128_v53 = vrot.slane %v9126_v42, 4  ;;  %v9224_v50 = vunpack.c.l.b16 %v9101_v4  ;;  %v9146_v42 = vshll.u32 %v15441_v28, 16 }
 0x4b6   : > { %9375 = vmatmul.bf16.gmra.mxu1 %v9243_v51  ;;  %v8343_v16 = vpop.f32.mrf.mxu3  ;;  %v16120_v51 = vld [vmem:[#allocation84_spill] sm:$0xff]  ;;  %v9150_v4 = vshrl.u32 %v15441_v28, 16 }
 0x4b7   : > { %v8413_v62 = vadd.f32 %v8343_v16, %v15355_v58  ;;  %v7319_v35 = vadd.f32 %v16121_v27, %v16120_v51  ;;  %v15613_v23 = vpop.f32.mrf.mxu1  ;;  %v9129_v52 = vor.u32 %v9128_v53, %v9124_v45  ;;  %v9140_v53 = vshll.u32 %v8794_v21, 16 }
 0x4b8   : > { %v9152_v51 = vrot.slane %v9150_v4, 4  ;;  %v15647_v4 = vld [vmem:[#allocation2 + $0xd0] sm:$0xf] }
 0x4b9   : > { %9750 = vmatmul.bf16.gmra.mxu2 %v16117_v59  ;;  %v15596_v34 = vadd.f32 %v8657_v12, %v8413_v62  ;;  %v9244_v62 = vpack.c.b16 %v9225_v49, %v9224_v50  ;;  %v9130_v14 = vrot.slane %v9129_v52, 4  ;;  %v9148_v50 = vrot.slane %v9146_v42, 5  ;;  %v4591_v42 = vld [vmem:[#allocation2 + $0xd4] sm:$0x1] }
 0x4ba   : > { %v9142_v52 = vrot.slane %v9140_v53, 5  ;;  %v4592_v53 = vsel %vm13333_vm10, 0, %v4591_v42 }
 0x4bb   : > { %8385 = vmatmul.bf16.gmra.mxu3 %v15258_v6  ;;  %8699 = vmatmul.bf16.gmra.mxu0 %v11604_v18  ;;  %v9116_v6 = vshll.u32 %v8791_v29, 16  ;;  %v16122_v18 = vld [vmem:[#allocation61_spill] sm:$0xff]  ;;  %v9153_v28 = vor.u32 %v9152_v51, %v9148_v50  ;;  %v9174_v51 = vshrl.u32 %v15647_v4, 16  ;;  %4593 = vst [vmem:[#allocation2 + $0xd4] sm:$0x1] %v4592_v53 }
 0x4bc   : > { %v7946_v58 = vpop.f32.mrf.mxu2 }
 0x4bd   : > { %v15603_v5 = vadd.f32 %v7946_v58, %v7318_v48  ;;  %v9118_v12 = vrot.slane %v9116_v6, 5  ;;  %v16124_v48 = vld [vmem:[#allocation40_spill] sm:$0xff]  ;;  %v9134_v58 = vrot.slane %v9132_v10, 5  ;;  %v9137_v6 = vshrl.u32 %v8794_v21, 16  ;;  %v4535_v21 = vld [vmem:[#allocation2 + $0xcc] sm:$0x1] }
 0x4be   : > { %v7320_v36 = vadd.f32 %v16124_v48, %v16123_v15  ;;  %v9154_v15 = vrot.slane %v9153_v28, 4  ;;  %v16127_v48 = vld [vmem:[#allocation67_spill] sm:$0xff]  ;;  %v16132_v28 = vld [vmem:[#allocation45_spill] sm:$0xff] }
 0x4bf   : > { %v9119_v59 = vor.u32 %v9118_v12, %v9115_v17  ;;  %v9135_v33 = vsel %vm11841_vm4, %v9130_v14, %v9134_v58  ;;  %v15628_v49 = vpop.f32.mrf.mxu1  ;;  %v9139_v12 = vrot.slane %v9137_v6, 4  ;;  %v11606_v14 = vld [vmem:[#allocation2 + $0xc0] sm:$0xff]  ;;  %v16135_v6 = vld [vmem:[#allocation62_spill] sm:$0xff] }
 0x4c1   : > { %v9120_v11 = vrot.slane %v9119_v59, 4  ;;  %v9156_v59 = vshll.u32 %v15461_v44, 16 }
 0x4c3   : > { %v9125_v61 = vsel %vm11841_vm4, %v9120_v11, %v9124_v45  ;;  %v9158_v58 = vrot.slane %v9156_v59, 5 }
 0x4c4   : > { %v7948_v16 = vpop.f32.mrf.mxu2  ;;  %v9226_v27 = vunpack.c.l.b16 %v9125_v61 }
 0x4c5   : > { %v15615_v54 = vadd.f32 %v7948_v16, %v7319_v35  ;;  %v16125_v35 = vld [vmem:[#allocation89_spill] sm:$0xff]  ;;  %v9159_v44 = vsel %vm11841_vm4, %v9154_v15, %v9158_v58 }
 0x4c6   : > { %9380 = vmatmul.bf16.gmra.mxu1 %v9244_v62  ;;  %v7321_v16 = vadd.f32 %v15194_v8, %v16125_v35  ;;  %v9229_v35 = vunpack.c.l.b16 %v9159_v44  ;;  %v16133_v44 = vld [vmem:[#allocation78_spill] sm:$0xff] }
 0x4c7   : > { %v15637_v45 = vpop.f32.mrf.mxu1 }
 0x4c9   : > { %9755 = vmatmul.bf16.gmra.mxu2 %v16122_v18  ;;  %v9143_v18 = vor.u32 %v9142_v52, %v9139_v12  ;;  %v16131_v52 = vld [vmem:[#allocation90_spill] sm:$0xff] }
 0x4ca   : > { %v7323_v59 = vadd.f32 %v16132_v28, %v16131_v52 }
 0x4cb   : > { %8390 = vmatmul.bf16.gmra.mxu3 %v15336_v37  ;;  %8704 = vmatmul.bf16.gmra.mxu0 %v11605_v7  ;;  %v9227_v37 = vunpack.c.l.b16 %v9135_v33  ;;  %v16126_v7 = vld [vmem:[#allocation65_spill] sm:$0xff]  ;;  %v9144_v11 = vrot.slane %v9143_v18, 4 }
 0x4cc   : > { %v7951_v0 = vpop.f32.mrf.mxu2 }
 0x4cd   : > { %v15622_v29 = vadd.f32 %v7951_v0, %v7320_v36  ;;  %v9245_v17 = vpack.c.b16 %v9227_v37, %v9226_v27  ;;  %v16128_v36 = vld [vmem:[#allocation43_spill] sm:$0xff]  ;;  %v4536_v37 = vsel %vm13308_vm8, 0, %v4535_v21  ;;  %v9149_v27 = vsel %vm11841_vm4, %v9144_v11, %v9148_v50  ;;  %v15663_v50 = vld [vmem:[#allocation2 + $0xd4] sm:$0x1] }
 0x4ce   : > { %v7322_v8 = vadd.f32 %v16128_v36, %v16127_v48  ;;  %4537 = vst [vmem:[#allocation2 + $0xcc] sm:$0x1] %v4536_v37  ;;  %v9228_v12 = vunpack.c.l.b16 %v9149_v27  ;;  %v9180_v11 = vshll.u32 %v15663_v50, 16  ;;  %v16134_v37 = vld [vmem:[#allocation42_spill] sm:$0xff] }
 0x4cf   : > { %v7324_v53 = vadd.f32 %v16135_v6, %v16134_v37  ;;  %v16142_v6 = vld [vmem:[#allocation83_spill] sm:$0xff] }
 0x4d0   : > { %v9182_v61 = vrot.slane %v9180_v11, 5  ;;  %v16140_v11 = vld [vmem:[#allocation53_spill] sm:$0xff] }
 0x4d4   : > { %v7953_v62 = vpop.f32.mrf.mxu2 }
 0x4d5   : > { %v15634_v10 = vadd.f32 %v7953_v62, %v7321_v16  ;;  %v9176_v62 = vrot.slane %v9174_v51, 4  ;;  %v8797_v48 = vld [vmem:[#allocation2 + $0xcc] sm:$0xf] }
 0x4d6   : > { %9385 = vmatmul.bf16.gmra.mxu1 %v9245_v17  ;;  %v15657_v17 = vpop.f32.mrf.mxu1  ;;  %v11607_v36 = vld [vmem:[#allocation2 + $0xcc] sm:$0xff]  ;;  %v9164_v58 = vshll.u32 %v8797_v48, 16 }
 0x4d8   : > { %v9166_v42 = vrot.slane %v9164_v58, 5  ;;  %v16138_v58 = vld [vmem:[#allocation79_spill] sm:$0xff] }
 0x4d9   : > { %9760 = vmatmul.bf16.gmra.mxu2 %v16126_v7  ;;  %v9246_v7 = vpack.c.b16 %v9229_v35, %v9228_v12 }
 0x4db   : > { %8395 = vmatmul.bf16.gmra.mxu3 %v15416_v3  ;;  %8709 = vmatmul.bf16.gmra.mxu0 %v11606_v14  ;;  %v9170_v3 = vshll.u32 %v15647_v4, 16 }
 0x4dc   : > { %v7956_v0 = vpop.f32.mrf.mxu2 }
 0x4dd   : > { %v15643_v33 = vadd.f32 %v7956_v0, %v7322_v8  ;;  %v9172_v16 = vrot.slane %v9170_v3, 5  ;;  %v9161_v8 = vshrl.u32 %v8797_v48, 16 }
 0x4de   : > { %v15670_v51 = vpop.f32.mrf.mxu1 }
 0x4df   : > { %v9177_v14 = vor.u32 %v9176_v62, %v9172_v16  ;;  %v9163_v21 = vrot.slane %v9161_v8, 4 }
 0x4e1   : > { %v9178_v0 = vrot.slane %v9177_v14, 4  ;;  %v9167_v3 = vor.u32 %v9166_v42, %v9163_v21  ;;  %v16137_v14 = vld [vmem:[#allocation50_spill] sm:$0xff] }
 0x4e3   : > { %v9183_v35 = vsel %vm11841_vm4, %v9178_v0, %v9182_v61  ;;  %v9168_v12 = vrot.slane %v9167_v3, 4  ;;  %v16139_v0 = vld [vmem:[#allocation44_spill] sm:$0xff] }
 0x4e4   : > { %v7958_v18 = vpop.f32.mrf.mxu2  ;;  %v9231_v52 = vunpack.c.l.b16 %v9183_v35 }
 0x4e5   : > { %v15661_v15 = vadd.f32 %v7958_v18, %v7323_v59  ;;  %v9173_v28 = vsel %vm11841_vm4, %v9168_v12, %v9172_v16  ;;  %v7327_v16 = vadd.f32 %v15487_v1, %v16141_v47  ;;  %v16144_v12 = vld [vmem:[#allocation49_spill] sm:$0xff]  ;;  %v16146_v1 = vld [vmem:[#allocation52_spill] sm:$0xff] }
 0x4e6   : > { %9390 = vmatmul.bf16.gmra.mxu1 %v9246_v7  ;;  %v9230_v59 = vunpack.c.l.b16 %v9173_v28  ;;  %v16136_v7 = vld [vmem:[#allocation55_spill] sm:$0xff]  ;;  %v15682_v8 = vpop.f32.mrf.mxu1 }
 0x4e8   : > { %v9247_v18 = vpack.c.b16 %v9231_v52, %v9230_v59  ;;  %v7329_v52 = vadd.f32 %v15534_v13, %v16144_v12  ;;  %v9401_v13 = vadd.f32 %v15585_v63, %v15500_v41  ;;  %v9402_v63 = vadd.f32 %v15598_v2, %v15514_v26  ;;  %v16150_v12 = vld [vmem:[#allocation22_spill] sm:$0xff] }
 0x4e9   : > { %9765 = vmatmul.bf16.gmra.mxu2 %v16133_v44  ;;  %v7326_v44 = vadd.f32 %v16140_v11, %v16139_v0  ;;  %v16148_v11 = vld [vmem:[#allocation38_spill] sm:$0xff] }
 0x4eb   : > { %8400 = vmatmul.bf16.gmra.mxu3 %v15489_v19  ;;  %8714 = vmatmul.bf16.gmra.mxu0 %v11607_v36  ;;  %v7325_v19 = vadd.f32 %v16137_v14, %v16136_v7  ;;  %v7330_v7 = vadd.f32 %v15549_v40, %v16146_v1 }
 0x4ec   : > { %v7961_v27 = vpop.f32.mrf.mxu2 }
 0x4ed   : > { %v15674_v62 = vadd.f32 %v7961_v27, %v7324_v53  ;;  %v16143_v53 = vld [vmem:[#allocation47_spill] sm:$0xff] }
 0x4ee   : > { %v7328_v3 = vadd.f32 %v15512_v32, %v16143_v53 }
 0x4f4   : > { %v7963_v48 = vpop.f32.mrf.mxu2 }
 0x4f5   : > { %v15680_v36 = vadd.f32 %v7963_v48, %v7325_v19  ;;  %v16147_v48 = vld [vmem:[#allocation74_spill] sm:$0xff] }
 0x4f6   : > { %9395 = vmatmul.bf16.gmra.mxu1 %v9247_v18  ;;  %v16145_v18 = vld [vmem:[#allocation88_spill] sm:$0xff]  ;;  %v7331_v32 = vadd.f32 %v15566_v46, %v16147_v48 }
 0x4f9   : > { %9770 = vmatmul.bf16.gmra.mxu2 %v16138_v58 }
 0x4fc   : > { %v7966_v21 = vpop.f32.mrf.mxu2 }
 0x4fd   : > { %v15687_v42 = vadd.f32 %v7966_v21, %v7326_v44  ;;  %v15717_v44 = vld [vmem:[%s15900_s5] ss:$0 sm:$0xff] }
 0x504   : > { %v7968_v61 = vpop.f32.mrf.mxu2 }
 0x505   : > { %v15691_v37 = vadd.f32 %v7968_v61, %v7327_v16  ;;  %v16149_v16 = vld [vmem:[#allocation21_spill] sm:$0xff]  ;;  %v8346_v61 = vpop.f32.mrf.mxu3 }
 0x509   : > { %9775 = vmatmul.bf16.gmra.mxu2 %v16142_v6 }
 0x50c   : > { %v7971_v27 = vpop.f32.mrf.mxu2 }
 0x50d   : > { %v15696_v35 = vadd.f32 %v7971_v27, %v7328_v3  ;;  %v8660_v27 = vpop.f32.mrf.mxu0 }
 0x514   : > { %v7973_v28 = vpop.f32.mrf.mxu2 }
 0x515   : > { %v15700_v59 = vadd.f32 %v7973_v28, %v7329_v52  ;;  %v16151_v28 = vld [vmem:[#allocation39_spill] sm:$0xff] }
 0x519   : > { %9780 = vmatmul.bf16.gmra.mxu2 %v16145_v18  ;;  %v15733_v18 = vpop.f32.mrf.mxu1 }
 0x51c   : > { %v7976_v14 = vpop.f32.mrf.mxu2 }
 0x51d   : > { %v15705_v19 = vadd.f32 %v7976_v14, %v7330_v7  ;;  %v9403_v7 = vadd.f32 %v15613_v23, %v15532_v20  ;;  %v8348_v14 = vpop.f32.mrf.mxu3  ;;  %v16153_v23 = vld [vmem:[#allocation24_spill] sm:$0xff] }
 0x524   : > { %v7978_v58 = vpop.f32.mrf.mxu2 }
 0x525   : > { %v15709_v0 = vadd.f32 %v7978_v58, %v7331_v32  ;;  %v16152_v32 = vld [vmem:[#allocation23_spill] sm:$0xff] }
 0x529   : > { %9785 = vmatmul.bf16.gmra.mxu2 %v16148_v11  ;;  %v8662_v11 = vpop.f32.mrf.mxu0 }
 0x52c   : > { %v9746_v40 = vpop.f32.mrf.mxu2 }
 0x52d   : > { %v9826_v21 = vadd.f32 %v9746_v40, %v9401_v13  ;;  %v9404_v40 = vadd.f32 %v15628_v49, %v15544_v39 }
 0x52f   : > { %v9862_v47 = vadd.f32 %v15717_v44, %v9826_v21 }
 0x531   : > { %v9894_v46 = vadd.f32 %v9862_v47, %v16149_v16  ;;  %v9343_v47 = vpop.f32.mrf.mxu1 }
 0x533   : > { %v9926_v41 = vmax.f32 %v9894_v46, 0.0  ;;  %v8351_v46 = vpop.f32.mrf.mxu3 }
 0x534   : > { %v9748_v6 = vpop.f32.mrf.mxu2 }
 0x535   : > { %9958 = vst [vmem:[%s15725_s20] sm:$0xff] %v9926_v41  ;;  %v9827_v53 = vadd.f32 %v9748_v6, %v9402_v63  ;;  %v16154_v63 = vld [vmem:[#allocation41_spill] sm:$0xff] }
 0x537   : > { %v9863_v3 = vadd.f32 %v15717_v44, %v9827_v53  ;;  %v9405_v53 = vadd.f32 %v15637_v45, %v15560_v30 }
 0x539   : > { %v9895_v52 = vadd.f32 %v9863_v3, %v16150_v12  ;;  %9790 = vmatmul.bf16.gmra.mxu2 %v16151_v28  ;;  %v8665_v3 = vpop.f32.mrf.mxu0  ;;  %v9346_v49 = vpop.f32.mrf.mxu1 }
 0x53b   : > { %v9927_v1 = vmax.f32 %v9895_v52, 0.0  ;;  %v8353_v28 = vpop.f32.mrf.mxu3 }
 0x53c   : > { %v9751_v48 = vpop.f32.mrf.mxu2 }
 0x53d   : > { %9959 = vst [vmem:[%s15725_s20 + $0x8] sm:$0xff] %v9927_v1  ;;  %v9828_v26 = vadd.f32 %v9751_v48, %v9403_v7  ;;  %v16155_v1 = vld [vmem:[#allocation25_spill] sm:$0xff] }
 0x53f   : > { %v9864_v2 = vadd.f32 %v15717_v44, %v9828_v26  ;;  %v9406_v26 = vadd.f32 %v15657_v17, %v15571_v24 }
 0x541   : > { %v9896_v58 = vadd.f32 %v9864_v2, %v16152_v32  ;;  %v15755_v45 = vpop.f32.mrf.mxu1 }
 0x543   : > { %v9928_v13 = vmax.f32 %v9896_v58, 0.0  ;;  %v8667_v58 = vpop.f32.mrf.mxu0 }
 0x544   : > { %v9753_v21 = vpop.f32.mrf.mxu2 }
 0x545   : > { %9960 = vst [vmem:[%s15725_s20 + $0x10] sm:$0xff] %v9928_v13  ;;  %v9829_v16 = vadd.f32 %v9753_v21, %v9404_v40  ;;  %v16156_v13 = vld [vmem:[#allocation26_spill] sm:$0xff]  ;;  %v16157_v21 = vld [vmem:[#allocation48_spill] sm:$0xff] }
 0x547   : > { %v9865_v20 = vadd.f32 %v15717_v44, %v9829_v16  ;;  %v8356_v16 = vpop.f32.mrf.mxu3 }
 0x549   : > { %v9897_v41 = vadd.f32 %v9865_v20, %v16153_v23  ;;  %9795 = vmatmul.bf16.gmra.mxu2 %v16154_v63  ;;  %v9407_v23 = vadd.f32 %v15670_v51, %v15587_v56 }
 0x54b   : > { %v9929_v6 = vmax.f32 %v9897_v41, 0.0  ;;  %v8670_v63 = vpop.f32.mrf.mxu0 }
 0x54c   : > { %v9756_v12 = vpop.f32.mrf.mxu2 }
 0x54d   : > { %9961 = vst [vmem:[%s15725_s20 + $0x18] sm:$0xff] %v9929_v6  ;;  %v9830_v39 = vadd.f32 %v9756_v12, %v9405_v53  ;;  %v16158_v6 = vld [vmem:[#allocation27_spill] sm:$0xff]  ;;  %v16159_v12 = vld [vmem:[#allocation70_spill] sm:$0xff] }
 0x54f   : > { %v9866_v52 = vadd.f32 %v15717_v44, %v9830_v39  ;;  %v8414_v39 = vadd.f32 %v8346_v61, %v16159_v12  ;;  %v16162_v61 = vld [vmem:[#allocation57_spill] sm:$0xff]  ;;  %v8416_v12 = vadd.f32 %v8351_v46, %v15479_v55  ;;  %v8417_v55 = vadd.f32 %v8353_v28, %v15508_v9 }
 0x551   : > { %v9898_v7 = vadd.f32 %v9866_v52, %v16155_v1  ;;  %v15765_v52 = vpop.f32.mrf.mxu1  ;;  %v8728_v51 = vadd.f32 %v8660_v27, %v8414_v39 }
 0x553   : > { %v9930_v48 = vmax.f32 %v9898_v7, 0.0  ;;  %v9408_v7 = vadd.f32 %v15682_v8, %v15596_v34 }
 0x554   : > { %v9758_v2 = vpop.f32.mrf.mxu2 }
 0x555   : > { %9962 = vst [vmem:[%s15725_s20 + $0x20] sm:$0xff] %v9930_v48  ;;  %v9831_v32 = vadd.f32 %v9758_v2, %v9406_v26  ;;  %v8358_v48 = vpop.f32.mrf.mxu3 }
 0x557   : > { %v9867_v30 = vadd.f32 %v15717_v44, %v9831_v32  ;;  %v16160_v32 = vld [vmem:[#allocation4_spill] sm:$0xff] }
 0x559   : > { %v9899_v40 = vadd.f32 %v9867_v30, %v16156_v13  ;;  %9800 = vmatmul.bf16.gmra.mxu2 %v16157_v21  ;;  %v16161_v13 = vld [vmem:[#allocation56_spill] sm:$0xff]  ;;  %v8415_v21 = vadd.f32 %v8348_v14, %v16162_v61  ;;  %v15777_v8 = vpop.f32.mrf.mxu1 }
 0x55b   : > { %v9931_v20 = vmax.f32 %v9899_v40, 0.0  ;;  %v15773_v40 = vpop.f32.mrf.mxu0 }
 0x55c   : > { %v9761_v41 = vpop.f32.mrf.mxu2 }
 0x55d   : > { %9963 = vst [vmem:[%s15725_s20 + $0x28] sm:$0xff] %v9931_v20  ;;  %v9832_v24 = vadd.f32 %v9761_v41, %v9407_v23  ;;  %v9409_v23 = vadd.f32 %v15733_v18, %v8728_v51  ;;  %v8361_v27 = vpop.f32.mrf.mxu3 }
 0x55f   : > { %v9868_v17 = vadd.f32 %v15717_v44, %v9832_v24  ;;  %v8729_v24 = vadd.f32 %v8662_v11, %v8415_v21  ;;  %v8731_v21 = vadd.f32 %v8667_v58, %v8417_v55 }
 0x561   : > { %v9900_v53 = vadd.f32 %v9868_v17, %v16158_v6  ;;  %v16163_v6 = vld [vmem:[#allocation5_spill] sm:$0xff]  ;;  %v9410_v14 = vadd.f32 %v9343_v47, %v8729_v24  ;;  %v8418_v24 = vadd.f32 %v8356_v16, %v15522_v60  ;;  %v9607_v16 = vrot.slane %v15663_v50, 5 }
 0x563   : > { %v9932_v1 = vmax.f32 %v9900_v53, 0.0 }
 0x564   : > { %v9763_v26 = vpop.f32.mrf.mxu2 }
 0x565   : > { %9964 = vst [vmem:[%s15725_s20 + $0x30] sm:$0xff] %v9932_v1  ;;  %v9833_v56 = vadd.f32 %v9763_v26, %v9408_v7  ;;  %v15783_v1 = vpop.f32.mrf.mxu0  ;;  %v8730_v26 = vadd.f32 %v8665_v3, %v8416_v12  ;;  %v8363_v11 = vpop.f32.mrf.mxu3 }
 0x567   : > { %v9869_v2 = vadd.f32 %v15717_v44, %v9833_v56  ;;  %v15786_v56 = vpop.f32.mrf.mxu1  ;;  %v9411_v47 = vadd.f32 %v9346_v49, %v8730_v26  ;;  %v9604_v49 = vrot.slane %v15647_v4, 5 }
 0x569   : > { %v9901_v30 = vadd.f32 %v9869_v2, %v16160_v32  ;;  %9805 = vmatmul.bf16.gmra.mxu2 %v16161_v13  ;;  %v16164_v2 = vld [vmem:[#allocation6_spill] sm:$0xff]  ;;  %v9606_v60 = vrot.slane %v9604_v49, 4 }
 0x56b   : > { %v9933_v20 = vmax.f32 %v9901_v30, 0.0 }
 0x56c   : > { %v9766_v34 = vpop.f32.mrf.mxu2 }
 0x56d   : > { %9965 = vst [vmem:[%s15725_s20 + $0x38] sm:$0xff] %v9933_v20  ;;  %v9834_v41 = vadd.f32 %v9766_v34, %v9409_v23  ;;  %v8677_v61 = vpop.f32.mrf.mxu0  ;;  %v16165_v23 = vld [vmem:[#allocation28_spill] sm:$0xff] }
 0x56f   : > { %v9870_v17 = vadd.f32 %v15717_v44, %v9834_v41  ;;  %v9358_v20 = vpop.f32.mrf.mxu1  ;;  %v8366_v41 = vpop.f32.mrf.mxu3 }
 0x571   : > { %v9902_v53 = vadd.f32 %v9870_v17, %v16163_v6  ;;  %v8732_v6 = vadd.f32 %v8670_v63, %v8418_v24 }
 0x573   : > { %v9934_v39 = vmax.f32 %v9902_v53, 0.0  ;;  %v9448_v53 = vld [vmem:[#allocation2 + $0xcc] sm:$0xe]  ;;  %v9413_v4 = vadd.f32 %v15765_v52, %v8732_v6 }
 0x574   : > { %v9768_v7 = vpop.f32.mrf.mxu2  ;;  %v16170_v6 = vld [vmem:[#allocation29_spill] sm:$0xff] }
 0x575   : > { %9966 = vst [vmem:[%s15725_s20 + $0x40] sm:$0xff] %v9934_v39  ;;  %v9835_v18 = vadd.f32 %v9768_v7, %v9410_v14  ;;  %v8680_v12 = vpop.f32.mrf.mxu0  ;;  %v16166_v39 = vld [vmem:[#allocation7_spill] sm:$0xff] }
 0x576   : > { %v16167_v7 = vld [vmem:[#allocation59_spill] sm:$0xff] }
 0x577   : > { %v9871_v51 = vadd.f32 %v15717_v44, %v9835_v18  ;;  %v11348_v18 = vrot.slane %v9448_v53, 9  ;;  %v9361_v26 = vpop.f32.mrf.mxu1  ;;  %v8421_v53 = vadd.f32 %v8363_v11, %v15564_v38 }
 0x579   : > { %v9903_v32 = vadd.f32 %v9871_v51, %v16164_v2  ;;  %9810 = vmatmul.bf16.gmra.mxu2 %v15477_v31  ;;  %v9412_v31 = vadd.f32 %v15755_v45, %v8731_v21  ;;  %v8419_v45 = vadd.f32 %v8358_v48, %v15540_v22  ;;  %v8368_v2 = vpop.f32.mrf.mxu3  ;;  %v16169_v22 = vld [vmem:[#allocation8_spill] sm:$0xff] }
 0x57b   : > { %v9935_v46 = vmax.f32 %v9903_v32, 0.0 }
 0x57c   : > { %v9771_v30 = vpop.f32.mrf.mxu2 }
 0x57d   : > { %9967 = vst [vmem:[%s15725_s20 + $0x48] sm:$0xff] %v9935_v46  ;;  %v9836_v13 = vadd.f32 %v9771_v30, %v9411_v47  ;;  %v9605_v46 = vsel %vm11853_vm5, %v11348_v18, %v9604_v49  ;;  %v9608_v47 = vsel %vm11853_vm5, %v9606_v60, %v9607_v16  ;;  %v8733_v30 = vadd.f32 %v15773_v40, %v8419_v45  ;;  %v8682_v52 = vpop.f32.mrf.mxu0  ;;  %v16171_v16 = vld [vmem:[#allocation9_spill] sm:$0xff] }
 0x57e   : > { %v9656_v21 = vunpack.c.l.b16 %v9608_v47 }
 0x57f   : > { %v9872_v3 = vadd.f32 %v15717_v44, %v9836_v13  ;;  %v9655_v13 = vunpack.c.l.b16 %v9605_v46 }
 0x581   : > { %v9904_v34 = vadd.f32 %v9872_v3, %v16165_v23  ;;  %v8420_v3 = vadd.f32 %v8361_v27, %v15551_v25 }
 0x583   : > { %v9936_v17 = vmax.f32 %v9904_v34, 0.0  ;;  %v9414_v34 = vadd.f32 %v15777_v8, %v8733_v30  ;;  %v8734_v40 = vadd.f32 %v15783_v1, %v8420_v3  ;;  %v16173_v3 = vld [vmem:[#allocation30_spill] sm:$0xff] }
 0x584   : > { %v9773_v9 = vpop.f32.mrf.mxu2 }
 0x585   : > { %9968 = vst [vmem:[%s15725_s20 + $0x50] sm:$0xff] %v9936_v17  ;;  %v9837_v28 = vadd.f32 %v9773_v9, %v9412_v31  ;;  %v9363_v17 = vpop.f32.mrf.mxu1  ;;  %v9672_v9 = vpack.c.b16 %v9656_v21, %v9655_v13  ;;  %v9415_v8 = vadd.f32 %v15786_v56, %v8734_v40  ;;  %v8685_v27 = vpop.f32.mrf.mxu0 }
 0x587   : > { %v9873_v58 = vadd.f32 %v15717_v44, %v9837_v28  ;;  %v8371_v28 = vpop.f32.mrf.mxu3 }
 0x589   : > { %v9905_v14 = vadd.f32 %v9873_v58, %v16166_v39  ;;  %9815 = vmatmul.bf16.gmra.mxu2 %v16167_v7  ;;  %v8735_v7 = vadd.f32 %v8677_v61, %v8421_v53  ;;  %v16172_v61 = vld [vmem:[#allocation10_spill] sm:$0xff] }
 0x58b   : > { %v9937_v51 = vmax.f32 %v9905_v14, 0.0  ;;  %v9416_v38 = vadd.f32 %v9358_v20, %v8735_v7  ;;  %v16175_v7 = vld [vmem:[#allocation12_spill] sm:$0xff] }
 0x58c   : > { %v9776_v63 = vpop.f32.mrf.mxu2 }
 0x58d   : > { %9969 = vst [vmem:[%s15725_s20 + $0x58] sm:$0xff] %v9937_v51  ;;  %v9838_v32 = vadd.f32 %v9776_v63, %v9413_v4  ;;  %v9366_v18 = vpop.f32.mrf.mxu1  ;;  %v8422_v51 = vadd.f32 %v8366_v41, %v15576_v43  ;;  %v8687_v56 = vpop.f32.mrf.mxu0 }
 0x58f   : > { %v9874_v50 = vadd.f32 %v15717_v44, %v9838_v32  ;;  %v8373_v1 = vpop.f32.mrf.mxu3  ;;  %v8736_v32 = vadd.f32 %v8680_v12, %v8422_v51 }
 0x591   : > { %v9906_v48 = vadd.f32 %v9874_v50, %v16169_v22  ;;  %v8423_v50 = vadd.f32 %v8368_v2, %v15591_v57 }
 0x593   : > { %v9938_v23 = vmax.f32 %v9906_v48, 0.0  ;;  %v9417_v48 = vadd.f32 %v9361_v26, %v8736_v32  ;;  %v8737_v20 = vadd.f32 %v8682_v52, %v8423_v50 }
 0x594   : > { %v9778_v24 = vpop.f32.mrf.mxu2 }
 0x595   : > { %9970 = vst [vmem:[%s15725_s20 + $0x60] sm:$0xff] %v9938_v23  ;;  %v9839_v31 = vadd.f32 %v9778_v24, %v9414_v34  ;;  %v9368_v46 = vpop.f32.mrf.mxu1  ;;  %v8690_v21 = vpop.f32.mrf.mxu0  ;;  %v8424_v23 = vadd.f32 %v8371_v28, %v15603_v5 }
 0x597   : > { %v9875_v49 = vadd.f32 %v15717_v44, %v9839_v31  ;;  %v8376_v30 = vpop.f32.mrf.mxu3  ;;  %v9418_v31 = vadd.f32 %v9363_v17, %v8737_v20  ;;  %v8738_v26 = vadd.f32 %v8685_v27, %v8424_v23 }
 0x599   : > { %v9907_v58 = vadd.f32 %v9875_v49, %v16170_v6  ;;  %9820 = vmatmul.bf16.gmra.mxu2 %v9672_v9  ;;  %v16174_v49 = vld [vmem:[#allocation11_spill] sm:$0xff] }
 0x59b   : > { %v9939_v25 = vmax.f32 %v9907_v58, 0.0  ;;  %v8425_v58 = vadd.f32 %v8373_v1, %v15615_v54 }
 0x59c   : > { %v9781_v39 = vpop.f32.mrf.mxu2 }
 0x59d   : > { %9971 = vst [vmem:[%s15725_s20 + $0x68] sm:$0xff] %v9939_v25  ;;  %v9840_v14 = vadd.f32 %v9781_v39, %v9415_v8  ;;  %v9371_v34 = vpop.f32.mrf.mxu1  ;;  %v8692_v6 = vpop.f32.mrf.mxu0  ;;  %v9419_v25 = vadd.f32 %v9366_v18, %v8738_v26  ;;  %v8739_v39 = vadd.f32 %v8687_v56, %v8425_v58  ;;  %v16179_v58 = vld [vmem:[#allocation15_spill] sm:$0xff] }
 0x59f   : > { %v9876_v60 = vadd.f32 %v15717_v44, %v9840_v14  ;;  %v8378_v9 = vpop.f32.mrf.mxu3 }
 0x5a0   : > { %v8427_v32 = vadd.f32 %v8378_v9, %v15634_v10 }
 0x5a1   : > { %v9908_v45 = vadd.f32 %v9876_v60, %v16171_v16  ;;  %v8426_v60 = vadd.f32 %v8376_v30, %v15622_v29 }
 0x5a2   : > { %v8741_v30 = vadd.f32 %v8692_v6, %v8427_v32 }
 0x5a3   : > { %v9940_v4 = vmax.f32 %v9908_v45, 0.0  ;;  %v9420_v45 = vadd.f32 %v9368_v46, %v8739_v39  ;;  %v8740_v18 = vadd.f32 %v8690_v21, %v8426_v60  ;;  %v16180_v60 = vld [vmem:[#allocation16_spill] sm:$0xff] }
 0x5a4   : > { %v9783_v11 = vpop.f32.mrf.mxu2 }
 0x5a5   : > { %9972 = vst [vmem:[%s15725_s20 + $0x70] sm:$0xff] %v9940_v4  ;;  %v9841_v63 = vadd.f32 %v9783_v11, %v9416_v38  ;;  %v9373_v28 = vpop.f32.mrf.mxu1  ;;  %v8695_v51 = vpop.f32.mrf.mxu0 }
 0x5a6   : > { %v9422_v21 = vadd.f32 %v9373_v28, %v8741_v30 }
 0x5a7   : > { %v9877_v55 = vadd.f32 %v15717_v44, %v9841_v63  ;;  %v8381_v17 = vpop.f32.mrf.mxu3  ;;  %v16176_v63 = vld [vmem:[#allocation31_spill] sm:$0xff] }
 0x5a8   : > { %v8428_v20 = vadd.f32 %v8381_v17, %v15643_v33 }
 0x5a9   : > { %v9909_v47 = vadd.f32 %v9877_v55, %v16172_v61  ;;  %v9421_v61 = vadd.f32 %v9371_v34, %v8740_v18 }
 0x5ab   : > { %v9941_v22 = vmax.f32 %v9909_v47, 0.0 }
 0x5ac   : > { %v9786_v43 = vpop.f32.mrf.mxu2 }
 0x5ad   : > { %9973 = vst [vmem:[%s15725_s20 + $0x78] sm:$0xff] %v9941_v22  ;;  %v9842_v41 = vadd.f32 %v9786_v43, %v9417_v48  ;;  %v9376_v4 = vpop.f32.mrf.mxu1  ;;  %v8697_v46 = vpop.f32.mrf.mxu0  ;;  %v16177_v48 = vld [vmem:[#allocation13_spill] sm:$0xff] }
 0x5af   : > { %v9878_v13 = vadd.f32 %v15717_v44, %v9842_v41  ;;  %v8383_v11 = vpop.f32.mrf.mxu3 }
 0x5b0   : > { %v8429_v9 = vadd.f32 %v8383_v11, %v15661_v15 }
 0x5b1   : > { %v9910_v12 = vadd.f32 %v9878_v13, %v16173_v3 }
 0x5b3   : > { %v9942_v24 = vmax.f32 %v9910_v12, 0.0  ;;  %v8742_v12 = vadd.f32 %v8695_v51, %v8428_v20 }
 0x5b4   : > { %v9788_v57 = vpop.f32.mrf.mxu2 }
 0x5b5   : > { %9974 = vst [vmem:[%s15725_s20 + $0x80] sm:$0xff] %v9942_v24  ;;  %v9843_v2 = vadd.f32 %v9788_v57, %v9418_v31  ;;  %v9378_v22 = vpop.f32.mrf.mxu1  ;;  %v8700_v34 = vpop.f32.mrf.mxu0  ;;  %v16178_v24 = vld [vmem:[#allocation14_spill] sm:$0xff]  ;;  %v9423_v26 = vadd.f32 %v9376_v4, %v8742_v12 }
 0x5b7   : > { %v9879_v40 = vadd.f32 %v15717_v44, %v9843_v2  ;;  %v8386_v41 = vpop.f32.mrf.mxu3 }
 0x5b9   : > { %v9911_v52 = vadd.f32 %v9879_v40, %v16174_v49 }
 0x5bb   : > { %v9943_v53 = vmax.f32 %v9911_v52, 0.0  ;;  %v8743_v52 = vadd.f32 %v8697_v46, %v8429_v9 }
 0x5bc   : > { %v9791_v5 = vpop.f32.mrf.mxu2 }
 0x5bd   : > { %9975 = vst [vmem:[%s15725_s20 + $0x88] sm:$0xff] %v9943_v53  ;;  %v9844_v8 = vadd.f32 %v9791_v5, %v9419_v25  ;;  %v9381_v57 = vpop.f32.mrf.mxu1  ;;  %v8702_v25 = vpop.f32.mrf.mxu0  ;;  %v8430_v5 = vadd.f32 %v8386_v41, %v15674_v62 }
 0x5bf   : > { %v9880_v14 = vadd.f32 %v15717_v44, %v9844_v8  ;;  %v8388_v40 = vpop.f32.mrf.mxu3  ;;  %v9424_v8 = vadd.f32 %v9378_v22, %v8743_v52  ;;  %v16184_v52 = vld [vmem:[#allocation35_spill] sm:$0xff] }
 0x5c1   : > { %v9912_v27 = vadd.f32 %v9880_v14, %v16175_v7  ;;  %v8744_v7 = vadd.f32 %v8700_v34, %v8430_v5  ;;  %v16183_v34 = vld [vmem:[#allocation34_spill] sm:$0xff] }
 0x5c3   : > { %v9944_v16 = vmax.f32 %v9912_v27, 0.0 }
 0x5c4   : > { %v9793_v54 = vpop.f32.mrf.mxu2 }
 0x5c5   : > { %9976 = vst [vmem:[%s15725_s20 + $0x90] sm:$0xff] %v9944_v16  ;;  %v9845_v1 = vadd.f32 %v9793_v54, %v9420_v45  ;;  %v9383_v17 = vpop.f32.mrf.mxu1  ;;  %v8431_v45 = vadd.f32 %v8388_v40, %v15680_v36  ;;  %v9425_v54 = vadd.f32 %v9381_v57, %v8744_v7 }
 0x5c7   : > { %v9881_v38 = vadd.f32 %v15717_v44, %v9845_v1  ;;  %v8391_v14 = vpop.f32.mrf.mxu3  ;;  %v8705_v1 = vpop.f32.mrf.mxu0  ;;  %v8745_v4 = vadd.f32 %v8702_v25, %v8431_v45 }
 0x5c9   : > { %v9913_v56 = vadd.f32 %v9881_v38, %v16176_v63 }
 0x5cb   : > { %v9945_v55 = vmax.f32 %v9913_v56, 0.0  ;;  %v16181_v56 = vld [vmem:[#allocation32_spill] sm:$0xff] }
 0x5cc   : > { %v9796_v29 = vpop.f32.mrf.mxu2 }
 0x5cd   : > { %9977 = vst [vmem:[%s15725_s20 + $0x98] sm:$0xff] %v9945_v55  ;;  %v9846_v47 = vadd.f32 %v9796_v29, %v9421_v61  ;;  %v9386_v38 = vpop.f32.mrf.mxu1  ;;  %v8432_v55 = vadd.f32 %v8391_v14, %v15687_v42  ;;  %v9426_v29 = vadd.f32 %v9383_v17, %v8745_v4  ;;  %v16185_v14 = vld [vmem:[#allocation20_spill] sm:$0xff]  ;;  %v16186_v4 = vld [vmem:[#allocation18_spill] sm:$0xff] }
 0x5cf   : > { %v9882_v50 = vadd.f32 %v15717_v44, %v9846_v47  ;;  %v8393_v63 = vpop.f32.mrf.mxu3  ;;  %v8707_v46 = vpop.f32.mrf.mxu0  ;;  %v8746_v30 = vadd.f32 %v8705_v1, %v8432_v55 }
 0x5d0   : > { %v8433_v20 = vadd.f32 %v8393_v63, %v15691_v37 }
 0x5d1   : > { %v9914_v43 = vadd.f32 %v9882_v50, %v16177_v48  ;;  %v16182_v48 = vld [vmem:[#allocation33_spill] sm:$0xff] }
 0x5d3   : > { %v9946_v13 = vmax.f32 %v9914_v43, 0.0 }
 0x5d4   : > { %v9798_v10 = vpop.f32.mrf.mxu2 }
 0x5d5   : > { %9978 = vst [vmem:[%s15725_s20 + $0xa0] sm:$0xff] %v9946_v13  ;;  %v9847_v3 = vadd.f32 %v9798_v10, %v9422_v21  ;;  %v9388_v22 = vpop.f32.mrf.mxu1  ;;  %v9427_v21 = vadd.f32 %v9386_v38, %v8746_v30 }
 0x5d7   : > { %v9883_v23 = vadd.f32 %v15717_v44, %v9847_v3  ;;  %v8396_v41 = vpop.f32.mrf.mxu3  ;;  %v8747_v3 = vadd.f32 %v8707_v46, %v8433_v20 }
 0x5d8   : > { %v8434_v9 = vadd.f32 %v8396_v41, %v15696_v35 }
 0x5d9   : > { %v9915_v31 = vadd.f32 %v9883_v23, %v16178_v24  ;;  %v8710_v23 = vpop.f32.mrf.mxu0 }
 0x5db   : > { %v9947_v2 = vmax.f32 %v9915_v31, 0.0 }
 0x5dc   : > { %v9801_v33 = vpop.f32.mrf.mxu2 }
 0x5dd   : > { %9979 = vst [vmem:[%s15725_s20 + $0xa8] sm:$0xff] %v9947_v2  ;;  %v9848_v49 = vadd.f32 %v9801_v33, %v9423_v26  ;;  %v9391_v31 = vpop.f32.mrf.mxu1  ;;  %v9428_v2 = vadd.f32 %v9388_v22, %v8747_v3  ;;  %v8748_v33 = vadd.f32 %v8710_v23, %v8434_v9 }
 0x5df   : > { %v9884_v6 = vadd.f32 %v15717_v44, %v9848_v49  ;;  %v8398_v26 = vpop.f32.mrf.mxu3  ;;  %v9429_v5 = vadd.f32 %v9391_v31, %v8748_v33 }
 0x5e1   : > { %v9916_v53 = vadd.f32 %v9884_v6, %v16179_v58  ;;  %v8712_v58 = vpop.f32.mrf.mxu0 }
 0x5e3   : > { %v9948_v28 = vmax.f32 %v9916_v53, 0.0  ;;  %v8435_v53 = vadd.f32 %v8398_v26, %v15700_v59 }
 0x5e4   : > { %v9803_v15 = vpop.f32.mrf.mxu2 }
 0x5e5   : > { %9980 = vst [vmem:[%s15725_s20 + $0xb0] sm:$0xff] %v9948_v28  ;;  %v9849_v39 = vadd.f32 %v9803_v15, %v9424_v8  ;;  %v9393_v8 = vpop.f32.mrf.mxu1  ;;  %v8749_v17 = vadd.f32 %v8712_v58, %v8435_v53 }
 0x5e7   : > { %v9885_v27 = vadd.f32 %v15717_v44, %v9849_v39  ;;  %v8401_v15 = vpop.f32.mrf.mxu3  ;;  %v9430_v45 = vadd.f32 %v9393_v8, %v8749_v17 }
 0x5e9   : > { %v9917_v16 = vadd.f32 %v9885_v27, %v16180_v60  ;;  %v8715_v27 = vpop.f32.mrf.mxu0  ;;  %v8436_v60 = vadd.f32 %v8401_v15, %v15705_v19 }
 0x5eb   : > { %v9949_v51 = vmax.f32 %v9917_v16, 0.0  ;;  %v8750_v1 = vadd.f32 %v8715_v27, %v8436_v60 }
 0x5ec   : > { %v9806_v62 = vpop.f32.mrf.mxu2 }
 0x5ed   : > { %9981 = vst [vmem:[%s15725_s20 + $0xb8] sm:$0xff] %v9949_v51  ;;  %v9850_v18 = vadd.f32 %v9806_v62, %v9425_v54  ;;  %v9396_v54 = vpop.f32.mrf.mxu1 }
 0x5ef   : > { %v9886_v11 = vadd.f32 %v15717_v44, %v9850_v18  ;;  %v8403_v18 = vpop.f32.mrf.mxu3 }
 0x5f0   : > { %v8437_v63 = vadd.f32 %v8403_v18, %v15709_v0  ;;  %v16188_v0 = vld [vmem:[#allocation37_spill] sm:$0xff] }
 0x5f1   : > { %v9918_v32 = vadd.f32 %v9886_v11, %v16181_v56  ;;  %v9431_v11 = vadd.f32 %v9396_v54, %v8750_v1 }
 0x5f3   : > { %v9950_v61 = vmax.f32 %v9918_v32, 0.0  ;;  %v8717_v32 = vpop.f32.mrf.mxu0 }
 0x5f4   : > { %v9808_v36 = vpop.f32.mrf.mxu2 }
 0x5f5   : > { %9982 = vst [vmem:[%s15725_s20 + $0xc0] sm:$0xff] %v9950_v61  ;;  %v9851_v47 = vadd.f32 %v9808_v36, %v9426_v29  ;;  %v8751_v61 = vadd.f32 %v8717_v32, %v8437_v63  ;;  %v9398_v36 = vpop.f32.mrf.mxu1 }
 0x5f7   : > { %v9887_v50 = vadd.f32 %v15717_v44, %v9851_v47  ;;  %v16187_v47 = vld [vmem:[#allocation36_spill] sm:$0xff]  ;;  %v9432_v30 = vadd.f32 %v9398_v36, %v8751_v61 }
 0x5f9   : > { %v9919_v43 = vadd.f32 %v9887_v50, %v16182_v48 }
 0x5fb   : > { %v9951_v13 = vmax.f32 %v9919_v43, 0.0 }
 0x5fc   : > { %v9811_v42 = vpop.f32.mrf.mxu2 }
 0x5fd   : > { %9983 = vst [vmem:[%s15725_s20 + $0xc8] sm:$0xff] %v9951_v13  ;;  %v9852_v10 = vadd.f32 %v9811_v42, %v9427_v21 }
 0x5ff   : > { %v9888_v12 = vadd.f32 %v15717_v44, %v9852_v10 }
 0x601   : > { %v9920_v24 = vadd.f32 %v9888_v12, %v16183_v34 }
 0x603   : > { %v9952_v57 = vmax.f32 %v9920_v24, 0.0 }
 0x604   : > { %v9813_v37 = vpop.f32.mrf.mxu2 }
 0x605   : > { %9984 = vst [vmem:[%s15725_s20 + $0xd0] sm:$0xff] %v9952_v57  ;;  %v9853_v40 = vadd.f32 %v9813_v37, %v9428_v2 }
 0x607   : > { %v9889_v49 = vadd.f32 %v15717_v44, %v9853_v40 }
 0x609   : > { %v9921_v6 = vadd.f32 %v9889_v49, %v16184_v52 }
 0x60b   : > { %v9953_v25 = vmax.f32 %v9921_v6, 0.0 }
 0x60c   : > { %v9816_v28 = vpop.f32.mrf.mxu2 }
 0x60d   : > { %9985 = vst [vmem:[%s15725_s20 + $0xd8] sm:$0xff] %v9953_v25  ;;  %v9854_v35 = vadd.f32 %v9816_v28, %v9429_v5 }
 0x60f   : > { %v9890_v39 = vadd.f32 %v15717_v44, %v9854_v35 }
 0x611   : > { %v9922_v7 = vadd.f32 %v9890_v39, %v16185_v14 }
 0x613   : > { %v9954_v16 = vmax.f32 %v9922_v7, 0.0 }
 0x614   : > { %v9818_v59 = vpop.f32.mrf.mxu2 }
 0x615   : > { %9986 = vst [vmem:[%s15725_s20 + $0xe0] sm:$0xff] %v9954_v16  ;;  %v9855_v51 = vadd.f32 %v9818_v59, %v9430_v45 }
 0x617   : > { %v9891_v62 = vadd.f32 %v15717_v44, %v9855_v51 }
 0x619   : > { %v9923_v38 = vadd.f32 %v9891_v62, %v16186_v4 }
 0x61b   : > { %v9955_v56 = vmax.f32 %v9923_v38, 0.0 }
 0x61c   : > { %v9821_v19 = vpop.f32.mrf.mxu2 }
 0x61d   : > { %9987 = vst [vmem:[%s15725_s20 + $0xe8] sm:$0xff] %v9955_v56  ;;  %v9856_v55 = vadd.f32 %v9821_v19, %v9431_v11 }
 0x61f   : > { %v9892_v29 = vadd.f32 %v15717_v44, %v9856_v55 }
 0x621   : > { %v9924_v46 = vadd.f32 %v9892_v29, %v16187_v47 }
 0x623   : > { %v9956_v50 = vmax.f32 %v9924_v46, 0.0 }
 0x624   : > { %v9823_v22 = vpop.f32.mrf.mxu2 }
 0x625   : > { %9988 = vst [vmem:[%s15725_s20 + $0xf0] sm:$0xff] %v9956_v50  ;;  %v9857_v48 = vadd.f32 %v9823_v22, %v9432_v30 }
 0x627   : > { %v9893_v43 = vadd.f32 %v15717_v44, %v9857_v48 }
 0x629   : > { %v9925_v41 = vadd.f32 %v9893_v43, %v16188_v0 }
 0x62b   : > { %v9957_v20 = vmax.f32 %v9925_v41, 0.0 }
 0x62d   : > { %9989 = vst [vmem:[%s15725_s20 + $0xf8] sm:$0xff] %v9957_v20 }
 0x62e PF: > { %s16_s21 = sadd.s32 1, %s11686_s21  }
 0x62f   : > { %p13_p4 = scmp.ge.s32.totalorder %s16_s21, 4  }
 0x631   :  { %15 = sbr.rel (!%p13_p4) target bundleno = 1 (0x1), region = 79 }

</bundles_post_ra>
